<compile_context>
chip_gen: v5e
topology: v5e:2x2
jax: 0.10.0
libtpu: 0.0.40
codegen_flags: <defaults>
</compile_context>

<pallas_src>
import jax
import jax.numpy as jnp
from jax.experimental import pallas as pl
from jax.experimental.pallas import tpu as pltpu


# ------------------------------------------------------------------
# Fused Conv1d(k=5, s=2, p=2) + bias + MaxPool1d(k=2, s=2) kernel
# ------------------------------------------------------------------
# Packed input X: row r, lane j*Cin+ci == x_pad[time 4r+j, channel ci]
# (x_pad = input zero-padded by 2 on each side of the time axis).
# Pooled output m = max(conv[2m], conv[2m+1]) + bias, where
#   conv[2m]   uses X[m]   @ WA_even + X[m+1] @ WB_even
#   conv[2m+1] uses X[m]   @ WA_odd  + X[m+1] @ WB_odd
# so the kernel only needs two contiguous shifted row slices of X.

def _conv_pool_kernel(x_ref, wae_ref, wbe_ref, wao_ref, wbo_ref, b_ref, o_ref):
    lp = o_ref.shape[0]                       # pooled length (= L // 4)
    x0 = x_ref[pl.ds(0, lp), :]               # (lp, 4*Cin)  rows m
    x1 = x_ref[pl.ds(1, lp), :]               # (lp, 4*Cin)  rows m+1
    even = (jnp.dot(x0, wae_ref[...], preferred_element_type=jnp.float32)
            + jnp.dot(x1, wbe_ref[...], preferred_element_type=jnp.float32))
    odd = (jnp.dot(x0, wao_ref[...], preferred_element_type=jnp.float32)
           + jnp.dot(x1, wbo_ref[...], preferred_element_type=jnp.float32))
    o_ref[...] = jnp.maximum(even, odd) + b_ref[...]


def conv_pool_stage(x_nlc, wae, wbe, wao, wbo, bias_row):
    """x_nlc: (B, L, Cin) -> (B, L // 4, Cout). Conv+bias+maxpool fused."""
    B, L, cin = x_nlc.shape
    cout = wae.shape[1]
    lp = L // 4
    lq = lp + 1                                # (L + 4) // 4 packed rows
    # zero-pad the time axis by 2 (conv padding) and pack 4 time steps per row
    xp = jnp.pad(x_nlc, ((0, 0), (2, 2), (0, 0))).reshape(B, lq, 4 * cin)

    w_spec = pl.BlockSpec((4 * cin, cout), lambda b: (0, 0))   # resident across grid
    return pl.pallas_call(
        _conv_pool_kernel,
        out_shape=jax.ShapeDtypeStruct((B, lp, cout), jnp.float32),
        grid=(B,),
        in_specs=[pl.BlockSpec((None, lq, 4 * cin), lambda b: (b, 0, 0)),
                  w_spec, w_spec, w_spec, w_spec,
                  pl.BlockSpec((1, cout), lambda b: (0, 0))],
        out_specs=pl.BlockSpec((None, lp, cout), lambda b: (b, 0, 0)),
        compiler_params=pltpu.CompilerParams(
            dimension_semantics=("parallel",)),
    )(xp, wae, wbe, wao, wbo, bias_row)


# ------------------------------------------------------------------
# LSTM head kernel: x @ W_ih^T folded in, unrolled recurrence,
# ReLU(h_n) -> bias-free Linear -> Sigmoid. Everything stays in VMEM.
# ------------------------------------------------------------------

def _lstm_head_kernel(x_ref, wih_t_ref, whh_t_ref, wlin_t_ref, o_ref):
    T = x_ref.shape[0]                         # seq length (= original batch B)
    H = whh_t_ref.shape[0]
    # input projection for all time steps at once (LSTM bias=False)
    xproj = jnp.dot(x_ref[...], wih_t_ref[...],
                    preferred_element_type=jnp.float32)        # (T, 4H)
    whh_t = whh_t_ref[...]                     # load W_hh^T from VMEM once
    h = jnp.zeros((1, H), jnp.float32)         # h0 = 0
    c = jnp.zeros((1, H), jnp.float32)         # c0 = 0
    for t in range(T):                         # T is static & tiny -> unrolled
        gates = xproj[t:t + 1, :] + jnp.dot(h, whh_t,
                                            preferred_element_type=jnp.float32)
        i = jax.nn.sigmoid(gates[:, 0 * H:1 * H])
        f = jax.nn.sigmoid(gates[:, 1 * H:2 * H])
        g = jnp.tanh(gates[:, 2 * H:3 * H])
        o = jax.nn.sigmoid(gates[:, 3 * H:4 * H])
        c = f * c + i * g
        h = o * jnp.tanh(c)
    h_relu = jnp.maximum(h, 0.0)                               # ReLU on h_n
    logits = jnp.dot(h_relu, wlin_t_ref[...],
                     preferred_element_type=jnp.float32)       # bias-free Linear
    o_ref[...] = jax.nn.sigmoid(logits)                        # Sigmoid


def lstm_head(feats, wih_t, whh_t, wlin_t):
    n_cls = wlin_t.shape[1]
    return pl.pallas_call(
        _lstm_head_kernel,
        out_shape=jax.ShapeDtypeStruct((1, n_cls), jnp.float32),
        in_specs=[pl.BlockSpec(memory_space=pltpu.MemorySpace.VMEM)] * 4,
        out_specs=pl.BlockSpec(memory_space=pltpu.MemorySpace.VMEM),
    )(feats, wih_t, whh_t, wlin_t)


# ------------------------------------------------------------------
# Forward pass (glue is only: zero-pad, pure reshapes, one tiny transpose)
# ------------------------------------------------------------------

@jax.jit
def bird_recognition_forward(x, kp):
    B, _, L = x.shape
    h = x.reshape(B, L, 1)                     # NCL (B,1,L) -> NLC (B,L,1); Cin=1
    for s in ("1", "2", "3"):
        h = conv_pool_stage(h, kp["wae" + s], kp["wbe" + s],
                            kp["wao" + s], kp["wbo" + s], kp["b" + s])
    # PyTorch flatten(x, 1) is channel-major on NCL -> transpose tiny (B,Lp,C)
    feats = jnp.transpose(h, (0, 2, 1)).reshape(B, -1)
    out = lstm_head(feats, kp["wih_t"], kp["whh_t"], kp["wlin_t"])
    return jnp.squeeze(out)                    # x.squeeze()


# ------------------------------------------------------------------
# Parameter creation (PyTorch layout) and one-time packing for the kernels
# ------------------------------------------------------------------

def _pack_conv_weights(w):
    """w: (Cout, Cin, 5) PyTorch conv1d weight -> 4 tap matrices (4*Cin, Cout)."""
    cout, cin, _ = w.shape
    wk = [w[:, :, k].T for k in range(5)]      # tap k as (Cin, Cout)
    z = jnp.zeros((cin, cout), w.dtype)
    wa_e = jnp.concatenate([wk[0], wk[1], wk[2], wk[3]], axis=0)  # X[m]   -> even
    wb_e = jnp.concatenate([wk[4], z, z, z], axis=0)              # X[m+1] -> even
    wa_o = jnp.concatenate([z, z, wk[0], wk[1]], axis=0)          # X[m]   -> odd
    wb_o = jnp.concatenate([wk[2], wk[3], wk[4], z], axis=0)      # X[m+1] -> odd
    return wa_e, wb_e, wa_o, wb_o


def prepare_params(p):
    """Pre-transpose / pre-pack all weights once (outside the jitted forward)."""
    kp = {}
    for s in ("1", "2", "3"):
        wae, wbe, wao, wbo = _pack_conv_weights(p["w" + s])
        kp["wae" + s], kp["wbe" + s] = wae, wbe
        kp["wao" + s], kp["wbo" + s] = wao, wbo
        kp["b" + s] = p["b" + s].reshape(1, -1)
    kp["wih_t"] = p["w_ih"].T                  # (D, 4H)
    kp["whh_t"] = p["w_hh"].T                  # (H, 4H)
    kp["wlin_t"] = p["w_lin"].T                # (H, n_classes)
    return kp


def init_params(key, dim_in, hid, n_classes):
    ks = jax.random.split(key, 10)

    def u(k, shape, fan_in):
        bound = 1.0 / jnp.sqrt(jnp.float32(fan_in))
        return jax.random.uniform(k, shape, jnp.float32, -bound, bound)

    return dict(
        w1=u(ks[0], (4, 1, 5), 1 * 5),    b1=u(ks[1], (4,), 1 * 5),
        w2=u(ks[2], (8, 4, 5), 4 * 5),    b2=u(ks[3], (8,), 4 * 5),
        w3=u(ks[4], (16, 8, 5), 8 * 5),   b3=u(ks[5], (16,), 8 * 5),
        w_ih=u(ks[6], (4 * hid, dim_in), hid),   # LSTM weight_ih_l0 (gates i,f,g,o)
        w_hh=u(ks[7], (4 * hid, hid), hid),      # LSTM weight_hh_l0
        w_lin=u(ks[8], (n_classes, hid), hid),   # Linear (no bias)
    )


# ------------------------------------------------------------------
# Pure-JAX reference (for in-script correctness check)
# ------------------------------------------------------------------

def _reference_forward(x, p):
    hp = jax.lax.Precision.HIGHEST

    def conv(h, w, b):
        Bn, cin, L = h.shape
        lout = L // 2
        xp = jnp.pad(h, ((0, 0), (0, 0), (2, 2)))
        idx = 2 * jnp.arange(lout)[:, None] + jnp.arange(5)[None, :]
        xcol = xp[:, :, idx]                                   # (B, cin, lout, 5)
        return jnp.einsum("bclk,ock->bol", xcol, w, precision=hp) + b[None, :, None]

    def pool(h):
        Bn, c, L = h.shape
        return jnp.max(h.reshape(Bn, c, L // 2, 2), axis=-1)

    h = pool(conv(x, p["w1"], p["b1"]))
    h = pool(conv(h, p["w2"], p["b2"]))
    h = pool(conv(h, p["w3"], p["b3"]))
    Bn = h.shape[0]
    feats = h.reshape(Bn, -1)                                  # channel-major flatten
    H = p["w_hh"].shape[1]
    hs = jnp.zeros((1, H), jnp.float32)
    cs = jnp.zeros((1, H), jnp.float32)
    for t in range(Bn):
        gates = (jnp.dot(feats[t:t + 1], p["w_ih"].T, precision=hp)
                 + jnp.dot(hs, p["w_hh"].T, precision=hp))
        i = jax.nn.sigmoid(gates[:, 0 * H:1 * H])
        f = jax.nn.sigmoid(gates[:, 1 * H:2 * H])
        g = jnp.tanh(gates[:, 2 * H:3 * H])
        o = jax.nn.sigmoid(gates[:, 3 * H:4 * H])
        cs = f * cs + i * g
        hs = o * jnp.tanh(cs)
    logits = jnp.dot(jnp.maximum(hs, 0.0), p["w_lin"].T, precision=hp)
    return jnp.squeeze(jax.nn.sigmoid(logits))


if __name__ == "__main__":
    B, L = 2, 2048                 # small demo length (module's real L would be 32000)
    hid = 256
    n_classes = 10
    dim_in = 16 * (L // 64)        # = 512 here; module hardcodes 16*500 for L=32000

    key = jax.random.PRNGKey(0)
    kx, kp_key = jax.random.split(key)
    x = jax.random.normal(kx, (B, 1, L), jnp.float32)
    params = init_params(kp_key, dim_in, hid, n_classes)
    kparams = prepare_params(params)           # one-time weight packing

    out = bird_recognition_forward(x, kparams)
    out = jax.block_until_ready(out)

    assert out.shape == (n_classes,), out.shape
    assert bool(jnp.all(jnp.isfinite(out)))
    assert bool(jnp.all((out >= 0.0) & (out <= 1.0)))          # sigmoid output

    ref = _reference_forward(x, params)
    assert bool(jnp.allclose(out, ref, atol=2e-3, rtol=2e-3)), (out, ref)

    print("KERNEL_OK")
</pallas_src>

<mosaic_0001>
module attributes {stable_mosaic.version = 11 : i64} {
  func.func @_conv_pool_kernel(%arg0: i32, %arg1: memref<1x513x4xf32, #tpu.memory_space<vmem>>, %arg2: memref<4x4xf32, #tpu.memory_space<vmem>>, %arg3: memref<4x4xf32, #tpu.memory_space<vmem>>, %arg4: memref<4x4xf32, #tpu.memory_space<vmem>>, %arg5: memref<4x4xf32, #tpu.memory_space<vmem>>, %arg6: memref<1x4xf32, #tpu.memory_space<vmem>>, %arg7: memref<1x512x4xf32, #tpu.memory_space<vmem>>) attributes {dimension_semantics = [#tpu.dimension_semantics<parallel>], iteration_bounds = array<i64: 2>, scalar_prefetch = 0 : i64, scratch_operands = 0 : i64, tpu.core_type = #tpu.core_type<tc>, window_params = [{transform_indices = @transform_0, window_bounds = array<i64: 1, 513, 4>}, {pipeline_mode = #tpu.pipeline_mode<synchronous>, transform_indices = @transform_1, window_bounds = array<i64: 4, 4>}, {pipeline_mode = #tpu.pipeline_mode<synchronous>, transform_indices = @transform_2, window_bounds = array<i64: 4, 4>}, {pipeline_mode = #tpu.pipeline_mode<synchronous>, transform_indices = @transform_3, window_bounds = array<i64: 4, 4>}, {pipeline_mode = #tpu.pipeline_mode<synchronous>, transform_indices = @transform_4, window_bounds = array<i64: 4, 4>}, {pipeline_mode = #tpu.pipeline_mode<synchronous>, transform_indices = @transform_5, window_bounds = array<i64: 1, 4>}, {transform_indices = @transform_6, window_bounds = array<i64: 1, 512, 4>}]} {
    %c0 = arith.constant 0 : index
    %c0_0 = arith.constant 0 : index
    %c0_1 = arith.constant 0 : index
    %0 = vector.load %arg1[%c0, %c0_0, %c0_1] : memref<1x513x4xf32, #tpu.memory_space<vmem>>, vector<1x512x4xf32>
    %1 = vector.shape_cast %0 : vector<1x512x4xf32> to vector<512x4xf32>
    %c0_2 = arith.constant 0 : index
    %c1 = arith.constant 1 : index
    %c0_3 = arith.constant 0 : index
    %2 = vector.load %arg1[%c0_2, %c1, %c0_3] : memref<1x513x4xf32, #tpu.memory_space<vmem>>, vector<1x512x4xf32>
    %3 = vector.shape_cast %2 : vector<1x512x4xf32> to vector<512x4xf32>
    %c0_4 = arith.constant 0 : index
    %c0_5 = arith.constant 0 : index
    %4 = vector.load %arg2[%c0_4, %c0_5] : memref<4x4xf32, #tpu.memory_space<vmem>>, vector<4x4xf32>
    %cst = arith.constant dense<0.000000e+00> : vector<512x4xf32>
    %5 = tpu.matmul %1, %4, %cst {dimension_numbers = #tpu.dot_dimension_numbers<[1], [0], [0], [1], [0, 0, 1, 1], [], []>} : vector<512x4xf32>, vector<4x4xf32>, vector<512x4xf32> -> vector<512x4xf32>
    %c0_6 = arith.constant 0 : index
    %c0_7 = arith.constant 0 : index
    %6 = vector.load %arg3[%c0_6, %c0_7] : memref<4x4xf32, #tpu.memory_space<vmem>>, vector<4x4xf32>
    %cst_8 = arith.constant dense<0.000000e+00> : vector<512x4xf32>
    %7 = tpu.matmul %3, %6, %cst_8 {dimension_numbers = #tpu.dot_dimension_numbers<[1], [0], [0], [1], [0, 0, 1, 1], [], []>} : vector<512x4xf32>, vector<4x4xf32>, vector<512x4xf32> -> vector<512x4xf32>
    %8 = arith.addf %5, %7 : vector<512x4xf32>
    %c0_9 = arith.constant 0 : index
    %c0_10 = arith.constant 0 : index
    %9 = vector.load %arg4[%c0_9, %c0_10] : memref<4x4xf32, #tpu.memory_space<vmem>>, vector<4x4xf32>
    %cst_11 = arith.constant dense<0.000000e+00> : vector<512x4xf32>
    %10 = tpu.matmul %1, %9, %cst_11 {dimension_numbers = #tpu.dot_dimension_numbers<[1], [0], [0], [1], [0, 0, 1, 1], [], []>} : vector<512x4xf32>, vector<4x4xf32>, vector<512x4xf32> -> vector<512x4xf32>
    %c0_12 = arith.constant 0 : index
    %c0_13 = arith.constant 0 : index
    %11 = vector.load %arg5[%c0_12, %c0_13] : memref<4x4xf32, #tpu.memory_space<vmem>>, vector<4x4xf32>
    %cst_14 = arith.constant dense<0.000000e+00> : vector<512x4xf32>
    %12 = tpu.matmul %3, %11, %cst_14 {dimension_numbers = #tpu.dot_dimension_numbers<[1], [0], [0], [1], [0, 0, 1, 1], [], []>} : vector<512x4xf32>, vector<4x4xf32>, vector<512x4xf32> -> vector<512x4xf32>
    %13 = arith.addf %10, %12 : vector<512x4xf32>
    %14 = arith.maximumf %8, %13 : vector<512x4xf32>
    %c0_15 = arith.constant 0 : index
    %c0_16 = arith.constant 0 : index
    %15 = vector.load %arg6[%c0_15, %c0_16] : memref<1x4xf32, #tpu.memory_space<vmem>>, vector<1x4xf32>
    %16 = vector.broadcast %15 : vector<1x4xf32> to vector<512x4xf32>
    %17 = arith.addf %14, %16 : vector<512x4xf32>
    %c0_17 = arith.constant 0 : index
    %c0_18 = arith.constant 0 : index
    %c0_19 = arith.constant 0 : index
    %18 = vector.load %arg7[%c0_17, %c0_18, %c0_19] : memref<1x512x4xf32, #tpu.memory_space<vmem>>, vector<1x512x4xf32>
    %19 = vector.shape_cast %18 : vector<1x512x4xf32> to vector<512x4xf32>
    %20 = vector.shape_cast %17 : vector<512x4xf32> to vector<1x512x4xf32>
    tpu.vector_store %arg7[%c0_17, %c0_18, %c0_19], %20 {strides = array<i32>} : memref<1x512x4xf32, #tpu.memory_space<vmem>>, vector<1x512x4xf32>,
    return
  }
  func.func @transform_0(%arg0: i32) -> (i32, i32, i32) {
    %c0_i32 = arith.constant 0 : i32
    %c0_i32_0 = arith.constant 0 : i32
    %c0_i32_1 = arith.constant 0 : i32
    return %arg0, %c0_i32, %c0_i32_0 : i32, i32, i32
  }
  func.func @transform_1(%arg0: i32) -> (i32, i32) {
    %c0_i32 = arith.constant 0 : i32
    %c0_i32_0 = arith.constant 0 : i32
    %c0_i32_1 = arith.constant 0 : i32
    return %c0_i32, %c0_i32_0 : i32, i32
  }
  func.func @transform_2(%arg0: i32) -> (i32, i32) {
    %c0_i32 = arith.constant 0 : i32
    %c0_i32_0 = arith.constant 0 : i32
    %c0_i32_1 = arith.constant 0 : i32
    return %c0_i32, %c0_i32_0 : i32, i32
  }
  func.func @transform_3(%arg0: i32) -> (i32, i32) {
    %c0_i32 = arith.constant 0 : i32
    %c0_i32_0 = arith.constant 0 : i32
    %c0_i32_1 = arith.constant 0 : i32
    return %c0_i32, %c0_i32_0 : i32, i32
  }
  func.func @transform_4(%arg0: i32) -> (i32, i32) {
    %c0_i32 = arith.constant 0 : i32
    %c0_i32_0 = arith.constant 0 : i32
    %c0_i32_1 = arith.constant 0 : i32
    return %c0_i32, %c0_i32_0 : i32, i32
  }
  func.func @transform_5(%arg0: i32) -> (i32, i32) {
    %c0_i32 = arith.constant 0 : i32
    %c0_i32_0 = arith.constant 0 : i32
    %c0_i32_1 = arith.constant 0 : i32
    return %c0_i32, %c0_i32_0 : i32, i32
  }
  func.func @transform_6(%arg0: i32) -> (i32, i32, i32) {
    %c0_i32 = arith.constant 0 : i32
    %c0_i32_0 = arith.constant 0 : i32
    %c0_i32_1 = arith.constant 0 : i32
    return %arg0, %c0_i32, %c0_i32_0 : i32, i32, i32
  }
}

module attributes {stable_mosaic.version = 11 : i64} {
  func.func @_conv_pool_kernel(%arg0: i32, %arg1: memref<1x129x16xf32, #tpu.memory_space<vmem>>, %arg2: memref<16x8xf32, #tpu.memory_space<vmem>>, %arg3: memref<16x8xf32, #tpu.memory_space<vmem>>, %arg4: memref<16x8xf32, #tpu.memory_space<vmem>>, %arg5: memref<16x8xf32, #tpu.memory_space<vmem>>, %arg6: memref<1x8xf32, #tpu.memory_space<vmem>>, %arg7: memref<1x128x8xf32, #tpu.memory_space<vmem>>) attributes {dimension_semantics = [#tpu.dimension_semantics<parallel>], iteration_bounds = array<i64: 2>, scalar_prefetch = 0 : i64, scratch_operands = 0 : i64, tpu.core_type = #tpu.core_type<tc>, window_params = [{transform_indices = @transform_0, window_bounds = array<i64: 1, 129, 16>}, {pipeline_mode = #tpu.pipeline_mode<synchronous>, transform_indices = @transform_1, window_bounds = array<i64: 16, 8>}, {pipeline_mode = #tpu.pipeline_mode<synchronous>, transform_indices = @transform_2, window_bounds = array<i64: 16, 8>}, {pipeline_mode = #tpu.pipeline_mode<synchronous>, transform_indices = @transform_3, window_bounds = array<i64: 16, 8>}, {pipeline_mode = #tpu.pipeline_mode<synchronous>, transform_indices = @transform_4, window_bounds = array<i64: 16, 8>}, {pipeline_mode = #tpu.pipeline_mode<synchronous>, transform_indices = @transform_5, window_bounds = array<i64: 1, 8>}, {transform_indices = @transform_6, window_bounds = array<i64: 1, 128, 8>}]} {
    %c0 = arith.constant 0 : index
    %c0_0 = arith.constant 0 : index
    %c0_1 = arith.constant 0 : index
    %0 = vector.load %arg1[%c0, %c0_0, %c0_1] : memref<1x129x16xf32, #tpu.memory_space<vmem>>, vector<1x128x16xf32>
    %1 = vector.shape_cast %0 : vector<1x128x16xf32> to vector<128x16xf32>
    %c0_2 = arith.constant 0 : index
    %c1 = arith.constant 1 : index
    %c0_3 = arith.constant 0 : index
    %2 = vector.load %arg1[%c0_2, %c1, %c0_3] : memref<1x129x16xf32, #tpu.memory_space<vmem>>, vector<1x128x16xf32>
    %3 = vector.shape_cast %2 : vector<1x128x16xf32> to vector<128x16xf32>
    %c0_4 = arith.constant 0 : index
    %c0_5 = arith.constant 0 : index
    %4 = vector.load %arg2[%c0_4, %c0_5] : memref<16x8xf32, #tpu.memory_space<vmem>>, vector<16x8xf32>
    %cst = arith.constant dense<0.000000e+00> : vector<128x8xf32>
    %5 = tpu.matmul %1, %4, %cst {dimension_numbers = #tpu.dot_dimension_numbers<[1], [0], [0], [1], [0, 0, 1, 1], [], []>} : vector<128x16xf32>, vector<16x8xf32>, vector<128x8xf32> -> vector<128x8xf32>
    %c0_6 = arith.constant 0 : index
    %c0_7 = arith.constant 0 : index
    %6 = vector.load %arg3[%c0_6, %c0_7] : memref<16x8xf32, #tpu.memory_space<vmem>>, vector<16x8xf32>
    %cst_8 = arith.constant dense<0.000000e+00> : vector<128x8xf32>
    %7 = tpu.matmul %3, %6, %cst_8 {dimension_numbers = #tpu.dot_dimension_numbers<[1], [0], [0], [1], [0, 0, 1, 1], [], []>} : vector<128x16xf32>, vector<16x8xf32>, vector<128x8xf32> -> vector<128x8xf32>
    %8 = arith.addf %5, %7 : vector<128x8xf32>
    %c0_9 = arith.constant 0 : index
    %c0_10 = arith.constant 0 : index
    %9 = vector.load %arg4[%c0_9, %c0_10] : memref<16x8xf32, #tpu.memory_space<vmem>>, vector<16x8xf32>
    %cst_11 = arith.constant dense<0.000000e+00> : vector<128x8xf32>
    %10 = tpu.matmul %1, %9, %cst_11 {dimension_numbers = #tpu.dot_dimension_numbers<[1], [0], [0], [1], [0, 0, 1, 1], [], []>} : vector<128x16xf32>, vector<16x8xf32>, vector<128x8xf32> -> vector<128x8xf32>
    %c0_12 = arith.constant 0 : index
    %c0_13 = arith.constant 0 : index
    %11 = vector.load %arg5[%c0_12, %c0_13] : memref<16x8xf32, #tpu.memory_space<vmem>>, vector<16x8xf32>
    %cst_14 = arith.constant dense<0.000000e+00> : vector<128x8xf32>
    %12 = tpu.matmul %3, %11, %cst_14 {dimension_numbers = #tpu.dot_dimension_numbers<[1], [0], [0], [1], [0, 0, 1, 1], [], []>} : vector<128x16xf32>, vector<16x8xf32>, vector<128x8xf32> -> vector<128x8xf32>
    %13 = arith.addf %10, %12 : vector<128x8xf32>
    %14 = arith.maximumf %8, %13 : vector<128x8xf32>
    %c0_15 = arith.constant 0 : index
    %c0_16 = arith.constant 0 : index
    %15 = vector.load %arg6[%c0_15, %c0_16] : memref<1x8xf32, #tpu.memory_space<vmem>>, vector<1x8xf32>
    %16 = vector.broadcast %15 : vector<1x8xf32> to vector<128x8xf32>
    %17 = arith.addf %14, %16 : vector<128x8xf32>
    %c0_17 = arith.constant 0 : index
    %c0_18 = arith.constant 0 : index
    %c0_19 = arith.constant 0 : index
    %18 = vector.load %arg7[%c0_17, %c0_18, %c0_19] : memref<1x128x8xf32, #tpu.memory_space<vmem>>, vector<1x128x8xf32>
    %19 = vector.shape_cast %18 : vector<1x128x8xf32> to vector<128x8xf32>
    %20 = vector.shape_cast %17 : vector<128x8xf32> to vector<1x128x8xf32>
    tpu.vector_store %arg7[%c0_17, %c0_18, %c0_19], %20 {strides = array<i32>} : memref<1x128x8xf32, #tpu.memory_space<vmem>>, vector<1x128x8xf32>,
    return
  }
  func.func @transform_0(%arg0: i32) -> (i32, i32, i32) {
    %c0_i32 = arith.constant 0 : i32
    %c0_i32_0 = arith.constant 0 : i32
    %c0_i32_1 = arith.constant 0 : i32
    return %arg0, %c0_i32, %c0_i32_0 : i32, i32, i32
  }
  func.func @transform_1(%arg0: i32) -> (i32, i32) {
    %c0_i32 = arith.constant 0 : i32
    %c0_i32_0 = arith.constant 0 : i32
    %c0_i32_1 = arith.constant 0 : i32
    return %c0_i32, %c0_i32_0 : i32, i32
  }
  func.func @transform_2(%arg0: i32) -> (i32, i32) {
    %c0_i32 = arith.constant 0 : i32
    %c0_i32_0 = arith.constant 0 : i32
    %c0_i32_1 = arith.constant 0 : i32
    return %c0_i32, %c0_i32_0 : i32, i32
  }
  func.func @transform_3(%arg0: i32) -> (i32, i32) {
    %c0_i32 = arith.constant 0 : i32
    %c0_i32_0 = arith.constant 0 : i32
    %c0_i32_1 = arith.constant 0 : i32
    return %c0_i32, %c0_i32_0 : i32, i32
  }
  func.func @transform_4(%arg0: i32) -> (i32, i32) {
    %c0_i32 = arith.constant 0 : i32
    %c0_i32_0 = arith.constant 0 : i32
    %c0_i32_1 = arith.constant 0 : i32
    return %c0_i32, %c0_i32_0 : i32, i32
  }
  func.func @transform_5(%arg0: i32) -> (i32, i32) {
    %c0_i32 = arith.constant 0 : i32
    %c0_i32_0 = arith.constant 0 : i32
    %c0_i32_1 = arith.constant 0 : i32
    return %c0_i32, %c0_i32_0 : i32, i32
  }
  func.func @transform_6(%arg0: i32) -> (i32, i32, i32) {
    %c0_i32 = arith.constant 0 : i32
    %c0_i32_0 = arith.constant 0 : i32
    %c0_i32_1 = arith.constant 0 : i32
    return %arg0, %c0_i32, %c0_i32_0 : i32, i32, i32
  }
}

module attributes {stable_mosaic.version = 11 : i64} {
  func.func @_conv_pool_kernel(%arg0: i32, %arg1: memref<1x33x32xf32, #tpu.memory_space<vmem>>, %arg2: memref<32x16xf32, #tpu.memory_space<vmem>>, %arg3: memref<32x16xf32, #tpu.memory_space<vmem>>, %arg4: memref<32x16xf32, #tpu.memory_space<vmem>>, %arg5: memref<32x16xf32, #tpu.memory_space<vmem>>, %arg6: memref<1x16xf32, #tpu.memory_space<vmem>>, %arg7: memref<1x32x16xf32, #tpu.memory_space<vmem>>) attributes {dimension_semantics = [#tpu.dimension_semantics<parallel>], iteration_bounds = array<i64: 2>, scalar_prefetch = 0 : i64, scratch_operands = 0 : i64, tpu.core_type = #tpu.core_type<tc>, window_params = [{transform_indices = @transform_0, window_bounds = array<i64: 1, 33, 32>}, {pipeline_mode = #tpu.pipeline_mode<synchronous>, transform_indices = @transform_1, window_bounds = array<i64: 32, 16>}, {pipeline_mode = #tpu.pipeline_mode<synchronous>, transform_indices = @transform_2, window_bounds = array<i64: 32, 16>}, {pipeline_mode = #tpu.pipeline_mode<synchronous>, transform_indices = @transform_3, window_bounds = array<i64: 32, 16>}, {pipeline_mode = #tpu.pipeline_mode<synchronous>, transform_indices = @transform_4, window_bounds = array<i64: 32, 16>}, {pipeline_mode = #tpu.pipeline_mode<synchronous>, transform_indices = @transform_5, window_bounds = array<i64: 1, 16>}, {transform_indices = @transform_6, window_bounds = array<i64: 1, 32, 16>}]} {
    %c0 = arith.constant 0 : index
    %c0_0 = arith.constant 0 : index
    %c0_1 = arith.constant 0 : index
    %0 = vector.load %arg1[%c0, %c0_0, %c0_1] : memref<1x33x32xf32, #tpu.memory_space<vmem>>, vector<1x32x32xf32>
    %1 = vector.shape_cast %0 : vector<1x32x32xf32> to vector<32x32xf32>
    %c0_2 = arith.constant 0 : index
    %c1 = arith.constant 1 : index
    %c0_3 = arith.constant 0 : index
    %2 = vector.load %arg1[%c0_2, %c1, %c0_3] : memref<1x33x32xf32, #tpu.memory_space<vmem>>, vector<1x32x32xf32>
    %3 = vector.shape_cast %2 : vector<1x32x32xf32> to vector<32x32xf32>
    %c0_4 = arith.constant 0 : index
    %c0_5 = arith.constant 0 : index
    %4 = vector.load %arg2[%c0_4, %c0_5] : memref<32x16xf32, #tpu.memory_space<vmem>>, vector<32x16xf32>
    %cst = arith.constant dense<0.000000e+00> : vector<32x16xf32>
    %5 = tpu.matmul %1, %4, %cst {dimension_numbers = #tpu.dot_dimension_numbers<[1], [0], [0], [1], [0, 0, 1, 1], [], []>} : vector<32x32xf32>, vector<32x16xf32>, vector<32x16xf32> -> vector<32x16xf32>
    %c0_6 = arith.constant 0 : index
    %c0_7 = arith.constant 0 : index
    %6 = vector.load %arg3[%c0_6, %c0_7] : memref<32x16xf32, #tpu.memory_space<vmem>>, vector<32x16xf32>
    %cst_8 = arith.constant dense<0.000000e+00> : vector<32x16xf32>
    %7 = tpu.matmul %3, %6, %cst_8 {dimension_numbers = #tpu.dot_dimension_numbers<[1], [0], [0], [1], [0, 0, 1, 1], [], []>} : vector<32x32xf32>, vector<32x16xf32>, vector<32x16xf32> -> vector<32x16xf32>
    %8 = arith.addf %5, %7 : vector<32x16xf32>
    %c0_9 = arith.constant 0 : index
    %c0_10 = arith.constant 0 : index
    %9 = vector.load %arg4[%c0_9, %c0_10] : memref<32x16xf32, #tpu.memory_space<vmem>>, vector<32x16xf32>
    %cst_11 = arith.constant dense<0.000000e+00> : vector<32x16xf32>
    %10 = tpu.matmul %1, %9, %cst_11 {dimension_numbers = #tpu.dot_dimension_numbers<[1], [0], [0], [1], [0, 0, 1, 1], [], []>} : vector<32x32xf32>, vector<32x16xf32>, vector<32x16xf32> -> vector<32x16xf32>
    %c0_12 = arith.constant 0 : index
    %c0_13 = arith.constant 0 : index
    %11 = vector.load %arg5[%c0_12, %c0_13] : memref<32x16xf32, #tpu.memory_space<vmem>>, vector<32x16xf32>
    %cst_14 = arith.constant dense<0.000000e+00> : vector<32x16xf32>
    %12 = tpu.matmul %3, %11, %cst_14 {dimension_numbers = #tpu.dot_dimension_numbers<[1], [0], [0], [1], [0, 0, 1, 1], [], []>} : vector<32x32xf32>, vector<32x16xf32>, vector<32x16xf32> -> vector<32x16xf32>
    %13 = arith.addf %10, %12 : vector<32x16xf32>
    %14 = arith.maximumf %8, %13 : vector<32x16xf32>
    %c0_15 = arith.constant 0 : index
    %c0_16 = arith.constant 0 : index
    %15 = vector.load %arg6[%c0_15, %c0_16] : memref<1x16xf32, #tpu.memory_space<vmem>>, vector<1x16xf32>
    %16 = vector.broadcast %15 : vector<1x16xf32> to vector<32x16xf32>
    %17 = arith.addf %14, %16 : vector<32x16xf32>
    %c0_17 = arith.constant 0 : index
    %c0_18 = arith.constant 0 : index
    %c0_19 = arith.constant 0 : index
    %18 = vector.load %arg7[%c0_17, %c0_18, %c0_19] : memref<1x32x16xf32, #tpu.memory_space<vmem>>, vector<1x32x16xf32>
    %19 = vector.shape_cast %18 : vector<1x32x16xf32> to vector<32x16xf32>
    %20 = vector.shape_cast %17 : vector<32x16xf32> to vector<1x32x16xf32>
    tpu.vector_store %arg7[%c0_17, %c0_18, %c0_19], %20 {strides = array<i32>} : memref<1x32x16xf32, #tpu.memory_space<vmem>>, vector<1x32x16xf32>,
    return
  }
  func.func @transform_0(%arg0: i32) -> (i32, i32, i32) {
    %c0_i32 = arith.constant 0 : i32
    %c0_i32_0 = arith.constant 0 : i32
    %c0_i32_1 = arith.constant 0 : i32
    return %arg0, %c0_i32, %c0_i32_0 : i32, i32, i32
  }
  func.func @transform_1(%arg0: i32) -> (i32, i32) {
    %c0_i32 = arith.constant 0 : i32
    %c0_i32_0 = arith.constant 0 : i32
    %c0_i32_1 = arith.constant 0 : i32
    return %c0_i32, %c0_i32_0 : i32, i32
  }
  func.func @transform_2(%arg0: i32) -> (i32, i32) {
    %c0_i32 = arith.constant 0 : i32
    %c0_i32_0 = arith.constant 0 : i32
    %c0_i32_1 = arith.constant 0 : i32
    return %c0_i32, %c0_i32_0 : i32, i32
  }
  func.func @transform_3(%arg0: i32) -> (i32, i32) {
    %c0_i32 = arith.constant 0 : i32
    %c0_i32_0 = arith.constant 0 : i32
    %c0_i32_1 = arith.constant 0 : i32
    return %c0_i32, %c0_i32_0 : i32, i32
  }
  func.func @transform_4(%arg0: i32) -> (i32, i32) {
    %c0_i32 = arith.constant 0 : i32
    %c0_i32_0 = arith.constant 0 : i32
    %c0_i32_1 = arith.constant 0 : i32
    return %c0_i32, %c0_i32_0 : i32, i32
  }
  func.func @transform_5(%arg0: i32) -> (i32, i32) {
    %c0_i32 = arith.constant 0 : i32
    %c0_i32_0 = arith.constant 0 : i32
    %c0_i32_1 = arith.constant 0 : i32
    return %c0_i32, %c0_i32_0 : i32, i32
  }
  func.func @transform_6(%arg0: i32) -> (i32, i32, i32) {
    %c0_i32 = arith.constant 0 : i32
    %c0_i32_0 = arith.constant 0 : i32
    %c0_i32_1 = arith.constant 0 : i32
    return %arg0, %c0_i32, %c0_i32_0 : i32, i32, i32
  }
}

module attributes {stable_mosaic.version = 11 : i64} {
  func.func @_lstm_head_kernel(%arg0: memref<2x512xf32, #tpu.memory_space<vmem>>, %arg1: memref<512x1024xf32, #tpu.memory_space<vmem>>, %arg2: memref<256x1024xf32, #tpu.memory_space<vmem>>, %arg3: memref<256x10xf32, #tpu.memory_space<vmem>>, %arg4: memref<1x10xf32, #tpu.memory_space<vmem>>) attributes {dimension_semantics = [], scalar_prefetch = 0 : i64, scratch_operands = 0 : i64, tpu.core_type = #tpu.core_type<tc>} {
    %c0 = arith.constant 0 : index
    %c0_0 = arith.constant 0 : index
    %0 = vector.load %arg0[%c0, %c0_0] : memref<2x512xf32, #tpu.memory_space<vmem>>, vector<2x512xf32>
    %c0_1 = arith.constant 0 : index
    %c0_2 = arith.constant 0 : index
    %1 = vector.load %arg1[%c0_1, %c0_2] : memref<512x1024xf32, #tpu.memory_space<vmem>>, vector<512x1024xf32>
    %cst = arith.constant dense<0.000000e+00> : vector<2x1024xf32>
    %2 = tpu.matmul %0, %1, %cst {dimension_numbers = #tpu.dot_dimension_numbers<[1], [0], [0], [1], [0, 0, 1, 1], [], []>} : vector<2x512xf32>, vector<512x1024xf32>, vector<2x1024xf32> -> vector<2x1024xf32>
    %c0_3 = arith.constant 0 : index
    %c0_4 = arith.constant 0 : index
    %3 = vector.load %arg2[%c0_3, %c0_4] : memref<256x1024xf32, #tpu.memory_space<vmem>>, vector<256x1024xf32>
    %cst_5 = arith.constant 0.000000e+00 : f32
    %4 = vector.broadcast %cst_5 : f32 to vector<1x256xf32>
    %cst_6 = arith.constant 0.000000e+00 : f32
    %5 = vector.broadcast %cst_6 : f32 to vector<1x256xf32>
    %6 = vector.extract_strided_slice %2 {offsets = [0, 0], sizes = [1, 1024], strides = [1, 1]} : vector<2x1024xf32> to vector<1x1024xf32>
    %cst_7 = arith.constant dense<0.000000e+00> : vector<1x1024xf32>
    %7 = tpu.matmul %4, %3, %cst_7 {dimension_numbers = #tpu.dot_dimension_numbers<[1], [0], [0], [1], [0, 0, 1, 1], [], []>} : vector<1x256xf32>, vector<256x1024xf32>, vector<1x1024xf32> -> vector<1x1024xf32>
    %8 = arith.addf %6, %7 : vector<1x1024xf32>
    %9 = vector.extract_strided_slice %8 {offsets = [0, 0], sizes = [1, 256], strides = [1, 1]} : vector<1x1024xf32> to vector<1x256xf32>
    %10 = arith.negf %9 : vector<1x256xf32>
    %11 = math.exp %10 : vector<1x256xf32>
    %cst_8 = arith.constant 1.000000e+00 : f32
    %12 = vector.broadcast %cst_8 : f32 to vector<1x256xf32>
    %13 = arith.addf %12, %11 : vector<1x256xf32>
    %14 = arith.divf %12, %13 : vector<1x256xf32>
    %15 = vector.extract_strided_slice %8 {offsets = [0, 256], sizes = [1, 256], strides = [1, 1]} : vector<1x1024xf32> to vector<1x256xf32>
    %16 = arith.negf %15 : vector<1x256xf32>
    %17 = math.exp %16 : vector<1x256xf32>
    %cst_9 = arith.constant 1.000000e+00 : f32
    %18 = vector.broadcast %cst_9 : f32 to vector<1x256xf32>
    %19 = arith.addf %18, %17 : vector<1x256xf32>
    %20 = arith.divf %18, %19 : vector<1x256xf32>
    %21 = vector.extract_strided_slice %8 {offsets = [0, 512], sizes = [1, 256], strides = [1, 1]} : vector<1x1024xf32> to vector<1x256xf32>
    %22 = math.tanh %21 : vector<1x256xf32>
    %23 = vector.extract_strided_slice %8 {offsets = [0, 768], sizes = [1, 256], strides = [1, 1]} : vector<1x1024xf32> to vector<1x256xf32>
    %24 = arith.negf %23 : vector<1x256xf32>
    %25 = math.exp %24 : vector<1x256xf32>
    %cst_10 = arith.constant 1.000000e+00 : f32
    %26 = vector.broadcast %cst_10 : f32 to vector<1x256xf32>
    %27 = arith.addf %26, %25 : vector<1x256xf32>
    %28 = arith.divf %26, %27 : vector<1x256xf32>
    %29 = arith.mulf %20, %5 : vector<1x256xf32>
    %30 = arith.mulf %14, %22 : vector<1x256xf32>
    %31 = arith.addf %29, %30 : vector<1x256xf32>
    %32 = math.tanh %31 : vector<1x256xf32>
    %33 = arith.mulf %28, %32 : vector<1x256xf32>
    %34 = vector.extract_strided_slice %2 {offsets = [1, 0], sizes = [1, 1024], strides = [1, 1]} : vector<2x1024xf32> to vector<1x1024xf32>
    %cst_11 = arith.constant dense<0.000000e+00> : vector<1x1024xf32>
    %35 = tpu.matmul %33, %3, %cst_11 {dimension_numbers = #tpu.dot_dimension_numbers<[1], [0], [0], [1], [0, 0, 1, 1], [], []>} : vector<1x256xf32>, vector<256x1024xf32>, vector<1x1024xf32> -> vector<1x1024xf32>
    %36 = arith.addf %34, %35 : vector<1x1024xf32>
    %37 = vector.extract_strided_slice %36 {offsets = [0, 0], sizes = [1, 256], strides = [1, 1]} : vector<1x1024xf32> to vector<1x256xf32>
    %38 = arith.negf %37 : vector<1x256xf32>
    %39 = math.exp %38 : vector<1x256xf32>
    %cst_12 = arith.constant 1.000000e+00 : f32
    %40 = vector.broadcast %cst_12 : f32 to vector<1x256xf32>
    %41 = arith.addf %40, %39 : vector<1x256xf32>
    %42 = arith.divf %40, %41 : vector<1x256xf32>
    %43 = vector.extract_strided_slice %36 {offsets = [0, 256], sizes = [1, 256], strides = [1, 1]} : vector<1x1024xf32> to vector<1x256xf32>
    %44 = arith.negf %43 : vector<1x256xf32>
    %45 = math.exp %44 : vector<1x256xf32>
    %cst_13 = arith.constant 1.000000e+00 : f32
    %46 = vector.broadcast %cst_13 : f32 to vector<1x256xf32>
    %47 = arith.addf %46, %45 : vector<1x256xf32>
    %48 = arith.divf %46, %47 : vector<1x256xf32>
    %49 = vector.extract_strided_slice %36 {offsets = [0, 512], sizes = [1, 256], strides = [1, 1]} : vector<1x1024xf32> to vector<1x256xf32>
    %50 = math.tanh %49 : vector<1x256xf32>
    %51 = vector.extract_strided_slice %36 {offsets = [0, 768], sizes = [1, 256], strides = [1, 1]} : vector<1x1024xf32> to vector<1x256xf32>
    %52 = arith.negf %51 : vector<1x256xf32>
    %53 = math.exp %52 : vector<1x256xf32>
    %cst_14 = arith.constant 1.000000e+00 : f32
    %54 = vector.broadcast %cst_14 : f32 to vector<1x256xf32>
    %55 = arith.addf %54, %53 : vector<1x256xf32>
    %56 = arith.divf %54, %55 : vector<1x256xf32>
    %57 = arith.mulf %48, %31 : vector<1x256xf32>
    %58 = arith.mulf %42, %50 : vector<1x256xf32>
    %59 = arith.addf %57, %58 : vector<1x256xf32>
    %60 = math.tanh %59 : vector<1x256xf32>
    %61 = arith.mulf %56, %60 : vector<1x256xf32>
    %cst_15 = arith.constant 0.000000e+00 : f32
    %62 = vector.broadcast %cst_15 : f32 to vector<1x256xf32>
    %63 = arith.maximumf %61, %62 : vector<1x256xf32>
    %c0_16 = arith.constant 0 : index
    %c0_17 = arith.constant 0 : index
    %64 = vector.load %arg3[%c0_16, %c0_17] : memref<256x10xf32, #tpu.memory_space<vmem>>, vector<256x10xf32>
    %cst_18 = arith.constant dense<0.000000e+00> : vector<1x10xf32>
    %65 = tpu.matmul %63, %64, %cst_18 {dimension_numbers = #tpu.dot_dimension_numbers<[1], [0], [0], [1], [0, 0, 1, 1], [], []>} : vector<1x256xf32>, vector<256x10xf32>, vector<1x10xf32> -> vector<1x10xf32>
    %66 = arith.negf %65 : vector<1x10xf32>
    %67 = math.exp %66 : vector<1x10xf32>
    %cst_19 = arith.constant 1.000000e+00 : f32
    %68 = vector.broadcast %cst_19 : f32 to vector<1x10xf32>
    %69 = arith.addf %68, %67 : vector<1x10xf32>
    %70 = arith.divf %68, %69 : vector<1x10xf32>
    %c0_20 = arith.constant 0 : index
    %c0_21 = arith.constant 0 : index
    %71 = vector.load %arg4[%c0_20, %c0_21] : memref<1x10xf32, #tpu.memory_space<vmem>>, vector<1x10xf32>
    tpu.vector_store %arg4[%c0_20, %c0_21], %70 {strides = array<i32>} : memref<1x10xf32, #tpu.memory_space<vmem>>, vector<1x10xf32>,
    return
  }
}

</mosaic_0001>

<bundles_post_ra>
// kernel: bird_recognition_forward.5
= control target key start
LH: loop header
LB: loop body
LE: loop exit
PB: predicated region body
PF: predicated region fallthrough
CT: control target
= control target key end

     0   :  { %s885_s21 = smov 0   ;;  %s1083_s0 = inlined_call_operand.vmem [shape: f32[2,129,16], index: 0, kind: input, shape index: {}]   ;;  %s1084_s1 = inlined_call_operand.vmem [shape: f32[16,8], index: 1, kind: input, shape index: {}]   ;;  %s1085_s2 = inlined_call_operand.vmem [shape: f32[16,8], index: 2, kind: input, shape index: {}]   ;;  %s1086_s3 = inlined_call_operand.vmem [shape: f32[16,8], index: 3, kind: input, shape index: {}]   ;;  %s1087_s4 = inlined_call_operand.vmem [shape: f32[16,8], index: 4, kind: input, shape index: {}]   ;;  %s1088_s5 = inlined_call_operand.vmem [shape: f32[1,8], index: 5, kind: input, shape index: {}]   ;;  %s1089_s6 = inlined_call_operand.vmem [shape: f32[2,128,8], index: 6, kind: output, shape index: {}]  }
   0x1 LB: > { %s757_s22 = sadd.s32 4294967295, %s848_s21   ;;  %p761_p0 = scmp.ge.s32.totalorder %s848_s21, 1  ;;  %s848_s21 = sphi %s885_s21, %s16_s21  }
   0x2   : > { %p212_p1 = scmp.lt.s32.totalorder %s848_s21, 3 }
   0x4   : > { %p213_p2 = pnand %p761_p0, %p212_p1 }
   0x5   : > { %p242_p3 = scmp.lt.s32.totalorder (!%p213_p2), %s757_s22, 1 }
   0x6   : > { %216 = sbr.rel (%p213_p2) target bundleno = 276 (0x114), region = 44 }
   0xb   : > { %v518_v0 = vld [vmem:[%s1087_s4 + $0x8] sm:$0xff]  ;;  %v517_v2 = vld [vmem:[%s1087_s4] sm:$0xff]  ;;  %s1091_s22 = smov (!%p242_p3, %s757_s22), 1  ;;  %vm288_vm0 = vcmask 130048   ;;  %vm685_vm1 = vcmask 64512  }
   0xc   : > { %v516_v1 = vld [vmem:[%s1086_s3 + $0x8] sm:$0xff]  ;;  %533 = vmatpush.msra.mxu2 %v518_v0  ;;  %v515_v3 = vld [vmem:[%s1086_s3] sm:$0xff]  ;;  %s832_s15 = smul.u32 136, %s1091_s22  ;;  %s831_s19 = sshll.u32 %s1091_s22, 7 }
   0xd   : > { %598 = vmatpush.msra.mxu3 %v516_v1  ;;  %v287_v4 = vld [vmem:[%s1085_s2 + $0x8] sm:$0xff]  ;;  %v286_v6 = vld [vmem:[%s1085_s2] sm:$0xff]  ;;  %s1030_s26 = scalar_lea.vmem %s1089_s6, %s831_s19 }
   0xe   : > { %v285_v5 = vld [vmem:[%s1084_s1 + $0x8] sm:$0xff]  ;;  %351 = vmatpush.msra.mxu0 %v287_v4  ;;  %v284_v7 = vld [vmem:[%s1084_s1] sm:$0xff]  ;;  %534 = vmatpush.msra.mxu2 %v517_v2  ;;  %s923_s18 = scalar_lea.vmem %s1083_s0, %s832_s15 }
   0xf   : > { %464 = vmatpush.msra.mxu1 %v285_v5  ;;  %599 = vmatpush.msra.mxu3 %v515_v3  ;;  %v268_v8 = vld [vmem:[%s923_s18 + $0x1] sm:$0xff]  ;;  %v269_v10 = vld [vmem:[%s923_s18 + $0x9] sm:$0xff]  ;;  %v270_v12 = vld [vmem:[%s923_s18 + $0x11] sm:$0xff] }
  0x10   : > { %352 = vmatpush.msra.mxu0 %v286_v6  ;;  %v252_v9 = vld [vmem:[%s923_s18] sm:$0xff]  ;;  %797 = vmatmul.msk.f32.vlgmr.msra.gmra.mxu2 %vm288_vm0, %v268_v8  ;;  %v253_v11 = vld [vmem:[%s923_s18 + $0x8] sm:$0xff]  ;;  %v254_v13 = vld [vmem:[%s923_s18 + $0x10] sm:$0xff] }
  0x11   : > { %465 = vmatpush.msra.mxu1 %v284_v7  ;;  %813 = vmatmul.msk.f32.vlgmr.msra.gmra.mxu3 %vm288_vm0, %v252_v9  ;;  %v271_v14 = vld [vmem:[%s923_s18 + $0x19] sm:$0xff]  ;;  %v272_v16 = vld [vmem:[%s923_s18 + $0x21] sm:$0xff]  ;;  %v273_v18 = vld [vmem:[%s923_s18 + $0x29] sm:$0xff] }
  0x12   : > { %765 = vmatmul.msk.f32.vlgmr.msra.gmra.mxu0 %vm288_vm0, %v268_v8  ;;  %781 = vmatmul.msk.f32.vlgmr.msra.gmra.mxu1 %vm288_vm0, %v252_v9  ;;  %v255_v15 = vld [vmem:[%s923_s18 + $0x18] sm:$0xff]  ;;  %v256_v17 = vld [vmem:[%s923_s18 + $0x20] sm:$0xff]  ;;  %v257_v19 = vld [vmem:[%s923_s18 + $0x28] sm:$0xff] }
  0x13   : > { %v274_v20 = vld [vmem:[%s923_s18 + $0x31] sm:$0xff]  ;;  %v275_v22 = vld [vmem:[%s923_s18 + $0x39] sm:$0xff]  ;;  %v276_v24 = vld [vmem:[%s923_s18 + $0x41] sm:$0xff] }
  0x14   : > { %v258_v21 = vld [vmem:[%s923_s18 + $0x30] sm:$0xff]  ;;  %v259_v23 = vld [vmem:[%s923_s18 + $0x38] sm:$0xff]  ;;  %v260_v25 = vld [vmem:[%s923_s18 + $0x40] sm:$0xff] }
  0x15   : > { %v277_v26 = vld [vmem:[%s923_s18 + $0x49] sm:$0xff]  ;;  %v278_v28 = vld [vmem:[%s923_s18 + $0x51] sm:$0xff]  ;;  %v279_v30 = vld [vmem:[%s923_s18 + $0x59] sm:$0xff] }
  0x16   : > { %v261_v27 = vld [vmem:[%s923_s18 + $0x48] sm:$0xff]  ;;  %v262_v29 = vld [vmem:[%s923_s18 + $0x50] sm:$0xff]  ;;  %v263_v31 = vld [vmem:[%s923_s18 + $0x58] sm:$0xff] }
  0x17   : > { %v280_v32 = vld [vmem:[%s923_s18 + $0x61] sm:$0xff]  ;;  %v281_v34 = vld [vmem:[%s923_s18 + $0x69] sm:$0xff]  ;;  %v282_v36 = vld [vmem:[%s923_s18 + $0x71] sm:$0xff] }
  0x18   : > { %798 = vmatmul.msk.f32.gmra.mxu2 %vm288_vm0, %v269_v10  ;;  %v264_v33 = vld [vmem:[%s923_s18 + $0x60] sm:$0xff]  ;;  %v265_v35 = vld [vmem:[%s923_s18 + $0x68] sm:$0xff]  ;;  %v266_v37 = vld [vmem:[%s923_s18 + $0x70] sm:$0xff] }
  0x19   : > { %814 = vmatmul.msk.f32.gmra.mxu3 %vm288_vm0, %v253_v11  ;;  %v283_v38 = vld [vmem:[%s923_s18 + $0x79] sm:$0xff] }
  0x1a   : > { %766 = vmatmul.msk.f32.gmra.mxu0 %vm288_vm0, %v269_v10  ;;  %782 = vmatmul.msk.f32.gmra.mxu1 %vm288_vm0, %v253_v11  ;;  %v267_v39 = vld [vmem:[%s923_s18 + $0x78] sm:$0xff]  ;;  %v1025_v46 = vld [vmem:[%s1088_s5] ss:$0 sm:$0xff] }
  0x20   : > { %799 = vmatmul.msk.f32.gmra.mxu2 %vm288_vm0, %v270_v12 }
  0x21   : > { %815 = vmatmul.msk.f32.gmra.mxu3 %vm288_vm0, %v254_v13 }
  0x22   : > { %767 = vmatmul.msk.f32.gmra.mxu0 %vm288_vm0, %v270_v12  ;;  %783 = vmatmul.msk.f32.gmra.mxu1 %vm288_vm0, %v254_v13 }
  0x28   : > { %800 = vmatmul.msk.f32.gmra.mxu2 %vm288_vm0, %v271_v14 }
  0x29   : > { %816 = vmatmul.msk.f32.gmra.mxu3 %vm288_vm0, %v255_v15 }
  0x2a   : > { %768 = vmatmul.msk.f32.gmra.mxu0 %vm288_vm0, %v271_v14  ;;  %784 = vmatmul.msk.f32.gmra.mxu1 %vm288_vm0, %v255_v15 }
  0x30   : > { %801 = vmatmul.msk.f32.gmra.mxu2 %vm288_vm0, %v272_v16 }
  0x31   : > { %817 = vmatmul.msk.f32.gmra.mxu3 %vm288_vm0, %v256_v17 }
  0x32   : > { %769 = vmatmul.msk.f32.gmra.mxu0 %vm288_vm0, %v272_v16  ;;  %785 = vmatmul.msk.f32.gmra.mxu1 %vm288_vm0, %v256_v17 }
  0x38   : > { %802 = vmatmul.msk.f32.gmra.mxu2 %vm288_vm0, %v273_v18 }
  0x39   : > { %818 = vmatmul.msk.f32.gmra.mxu3 %vm288_vm0, %v257_v19 }
  0x3a   : > { %770 = vmatmul.msk.f32.gmra.mxu0 %vm288_vm0, %v273_v18  ;;  %786 = vmatmul.msk.f32.gmra.mxu1 %vm288_vm0, %v257_v19 }
  0x40   : > { %803 = vmatmul.msk.f32.gmra.mxu2 %vm288_vm0, %v274_v20 }
  0x41   : > { %819 = vmatmul.msk.f32.gmra.mxu3 %vm288_vm0, %v258_v21 }
  0x42   : > { %771 = vmatmul.msk.f32.gmra.mxu0 %vm288_vm0, %v274_v20  ;;  %787 = vmatmul.msk.f32.gmra.mxu1 %vm288_vm0, %v258_v21 }
  0x48   : > { %804 = vmatmul.msk.f32.gmra.mxu2 %vm288_vm0, %v275_v22 }
  0x49   : > { %820 = vmatmul.msk.f32.gmra.mxu3 %vm288_vm0, %v259_v23 }
  0x4a   : > { %772 = vmatmul.msk.f32.gmra.mxu0 %vm288_vm0, %v275_v22  ;;  %788 = vmatmul.msk.f32.gmra.mxu1 %vm288_vm0, %v259_v23 }
  0x50   : > { %805 = vmatmul.msk.f32.gmra.mxu2 %vm288_vm0, %v276_v24 }
  0x51   : > { %821 = vmatmul.msk.f32.gmra.mxu3 %vm288_vm0, %v260_v25 }
  0x52   : > { %773 = vmatmul.msk.f32.gmra.mxu0 %vm288_vm0, %v276_v24  ;;  %789 = vmatmul.msk.f32.gmra.mxu1 %vm288_vm0, %v260_v25 }
  0x58   : > { %806 = vmatmul.msk.f32.gmra.mxu2 %vm288_vm0, %v277_v26 }
  0x59   : > { %822 = vmatmul.msk.f32.gmra.mxu3 %vm288_vm0, %v261_v27 }
  0x5a   : > { %774 = vmatmul.msk.f32.gmra.mxu0 %vm288_vm0, %v277_v26  ;;  %790 = vmatmul.msk.f32.gmra.mxu1 %vm288_vm0, %v261_v27 }
  0x60   : > { %807 = vmatmul.msk.f32.gmra.mxu2 %vm288_vm0, %v278_v28 }
  0x61   : > { %823 = vmatmul.msk.f32.gmra.mxu3 %vm288_vm0, %v262_v29 }
  0x62   : > { %775 = vmatmul.msk.f32.gmra.mxu0 %vm288_vm0, %v278_v28  ;;  %791 = vmatmul.msk.f32.gmra.mxu1 %vm288_vm0, %v262_v29 }
  0x68   : > { %808 = vmatmul.msk.f32.gmra.mxu2 %vm288_vm0, %v279_v30 }
  0x69   : > { %824 = vmatmul.msk.f32.gmra.mxu3 %vm288_vm0, %v263_v31 }
  0x6a   : > { %776 = vmatmul.msk.f32.gmra.mxu0 %vm288_vm0, %v279_v30  ;;  %792 = vmatmul.msk.f32.gmra.mxu1 %vm288_vm0, %v263_v31 }
  0x70   : > { %809 = vmatmul.msk.f32.gmra.mxu2 %vm288_vm0, %v280_v32 }
  0x71   : > { %825 = vmatmul.msk.f32.gmra.mxu3 %vm288_vm0, %v264_v33 }
  0x72   : > { %777 = vmatmul.msk.f32.gmra.mxu0 %vm288_vm0, %v280_v32  ;;  %793 = vmatmul.msk.f32.gmra.mxu1 %vm288_vm0, %v264_v33 }
  0x78   : > { %810 = vmatmul.msk.f32.gmra.mxu2 %vm288_vm0, %v281_v34 }
  0x79   : > { %826 = vmatmul.msk.f32.gmra.mxu3 %vm288_vm0, %v265_v35 }
  0x7a   : > { %778 = vmatmul.msk.f32.gmra.mxu0 %vm288_vm0, %v281_v34  ;;  %794 = vmatmul.msk.f32.gmra.mxu1 %vm288_vm0, %v265_v35 }
  0x80   : > { %811 = vmatmul.msk.f32.gmra.mxu2 %vm288_vm0, %v282_v36 }
  0x81   : > { %827 = vmatmul.msk.f32.gmra.mxu3 %vm288_vm0, %v266_v37 }
  0x82   : > { %779 = vmatmul.msk.f32.gmra.mxu0 %vm288_vm0, %v282_v36  ;;  %795 = vmatmul.msk.f32.gmra.mxu1 %vm288_vm0, %v266_v37 }
  0x88   : > { %812 = vmatmul.msk.f32.gmra.mxu2 %vm288_vm0, %v283_v38 }
  0x89   : > { %828 = vmatmul.msk.f32.gmra.mxu3 %vm288_vm0, %v267_v39 }
  0x8a   : > { %780 = vmatmul.msk.f32.gmra.mxu0 %vm288_vm0, %v283_v38  ;;  %796 = vmatmul.msk.f32.gmra.mxu1 %vm288_vm0, %v267_v39 }
  0x8f   : > { %v354_v40 = vpop.f32.mrf.mxu0  ;;  %v467_v41 = vpop.f32.mrf.mxu1 }
  0x90   : > { %v468_v42 = vadd.f32 %v467_v41, %v354_v40 }
  0x93   : > { %v536_v43 = vpop.f32.mrf.mxu2 }
  0x94   : > { %v601_v44 = vpop.f32.mrf.mxu3 }
  0x95   : > { %v602_v45 = vadd.f32 %v601_v44, %v536_v43 }
  0x97   : > { %v649_v47 = vmax.f32 %v468_v42, %v602_v45  ;;  %v357_v48 = vpop.f32.mrf.mxu0  ;;  %v470_v49 = vpop.f32.mrf.mxu1 }
  0x98   : > { %v471_v51 = vadd.f32 %v470_v49, %v357_v48 }
  0x99   : > { %v669_v50 = vadd.f32 %v1025_v46, %v649_v47 }
  0x9b   : > { %686 = vst.msk [vmem:[%s1030_s26] sm:$0xff] %vm685_vm1, %v669_v50  ;;  %v539_v52 = vpop.f32.mrf.mxu2 }
  0x9c   : > { %v604_v53 = vpop.f32.mrf.mxu3 }
  0x9d   : > { %v605_v54 = vadd.f32 %v604_v53, %v539_v52 }
  0x9f   : > { %v650_v55 = vmax.f32 %v471_v51, %v605_v54  ;;  %v360_v56 = vpop.f32.mrf.mxu0  ;;  %v473_v57 = vpop.f32.mrf.mxu1 }
  0xa0   : > { %v474_v59 = vadd.f32 %v473_v57, %v360_v56 }
  0xa1   : > { %v670_v58 = vadd.f32 %v1025_v46, %v650_v55 }
  0xa3   : > { %687 = vst.msk [vmem:[%s1030_s26 + $0x8] sm:$0xff] %vm685_vm1, %v670_v58  ;;  %v542_v60 = vpop.f32.mrf.mxu2 }
  0xa4   : > { %v607_v61 = vpop.f32.mrf.mxu3 }
  0xa5   : > { %v608_v62 = vadd.f32 %v607_v61, %v542_v60 }
  0xa7   : > { %v651_v63 = vmax.f32 %v474_v59, %v608_v62  ;;  %v363_v0 = vpop.f32.mrf.mxu0  ;;  %v476_v1 = vpop.f32.mrf.mxu1 }
  0xa8   : > { %v477_v3 = vadd.f32 %v476_v1, %v363_v0 }
  0xa9   : > { %v671_v2 = vadd.f32 %v1025_v46, %v651_v63 }
  0xab   : > { %688 = vst.msk [vmem:[%s1030_s26 + $0x10] sm:$0xff] %vm685_vm1, %v671_v2  ;;  %v545_v4 = vpop.f32.mrf.mxu2 }
  0xac   : > { %v610_v5 = vpop.f32.mrf.mxu3 }
  0xad   : > { %v611_v6 = vadd.f32 %v610_v5, %v545_v4 }
  0xaf   : > { %v652_v7 = vmax.f32 %v477_v3, %v611_v6  ;;  %v366_v8 = vpop.f32.mrf.mxu0  ;;  %v479_v9 = vpop.f32.mrf.mxu1 }
  0xb0   : > { %v480_v11 = vadd.f32 %v479_v9, %v366_v8 }
  0xb1   : > { %v672_v10 = vadd.f32 %v1025_v46, %v652_v7 }
  0xb3   : > { %689 = vst.msk [vmem:[%s1030_s26 + $0x18] sm:$0xff] %vm685_vm1, %v672_v10  ;;  %v548_v12 = vpop.f32.mrf.mxu2 }
  0xb4   : > { %v613_v13 = vpop.f32.mrf.mxu3 }
  0xb5   : > { %v614_v14 = vadd.f32 %v613_v13, %v548_v12 }
  0xb7   : > { %v653_v15 = vmax.f32 %v480_v11, %v614_v14  ;;  %v369_v16 = vpop.f32.mrf.mxu0  ;;  %v482_v17 = vpop.f32.mrf.mxu1 }
  0xb8   : > { %v483_v19 = vadd.f32 %v482_v17, %v369_v16 }
  0xb9   : > { %v673_v18 = vadd.f32 %v1025_v46, %v653_v15 }
  0xbb   : > { %690 = vst.msk [vmem:[%s1030_s26 + $0x20] sm:$0xff] %vm685_vm1, %v673_v18  ;;  %v551_v20 = vpop.f32.mrf.mxu2 }
  0xbc   : > { %v616_v21 = vpop.f32.mrf.mxu3 }
  0xbd   : > { %v617_v22 = vadd.f32 %v616_v21, %v551_v20 }
  0xbf   : > { %v654_v23 = vmax.f32 %v483_v19, %v617_v22  ;;  %v372_v24 = vpop.f32.mrf.mxu0  ;;  %v485_v25 = vpop.f32.mrf.mxu1 }
  0xc0   : > { %v486_v27 = vadd.f32 %v485_v25, %v372_v24 }
  0xc1   : > { %v674_v26 = vadd.f32 %v1025_v46, %v654_v23 }
  0xc3   : > { %691 = vst.msk [vmem:[%s1030_s26 + $0x28] sm:$0xff] %vm685_vm1, %v674_v26  ;;  %v554_v28 = vpop.f32.mrf.mxu2 }
  0xc4   : > { %v619_v29 = vpop.f32.mrf.mxu3 }
  0xc5   : > { %v620_v30 = vadd.f32 %v619_v29, %v554_v28 }
  0xc7   : > { %v655_v31 = vmax.f32 %v486_v27, %v620_v30  ;;  %v375_v32 = vpop.f32.mrf.mxu0  ;;  %v488_v33 = vpop.f32.mrf.mxu1 }
  0xc8   : > { %v489_v35 = vadd.f32 %v488_v33, %v375_v32 }
  0xc9   : > { %v675_v34 = vadd.f32 %v1025_v46, %v655_v31 }
  0xcb   : > { %692 = vst.msk [vmem:[%s1030_s26 + $0x30] sm:$0xff] %vm685_vm1, %v675_v34  ;;  %v557_v36 = vpop.f32.mrf.mxu2 }
  0xcc   : > { %v622_v37 = vpop.f32.mrf.mxu3 }
  0xcd   : > { %v623_v38 = vadd.f32 %v622_v37, %v557_v36 }
  0xcf   : > { %v656_v39 = vmax.f32 %v489_v35, %v623_v38  ;;  %v378_v40 = vpop.f32.mrf.mxu0  ;;  %v491_v41 = vpop.f32.mrf.mxu1 }
  0xd0   : > { %v492_v43 = vadd.f32 %v491_v41, %v378_v40 }
  0xd1   : > { %v676_v42 = vadd.f32 %v1025_v46, %v656_v39 }
  0xd3   : > { %693 = vst.msk [vmem:[%s1030_s26 + $0x38] sm:$0xff] %vm685_vm1, %v676_v42  ;;  %v560_v44 = vpop.f32.mrf.mxu2 }
  0xd4   : > { %v625_v45 = vpop.f32.mrf.mxu3 }
  0xd5   : > { %v626_v47 = vadd.f32 %v625_v45, %v560_v44 }
  0xd7   : > { %v657_v48 = vmax.f32 %v492_v43, %v626_v47  ;;  %v381_v49 = vpop.f32.mrf.mxu0  ;;  %v494_v50 = vpop.f32.mrf.mxu1 }
  0xd8   : > { %v495_v52 = vadd.f32 %v494_v50, %v381_v49 }
  0xd9   : > { %v677_v51 = vadd.f32 %v1025_v46, %v657_v48 }
  0xdb   : > { %694 = vst.msk [vmem:[%s1030_s26 + $0x40] sm:$0xff] %vm685_vm1, %v677_v51  ;;  %v563_v53 = vpop.f32.mrf.mxu2 }
  0xdc   : > { %v628_v54 = vpop.f32.mrf.mxu3 }
  0xdd   : > { %v629_v55 = vadd.f32 %v628_v54, %v563_v53 }
  0xdf   : > { %v658_v56 = vmax.f32 %v495_v52, %v629_v55  ;;  %v384_v57 = vpop.f32.mrf.mxu0  ;;  %v497_v58 = vpop.f32.mrf.mxu1 }
  0xe0   : > { %v498_v60 = vadd.f32 %v497_v58, %v384_v57 }
  0xe1   : > { %v678_v59 = vadd.f32 %v1025_v46, %v658_v56 }
  0xe3   : > { %695 = vst.msk [vmem:[%s1030_s26 + $0x48] sm:$0xff] %vm685_vm1, %v678_v59  ;;  %v566_v61 = vpop.f32.mrf.mxu2 }
  0xe4   : > { %v631_v62 = vpop.f32.mrf.mxu3 }
  0xe5   : > { %v632_v63 = vadd.f32 %v631_v62, %v566_v61 }
  0xe7   : > { %v659_v0 = vmax.f32 %v498_v60, %v632_v63  ;;  %v387_v1 = vpop.f32.mrf.mxu0  ;;  %v500_v2 = vpop.f32.mrf.mxu1 }
  0xe8   : > { %v501_v4 = vadd.f32 %v500_v2, %v387_v1 }
  0xe9   : > { %v679_v3 = vadd.f32 %v1025_v46, %v659_v0 }
  0xeb   : > { %696 = vst.msk [vmem:[%s1030_s26 + $0x50] sm:$0xff] %vm685_vm1, %v679_v3  ;;  %v569_v5 = vpop.f32.mrf.mxu2 }
  0xec   : > { %v634_v6 = vpop.f32.mrf.mxu3 }
  0xed   : > { %v635_v7 = vadd.f32 %v634_v6, %v569_v5 }
  0xef   : > { %v660_v8 = vmax.f32 %v501_v4, %v635_v7  ;;  %v390_v9 = vpop.f32.mrf.mxu0  ;;  %v503_v10 = vpop.f32.mrf.mxu1 }
  0xf0   : > { %v504_v12 = vadd.f32 %v503_v10, %v390_v9 }
  0xf1   : > { %v680_v11 = vadd.f32 %v1025_v46, %v660_v8 }
  0xf3   : > { %697 = vst.msk [vmem:[%s1030_s26 + $0x58] sm:$0xff] %vm685_vm1, %v680_v11  ;;  %v572_v13 = vpop.f32.mrf.mxu2 }
  0xf4   : > { %v637_v14 = vpop.f32.mrf.mxu3 }
  0xf5   : > { %v638_v15 = vadd.f32 %v637_v14, %v572_v13 }
  0xf7   : > { %v661_v16 = vmax.f32 %v504_v12, %v638_v15  ;;  %v393_v17 = vpop.f32.mrf.mxu0  ;;  %v506_v18 = vpop.f32.mrf.mxu1 }
  0xf8   : > { %v507_v20 = vadd.f32 %v506_v18, %v393_v17 }
  0xf9   : > { %v681_v19 = vadd.f32 %v1025_v46, %v661_v16 }
  0xfb   : > { %698 = vst.msk [vmem:[%s1030_s26 + $0x60] sm:$0xff] %vm685_vm1, %v681_v19  ;;  %v575_v21 = vpop.f32.mrf.mxu2 }
  0xfc   : > { %v640_v22 = vpop.f32.mrf.mxu3 }
  0xfd   : > { %v641_v23 = vadd.f32 %v640_v22, %v575_v21 }
  0xff   : > { %v662_v24 = vmax.f32 %v507_v20, %v641_v23  ;;  %v396_v25 = vpop.f32.mrf.mxu0  ;;  %v509_v26 = vpop.f32.mrf.mxu1 }
 0x100   : > { %v510_v28 = vadd.f32 %v509_v26, %v396_v25 }
 0x101   : > { %v682_v27 = vadd.f32 %v1025_v46, %v662_v24 }
 0x103   : > { %699 = vst.msk [vmem:[%s1030_s26 + $0x68] sm:$0xff] %vm685_vm1, %v682_v27  ;;  %v578_v29 = vpop.f32.mrf.mxu2 }
 0x104   : > { %v643_v30 = vpop.f32.mrf.mxu3 }
 0x105   : > { %v644_v31 = vadd.f32 %v643_v30, %v578_v29 }
 0x107   : > { %v663_v32 = vmax.f32 %v510_v28, %v644_v31  ;;  %v399_v33 = vpop.f32.mrf.mxu0  ;;  %v512_v34 = vpop.f32.mrf.mxu1 }
 0x108   : > { %v513_v36 = vadd.f32 %v512_v34, %v399_v33 }
 0x109   : > { %v683_v35 = vadd.f32 %v1025_v46, %v663_v32 }
 0x10b   : > { %700 = vst.msk [vmem:[%s1030_s26 + $0x70] sm:$0xff] %vm685_vm1, %v683_v35  ;;  %v581_v37 = vpop.f32.mrf.mxu2 }
 0x10c   : > { %v646_v38 = vpop.f32.mrf.mxu3 }
 0x10d   : > { %v647_v39 = vadd.f32 %v646_v38, %v581_v37 }
 0x10f   : > { %v664_v40 = vmax.f32 %v513_v36, %v647_v39 }
 0x111   : > { %v684_v41 = vadd.f32 %v1025_v46, %v664_v40 }
 0x113   : > { %701 = vst.msk [vmem:[%s1030_s26 + $0x78] sm:$0xff] %vm685_vm1, %v684_v41 }
 0x114 PF: > { %s16_s21 = sadd.s32 1, %s848_s21  }
 0x115   : > { %p13_p4 = scmp.ge.s32.totalorder %s16_s21, 4  }
 0x117   :  { %15 = sbr.rel (!%p13_p4) target bundleno = 1 (0x1), region = 74 }

// kernel: bird_recognition_forward.4
= control target key start
LH: loop header
LB: loop body
LE: loop exit
PB: predicated region body
PF: predicated region fallthrough
CT: control target
= control target key end

     0   :  { %11 = vsyncpa [#allocation3], 0  ;;  %s3206_s0 = inlined_call_operand.vmem [shape: f32[2,513,4], index: 0, kind: input, shape index: {}]   ;;  %s3207_s1 = inlined_call_operand.hbm [shape: f32[4,4], index: 1, kind: input, shape index: {}]   ;;  %s3208_s2 = inlined_call_operand.hbm [shape: f32[4,4], index: 2, kind: input, shape index: {}]   ;;  %s3209_s3 = inlined_call_operand.hbm [shape: f32[4,4], index: 3, kind: input, shape index: {}]   ;;  %s3210_s4 = inlined_call_operand.hbm [shape: f32[4,4], index: 4, kind: input, shape index: {}]   ;;  %s3211_s5 = inlined_call_operand.hbm [shape: f32[1,4], index: 5, kind: input, shape index: {}]   ;;  %s3212_s6 = inlined_call_operand.vmem [shape: f32[2,512,4], index: 6, kind: output, shape index: {}]  }
   0x1   :  { %12 = vsyncpa [#allocation5], 0 }
   0x2   :  { %13 = vsyncpa [#allocation8], 0  ;;  %s2545_s21 = smov 0  }
   0x3 LB: > { %s205_s24 = sshll.u32 %s3208_s2, 4  ;;  %s2554_s25 = sadd.s32 4294967295, %s2503_s21   ;;  %s2503_s21 = sphi %s2545_s21, %s19_s21   ;;  %s206_s24 = int_to_ptr.hbm [resolvable:$true] %s205_s24 }
   0x4   : > { %p1994_p0 = scmp.ge.s32.totalorder %s2503_s21, 1  ;;  %p181_p1 = scmp.lt.s32.totalorder %s2503_s21, 3 }
   0x5   : > { %p2310_p2 = scmp.eq.s32.totalorder %s2554_s25, 0  ;;  %s2505_s27 = smov [#allocation4]  }
   0x6   : > { %p2559_p3 = pnand %p1994_p0, %p181_p1  ;;  %s207_s28 = sshll.u32 %s2505_s27, 4  ;;  %s208_s28 = int_to_ptr.vmem [resolvable:$true] %s207_s28 }
   0x7   : > { %s229_s7 = sshll.u32 %s3210_s4, 4  ;;  %s193_s10 = sshll.u32 %s3207_s1, 4  ;;  %s230_s7 = int_to_ptr.hbm [resolvable:$true] %s229_s7  ;;  %s194_s10 = int_to_ptr.hbm [resolvable:$true] %s193_s10 }
   0x8   : > { %p2294_p4 = pneg %p2559_p3  ;;  %s2506_s12 = smov [#allocation7]  }
   0x9   : > { %s231_s13 = sshll.u32 %s2506_s12, 4  ;;  %s2507_s14 = smov [#allocation2]   ;;  %s232_s13 = int_to_ptr.vmem [resolvable:$true] %s231_s13 }
   0xa   : > { %p2573_p5 = pnand %p2310_p2, %p2294_p4  ;;  %s195_s15 = sshll.u32 %s2507_s14, 4  ;;  %s196_s15 = int_to_ptr.vmem [resolvable:$true] %s195_s15 }
   0xb   : > { %s217_s18 = sshll.u32 %s3209_s3, 4  ;;  %s241_s22 = sshll.u32 %s3211_s5, 4  ;;  %s218_s18 = int_to_ptr.hbm [resolvable:$true] %s217_s18  ;;  %s242_s22 = int_to_ptr.hbm [resolvable:$true] %s241_s22 }
   0xc   : > { %2300 = dma.hbm_to_vmem [thread:$0]  (!%p2573_p5), %s206_s24, 64, %s208_s28, [#allocation5]  }
   0xd   : > { %2306 = dma.hbm_to_vmem [thread:$0]  (!%p2573_p5), %s230_s7, 64, %s232_s13, [#allocation8]  }
   0xe   : > { %2297 = dma.hbm_to_vmem [thread:$0]  (!%p2573_p5), %s194_s10, 64, %s196_s15, [#allocation3]  }
   0xf   : > { %s2508_s23 = smov [#allocation6]   ;;  %s2509_s24 = smov [#allocation9]  }
  0x10   : > { %s219_s27 = sshll.u32 %s2508_s23, 4  ;;  %s243_s28 = sshll.u32 %s2509_s24, 4  ;;  %s220_s27 = int_to_ptr.vmem [resolvable:$true] %s219_s27  ;;  %s244_s28 = int_to_ptr.vmem [resolvable:$true] %s243_s28 }
  0x11   : > { %2303 = dma.hbm_to_vmem [thread:$0]  (!%p2573_p5), %s218_s18, 64, %s220_s27, [#allocation5]  }
  0x12   : > { %2309 = dma.hbm_to_vmem [thread:$0]  (!%p2573_p5), %s242_s22, 16, %s244_s28, [#allocation8]  }
  0x13   : > { %264 = sbr.rel (%p2559_p3) target bundleno = 680 (0x2a8), region = 44 }
  0x18   : > { %2490 = dma.done.wait (%p2310_p2), [#allocation3], 64  }
  0x19   : > { %2492 = vsyncadd (%p2310_p2), [#allocation3], 4294967232 }
  0x1a   : > { %2494 = dma.done.wait (%p2310_p2), [#allocation5], 128  }
  0x1b   : > { %2496 = vsyncadd (%p2310_p2), [#allocation5], 4294967168 }
  0x1c   : > { %2498 = dma.done.wait (%p2310_p2), [#allocation8], 80  }
  0x1d   : > { %2500 = vsyncadd (%p2310_p2), [#allocation8], 4294967216  ;;  %p315_p6 = scmp.lt.s32.totalorder %s2554_s25, 1  ;;  %vm648_vm0 = vcmask 1043456   ;;  %vm455_vm1 = vcmask 31744  }
  0x1e   : > { %v1266_v0 = vld [vmem:[#allocation7] sm:$0xf]  ;;  %v1265_v1 = vld [vmem:[#allocation6] sm:$0xf]  ;;  %v454_v4 = vld [vmem:[#allocation4] sm:$0xf] }
  0x1f   : > { %s3216_s25 = smov (!%p315_p6, %s2554_s25), 1  ;;  %2140 = vmatpush.msk.msra.mxu2 %vm648_vm0, %v1266_v0  ;;  %2205 = vmatpush.msk.msra.mxu3 %vm648_vm0, %v1265_v1  ;;  %v453_v5 = vld [vmem:[#allocation2] sm:$0xf]  ;;  %v2720_v44 = vld [vmem:[#allocation9] ss:$0 sm:$0xff] }
  0x20   : > { %s2273_s26 = smul.u32 520, %s3216_s25  ;;  %2010 = vmatpush.msk.msra.mxu0 %vm648_vm0, %v454_v4  ;;  %2075 = vmatpush.msk.msra.mxu1 %vm648_vm0, %v453_v5  ;;  %s2272_s8 = sshll.u32 %s3216_s25, 9 }
  0x21   : > { %s2727_s11 = scalar_lea.vmem %s3212_s6, %s2272_s8 }
  0x22   : > { %s2615_s7 = scalar_lea.vmem %s3206_s0, %s2273_s26 }
  0x23   : > { %v389_v2 = vld [vmem:[%s2615_s7 + $0x1] sm:$0xff]  ;;  %v390_v6 = vld [vmem:[%s2615_s7 + $0x9] sm:$0xff]  ;;  %v391_v8 = vld [vmem:[%s2615_s7 + $0x11] sm:$0xff] }
  0x24   : > { %v325_v3 = vld [vmem:[%s2615_s7] sm:$0xff]  ;;  %2141 = vmatmul.msk.f32.vlgmr.msra.gmra.mxu2 %vm455_vm1, %v389_v2  ;;  %2011 = vmatmul.msk.f32.vlgmr.msra.gmra.mxu0 %vm455_vm1, %v389_v2  ;;  %v326_v7 = vld [vmem:[%s2615_s7 + $0x8] sm:$0xff]  ;;  %v327_v9 = vld [vmem:[%s2615_s7 + $0x10] sm:$0xff] }
  0x25   : > { %2206 = vmatmul.msk.f32.vlgmr.msra.gmra.mxu3 %vm455_vm1, %v325_v3  ;;  %2076 = vmatmul.msk.f32.vlgmr.msra.gmra.mxu1 %vm455_vm1, %v325_v3  ;;  %v392_v10 = vld [vmem:[%s2615_s7 + $0x19] sm:$0xff]  ;;  %v393_v12 = vld [vmem:[%s2615_s7 + $0x21] sm:$0xff]  ;;  %v394_v14 = vld [vmem:[%s2615_s7 + $0x29] sm:$0xff] }
  0x26   : > { %v328_v11 = vld [vmem:[%s2615_s7 + $0x18] sm:$0xff]  ;;  %v329_v13 = vld [vmem:[%s2615_s7 + $0x20] sm:$0xff]  ;;  %v330_v15 = vld [vmem:[%s2615_s7 + $0x28] sm:$0xff] }
  0x27   : > { %v395_v16 = vld [vmem:[%s2615_s7 + $0x31] sm:$0xff]  ;;  %v396_v18 = vld [vmem:[%s2615_s7 + $0x39] sm:$0xff]  ;;  %v397_v20 = vld [vmem:[%s2615_s7 + $0x41] sm:$0xff] }
  0x28   : > { %v331_v17 = vld [vmem:[%s2615_s7 + $0x30] sm:$0xff]  ;;  %v332_v19 = vld [vmem:[%s2615_s7 + $0x38] sm:$0xff]  ;;  %v333_v21 = vld [vmem:[%s2615_s7 + $0x40] sm:$0xff] }
  0x29   : > { %v398_v22 = vld [vmem:[%s2615_s7 + $0x49] sm:$0xff]  ;;  %v399_v24 = vld [vmem:[%s2615_s7 + $0x51] sm:$0xff]  ;;  %v400_v26 = vld [vmem:[%s2615_s7 + $0x59] sm:$0xff] }
  0x2a   : > { %v334_v23 = vld [vmem:[%s2615_s7 + $0x48] sm:$0xff]  ;;  %v335_v25 = vld [vmem:[%s2615_s7 + $0x50] sm:$0xff]  ;;  %v336_v27 = vld [vmem:[%s2615_s7 + $0x58] sm:$0xff] }
  0x2b   : > { %v401_v28 = vld [vmem:[%s2615_s7 + $0x61] sm:$0xff]  ;;  %v402_v30 = vld [vmem:[%s2615_s7 + $0x69] sm:$0xff]  ;;  %v403_v32 = vld [vmem:[%s2615_s7 + $0x71] sm:$0xff] }
  0x2c   : > { %2142 = vmatmul.msk.f32.gmra.mxu2 %vm455_vm1, %v390_v6  ;;  %2012 = vmatmul.msk.f32.gmra.mxu0 %vm455_vm1, %v390_v6  ;;  %v337_v29 = vld [vmem:[%s2615_s7 + $0x60] sm:$0xff]  ;;  %v338_v31 = vld [vmem:[%s2615_s7 + $0x68] sm:$0xff]  ;;  %v339_v33 = vld [vmem:[%s2615_s7 + $0x70] sm:$0xff] }
  0x2d   : > { %2207 = vmatmul.msk.f32.gmra.mxu3 %vm455_vm1, %v326_v7  ;;  %2077 = vmatmul.msk.f32.gmra.mxu1 %vm455_vm1, %v326_v7  ;;  %v404_v34 = vld [vmem:[%s2615_s7 + $0x79] sm:$0xff]  ;;  %v405_v36 = vld [vmem:[%s2615_s7 + $0x81] sm:$0xff]  ;;  %v406_v45 = vld [vmem:[%s2615_s7 + $0x89] sm:$0xff] }
  0x2e   : > { %v340_v35 = vld [vmem:[%s2615_s7 + $0x78] sm:$0xff]  ;;  %v341_v37 = vld [vmem:[%s2615_s7 + $0x80] sm:$0xff]  ;;  %v342_v46 = vld [vmem:[%s2615_s7 + $0x88] sm:$0xff] }
  0x2f   : > { %v407_v55 = vld [vmem:[%s2615_s7 + $0x91] sm:$0xff]  ;;  %v408_v1 = vld [vmem:[%s2615_s7 + $0x99] sm:$0xff] }
  0x30   : > { %v343_v56 = vld [vmem:[%s2615_s7 + $0x90] sm:$0xff]  ;;  %v344_v2 = vld [vmem:[%s2615_s7 + $0x98] sm:$0xff] }
  0x34   : > { %2143 = vmatmul.msk.f32.gmra.mxu2 %vm455_vm1, %v391_v8  ;;  %2013 = vmatmul.msk.f32.gmra.mxu0 %vm455_vm1, %v391_v8 }
  0x35   : > { %2208 = vmatmul.msk.f32.gmra.mxu3 %vm455_vm1, %v327_v9  ;;  %2078 = vmatmul.msk.f32.gmra.mxu1 %vm455_vm1, %v327_v9 }
  0x3c   : > { %2144 = vmatmul.msk.f32.gmra.mxu2 %vm455_vm1, %v392_v10  ;;  %2014 = vmatmul.msk.f32.gmra.mxu0 %vm455_vm1, %v392_v10 }
  0x3d   : > { %2209 = vmatmul.msk.f32.gmra.mxu3 %vm455_vm1, %v328_v11  ;;  %2079 = vmatmul.msk.f32.gmra.mxu1 %vm455_vm1, %v328_v11  ;;  %v409_v11 = vld [vmem:[%s2615_s7 + $0xa1] sm:$0xff] }
  0x44   : > { %2145 = vmatmul.msk.f32.gmra.mxu2 %vm455_vm1, %v393_v12  ;;  %2015 = vmatmul.msk.f32.gmra.mxu0 %vm455_vm1, %v393_v12  ;;  %v345_v12 = vld [vmem:[%s2615_s7 + $0xa0] sm:$0xff] }
  0x45   : > { %2210 = vmatmul.msk.f32.gmra.mxu3 %vm455_vm1, %v329_v13  ;;  %2080 = vmatmul.msk.f32.gmra.mxu1 %vm455_vm1, %v329_v13 }
  0x4c   : > { %2146 = vmatmul.msk.f32.gmra.mxu2 %vm455_vm1, %v394_v14  ;;  %2016 = vmatmul.msk.f32.gmra.mxu0 %vm455_vm1, %v394_v14 }
  0x4d   : > { %2211 = vmatmul.msk.f32.gmra.mxu3 %vm455_vm1, %v330_v15  ;;  %2081 = vmatmul.msk.f32.gmra.mxu1 %vm455_vm1, %v330_v15 }
  0x54   : > { %2147 = vmatmul.msk.f32.gmra.mxu2 %vm455_vm1, %v395_v16  ;;  %2017 = vmatmul.msk.f32.gmra.mxu0 %vm455_vm1, %v395_v16 }
  0x55   : > { %2212 = vmatmul.msk.f32.gmra.mxu3 %vm455_vm1, %v331_v17  ;;  %2082 = vmatmul.msk.f32.gmra.mxu1 %vm455_vm1, %v331_v17 }
  0x5c   : > { %2148 = vmatmul.msk.f32.gmra.mxu2 %vm455_vm1, %v396_v18  ;;  %2018 = vmatmul.msk.f32.gmra.mxu0 %vm455_vm1, %v396_v18 }
  0x5d   : > { %2213 = vmatmul.msk.f32.gmra.mxu3 %vm455_vm1, %v332_v19  ;;  %2083 = vmatmul.msk.f32.gmra.mxu1 %vm455_vm1, %v332_v19 }
  0x64   : > { %2149 = vmatmul.msk.f32.gmra.mxu2 %vm455_vm1, %v397_v20  ;;  %2019 = vmatmul.msk.f32.gmra.mxu0 %vm455_vm1, %v397_v20 }
  0x65   : > { %2214 = vmatmul.msk.f32.gmra.mxu3 %vm455_vm1, %v333_v21  ;;  %2084 = vmatmul.msk.f32.gmra.mxu1 %vm455_vm1, %v333_v21  ;;  %v410_v21 = vld [vmem:[%s2615_s7 + $0xa9] sm:$0xff] }
  0x6c   : > { %2150 = vmatmul.msk.f32.gmra.mxu2 %vm455_vm1, %v398_v22  ;;  %2020 = vmatmul.msk.f32.gmra.mxu0 %vm455_vm1, %v398_v22  ;;  %v346_v22 = vld [vmem:[%s2615_s7 + $0xa8] sm:$0xff] }
  0x6d   : > { %2215 = vmatmul.msk.f32.gmra.mxu3 %vm455_vm1, %v334_v23  ;;  %2085 = vmatmul.msk.f32.gmra.mxu1 %vm455_vm1, %v334_v23 }
  0x74   : > { %2151 = vmatmul.msk.f32.gmra.mxu2 %vm455_vm1, %v399_v24  ;;  %2021 = vmatmul.msk.f32.gmra.mxu0 %vm455_vm1, %v399_v24 }
  0x75   : > { %2216 = vmatmul.msk.f32.gmra.mxu3 %vm455_vm1, %v335_v25  ;;  %2086 = vmatmul.msk.f32.gmra.mxu1 %vm455_vm1, %v335_v25 }
  0x7c   : > { %2152 = vmatmul.msk.f32.gmra.mxu2 %vm455_vm1, %v400_v26  ;;  %2022 = vmatmul.msk.f32.gmra.mxu0 %vm455_vm1, %v400_v26 }
  0x7d   : > { %2217 = vmatmul.msk.f32.gmra.mxu3 %vm455_vm1, %v336_v27  ;;  %2087 = vmatmul.msk.f32.gmra.mxu1 %vm455_vm1, %v336_v27 }
  0x84   : > { %2153 = vmatmul.msk.f32.gmra.mxu2 %vm455_vm1, %v401_v28  ;;  %2023 = vmatmul.msk.f32.gmra.mxu0 %vm455_vm1, %v401_v28 }
  0x85   : > { %2218 = vmatmul.msk.f32.gmra.mxu3 %vm455_vm1, %v337_v29  ;;  %2088 = vmatmul.msk.f32.gmra.mxu1 %vm455_vm1, %v337_v29 }
  0x8c   : > { %2154 = vmatmul.msk.f32.gmra.mxu2 %vm455_vm1, %v402_v30  ;;  %2024 = vmatmul.msk.f32.gmra.mxu0 %vm455_vm1, %v402_v30 }
  0x8d   : > { %2219 = vmatmul.msk.f32.gmra.mxu3 %vm455_vm1, %v338_v31  ;;  %2089 = vmatmul.msk.f32.gmra.mxu1 %vm455_vm1, %v338_v31  ;;  %v411_v31 = vld [vmem:[%s2615_s7 + $0xb1] sm:$0xff] }
  0x94   : > { %2155 = vmatmul.msk.f32.gmra.mxu2 %vm455_vm1, %v403_v32  ;;  %2025 = vmatmul.msk.f32.gmra.mxu0 %vm455_vm1, %v403_v32  ;;  %v347_v32 = vld [vmem:[%s2615_s7 + $0xb0] sm:$0xff] }
  0x95   : > { %2220 = vmatmul.msk.f32.gmra.mxu3 %vm455_vm1, %v339_v33  ;;  %2090 = vmatmul.msk.f32.gmra.mxu1 %vm455_vm1, %v339_v33 }
  0x9c   : > { %2156 = vmatmul.msk.f32.gmra.mxu2 %vm455_vm1, %v404_v34  ;;  %2026 = vmatmul.msk.f32.gmra.mxu0 %vm455_vm1, %v404_v34 }
  0x9d   : > { %2221 = vmatmul.msk.f32.gmra.mxu3 %vm455_vm1, %v340_v35  ;;  %2091 = vmatmul.msk.f32.gmra.mxu1 %vm455_vm1, %v340_v35 }
  0xa1   : > { %v669_v38 = vpop.f32.mrf.mxu0 }
  0xa2   : > { %v1073_v39 = vpop.f32.mrf.mxu1 }
  0xa3   : > { %v1074_v40 = vadd.f32 %v1073_v39, %v669_v38 }
  0xa4   : > { %2157 = vmatmul.msk.f32.gmra.mxu2 %vm455_vm1, %v405_v36  ;;  %2027 = vmatmul.msk.f32.gmra.mxu0 %vm455_vm1, %v405_v36 }
  0xa5   : > { %2222 = vmatmul.msk.f32.gmra.mxu3 %vm455_vm1, %v341_v37  ;;  %2092 = vmatmul.msk.f32.gmra.mxu1 %vm455_vm1, %v341_v37 }
  0xa7   : > { %v1287_v41 = vpop.f32.mrf.mxu2 }
  0xa8   : > { %v1499_v42 = vpop.f32.mrf.mxu3 }
  0xa9   : > { %v1500_v43 = vadd.f32 %v1499_v42, %v1287_v41  ;;  %v672_v48 = vpop.f32.mrf.mxu0  ;;  %v412_v41 = vld [vmem:[%s2615_s7 + $0xb9] sm:$0xff] }
  0xaa   : > { %v1076_v49 = vpop.f32.mrf.mxu1  ;;  %v348_v42 = vld [vmem:[%s2615_s7 + $0xb8] sm:$0xff] }
  0xab   : > { %v1691_v47 = vmax.f32 %v1074_v40, %v1500_v43  ;;  %v1077_v51 = vadd.f32 %v1076_v49, %v672_v48 }
  0xac   : > { %2158 = vmatmul.msk.f32.gmra.mxu2 %vm455_vm1, %v406_v45  ;;  %2028 = vmatmul.msk.f32.gmra.mxu0 %vm455_vm1, %v406_v45 }
  0xad   : > { %v1759_v50 = vadd.f32 %v2720_v44, %v1691_v47  ;;  %2223 = vmatmul.msk.f32.gmra.mxu3 %vm455_vm1, %v342_v46  ;;  %2093 = vmatmul.msk.f32.gmra.mxu1 %vm455_vm1, %v342_v46 }
  0xaf   : > { %1823 = vst.msk [vmem:[%s2727_s11] sm:$0xff] %vm455_vm1, %v1759_v50  ;;  %v1290_v52 = vpop.f32.mrf.mxu2 }
  0xb0   : > { %v1502_v53 = vpop.f32.mrf.mxu3 }
  0xb1   : > { %v1503_v54 = vadd.f32 %v1502_v53, %v1290_v52  ;;  %v675_v58 = vpop.f32.mrf.mxu0  ;;  %v413_v52 = vld [vmem:[%s2615_s7 + $0xc1] sm:$0xff] }
  0xb2   : > { %v1079_v59 = vpop.f32.mrf.mxu1  ;;  %v349_v53 = vld [vmem:[%s2615_s7 + $0xc0] sm:$0xff] }
  0xb3   : > { %v1692_v57 = vmax.f32 %v1077_v51, %v1503_v54  ;;  %v1080_v61 = vadd.f32 %v1079_v59, %v675_v58 }
  0xb4   : > { %2159 = vmatmul.msk.f32.gmra.mxu2 %vm455_vm1, %v407_v55  ;;  %2029 = vmatmul.msk.f32.gmra.mxu0 %vm455_vm1, %v407_v55 }
  0xb5   : > { %v1760_v60 = vadd.f32 %v2720_v44, %v1692_v57  ;;  %2224 = vmatmul.msk.f32.gmra.mxu3 %vm455_vm1, %v343_v56  ;;  %2094 = vmatmul.msk.f32.gmra.mxu1 %vm455_vm1, %v343_v56 }
  0xb7   : > { %1824 = vst.msk [vmem:[%s2727_s11 + $0x8] sm:$0xff] %vm455_vm1, %v1760_v60  ;;  %v1293_v62 = vpop.f32.mrf.mxu2 }
  0xb8   : > { %v1505_v63 = vpop.f32.mrf.mxu3 }
  0xb9   : > { %v1506_v0 = vadd.f32 %v1505_v63, %v1293_v62  ;;  %v678_v4 = vpop.f32.mrf.mxu0  ;;  %v414_v62 = vld [vmem:[%s2615_s7 + $0xc9] sm:$0xff] }
  0xba   : > { %v1082_v5 = vpop.f32.mrf.mxu1  ;;  %v350_v63 = vld [vmem:[%s2615_s7 + $0xc8] sm:$0xff] }
  0xbb   : > { %v1693_v3 = vmax.f32 %v1080_v61, %v1506_v0  ;;  %v1083_v7 = vadd.f32 %v1082_v5, %v678_v4 }
  0xbc   : > { %2160 = vmatmul.msk.f32.gmra.mxu2 %vm455_vm1, %v408_v1  ;;  %2030 = vmatmul.msk.f32.gmra.mxu0 %vm455_vm1, %v408_v1 }
  0xbd   : > { %v1761_v6 = vadd.f32 %v2720_v44, %v1693_v3  ;;  %2225 = vmatmul.msk.f32.gmra.mxu3 %vm455_vm1, %v344_v2  ;;  %2095 = vmatmul.msk.f32.gmra.mxu1 %vm455_vm1, %v344_v2 }
  0xbf   : > { %1825 = vst.msk [vmem:[%s2727_s11 + $0x10] sm:$0xff] %vm455_vm1, %v1761_v6  ;;  %v1296_v8 = vpop.f32.mrf.mxu2 }
  0xc0   : > { %v1508_v9 = vpop.f32.mrf.mxu3 }
  0xc1   : > { %v1509_v10 = vadd.f32 %v1508_v9, %v1296_v8  ;;  %v681_v14 = vpop.f32.mrf.mxu0  ;;  %v415_v8 = vld [vmem:[%s2615_s7 + $0xd1] sm:$0xff] }
  0xc2   : > { %v1085_v15 = vpop.f32.mrf.mxu1  ;;  %v351_v9 = vld [vmem:[%s2615_s7 + $0xd0] sm:$0xff] }
  0xc3   : > { %v1694_v13 = vmax.f32 %v1083_v7, %v1509_v10  ;;  %v1086_v17 = vadd.f32 %v1085_v15, %v681_v14 }
  0xc4   : > { %2161 = vmatmul.msk.f32.gmra.mxu2 %vm455_vm1, %v409_v11  ;;  %2031 = vmatmul.msk.f32.gmra.mxu0 %vm455_vm1, %v409_v11 }
  0xc5   : > { %v1762_v16 = vadd.f32 %v2720_v44, %v1694_v13  ;;  %2226 = vmatmul.msk.f32.gmra.mxu3 %vm455_vm1, %v345_v12  ;;  %2096 = vmatmul.msk.f32.gmra.mxu1 %vm455_vm1, %v345_v12 }
  0xc7   : > { %1826 = vst.msk [vmem:[%s2727_s11 + $0x18] sm:$0xff] %vm455_vm1, %v1762_v16  ;;  %v1299_v18 = vpop.f32.mrf.mxu2 }
  0xc8   : > { %v1511_v19 = vpop.f32.mrf.mxu3 }
  0xc9   : > { %v1512_v20 = vadd.f32 %v1511_v19, %v1299_v18  ;;  %v684_v24 = vpop.f32.mrf.mxu0  ;;  %v416_v18 = vld [vmem:[%s2615_s7 + $0xd9] sm:$0xff] }
  0xca   : > { %v1088_v25 = vpop.f32.mrf.mxu1  ;;  %v352_v19 = vld [vmem:[%s2615_s7 + $0xd8] sm:$0xff] }
  0xcb   : > { %v1695_v23 = vmax.f32 %v1086_v17, %v1512_v20  ;;  %v1089_v27 = vadd.f32 %v1088_v25, %v684_v24 }
  0xcc   : > { %2162 = vmatmul.msk.f32.gmra.mxu2 %vm455_vm1, %v410_v21  ;;  %2032 = vmatmul.msk.f32.gmra.mxu0 %vm455_vm1, %v410_v21 }
  0xcd   : > { %v1763_v26 = vadd.f32 %v2720_v44, %v1695_v23  ;;  %2227 = vmatmul.msk.f32.gmra.mxu3 %vm455_vm1, %v346_v22  ;;  %2097 = vmatmul.msk.f32.gmra.mxu1 %vm455_vm1, %v346_v22 }
  0xcf   : > { %1827 = vst.msk [vmem:[%s2727_s11 + $0x20] sm:$0xff] %vm455_vm1, %v1763_v26  ;;  %v1302_v28 = vpop.f32.mrf.mxu2 }
  0xd0   : > { %v1514_v29 = vpop.f32.mrf.mxu3 }
  0xd1   : > { %v1515_v30 = vadd.f32 %v1514_v29, %v1302_v28  ;;  %v687_v34 = vpop.f32.mrf.mxu0  ;;  %v417_v28 = vld [vmem:[%s2615_s7 + $0xe1] sm:$0xff] }
  0xd2   : > { %v1091_v35 = vpop.f32.mrf.mxu1  ;;  %v353_v29 = vld [vmem:[%s2615_s7 + $0xe0] sm:$0xff] }
  0xd3   : > { %v1696_v33 = vmax.f32 %v1089_v27, %v1515_v30  ;;  %v1092_v37 = vadd.f32 %v1091_v35, %v687_v34 }
  0xd4   : > { %2163 = vmatmul.msk.f32.gmra.mxu2 %vm455_vm1, %v411_v31  ;;  %2033 = vmatmul.msk.f32.gmra.mxu0 %vm455_vm1, %v411_v31 }
  0xd5   : > { %v1764_v36 = vadd.f32 %v2720_v44, %v1696_v33  ;;  %2228 = vmatmul.msk.f32.gmra.mxu3 %vm455_vm1, %v347_v32  ;;  %2098 = vmatmul.msk.f32.gmra.mxu1 %vm455_vm1, %v347_v32 }
  0xd7   : > { %1828 = vst.msk [vmem:[%s2727_s11 + $0x28] sm:$0xff] %vm455_vm1, %v1764_v36  ;;  %v1305_v38 = vpop.f32.mrf.mxu2 }
  0xd8   : > { %v1517_v39 = vpop.f32.mrf.mxu3 }
  0xd9   : > { %v1518_v40 = vadd.f32 %v1517_v39, %v1305_v38  ;;  %v690_v45 = vpop.f32.mrf.mxu0  ;;  %v418_v38 = vld [vmem:[%s2615_s7 + $0xe9] sm:$0xff] }
  0xda   : > { %v1094_v46 = vpop.f32.mrf.mxu1  ;;  %v354_v39 = vld [vmem:[%s2615_s7 + $0xe8] sm:$0xff] }
  0xdb   : > { %v1697_v43 = vmax.f32 %v1092_v37, %v1518_v40  ;;  %v1095_v48 = vadd.f32 %v1094_v46, %v690_v45 }
  0xdc   : > { %2164 = vmatmul.msk.f32.gmra.mxu2 %vm455_vm1, %v412_v41  ;;  %2034 = vmatmul.msk.f32.gmra.mxu0 %vm455_vm1, %v412_v41 }
  0xdd   : > { %v1765_v47 = vadd.f32 %v2720_v44, %v1697_v43  ;;  %2229 = vmatmul.msk.f32.gmra.mxu3 %vm455_vm1, %v348_v42  ;;  %2099 = vmatmul.msk.f32.gmra.mxu1 %vm455_vm1, %v348_v42 }
  0xdf   : > { %1829 = vst.msk [vmem:[%s2727_s11 + $0x30] sm:$0xff] %vm455_vm1, %v1765_v47  ;;  %v1308_v49 = vpop.f32.mrf.mxu2 }
  0xe0   : > { %v1520_v50 = vpop.f32.mrf.mxu3 }
  0xe1   : > { %v1521_v51 = vadd.f32 %v1520_v50, %v1308_v49  ;;  %v693_v55 = vpop.f32.mrf.mxu0  ;;  %v419_v49 = vld [vmem:[%s2615_s7 + $0xf1] sm:$0xff] }
  0xe2   : > { %v1097_v56 = vpop.f32.mrf.mxu1  ;;  %v355_v50 = vld [vmem:[%s2615_s7 + $0xf0] sm:$0xff] }
  0xe3   : > { %v1698_v54 = vmax.f32 %v1095_v48, %v1521_v51  ;;  %v1098_v58 = vadd.f32 %v1097_v56, %v693_v55 }
  0xe4   : > { %2165 = vmatmul.msk.f32.gmra.mxu2 %vm455_vm1, %v413_v52  ;;  %2035 = vmatmul.msk.f32.gmra.mxu0 %vm455_vm1, %v413_v52 }
  0xe5   : > { %v1766_v57 = vadd.f32 %v2720_v44, %v1698_v54  ;;  %2230 = vmatmul.msk.f32.gmra.mxu3 %vm455_vm1, %v349_v53  ;;  %2100 = vmatmul.msk.f32.gmra.mxu1 %vm455_vm1, %v349_v53 }
  0xe7   : > { %1830 = vst.msk [vmem:[%s2727_s11 + $0x38] sm:$0xff] %vm455_vm1, %v1766_v57  ;;  %v1311_v59 = vpop.f32.mrf.mxu2 }
  0xe8   : > { %v1523_v60 = vpop.f32.mrf.mxu3 }
  0xe9   : > { %v1524_v61 = vadd.f32 %v1523_v60, %v1311_v59  ;;  %v696_v1 = vpop.f32.mrf.mxu0  ;;  %v420_v59 = vld [vmem:[%s2615_s7 + $0xf9] sm:$0xff] }
  0xea   : > { %v1100_v2 = vpop.f32.mrf.mxu1  ;;  %v356_v60 = vld [vmem:[%s2615_s7 + $0xf8] sm:$0xff] }
  0xeb   : > { %v1699_v0 = vmax.f32 %v1098_v58, %v1524_v61  ;;  %v1101_v4 = vadd.f32 %v1100_v2, %v696_v1 }
  0xec   : > { %2166 = vmatmul.msk.f32.gmra.mxu2 %vm455_vm1, %v414_v62  ;;  %2036 = vmatmul.msk.f32.gmra.mxu0 %vm455_vm1, %v414_v62 }
  0xed   : > { %v1767_v3 = vadd.f32 %v2720_v44, %v1699_v0  ;;  %2231 = vmatmul.msk.f32.gmra.mxu3 %vm455_vm1, %v350_v63  ;;  %2101 = vmatmul.msk.f32.gmra.mxu1 %vm455_vm1, %v350_v63 }
  0xef   : > { %1831 = vst.msk [vmem:[%s2727_s11 + $0x40] sm:$0xff] %vm455_vm1, %v1767_v3  ;;  %v1314_v5 = vpop.f32.mrf.mxu2 }
  0xf0   : > { %v1526_v6 = vpop.f32.mrf.mxu3 }
  0xf1   : > { %v1527_v7 = vadd.f32 %v1526_v6, %v1314_v5  ;;  %v699_v11 = vpop.f32.mrf.mxu0  ;;  %v421_v5 = vld [vmem:[%s2615_s7 + $0x101] sm:$0xff] }
  0xf2   : > { %v1103_v12 = vpop.f32.mrf.mxu1  ;;  %v357_v6 = vld [vmem:[%s2615_s7 + $0x100] sm:$0xff] }
  0xf3   : > { %v1700_v10 = vmax.f32 %v1101_v4, %v1527_v7  ;;  %v1104_v14 = vadd.f32 %v1103_v12, %v699_v11 }
  0xf4   : > { %2167 = vmatmul.msk.f32.gmra.mxu2 %vm455_vm1, %v415_v8  ;;  %2037 = vmatmul.msk.f32.gmra.mxu0 %vm455_vm1, %v415_v8 }
  0xf5   : > { %v1768_v13 = vadd.f32 %v2720_v44, %v1700_v10  ;;  %2232 = vmatmul.msk.f32.gmra.mxu3 %vm455_vm1, %v351_v9  ;;  %2102 = vmatmul.msk.f32.gmra.mxu1 %vm455_vm1, %v351_v9 }
  0xf7   : > { %1832 = vst.msk [vmem:[%s2727_s11 + $0x48] sm:$0xff] %vm455_vm1, %v1768_v13  ;;  %v1317_v15 = vpop.f32.mrf.mxu2 }
  0xf8   : > { %v1529_v16 = vpop.f32.mrf.mxu3 }
  0xf9   : > { %v1530_v17 = vadd.f32 %v1529_v16, %v1317_v15  ;;  %v702_v21 = vpop.f32.mrf.mxu0  ;;  %v422_v15 = vld [vmem:[%s2615_s7 + $0x109] sm:$0xff] }
  0xfa   : > { %v1106_v22 = vpop.f32.mrf.mxu1  ;;  %v358_v16 = vld [vmem:[%s2615_s7 + $0x108] sm:$0xff] }
  0xfb   : > { %v1701_v20 = vmax.f32 %v1104_v14, %v1530_v17  ;;  %v1107_v24 = vadd.f32 %v1106_v22, %v702_v21 }
  0xfc   : > { %2168 = vmatmul.msk.f32.gmra.mxu2 %vm455_vm1, %v416_v18  ;;  %2038 = vmatmul.msk.f32.gmra.mxu0 %vm455_vm1, %v416_v18 }
  0xfd   : > { %v1769_v23 = vadd.f32 %v2720_v44, %v1701_v20  ;;  %2233 = vmatmul.msk.f32.gmra.mxu3 %vm455_vm1, %v352_v19  ;;  %2103 = vmatmul.msk.f32.gmra.mxu1 %vm455_vm1, %v352_v19 }
  0xff   : > { %1833 = vst.msk [vmem:[%s2727_s11 + $0x50] sm:$0xff] %vm455_vm1, %v1769_v23  ;;  %v1320_v25 = vpop.f32.mrf.mxu2 }
 0x100   : > { %v1532_v26 = vpop.f32.mrf.mxu3 }
 0x101   : > { %v1533_v27 = vadd.f32 %v1532_v26, %v1320_v25  ;;  %v705_v31 = vpop.f32.mrf.mxu0  ;;  %v423_v25 = vld [vmem:[%s2615_s7 + $0x111] sm:$0xff] }
 0x102   : > { %v1109_v32 = vpop.f32.mrf.mxu1  ;;  %v359_v26 = vld [vmem:[%s2615_s7 + $0x110] sm:$0xff] }
 0x103   : > { %v1702_v30 = vmax.f32 %v1107_v24, %v1533_v27  ;;  %v1110_v34 = vadd.f32 %v1109_v32, %v705_v31 }
 0x104   : > { %2169 = vmatmul.msk.f32.gmra.mxu2 %vm455_vm1, %v417_v28  ;;  %2039 = vmatmul.msk.f32.gmra.mxu0 %vm455_vm1, %v417_v28 }
 0x105   : > { %v1770_v33 = vadd.f32 %v2720_v44, %v1702_v30  ;;  %2234 = vmatmul.msk.f32.gmra.mxu3 %vm455_vm1, %v353_v29  ;;  %2104 = vmatmul.msk.f32.gmra.mxu1 %vm455_vm1, %v353_v29 }
 0x107   : > { %1834 = vst.msk [vmem:[%s2727_s11 + $0x58] sm:$0xff] %vm455_vm1, %v1770_v33  ;;  %v1323_v35 = vpop.f32.mrf.mxu2 }
 0x108   : > { %v1535_v36 = vpop.f32.mrf.mxu3 }
 0x109   : > { %v1536_v37 = vadd.f32 %v1535_v36, %v1323_v35  ;;  %v708_v41 = vpop.f32.mrf.mxu0  ;;  %v424_v35 = vld [vmem:[%s2615_s7 + $0x119] sm:$0xff] }
 0x10a   : > { %v1112_v42 = vpop.f32.mrf.mxu1  ;;  %v360_v36 = vld [vmem:[%s2615_s7 + $0x118] sm:$0xff] }
 0x10b   : > { %v1703_v40 = vmax.f32 %v1110_v34, %v1536_v37  ;;  %v1113_v45 = vadd.f32 %v1112_v42, %v708_v41 }
 0x10c   : > { %2170 = vmatmul.msk.f32.gmra.mxu2 %vm455_vm1, %v418_v38  ;;  %2040 = vmatmul.msk.f32.gmra.mxu0 %vm455_vm1, %v418_v38 }
 0x10d   : > { %v1771_v43 = vadd.f32 %v2720_v44, %v1703_v40  ;;  %2235 = vmatmul.msk.f32.gmra.mxu3 %vm455_vm1, %v354_v39  ;;  %2105 = vmatmul.msk.f32.gmra.mxu1 %vm455_vm1, %v354_v39 }
 0x10f   : > { %1835 = vst.msk [vmem:[%s2727_s11 + $0x60] sm:$0xff] %vm455_vm1, %v1771_v43  ;;  %v1326_v46 = vpop.f32.mrf.mxu2 }
 0x110   : > { %v1538_v47 = vpop.f32.mrf.mxu3 }
 0x111   : > { %v1539_v48 = vadd.f32 %v1538_v47, %v1326_v46  ;;  %v711_v52 = vpop.f32.mrf.mxu0  ;;  %v425_v46 = vld [vmem:[%s2615_s7 + $0x121] sm:$0xff] }
 0x112   : > { %v1115_v53 = vpop.f32.mrf.mxu1  ;;  %v361_v47 = vld [vmem:[%s2615_s7 + $0x120] sm:$0xff] }
 0x113   : > { %v1704_v51 = vmax.f32 %v1113_v45, %v1539_v48  ;;  %v1116_v55 = vadd.f32 %v1115_v53, %v711_v52 }
 0x114   : > { %2171 = vmatmul.msk.f32.gmra.mxu2 %vm455_vm1, %v419_v49  ;;  %2041 = vmatmul.msk.f32.gmra.mxu0 %vm455_vm1, %v419_v49 }
 0x115   : > { %v1772_v54 = vadd.f32 %v2720_v44, %v1704_v51  ;;  %2236 = vmatmul.msk.f32.gmra.mxu3 %vm455_vm1, %v355_v50  ;;  %2106 = vmatmul.msk.f32.gmra.mxu1 %vm455_vm1, %v355_v50 }
 0x117   : > { %1836 = vst.msk [vmem:[%s2727_s11 + $0x68] sm:$0xff] %vm455_vm1, %v1772_v54  ;;  %v1329_v56 = vpop.f32.mrf.mxu2 }
 0x118   : > { %v1541_v57 = vpop.f32.mrf.mxu3 }
 0x119   : > { %v1542_v58 = vadd.f32 %v1541_v57, %v1329_v56  ;;  %v714_v62 = vpop.f32.mrf.mxu0  ;;  %v426_v56 = vld [vmem:[%s2615_s7 + $0x129] sm:$0xff] }
 0x11a   : > { %v1118_v63 = vpop.f32.mrf.mxu1  ;;  %v362_v57 = vld [vmem:[%s2615_s7 + $0x128] sm:$0xff] }
 0x11b   : > { %v1705_v61 = vmax.f32 %v1116_v55, %v1542_v58  ;;  %v1119_v1 = vadd.f32 %v1118_v63, %v714_v62 }
 0x11c   : > { %2172 = vmatmul.msk.f32.gmra.mxu2 %vm455_vm1, %v420_v59  ;;  %2042 = vmatmul.msk.f32.gmra.mxu0 %vm455_vm1, %v420_v59 }
 0x11d   : > { %v1773_v0 = vadd.f32 %v2720_v44, %v1705_v61  ;;  %2237 = vmatmul.msk.f32.gmra.mxu3 %vm455_vm1, %v356_v60  ;;  %2107 = vmatmul.msk.f32.gmra.mxu1 %vm455_vm1, %v356_v60 }
 0x11f   : > { %1837 = vst.msk [vmem:[%s2727_s11 + $0x70] sm:$0xff] %vm455_vm1, %v1773_v0  ;;  %v1332_v2 = vpop.f32.mrf.mxu2 }
 0x120   : > { %v1544_v3 = vpop.f32.mrf.mxu3 }
 0x121   : > { %v1545_v4 = vadd.f32 %v1544_v3, %v1332_v2  ;;  %v717_v8 = vpop.f32.mrf.mxu0  ;;  %v427_v2 = vld [vmem:[%s2615_s7 + $0x131] sm:$0xff] }
 0x122   : > { %v1121_v9 = vpop.f32.mrf.mxu1  ;;  %v363_v3 = vld [vmem:[%s2615_s7 + $0x130] sm:$0xff] }
 0x123   : > { %v1706_v7 = vmax.f32 %v1119_v1, %v1545_v4  ;;  %v1122_v11 = vadd.f32 %v1121_v9, %v717_v8 }
 0x124   : > { %2173 = vmatmul.msk.f32.gmra.mxu2 %vm455_vm1, %v421_v5  ;;  %2043 = vmatmul.msk.f32.gmra.mxu0 %vm455_vm1, %v421_v5 }
 0x125   : > { %v1774_v10 = vadd.f32 %v2720_v44, %v1706_v7  ;;  %2238 = vmatmul.msk.f32.gmra.mxu3 %vm455_vm1, %v357_v6  ;;  %2108 = vmatmul.msk.f32.gmra.mxu1 %vm455_vm1, %v357_v6 }
 0x127   : > { %1838 = vst.msk [vmem:[%s2727_s11 + $0x78] sm:$0xff] %vm455_vm1, %v1774_v10  ;;  %v1335_v12 = vpop.f32.mrf.mxu2 }
 0x128   : > { %v1547_v13 = vpop.f32.mrf.mxu3 }
 0x129   : > { %v1548_v14 = vadd.f32 %v1547_v13, %v1335_v12  ;;  %v720_v18 = vpop.f32.mrf.mxu0  ;;  %v428_v12 = vld [vmem:[%s2615_s7 + $0x139] sm:$0xff] }
 0x12a   : > { %v1124_v19 = vpop.f32.mrf.mxu1  ;;  %v364_v13 = vld [vmem:[%s2615_s7 + $0x138] sm:$0xff] }
 0x12b   : > { %v1707_v17 = vmax.f32 %v1122_v11, %v1548_v14  ;;  %v1125_v21 = vadd.f32 %v1124_v19, %v720_v18 }
 0x12c   : > { %2174 = vmatmul.msk.f32.gmra.mxu2 %vm455_vm1, %v422_v15  ;;  %2044 = vmatmul.msk.f32.gmra.mxu0 %vm455_vm1, %v422_v15 }
 0x12d   : > { %v1775_v20 = vadd.f32 %v2720_v44, %v1707_v17  ;;  %2239 = vmatmul.msk.f32.gmra.mxu3 %vm455_vm1, %v358_v16  ;;  %2109 = vmatmul.msk.f32.gmra.mxu1 %vm455_vm1, %v358_v16 }
 0x12f   : > { %1839 = vst.msk [vmem:[%s2727_s11 + $0x80] sm:$0xff] %vm455_vm1, %v1775_v20  ;;  %v1338_v22 = vpop.f32.mrf.mxu2 }
 0x130   : > { %v1550_v23 = vpop.f32.mrf.mxu3 }
 0x131   : > { %v1551_v24 = vadd.f32 %v1550_v23, %v1338_v22  ;;  %v723_v28 = vpop.f32.mrf.mxu0  ;;  %v429_v22 = vld [vmem:[%s2615_s7 + $0x141] sm:$0xff] }
 0x132   : > { %v1127_v29 = vpop.f32.mrf.mxu1  ;;  %v365_v23 = vld [vmem:[%s2615_s7 + $0x140] sm:$0xff] }
 0x133   : > { %v1708_v27 = vmax.f32 %v1125_v21, %v1551_v24  ;;  %v1128_v31 = vadd.f32 %v1127_v29, %v723_v28 }
 0x134   : > { %2175 = vmatmul.msk.f32.gmra.mxu2 %vm455_vm1, %v423_v25  ;;  %2045 = vmatmul.msk.f32.gmra.mxu0 %vm455_vm1, %v423_v25 }
 0x135   : > { %v1776_v30 = vadd.f32 %v2720_v44, %v1708_v27  ;;  %2240 = vmatmul.msk.f32.gmra.mxu3 %vm455_vm1, %v359_v26  ;;  %2110 = vmatmul.msk.f32.gmra.mxu1 %vm455_vm1, %v359_v26 }
 0x137   : > { %1840 = vst.msk [vmem:[%s2727_s11 + $0x88] sm:$0xff] %vm455_vm1, %v1776_v30  ;;  %v1341_v32 = vpop.f32.mrf.mxu2 }
 0x138   : > { %v1553_v33 = vpop.f32.mrf.mxu3 }
 0x139   : > { %v1554_v34 = vadd.f32 %v1553_v33, %v1341_v32  ;;  %v726_v38 = vpop.f32.mrf.mxu0  ;;  %v430_v32 = vld [vmem:[%s2615_s7 + $0x149] sm:$0xff] }
 0x13a   : > { %v1130_v39 = vpop.f32.mrf.mxu1  ;;  %v366_v33 = vld [vmem:[%s2615_s7 + $0x148] sm:$0xff] }
 0x13b   : > { %v1709_v37 = vmax.f32 %v1128_v31, %v1554_v34  ;;  %v1131_v41 = vadd.f32 %v1130_v39, %v726_v38 }
 0x13c   : > { %2176 = vmatmul.msk.f32.gmra.mxu2 %vm455_vm1, %v424_v35  ;;  %2046 = vmatmul.msk.f32.gmra.mxu0 %vm455_vm1, %v424_v35 }
 0x13d   : > { %v1777_v40 = vadd.f32 %v2720_v44, %v1709_v37  ;;  %2241 = vmatmul.msk.f32.gmra.mxu3 %vm455_vm1, %v360_v36  ;;  %2111 = vmatmul.msk.f32.gmra.mxu1 %vm455_vm1, %v360_v36 }
 0x13f   : > { %1841 = vst.msk [vmem:[%s2727_s11 + $0x90] sm:$0xff] %vm455_vm1, %v1777_v40  ;;  %v1344_v42 = vpop.f32.mrf.mxu2 }
 0x140   : > { %v1556_v43 = vpop.f32.mrf.mxu3 }
 0x141   : > { %v1557_v45 = vadd.f32 %v1556_v43, %v1344_v42  ;;  %v729_v49 = vpop.f32.mrf.mxu0  ;;  %v431_v42 = vld [vmem:[%s2615_s7 + $0x151] sm:$0xff] }
 0x142   : > { %v1133_v50 = vpop.f32.mrf.mxu1  ;;  %v367_v43 = vld [vmem:[%s2615_s7 + $0x150] sm:$0xff] }
 0x143   : > { %v1710_v48 = vmax.f32 %v1131_v41, %v1557_v45  ;;  %v1134_v52 = vadd.f32 %v1133_v50, %v729_v49 }
 0x144   : > { %2177 = vmatmul.msk.f32.gmra.mxu2 %vm455_vm1, %v425_v46  ;;  %2047 = vmatmul.msk.f32.gmra.mxu0 %vm455_vm1, %v425_v46 }
 0x145   : > { %v1778_v51 = vadd.f32 %v2720_v44, %v1710_v48  ;;  %2242 = vmatmul.msk.f32.gmra.mxu3 %vm455_vm1, %v361_v47  ;;  %2112 = vmatmul.msk.f32.gmra.mxu1 %vm455_vm1, %v361_v47 }
 0x147   : > { %1842 = vst.msk [vmem:[%s2727_s11 + $0x98] sm:$0xff] %vm455_vm1, %v1778_v51  ;;  %v1347_v53 = vpop.f32.mrf.mxu2 }
 0x148   : > { %v1559_v54 = vpop.f32.mrf.mxu3 }
 0x149   : > { %v1560_v55 = vadd.f32 %v1559_v54, %v1347_v53  ;;  %v732_v59 = vpop.f32.mrf.mxu0  ;;  %v432_v53 = vld [vmem:[%s2615_s7 + $0x159] sm:$0xff] }
 0x14a   : > { %v1136_v60 = vpop.f32.mrf.mxu1  ;;  %v368_v54 = vld [vmem:[%s2615_s7 + $0x158] sm:$0xff] }
 0x14b   : > { %v1711_v58 = vmax.f32 %v1134_v52, %v1560_v55  ;;  %v1137_v62 = vadd.f32 %v1136_v60, %v732_v59 }
 0x14c   : > { %2178 = vmatmul.msk.f32.gmra.mxu2 %vm455_vm1, %v426_v56  ;;  %2048 = vmatmul.msk.f32.gmra.mxu0 %vm455_vm1, %v426_v56 }
 0x14d   : > { %v1779_v61 = vadd.f32 %v2720_v44, %v1711_v58  ;;  %2243 = vmatmul.msk.f32.gmra.mxu3 %vm455_vm1, %v362_v57  ;;  %2113 = vmatmul.msk.f32.gmra.mxu1 %vm455_vm1, %v362_v57 }
 0x14f   : > { %1843 = vst.msk [vmem:[%s2727_s11 + $0xa0] sm:$0xff] %vm455_vm1, %v1779_v61  ;;  %v1350_v63 = vpop.f32.mrf.mxu2 }
 0x150   : > { %v1562_v0 = vpop.f32.mrf.mxu3 }
 0x151   : > { %v1563_v1 = vadd.f32 %v1562_v0, %v1350_v63  ;;  %v735_v5 = vpop.f32.mrf.mxu0  ;;  %v433_v63 = vld [vmem:[%s2615_s7 + $0x161] sm:$0xff] }
 0x152   : > { %v1139_v6 = vpop.f32.mrf.mxu1  ;;  %v369_v0 = vld [vmem:[%s2615_s7 + $0x160] sm:$0xff] }
 0x153   : > { %v1712_v4 = vmax.f32 %v1137_v62, %v1563_v1  ;;  %v1140_v8 = vadd.f32 %v1139_v6, %v735_v5 }
 0x154   : > { %2179 = vmatmul.msk.f32.gmra.mxu2 %vm455_vm1, %v427_v2  ;;  %2049 = vmatmul.msk.f32.gmra.mxu0 %vm455_vm1, %v427_v2 }
 0x155   : > { %v1780_v7 = vadd.f32 %v2720_v44, %v1712_v4  ;;  %2244 = vmatmul.msk.f32.gmra.mxu3 %vm455_vm1, %v363_v3  ;;  %2114 = vmatmul.msk.f32.gmra.mxu1 %vm455_vm1, %v363_v3 }
 0x157   : > { %1844 = vst.msk [vmem:[%s2727_s11 + $0xa8] sm:$0xff] %vm455_vm1, %v1780_v7  ;;  %v1353_v9 = vpop.f32.mrf.mxu2 }
 0x158   : > { %v1565_v10 = vpop.f32.mrf.mxu3 }
 0x159   : > { %v1566_v11 = vadd.f32 %v1565_v10, %v1353_v9  ;;  %v738_v15 = vpop.f32.mrf.mxu0  ;;  %v434_v9 = vld [vmem:[%s2615_s7 + $0x169] sm:$0xff] }
 0x15a   : > { %v1142_v16 = vpop.f32.mrf.mxu1  ;;  %v370_v10 = vld [vmem:[%s2615_s7 + $0x168] sm:$0xff] }
 0x15b   : > { %v1713_v14 = vmax.f32 %v1140_v8, %v1566_v11  ;;  %v1143_v18 = vadd.f32 %v1142_v16, %v738_v15 }
 0x15c   : > { %2180 = vmatmul.msk.f32.gmra.mxu2 %vm455_vm1, %v428_v12  ;;  %2050 = vmatmul.msk.f32.gmra.mxu0 %vm455_vm1, %v428_v12 }
 0x15d   : > { %v1781_v17 = vadd.f32 %v2720_v44, %v1713_v14  ;;  %2245 = vmatmul.msk.f32.gmra.mxu3 %vm455_vm1, %v364_v13  ;;  %2115 = vmatmul.msk.f32.gmra.mxu1 %vm455_vm1, %v364_v13 }
 0x15f   : > { %1845 = vst.msk [vmem:[%s2727_s11 + $0xb0] sm:$0xff] %vm455_vm1, %v1781_v17  ;;  %v1356_v19 = vpop.f32.mrf.mxu2 }
 0x160   : > { %v1568_v20 = vpop.f32.mrf.mxu3 }
 0x161   : > { %v1569_v21 = vadd.f32 %v1568_v20, %v1356_v19  ;;  %v741_v25 = vpop.f32.mrf.mxu0  ;;  %v435_v19 = vld [vmem:[%s2615_s7 + $0x171] sm:$0xff] }
 0x162   : > { %v1145_v26 = vpop.f32.mrf.mxu1  ;;  %v371_v20 = vld [vmem:[%s2615_s7 + $0x170] sm:$0xff] }
 0x163   : > { %v1714_v24 = vmax.f32 %v1143_v18, %v1569_v21  ;;  %v1146_v28 = vadd.f32 %v1145_v26, %v741_v25 }
 0x164   : > { %2181 = vmatmul.msk.f32.gmra.mxu2 %vm455_vm1, %v429_v22  ;;  %2051 = vmatmul.msk.f32.gmra.mxu0 %vm455_vm1, %v429_v22 }
 0x165   : > { %v1782_v27 = vadd.f32 %v2720_v44, %v1714_v24  ;;  %2246 = vmatmul.msk.f32.gmra.mxu3 %vm455_vm1, %v365_v23  ;;  %2116 = vmatmul.msk.f32.gmra.mxu1 %vm455_vm1, %v365_v23 }
 0x167   : > { %1846 = vst.msk [vmem:[%s2727_s11 + $0xb8] sm:$0xff] %vm455_vm1, %v1782_v27  ;;  %v1359_v29 = vpop.f32.mrf.mxu2 }
 0x168   : > { %v1571_v30 = vpop.f32.mrf.mxu3 }
 0x169   : > { %v1572_v31 = vadd.f32 %v1571_v30, %v1359_v29  ;;  %v744_v35 = vpop.f32.mrf.mxu0  ;;  %v436_v29 = vld [vmem:[%s2615_s7 + $0x179] sm:$0xff] }
 0x16a   : > { %v1148_v36 = vpop.f32.mrf.mxu1  ;;  %v372_v30 = vld [vmem:[%s2615_s7 + $0x178] sm:$0xff] }
 0x16b   : > { %v1715_v34 = vmax.f32 %v1146_v28, %v1572_v31  ;;  %v1149_v38 = vadd.f32 %v1148_v36, %v744_v35 }
 0x16c   : > { %2182 = vmatmul.msk.f32.gmra.mxu2 %vm455_vm1, %v430_v32  ;;  %2052 = vmatmul.msk.f32.gmra.mxu0 %vm455_vm1, %v430_v32 }
 0x16d   : > { %v1783_v37 = vadd.f32 %v2720_v44, %v1715_v34  ;;  %2247 = vmatmul.msk.f32.gmra.mxu3 %vm455_vm1, %v366_v33  ;;  %2117 = vmatmul.msk.f32.gmra.mxu1 %vm455_vm1, %v366_v33 }
 0x16f   : > { %1847 = vst.msk [vmem:[%s2727_s11 + $0xc0] sm:$0xff] %vm455_vm1, %v1783_v37  ;;  %v1362_v39 = vpop.f32.mrf.mxu2 }
 0x170   : > { %v1574_v40 = vpop.f32.mrf.mxu3 }
 0x171   : > { %v1575_v41 = vadd.f32 %v1574_v40, %v1362_v39  ;;  %v747_v46 = vpop.f32.mrf.mxu0  ;;  %v437_v39 = vld [vmem:[%s2615_s7 + $0x181] sm:$0xff] }
 0x172   : > { %v1151_v47 = vpop.f32.mrf.mxu1  ;;  %v373_v40 = vld [vmem:[%s2615_s7 + $0x180] sm:$0xff] }
 0x173   : > { %v1716_v45 = vmax.f32 %v1149_v38, %v1575_v41  ;;  %v1152_v49 = vadd.f32 %v1151_v47, %v747_v46 }
 0x174   : > { %2183 = vmatmul.msk.f32.gmra.mxu2 %vm455_vm1, %v431_v42  ;;  %2053 = vmatmul.msk.f32.gmra.mxu0 %vm455_vm1, %v431_v42 }
 0x175   : > { %v1784_v48 = vadd.f32 %v2720_v44, %v1716_v45  ;;  %2248 = vmatmul.msk.f32.gmra.mxu3 %vm455_vm1, %v367_v43  ;;  %2118 = vmatmul.msk.f32.gmra.mxu1 %vm455_vm1, %v367_v43 }
 0x177   : > { %1848 = vst.msk [vmem:[%s2727_s11 + $0xc8] sm:$0xff] %vm455_vm1, %v1784_v48  ;;  %v1365_v50 = vpop.f32.mrf.mxu2 }
 0x178   : > { %v1577_v51 = vpop.f32.mrf.mxu3 }
 0x179   : > { %v1578_v52 = vadd.f32 %v1577_v51, %v1365_v50  ;;  %v750_v56 = vpop.f32.mrf.mxu0  ;;  %v438_v50 = vld [vmem:[%s2615_s7 + $0x189] sm:$0xff] }
 0x17a   : > { %v1154_v57 = vpop.f32.mrf.mxu1  ;;  %v374_v51 = vld [vmem:[%s2615_s7 + $0x188] sm:$0xff] }
 0x17b   : > { %v1717_v55 = vmax.f32 %v1152_v49, %v1578_v52  ;;  %v1155_v59 = vadd.f32 %v1154_v57, %v750_v56 }
 0x17c   : > { %2184 = vmatmul.msk.f32.gmra.mxu2 %vm455_vm1, %v432_v53  ;;  %2054 = vmatmul.msk.f32.gmra.mxu0 %vm455_vm1, %v432_v53 }
 0x17d   : > { %v1785_v58 = vadd.f32 %v2720_v44, %v1717_v55  ;;  %2249 = vmatmul.msk.f32.gmra.mxu3 %vm455_vm1, %v368_v54  ;;  %2119 = vmatmul.msk.f32.gmra.mxu1 %vm455_vm1, %v368_v54 }
 0x17f   : > { %1849 = vst.msk [vmem:[%s2727_s11 + $0xd0] sm:$0xff] %vm455_vm1, %v1785_v58  ;;  %v1368_v60 = vpop.f32.mrf.mxu2 }
 0x180   : > { %v1580_v61 = vpop.f32.mrf.mxu3 }
 0x181   : > { %v1581_v62 = vadd.f32 %v1580_v61, %v1368_v60  ;;  %v753_v2 = vpop.f32.mrf.mxu0  ;;  %v439_v60 = vld [vmem:[%s2615_s7 + $0x191] sm:$0xff] }
 0x182   : > { %v1157_v3 = vpop.f32.mrf.mxu1  ;;  %v375_v61 = vld [vmem:[%s2615_s7 + $0x190] sm:$0xff] }
 0x183   : > { %v1718_v1 = vmax.f32 %v1155_v59, %v1581_v62  ;;  %v1158_v5 = vadd.f32 %v1157_v3, %v753_v2 }
 0x184   : > { %2185 = vmatmul.msk.f32.gmra.mxu2 %vm455_vm1, %v433_v63  ;;  %2055 = vmatmul.msk.f32.gmra.mxu0 %vm455_vm1, %v433_v63 }
 0x185   : > { %v1786_v4 = vadd.f32 %v2720_v44, %v1718_v1  ;;  %2250 = vmatmul.msk.f32.gmra.mxu3 %vm455_vm1, %v369_v0  ;;  %2120 = vmatmul.msk.f32.gmra.mxu1 %vm455_vm1, %v369_v0 }
 0x187   : > { %1850 = vst.msk [vmem:[%s2727_s11 + $0xd8] sm:$0xff] %vm455_vm1, %v1786_v4  ;;  %v1371_v6 = vpop.f32.mrf.mxu2 }
 0x188   : > { %v1583_v7 = vpop.f32.mrf.mxu3 }
 0x189   : > { %v1584_v8 = vadd.f32 %v1583_v7, %v1371_v6  ;;  %v756_v12 = vpop.f32.mrf.mxu0  ;;  %v440_v6 = vld [vmem:[%s2615_s7 + $0x199] sm:$0xff] }
 0x18a   : > { %v1160_v13 = vpop.f32.mrf.mxu1  ;;  %v376_v7 = vld [vmem:[%s2615_s7 + $0x198] sm:$0xff] }
 0x18b   : > { %v1719_v11 = vmax.f32 %v1158_v5, %v1584_v8  ;;  %v1161_v15 = vadd.f32 %v1160_v13, %v756_v12 }
 0x18c   : > { %2186 = vmatmul.msk.f32.gmra.mxu2 %vm455_vm1, %v434_v9  ;;  %2056 = vmatmul.msk.f32.gmra.mxu0 %vm455_vm1, %v434_v9 }
 0x18d   : > { %v1787_v14 = vadd.f32 %v2720_v44, %v1719_v11  ;;  %2251 = vmatmul.msk.f32.gmra.mxu3 %vm455_vm1, %v370_v10  ;;  %2121 = vmatmul.msk.f32.gmra.mxu1 %vm455_vm1, %v370_v10  ;;  %v3035_v10 = vld [vmem:[#allocation9] ss:$0 sm:$0xff] }
 0x18f   : > { %1851 = vst.msk [vmem:[%s2727_s11 + $0xe0] sm:$0xff] %vm455_vm1, %v1787_v14  ;;  %v1374_v16 = vpop.f32.mrf.mxu2 }
 0x190   : > { %v1586_v17 = vpop.f32.mrf.mxu3 }
 0x191   : > { %v1587_v18 = vadd.f32 %v1586_v17, %v1374_v16  ;;  %v759_v22 = vpop.f32.mrf.mxu0  ;;  %v441_v16 = vld [vmem:[%s2615_s7 + $0x1a1] sm:$0xff] }
 0x192   : > { %v1163_v23 = vpop.f32.mrf.mxu1  ;;  %v377_v17 = vld [vmem:[%s2615_s7 + $0x1a0] sm:$0xff] }
 0x193   : > { %v1720_v21 = vmax.f32 %v1161_v15, %v1587_v18  ;;  %v1164_v25 = vadd.f32 %v1163_v23, %v759_v22 }
 0x194   : > { %2187 = vmatmul.msk.f32.gmra.mxu2 %vm455_vm1, %v435_v19  ;;  %2057 = vmatmul.msk.f32.gmra.mxu0 %vm455_vm1, %v435_v19 }
 0x195   : > { %v1788_v24 = vadd.f32 %v2720_v44, %v1720_v21  ;;  %2252 = vmatmul.msk.f32.gmra.mxu3 %vm455_vm1, %v371_v20  ;;  %2122 = vmatmul.msk.f32.gmra.mxu1 %vm455_vm1, %v371_v20 }
 0x197   : > { %1852 = vst.msk [vmem:[%s2727_s11 + $0xe8] sm:$0xff] %vm455_vm1, %v1788_v24  ;;  %v1377_v26 = vpop.f32.mrf.mxu2 }
 0x198   : > { %v1589_v27 = vpop.f32.mrf.mxu3 }
 0x199   : > { %v1590_v28 = vadd.f32 %v1589_v27, %v1377_v26  ;;  %v762_v32 = vpop.f32.mrf.mxu0  ;;  %v442_v26 = vld [vmem:[%s2615_s7 + $0x1a9] sm:$0xff] }
 0x19a   : > { %v1166_v33 = vpop.f32.mrf.mxu1  ;;  %v378_v27 = vld [vmem:[%s2615_s7 + $0x1a8] sm:$0xff] }
 0x19b   : > { %v1721_v31 = vmax.f32 %v1164_v25, %v1590_v28  ;;  %v1167_v35 = vadd.f32 %v1166_v33, %v762_v32 }
 0x19c   : > { %2188 = vmatmul.msk.f32.gmra.mxu2 %vm455_vm1, %v436_v29  ;;  %2058 = vmatmul.msk.f32.gmra.mxu0 %vm455_vm1, %v436_v29 }
 0x19d   : > { %v1789_v34 = vadd.f32 %v2720_v44, %v1721_v31  ;;  %2253 = vmatmul.msk.f32.gmra.mxu3 %vm455_vm1, %v372_v30  ;;  %2123 = vmatmul.msk.f32.gmra.mxu1 %vm455_vm1, %v372_v30 }
 0x19f   : > { %1853 = vst.msk [vmem:[%s2727_s11 + $0xf0] sm:$0xff] %vm455_vm1, %v1789_v34  ;;  %v1380_v36 = vpop.f32.mrf.mxu2 }
 0x1a0   : > { %v1592_v37 = vpop.f32.mrf.mxu3 }
 0x1a1   : > { %v1593_v38 = vadd.f32 %v1592_v37, %v1380_v36  ;;  %v765_v42 = vpop.f32.mrf.mxu0  ;;  %v443_v36 = vld [vmem:[%s2615_s7 + $0x1b1] sm:$0xff] }
 0x1a2   : > { %v1169_v43 = vpop.f32.mrf.mxu1  ;;  %v379_v37 = vld [vmem:[%s2615_s7 + $0x1b0] sm:$0xff] }
 0x1a3   : > { %v1722_v41 = vmax.f32 %v1167_v35, %v1593_v38  ;;  %v1170_v46 = vadd.f32 %v1169_v43, %v765_v42 }
 0x1a4   : > { %2189 = vmatmul.msk.f32.gmra.mxu2 %vm455_vm1, %v437_v39  ;;  %2059 = vmatmul.msk.f32.gmra.mxu0 %vm455_vm1, %v437_v39 }
 0x1a5   : > { %v1790_v45 = vadd.f32 %v2720_v44, %v1722_v41  ;;  %2254 = vmatmul.msk.f32.gmra.mxu3 %vm455_vm1, %v373_v40  ;;  %2124 = vmatmul.msk.f32.gmra.mxu1 %vm455_vm1, %v373_v40 }
 0x1a7   : > { %1854 = vst.msk [vmem:[%s2727_s11 + $0xf8] sm:$0xff] %vm455_vm1, %v1790_v45  ;;  %v1383_v47 = vpop.f32.mrf.mxu2 }
 0x1a8   : > { %v1595_v48 = vpop.f32.mrf.mxu3 }
 0x1a9   : > { %v1596_v49 = vadd.f32 %v1595_v48, %v1383_v47  ;;  %v768_v53 = vpop.f32.mrf.mxu0  ;;  %v444_v47 = vld [vmem:[%s2615_s7 + $0x1b9] sm:$0xff] }
 0x1aa   : > { %v1172_v54 = vpop.f32.mrf.mxu1  ;;  %v380_v48 = vld [vmem:[%s2615_s7 + $0x1b8] sm:$0xff] }
 0x1ab   : > { %v1723_v52 = vmax.f32 %v1170_v46, %v1596_v49  ;;  %v1173_v56 = vadd.f32 %v1172_v54, %v768_v53 }
 0x1ac   : > { %2190 = vmatmul.msk.f32.gmra.mxu2 %vm455_vm1, %v438_v50  ;;  %2060 = vmatmul.msk.f32.gmra.mxu0 %vm455_vm1, %v438_v50 }
 0x1ad   : > { %v1791_v55 = vadd.f32 %v2720_v44, %v1723_v52  ;;  %2255 = vmatmul.msk.f32.gmra.mxu3 %vm455_vm1, %v374_v51  ;;  %2125 = vmatmul.msk.f32.gmra.mxu1 %vm455_vm1, %v374_v51 }
 0x1af   : > { %1855 = vst.msk [vmem:[%s2727_s11 + $0x100] sm:$0xff] %vm455_vm1, %v1791_v55  ;;  %v1386_v57 = vpop.f32.mrf.mxu2 }
 0x1b0   : > { %v1598_v58 = vpop.f32.mrf.mxu3 }
 0x1b1   : > { %v1599_v59 = vadd.f32 %v1598_v58, %v1386_v57  ;;  %v771_v63 = vpop.f32.mrf.mxu0  ;;  %v445_v57 = vld [vmem:[%s2615_s7 + $0x1c1] sm:$0xff] }
 0x1b2   : > { %v1175_v0 = vpop.f32.mrf.mxu1  ;;  %v381_v58 = vld [vmem:[%s2615_s7 + $0x1c0] sm:$0xff] }
 0x1b3   : > { %v1724_v62 = vmax.f32 %v1173_v56, %v1599_v59  ;;  %v1176_v2 = vadd.f32 %v1175_v0, %v771_v63 }
 0x1b4   : > { %2191 = vmatmul.msk.f32.gmra.mxu2 %vm455_vm1, %v439_v60  ;;  %2061 = vmatmul.msk.f32.gmra.mxu0 %vm455_vm1, %v439_v60 }
 0x1b5   : > { %v1792_v1 = vadd.f32 %v2720_v44, %v1724_v62  ;;  %2256 = vmatmul.msk.f32.gmra.mxu3 %vm455_vm1, %v375_v61  ;;  %2126 = vmatmul.msk.f32.gmra.mxu1 %vm455_vm1, %v375_v61 }
 0x1b7   : > { %1856 = vst.msk [vmem:[%s2727_s11 + $0x108] sm:$0xff] %vm455_vm1, %v1792_v1  ;;  %v1389_v3 = vpop.f32.mrf.mxu2 }
 0x1b8   : > { %v1601_v4 = vpop.f32.mrf.mxu3 }
 0x1b9   : > { %v1602_v5 = vadd.f32 %v1601_v4, %v1389_v3  ;;  %v774_v8 = vpop.f32.mrf.mxu0  ;;  %v446_v3 = vld [vmem:[%s2615_s7 + $0x1c9] sm:$0xff] }
 0x1ba   : > { %v1178_v9 = vpop.f32.mrf.mxu1  ;;  %v382_v4 = vld [vmem:[%s2615_s7 + $0x1c8] sm:$0xff] }
 0x1bb   : > { %v1725_v44 = vmax.f32 %v1176_v2, %v1602_v5  ;;  %v1179_v12 = vadd.f32 %v1178_v9, %v774_v8 }
 0x1bc   : > { %2192 = vmatmul.msk.f32.gmra.mxu2 %vm455_vm1, %v440_v6  ;;  %2062 = vmatmul.msk.f32.gmra.mxu0 %vm455_vm1, %v440_v6 }
 0x1bd   : > { %v1793_v11 = vadd.f32 %v3035_v10, %v1725_v44  ;;  %2257 = vmatmul.msk.f32.gmra.mxu3 %vm455_vm1, %v376_v7  ;;  %2127 = vmatmul.msk.f32.gmra.mxu1 %vm455_vm1, %v376_v7 }
 0x1bf   : > { %1857 = vst.msk [vmem:[%s2727_s11 + $0x110] sm:$0xff] %vm455_vm1, %v1793_v11  ;;  %v1392_v13 = vpop.f32.mrf.mxu2 }
 0x1c0   : > { %v1604_v14 = vpop.f32.mrf.mxu3 }
 0x1c1   : > { %v1605_v15 = vadd.f32 %v1604_v14, %v1392_v13  ;;  %v777_v19 = vpop.f32.mrf.mxu0  ;;  %v447_v13 = vld [vmem:[%s2615_s7 + $0x1d1] sm:$0xff] }
 0x1c2   : > { %v1181_v20 = vpop.f32.mrf.mxu1  ;;  %v383_v14 = vld [vmem:[%s2615_s7 + $0x1d0] sm:$0xff] }
 0x1c3   : > { %v1726_v18 = vmax.f32 %v1179_v12, %v1605_v15  ;;  %v1182_v22 = vadd.f32 %v1181_v20, %v777_v19 }
 0x1c4   : > { %2193 = vmatmul.msk.f32.gmra.mxu2 %vm455_vm1, %v441_v16  ;;  %2063 = vmatmul.msk.f32.gmra.mxu0 %vm455_vm1, %v441_v16 }
 0x1c5   : > { %v1794_v21 = vadd.f32 %v3035_v10, %v1726_v18  ;;  %2258 = vmatmul.msk.f32.gmra.mxu3 %vm455_vm1, %v377_v17  ;;  %2128 = vmatmul.msk.f32.gmra.mxu1 %vm455_vm1, %v377_v17 }
 0x1c7   : > { %1858 = vst.msk [vmem:[%s2727_s11 + $0x118] sm:$0xff] %vm455_vm1, %v1794_v21  ;;  %v1395_v23 = vpop.f32.mrf.mxu2 }
 0x1c8   : > { %v1607_v24 = vpop.f32.mrf.mxu3 }
 0x1c9   : > { %v1608_v25 = vadd.f32 %v1607_v24, %v1395_v23  ;;  %v780_v29 = vpop.f32.mrf.mxu0  ;;  %v448_v23 = vld [vmem:[%s2615_s7 + $0x1d9] sm:$0xff] }
 0x1ca   : > { %v1184_v30 = vpop.f32.mrf.mxu1  ;;  %v384_v24 = vld [vmem:[%s2615_s7 + $0x1d8] sm:$0xff] }
 0x1cb   : > { %v1727_v28 = vmax.f32 %v1182_v22, %v1608_v25  ;;  %v1185_v32 = vadd.f32 %v1184_v30, %v780_v29 }
 0x1cc   : > { %2194 = vmatmul.msk.f32.gmra.mxu2 %vm455_vm1, %v442_v26  ;;  %2064 = vmatmul.msk.f32.gmra.mxu0 %vm455_vm1, %v442_v26 }
 0x1cd   : > { %v1795_v31 = vadd.f32 %v3035_v10, %v1727_v28  ;;  %2259 = vmatmul.msk.f32.gmra.mxu3 %vm455_vm1, %v378_v27  ;;  %2129 = vmatmul.msk.f32.gmra.mxu1 %vm455_vm1, %v378_v27 }
 0x1cf   : > { %1859 = vst.msk [vmem:[%s2727_s11 + $0x120] sm:$0xff] %vm455_vm1, %v1795_v31  ;;  %v1398_v33 = vpop.f32.mrf.mxu2 }
 0x1d0   : > { %v1610_v34 = vpop.f32.mrf.mxu3 }
 0x1d1   : > { %v1611_v35 = vadd.f32 %v1610_v34, %v1398_v33  ;;  %v783_v39 = vpop.f32.mrf.mxu0  ;;  %v449_v33 = vld [vmem:[%s2615_s7 + $0x1e1] sm:$0xff] }
 0x1d2   : > { %v1187_v40 = vpop.f32.mrf.mxu1  ;;  %v385_v34 = vld [vmem:[%s2615_s7 + $0x1e0] sm:$0xff] }
 0x1d3   : > { %v1728_v38 = vmax.f32 %v1185_v32, %v1611_v35  ;;  %v1188_v42 = vadd.f32 %v1187_v40, %v783_v39 }
 0x1d4   : > { %2195 = vmatmul.msk.f32.gmra.mxu2 %vm455_vm1, %v443_v36  ;;  %2065 = vmatmul.msk.f32.gmra.mxu0 %vm455_vm1, %v443_v36 }
 0x1d5   : > { %v1796_v41 = vadd.f32 %v3035_v10, %v1728_v38  ;;  %2260 = vmatmul.msk.f32.gmra.mxu3 %vm455_vm1, %v379_v37  ;;  %2130 = vmatmul.msk.f32.gmra.mxu1 %vm455_vm1, %v379_v37 }
 0x1d7   : > { %1860 = vst.msk [vmem:[%s2727_s11 + $0x128] sm:$0xff] %vm455_vm1, %v1796_v41  ;;  %v1401_v43 = vpop.f32.mrf.mxu2 }
 0x1d8   : > { %v1613_v45 = vpop.f32.mrf.mxu3 }
 0x1d9   : > { %v1614_v46 = vadd.f32 %v1613_v45, %v1401_v43  ;;  %v786_v50 = vpop.f32.mrf.mxu0  ;;  %v450_v43 = vld [vmem:[%s2615_s7 + $0x1e9] sm:$0xff] }
 0x1da   : > { %v1190_v51 = vpop.f32.mrf.mxu1  ;;  %v386_v45 = vld [vmem:[%s2615_s7 + $0x1e8] sm:$0xff] }
 0x1db   : > { %v1729_v49 = vmax.f32 %v1188_v42, %v1614_v46  ;;  %v1191_v53 = vadd.f32 %v1190_v51, %v786_v50 }
 0x1dc   : > { %2196 = vmatmul.msk.f32.gmra.mxu2 %vm455_vm1, %v444_v47  ;;  %2066 = vmatmul.msk.f32.gmra.mxu0 %vm455_vm1, %v444_v47 }
 0x1dd   : > { %v1797_v52 = vadd.f32 %v3035_v10, %v1729_v49  ;;  %2261 = vmatmul.msk.f32.gmra.mxu3 %vm455_vm1, %v380_v48  ;;  %2131 = vmatmul.msk.f32.gmra.mxu1 %vm455_vm1, %v380_v48 }
 0x1df   : > { %1861 = vst.msk [vmem:[%s2727_s11 + $0x130] sm:$0xff] %vm455_vm1, %v1797_v52  ;;  %v1404_v54 = vpop.f32.mrf.mxu2 }
 0x1e0   : > { %v1616_v55 = vpop.f32.mrf.mxu3 }
 0x1e1   : > { %v1617_v56 = vadd.f32 %v1616_v55, %v1404_v54  ;;  %v789_v60 = vpop.f32.mrf.mxu0  ;;  %v451_v54 = vld [vmem:[%s2615_s7 + $0x1f1] sm:$0xff] }
 0x1e2   : > { %v1193_v61 = vpop.f32.mrf.mxu1  ;;  %v387_v55 = vld [vmem:[%s2615_s7 + $0x1f0] sm:$0xff] }
 0x1e3   : > { %v1730_v59 = vmax.f32 %v1191_v53, %v1617_v56  ;;  %v1194_v63 = vadd.f32 %v1193_v61, %v789_v60 }
 0x1e4   : > { %2197 = vmatmul.msk.f32.gmra.mxu2 %vm455_vm1, %v445_v57  ;;  %2067 = vmatmul.msk.f32.gmra.mxu0 %vm455_vm1, %v445_v57 }
 0x1e5   : > { %v1798_v62 = vadd.f32 %v3035_v10, %v1730_v59  ;;  %2262 = vmatmul.msk.f32.gmra.mxu3 %vm455_vm1, %v381_v58  ;;  %2132 = vmatmul.msk.f32.gmra.mxu1 %vm455_vm1, %v381_v58 }
 0x1e7   : > { %1862 = vst.msk [vmem:[%s2727_s11 + $0x138] sm:$0xff] %vm455_vm1, %v1798_v62  ;;  %v1407_v0 = vpop.f32.mrf.mxu2 }
 0x1e8   : > { %v1619_v1 = vpop.f32.mrf.mxu3 }
 0x1e9   : > { %v1620_v2 = vadd.f32 %v1619_v1, %v1407_v0  ;;  %v792_v6 = vpop.f32.mrf.mxu0  ;;  %v452_v0 = vld [vmem:[%s2615_s7 + $0x1f9] sm:$0xff] }
 0x1ea   : > { %v1196_v7 = vpop.f32.mrf.mxu1  ;;  %v388_v1 = vld [vmem:[%s2615_s7 + $0x1f8] sm:$0xff] }
 0x1eb   : > { %v1731_v5 = vmax.f32 %v1194_v63, %v1620_v2  ;;  %v1197_v8 = vadd.f32 %v1196_v7, %v792_v6 }
 0x1ec   : > { %2198 = vmatmul.msk.f32.gmra.mxu2 %vm455_vm1, %v446_v3  ;;  %2068 = vmatmul.msk.f32.gmra.mxu0 %vm455_vm1, %v446_v3 }
 0x1ed   : > { %v1799_v44 = vadd.f32 %v3035_v10, %v1731_v5  ;;  %2263 = vmatmul.msk.f32.gmra.mxu3 %vm455_vm1, %v382_v4  ;;  %2133 = vmatmul.msk.f32.gmra.mxu1 %vm455_vm1, %v382_v4 }
 0x1ef   : > { %1863 = vst.msk [vmem:[%s2727_s11 + $0x140] sm:$0xff] %vm455_vm1, %v1799_v44  ;;  %v1410_v9 = vpop.f32.mrf.mxu2 }
 0x1f0   : > { %v1622_v11 = vpop.f32.mrf.mxu3 }
 0x1f1   : > { %v1623_v12 = vadd.f32 %v1622_v11, %v1410_v9  ;;  %v795_v16 = vpop.f32.mrf.mxu0 }
 0x1f2   : > { %v1199_v17 = vpop.f32.mrf.mxu1 }
 0x1f3   : > { %v1732_v15 = vmax.f32 %v1197_v8, %v1623_v12  ;;  %v1200_v19 = vadd.f32 %v1199_v17, %v795_v16 }
 0x1f4   : > { %2199 = vmatmul.msk.f32.gmra.mxu2 %vm455_vm1, %v447_v13  ;;  %2069 = vmatmul.msk.f32.gmra.mxu0 %vm455_vm1, %v447_v13 }
 0x1f5   : > { %v1800_v18 = vadd.f32 %v3035_v10, %v1732_v15  ;;  %2264 = vmatmul.msk.f32.gmra.mxu3 %vm455_vm1, %v383_v14  ;;  %2134 = vmatmul.msk.f32.gmra.mxu1 %vm455_vm1, %v383_v14 }
 0x1f7   : > { %1864 = vst.msk [vmem:[%s2727_s11 + $0x148] sm:$0xff] %vm455_vm1, %v1800_v18  ;;  %v1413_v20 = vpop.f32.mrf.mxu2 }
 0x1f8   : > { %v1625_v21 = vpop.f32.mrf.mxu3 }
 0x1f9   : > { %v1626_v22 = vadd.f32 %v1625_v21, %v1413_v20  ;;  %v798_v26 = vpop.f32.mrf.mxu0 }
 0x1fa   : > { %v1202_v27 = vpop.f32.mrf.mxu1 }
 0x1fb   : > { %v1733_v25 = vmax.f32 %v1200_v19, %v1626_v22  ;;  %v1203_v29 = vadd.f32 %v1202_v27, %v798_v26 }
 0x1fc   : > { %2200 = vmatmul.msk.f32.gmra.mxu2 %vm455_vm1, %v448_v23  ;;  %2070 = vmatmul.msk.f32.gmra.mxu0 %vm455_vm1, %v448_v23 }
 0x1fd   : > { %v1801_v28 = vadd.f32 %v3035_v10, %v1733_v25  ;;  %2265 = vmatmul.msk.f32.gmra.mxu3 %vm455_vm1, %v384_v24  ;;  %2135 = vmatmul.msk.f32.gmra.mxu1 %vm455_vm1, %v384_v24 }
 0x1ff   : > { %1865 = vst.msk [vmem:[%s2727_s11 + $0x150] sm:$0xff] %vm455_vm1, %v1801_v28  ;;  %v1416_v30 = vpop.f32.mrf.mxu2 }
 0x200   : > { %v1628_v31 = vpop.f32.mrf.mxu3 }
 0x201   : > { %v1629_v32 = vadd.f32 %v1628_v31, %v1416_v30  ;;  %v801_v36 = vpop.f32.mrf.mxu0 }
 0x202   : > { %v1205_v37 = vpop.f32.mrf.mxu1 }
 0x203   : > { %v1734_v35 = vmax.f32 %v1203_v29, %v1629_v32  ;;  %v1206_v39 = vadd.f32 %v1205_v37, %v801_v36 }
 0x204   : > { %2201 = vmatmul.msk.f32.gmra.mxu2 %vm455_vm1, %v449_v33  ;;  %2071 = vmatmul.msk.f32.gmra.mxu0 %vm455_vm1, %v449_v33 }
 0x205   : > { %v1802_v38 = vadd.f32 %v3035_v10, %v1734_v35  ;;  %2266 = vmatmul.msk.f32.gmra.mxu3 %vm455_vm1, %v385_v34  ;;  %2136 = vmatmul.msk.f32.gmra.mxu1 %vm455_vm1, %v385_v34 }
 0x207   : > { %1866 = vst.msk [vmem:[%s2727_s11 + $0x158] sm:$0xff] %vm455_vm1, %v1802_v38  ;;  %v1419_v40 = vpop.f32.mrf.mxu2 }
 0x208   : > { %v1631_v41 = vpop.f32.mrf.mxu3 }
 0x209   : > { %v1632_v42 = vadd.f32 %v1631_v41, %v1419_v40  ;;  %v804_v47 = vpop.f32.mrf.mxu0 }
 0x20a   : > { %v1208_v48 = vpop.f32.mrf.mxu1 }
 0x20b   : > { %v1735_v46 = vmax.f32 %v1206_v39, %v1632_v42  ;;  %v1209_v50 = vadd.f32 %v1208_v48, %v804_v47 }
 0x20c   : > { %2202 = vmatmul.msk.f32.gmra.mxu2 %vm455_vm1, %v450_v43  ;;  %2072 = vmatmul.msk.f32.gmra.mxu0 %vm455_vm1, %v450_v43 }
 0x20d   : > { %v1803_v49 = vadd.f32 %v3035_v10, %v1735_v46  ;;  %2267 = vmatmul.msk.f32.gmra.mxu3 %vm455_vm1, %v386_v45  ;;  %2137 = vmatmul.msk.f32.gmra.mxu1 %vm455_vm1, %v386_v45 }
 0x20f   : > { %1867 = vst.msk [vmem:[%s2727_s11 + $0x160] sm:$0xff] %vm455_vm1, %v1803_v49  ;;  %v1422_v51 = vpop.f32.mrf.mxu2 }
 0x210   : > { %v1634_v52 = vpop.f32.mrf.mxu3 }
 0x211   : > { %v1635_v53 = vadd.f32 %v1634_v52, %v1422_v51  ;;  %v807_v57 = vpop.f32.mrf.mxu0 }
 0x212   : > { %v1211_v58 = vpop.f32.mrf.mxu1 }
 0x213   : > { %v1736_v56 = vmax.f32 %v1209_v50, %v1635_v53  ;;  %v1212_v60 = vadd.f32 %v1211_v58, %v807_v57 }
 0x214   : > { %2203 = vmatmul.msk.f32.gmra.mxu2 %vm455_vm1, %v451_v54  ;;  %2073 = vmatmul.msk.f32.gmra.mxu0 %vm455_vm1, %v451_v54 }
 0x215   : > { %v1804_v59 = vadd.f32 %v3035_v10, %v1736_v56  ;;  %2268 = vmatmul.msk.f32.gmra.mxu3 %vm455_vm1, %v387_v55  ;;  %2138 = vmatmul.msk.f32.gmra.mxu1 %vm455_vm1, %v387_v55 }
 0x217   : > { %1868 = vst.msk [vmem:[%s2727_s11 + $0x168] sm:$0xff] %vm455_vm1, %v1804_v59  ;;  %v1425_v61 = vpop.f32.mrf.mxu2 }
 0x218   : > { %v1637_v62 = vpop.f32.mrf.mxu3 }
 0x219   : > { %v1638_v63 = vadd.f32 %v1637_v62, %v1425_v61  ;;  %v810_v3 = vpop.f32.mrf.mxu0 }
 0x21a   : > { %v1214_v4 = vpop.f32.mrf.mxu1 }
 0x21b   : > { %v1737_v2 = vmax.f32 %v1212_v60, %v1638_v63  ;;  %v1215_v6 = vadd.f32 %v1214_v4, %v810_v3 }
 0x21c   : > { %2204 = vmatmul.msk.f32.gmra.mxu2 %vm455_vm1, %v452_v0  ;;  %2074 = vmatmul.msk.f32.gmra.mxu0 %vm455_vm1, %v452_v0 }
 0x21d   : > { %v1805_v5 = vadd.f32 %v3035_v10, %v1737_v2  ;;  %2269 = vmatmul.msk.f32.gmra.mxu3 %vm455_vm1, %v388_v1  ;;  %2139 = vmatmul.msk.f32.gmra.mxu1 %vm455_vm1, %v388_v1 }
 0x21f   : > { %1869 = vst.msk [vmem:[%s2727_s11 + $0x170] sm:$0xff] %vm455_vm1, %v1805_v5  ;;  %v1428_v7 = vpop.f32.mrf.mxu2 }
 0x220   : > { %v1640_v44 = vpop.f32.mrf.mxu3 }
 0x221   : > { %v1641_v8 = vadd.f32 %v1640_v44, %v1428_v7  ;;  %v813_v11 = vpop.f32.mrf.mxu0 }
 0x222   : > { %v1217_v12 = vpop.f32.mrf.mxu1 }
 0x223   : > { %v1738_v9 = vmax.f32 %v1215_v6, %v1641_v8  ;;  %v1218_v14 = vadd.f32 %v1217_v12, %v813_v11 }
 0x225   : > { %v1806_v13 = vadd.f32 %v3035_v10, %v1738_v9 }
 0x227   : > { %1870 = vst.msk [vmem:[%s2727_s11 + $0x178] sm:$0xff] %vm455_vm1, %v1806_v13  ;;  %v1431_v15 = vpop.f32.mrf.mxu2 }
 0x228   : > { %v1643_v16 = vpop.f32.mrf.mxu3 }
 0x229   : > { %v1644_v17 = vadd.f32 %v1643_v16, %v1431_v15  ;;  %v816_v19 = vpop.f32.mrf.mxu0 }
 0x22a   : > { %v1220_v20 = vpop.f32.mrf.mxu1 }
 0x22b   : > { %v1739_v18 = vmax.f32 %v1218_v14, %v1644_v17  ;;  %v1221_v22 = vadd.f32 %v1220_v20, %v816_v19 }
 0x22d   : > { %v1807_v21 = vadd.f32 %v3035_v10, %v1739_v18 }
 0x22f   : > { %1871 = vst.msk [vmem:[%s2727_s11 + $0x180] sm:$0xff] %vm455_vm1, %v1807_v21  ;;  %v1434_v23 = vpop.f32.mrf.mxu2 }
 0x230   : > { %v1646_v24 = vpop.f32.mrf.mxu3 }
 0x231   : > { %v1647_v25 = vadd.f32 %v1646_v24, %v1434_v23  ;;  %v819_v27 = vpop.f32.mrf.mxu0 }
 0x232   : > { %v1223_v28 = vpop.f32.mrf.mxu1 }
 0x233   : > { %v1740_v26 = vmax.f32 %v1221_v22, %v1647_v25  ;;  %v1224_v30 = vadd.f32 %v1223_v28, %v819_v27 }
 0x235   : > { %v1808_v29 = vadd.f32 %v3035_v10, %v1740_v26 }
 0x237   : > { %1872 = vst.msk [vmem:[%s2727_s11 + $0x188] sm:$0xff] %vm455_vm1, %v1808_v29  ;;  %v1437_v31 = vpop.f32.mrf.mxu2 }
 0x238   : > { %v1649_v32 = vpop.f32.mrf.mxu3 }
 0x239   : > { %v1650_v33 = vadd.f32 %v1649_v32, %v1437_v31  ;;  %v822_v35 = vpop.f32.mrf.mxu0 }
 0x23a   : > { %v1226_v36 = vpop.f32.mrf.mxu1 }
 0x23b   : > { %v1741_v34 = vmax.f32 %v1224_v30, %v1650_v33  ;;  %v1227_v38 = vadd.f32 %v1226_v36, %v822_v35 }
 0x23d   : > { %v1809_v37 = vadd.f32 %v3035_v10, %v1741_v34 }
 0x23f   : > { %1873 = vst.msk [vmem:[%s2727_s11 + $0x190] sm:$0xff] %vm455_vm1, %v1809_v37  ;;  %v1440_v39 = vpop.f32.mrf.mxu2 }
 0x240   : > { %v1652_v40 = vpop.f32.mrf.mxu3 }
 0x241   : > { %v1653_v41 = vadd.f32 %v1652_v40, %v1440_v39  ;;  %v825_v43 = vpop.f32.mrf.mxu0 }
 0x242   : > { %v1229_v45 = vpop.f32.mrf.mxu1 }
 0x243   : > { %v1742_v42 = vmax.f32 %v1227_v38, %v1653_v41  ;;  %v1230_v47 = vadd.f32 %v1229_v45, %v825_v43 }
 0x245   : > { %v1810_v46 = vadd.f32 %v3035_v10, %v1742_v42 }
 0x247   : > { %1874 = vst.msk [vmem:[%s2727_s11 + $0x198] sm:$0xff] %vm455_vm1, %v1810_v46  ;;  %v1443_v48 = vpop.f32.mrf.mxu2 }
 0x248   : > { %v1655_v49 = vpop.f32.mrf.mxu3 }
 0x249   : > { %v1656_v50 = vadd.f32 %v1655_v49, %v1443_v48  ;;  %v828_v52 = vpop.f32.mrf.mxu0 }
 0x24a   : > { %v1232_v53 = vpop.f32.mrf.mxu1 }
 0x24b   : > { %v1743_v51 = vmax.f32 %v1230_v47, %v1656_v50  ;;  %v1233_v55 = vadd.f32 %v1232_v53, %v828_v52 }
 0x24d   : > { %v1811_v54 = vadd.f32 %v3035_v10, %v1743_v51 }
 0x24f   : > { %1875 = vst.msk [vmem:[%s2727_s11 + $0x1a0] sm:$0xff] %vm455_vm1, %v1811_v54  ;;  %v1446_v56 = vpop.f32.mrf.mxu2 }
 0x250   : > { %v1658_v57 = vpop.f32.mrf.mxu3 }
 0x251   : > { %v1659_v58 = vadd.f32 %v1658_v57, %v1446_v56  ;;  %v831_v60 = vpop.f32.mrf.mxu0 }
 0x252   : > { %v1235_v61 = vpop.f32.mrf.mxu1 }
 0x253   : > { %v1744_v59 = vmax.f32 %v1233_v55, %v1659_v58  ;;  %v1236_v63 = vadd.f32 %v1235_v61, %v831_v60 }
 0x255   : > { %v1812_v62 = vadd.f32 %v3035_v10, %v1744_v59 }
 0x257   : > { %1876 = vst.msk [vmem:[%s2727_s11 + $0x1a8] sm:$0xff] %vm455_vm1, %v1812_v62  ;;  %v1449_v0 = vpop.f32.mrf.mxu2 }
 0x258   : > { %v1661_v1 = vpop.f32.mrf.mxu3 }
 0x259   : > { %v1662_v2 = vadd.f32 %v1661_v1, %v1449_v0  ;;  %v834_v4 = vpop.f32.mrf.mxu0 }
 0x25a   : > { %v1238_v5 = vpop.f32.mrf.mxu1 }
 0x25b   : > { %v1745_v3 = vmax.f32 %v1236_v63, %v1662_v2  ;;  %v1239_v7 = vadd.f32 %v1238_v5, %v834_v4 }
 0x25d   : > { %v1813_v6 = vadd.f32 %v3035_v10, %v1745_v3 }
 0x25f   : > { %1877 = vst.msk [vmem:[%s2727_s11 + $0x1b0] sm:$0xff] %vm455_vm1, %v1813_v6  ;;  %v1452_v44 = vpop.f32.mrf.mxu2 }
 0x260   : > { %v1664_v8 = vpop.f32.mrf.mxu3 }
 0x261   : > { %v1665_v9 = vadd.f32 %v1664_v8, %v1452_v44  ;;  %v837_v12 = vpop.f32.mrf.mxu0 }
 0x262   : > { %v1241_v13 = vpop.f32.mrf.mxu1 }
 0x263   : > { %v1746_v11 = vmax.f32 %v1239_v7, %v1665_v9  ;;  %v1242_v15 = vadd.f32 %v1241_v13, %v837_v12 }
 0x265   : > { %v1814_v14 = vadd.f32 %v3035_v10, %v1746_v11 }
 0x267   : > { %1878 = vst.msk [vmem:[%s2727_s11 + $0x1b8] sm:$0xff] %vm455_vm1, %v1814_v14  ;;  %v1455_v16 = vpop.f32.mrf.mxu2 }
 0x268   : > { %v1667_v17 = vpop.f32.mrf.mxu3 }
 0x269   : > { %v1668_v18 = vadd.f32 %v1667_v17, %v1455_v16  ;;  %v840_v20 = vpop.f32.mrf.mxu0 }
 0x26a   : > { %v1244_v21 = vpop.f32.mrf.mxu1 }
 0x26b   : > { %v1747_v19 = vmax.f32 %v1242_v15, %v1668_v18  ;;  %v1245_v23 = vadd.f32 %v1244_v21, %v840_v20 }
 0x26d   : > { %v1815_v22 = vadd.f32 %v3035_v10, %v1747_v19 }
 0x26f   : > { %1879 = vst.msk [vmem:[%s2727_s11 + $0x1c0] sm:$0xff] %vm455_vm1, %v1815_v22  ;;  %v1458_v24 = vpop.f32.mrf.mxu2 }
 0x270   : > { %v1670_v25 = vpop.f32.mrf.mxu3 }
 0x271   : > { %v1671_v26 = vadd.f32 %v1670_v25, %v1458_v24  ;;  %v843_v28 = vpop.f32.mrf.mxu0 }
 0x272   : > { %v1247_v29 = vpop.f32.mrf.mxu1 }
 0x273   : > { %v1748_v27 = vmax.f32 %v1245_v23, %v1671_v26  ;;  %v1248_v31 = vadd.f32 %v1247_v29, %v843_v28 }
 0x275   : > { %v1816_v30 = vadd.f32 %v3035_v10, %v1748_v27 }
 0x277   : > { %1880 = vst.msk [vmem:[%s2727_s11 + $0x1c8] sm:$0xff] %vm455_vm1, %v1816_v30  ;;  %v1461_v32 = vpop.f32.mrf.mxu2 }
 0x278   : > { %v1673_v33 = vpop.f32.mrf.mxu3 }
 0x279   : > { %v1674_v34 = vadd.f32 %v1673_v33, %v1461_v32  ;;  %v846_v36 = vpop.f32.mrf.mxu0 }
 0x27a   : > { %v1250_v37 = vpop.f32.mrf.mxu1 }
 0x27b   : > { %v1749_v35 = vmax.f32 %v1248_v31, %v1674_v34  ;;  %v1251_v39 = vadd.f32 %v1250_v37, %v846_v36 }
 0x27d   : > { %v1817_v38 = vadd.f32 %v3035_v10, %v1749_v35 }
 0x27f   : > { %1881 = vst.msk [vmem:[%s2727_s11 + $0x1d0] sm:$0xff] %vm455_vm1, %v1817_v38  ;;  %v1464_v40 = vpop.f32.mrf.mxu2 }
 0x280   : > { %v1676_v41 = vpop.f32.mrf.mxu3 }
 0x281   : > { %v1677_v42 = vadd.f32 %v1676_v41, %v1464_v40  ;;  %v849_v45 = vpop.f32.mrf.mxu0 }
 0x282   : > { %v1253_v46 = vpop.f32.mrf.mxu1 }
 0x283   : > { %v1750_v43 = vmax.f32 %v1251_v39, %v1677_v42  ;;  %v1254_v48 = vadd.f32 %v1253_v46, %v849_v45 }
 0x285   : > { %v1818_v47 = vadd.f32 %v3035_v10, %v1750_v43 }
 0x287   : > { %1882 = vst.msk [vmem:[%s2727_s11 + $0x1d8] sm:$0xff] %vm455_vm1, %v1818_v47  ;;  %v1467_v49 = vpop.f32.mrf.mxu2 }
 0x288   : > { %v1679_v50 = vpop.f32.mrf.mxu3 }
 0x289   : > { %v1680_v51 = vadd.f32 %v1679_v50, %v1467_v49  ;;  %v852_v53 = vpop.f32.mrf.mxu0 }
 0x28a   : > { %v1256_v54 = vpop.f32.mrf.mxu1 }
 0x28b   : > { %v1751_v52 = vmax.f32 %v1254_v48, %v1680_v51  ;;  %v1257_v56 = vadd.f32 %v1256_v54, %v852_v53 }
 0x28d   : > { %v1819_v55 = vadd.f32 %v3035_v10, %v1751_v52 }
 0x28f   : > { %1883 = vst.msk [vmem:[%s2727_s11 + $0x1e0] sm:$0xff] %vm455_vm1, %v1819_v55  ;;  %v1470_v57 = vpop.f32.mrf.mxu2 }
 0x290   : > { %v1682_v58 = vpop.f32.mrf.mxu3 }
 0x291   : > { %v1683_v59 = vadd.f32 %v1682_v58, %v1470_v57  ;;  %v855_v61 = vpop.f32.mrf.mxu0 }
 0x292   : > { %v1259_v62 = vpop.f32.mrf.mxu1 }
 0x293   : > { %v1752_v60 = vmax.f32 %v1257_v56, %v1683_v59  ;;  %v1260_v0 = vadd.f32 %v1259_v62, %v855_v61 }
 0x295   : > { %v1820_v63 = vadd.f32 %v3035_v10, %v1752_v60 }
 0x297   : > { %1884 = vst.msk [vmem:[%s2727_s11 + $0x1e8] sm:$0xff] %vm455_vm1, %v1820_v63  ;;  %v1473_v1 = vpop.f32.mrf.mxu2 }
 0x298   : > { %v1685_v2 = vpop.f32.mrf.mxu3 }
 0x299   : > { %v1686_v3 = vadd.f32 %v1685_v2, %v1473_v1  ;;  %v858_v5 = vpop.f32.mrf.mxu0 }
 0x29a   : > { %v1262_v6 = vpop.f32.mrf.mxu1 }
 0x29b   : > { %v1753_v4 = vmax.f32 %v1260_v0, %v1686_v3  ;;  %v1263_v44 = vadd.f32 %v1262_v6, %v858_v5 }
 0x29d   : > { %v1821_v7 = vadd.f32 %v3035_v10, %v1753_v4 }
 0x29f   : > { %1885 = vst.msk [vmem:[%s2727_s11 + $0x1f0] sm:$0xff] %vm455_vm1, %v1821_v7  ;;  %v1476_v8 = vpop.f32.mrf.mxu2 }
 0x2a0   : > { %v1688_v9 = vpop.f32.mrf.mxu3 }
 0x2a1   : > { %v1689_v11 = vadd.f32 %v1688_v9, %v1476_v8 }
 0x2a3   : > { %v1754_v12 = vmax.f32 %v1263_v44, %v1689_v11 }
 0x2a5   : > { %v1822_v13 = vadd.f32 %v3035_v10, %v1754_v12 }
 0x2a7   : > { %1886 = vst.msk [vmem:[%s2727_s11 + $0x1f8] sm:$0xff] %vm455_vm1, %v1822_v13 }
 0x2a8 PF: > { %s19_s21 = sadd.s32 1, %s2503_s21  }
 0x2a9   : > { %p16_p7 = scmp.ge.s32.totalorder %s19_s21, 4  }
 0x2ab   :  { %18 = sbr.rel (!%p16_p7) target bundleno = 3 (0x3), region = 95 }
 0x2b0   :  { %1908 = vsyncpa [#allocation3], 1 }
 0x2b1   :  { %1910 = vsyncpa [#allocation3 + $0x1], 1 }
 0x2b2   :  { %1911 = vsyncpa [#allocation5], 1 }
 0x2b3   :  { %1912 = vsyncpa [#allocation8], 1 }

// kernel: bird_recognition_forward.6
= control target key start
LH: loop header
LB: loop body
LE: loop exit
PB: predicated region body
PF: predicated region fallthrough
CT: control target
= control target key end

     0   :  { %s569_s21 = smov 0   ;;  %s671_s0 = inlined_call_operand.vmem [shape: f32[2,33,32], index: 0, kind: input, shape index: {}]   ;;  %s672_s1 = inlined_call_operand.vmem [shape: f32[32,16], index: 1, kind: input, shape index: {}]   ;;  %s673_s2 = inlined_call_operand.vmem [shape: f32[32,16], index: 2, kind: input, shape index: {}]   ;;  %s674_s3 = inlined_call_operand.vmem [shape: f32[32,16], index: 3, kind: input, shape index: {}]   ;;  %s675_s4 = inlined_call_operand.vmem [shape: f32[32,16], index: 4, kind: input, shape index: {}]   ;;  %s676_s5 = inlined_call_operand.vmem [shape: f32[1,16], index: 5, kind: input, shape index: {}]   ;;  %s677_s6 = inlined_call_operand.vmem [shape: f32[2,32,16], index: 6, kind: output, shape index: {}]  }
   0x1 LB: > { %s489_s22 = sadd.s32 4294967295, %s532_s21   ;;  %p493_p0 = scmp.ge.s32.totalorder %s532_s21, 1  ;;  %s532_s21 = sphi %s569_s21, %s16_s21  }
   0x2   : > { %p212_p1 = scmp.lt.s32.totalorder %s532_s21, 3 }
   0x4   : > { %p213_p2 = pnand %p493_p0, %p212_p1 }
   0x5   : > { %p242_p3 = scmp.lt.s32.totalorder (!%p213_p2), %s489_s22, 1 }
   0x6   : > { %216 = sbr.rel (%p213_p2) target bundleno = 183 (0xb7), region = 44 }
   0xb   : > { %v358_v0 = vld [vmem:[%s675_s4 + $0x18] sm:$0xff]  ;;  %v357_v2 = vld [vmem:[%s675_s4 + $0x10] sm:$0xff]  ;;  %v356_v4 = vld [vmem:[%s675_s4 + $0x8] sm:$0xff]  ;;  %s679_s22 = smov (!%p242_p3, %s489_s22), 1  ;;  %vm268_vm0 = vcmask 261120   ;;  %vm429_vm1 = vcmask 130048  }
   0xc   : > { %v354_v1 = vld [vmem:[%s674_s3 + $0x18] sm:$0xff]  ;;  %371 = vmatpush.msra.mxu2 %v358_v0  ;;  %v353_v3 = vld [vmem:[%s674_s3 + $0x10] sm:$0xff]  ;;  %v352_v5 = vld [vmem:[%s674_s3 + $0x8] sm:$0xff]  ;;  %s516_s25 = smul.u32 40, %s679_s22  ;;  %s515_s13 = sshll.u32 %s679_s22, 5 }
   0xd   : > { %400 = vmatpush.msra.mxu3 %v354_v1  ;;  %v267_v6 = vld [vmem:[%s673_s2 + $0x18] sm:$0xff]  ;;  %v266_v8 = vld [vmem:[%s673_s2 + $0x10] sm:$0xff]  ;;  %v355_v10 = vld [vmem:[%s675_s4] sm:$0xff]  ;;  %s251_s18 = scalar_lea.vmem %s677_s6, %s515_s13 }
   0xe   : > { %v263_v7 = vld [vmem:[%s672_s1 + $0x18] sm:$0xff]  ;;  %372 = vmatpush.msra.mxu2 %v357_v2  ;;  %v262_v9 = vld [vmem:[%s672_s1 + $0x10] sm:$0xff]  ;;  %293 = vmatpush.msra.mxu0 %v267_v6  ;;  %v351_v11 = vld [vmem:[%s674_s3] sm:$0xff]  ;;  %s619_s28 = scalar_lea.vmem %s671_s0, %s516_s25 }
   0xf   : > { %401 = vmatpush.msra.mxu3 %v353_v3  ;;  %334 = vmatpush.msra.mxu1 %v263_v7  ;;  %v265_v12 = vld [vmem:[%s673_s2 + $0x8] sm:$0xff]  ;;  %v252_v15 = vld [vmem:[%s619_s28] sm:$0xff]  ;;  %v258_v20 = vld [vmem:[%s619_s28 + $0x11] sm:$0xff] }
  0x10   : > { %373 = vmatpush.msra.mxu2 %v356_v4  ;;  %294 = vmatpush.msra.mxu0 %v266_v8  ;;  %v261_v13 = vld [vmem:[%s672_s1 + $0x8] sm:$0xff]  ;;  %v264_v16 = vld [vmem:[%s673_s2] sm:$0xff]  ;;  %v254_v21 = vld [vmem:[%s619_s28 + $0x10] sm:$0xff] }
  0x11   : > { %402 = vmatpush.msra.mxu3 %v352_v5  ;;  %335 = vmatpush.msra.mxu1 %v262_v9  ;;  %v256_v14 = vld [vmem:[%s619_s28 + $0x1] sm:$0xff]  ;;  %v257_v18 = vld [vmem:[%s619_s28 + $0x9] sm:$0xff]  ;;  %v259_v22 = vld [vmem:[%s619_s28 + $0x19] sm:$0xff] }
  0x12   : > { %374 = vmatpush.msra.mxu2 %v355_v10  ;;  %v260_v17 = vld [vmem:[%s672_s1] sm:$0xff]  ;;  %295 = vmatpush.msra.mxu0 %v265_v12  ;;  %v253_v19 = vld [vmem:[%s619_s28 + $0x8] sm:$0xff]  ;;  %v255_v23 = vld [vmem:[%s619_s28 + $0x18] sm:$0xff] }
  0x13   : > { %403 = vmatpush.msra.mxu3 %v351_v11  ;;  %505 = vmatmul.msk.f32.vlgmr.msra.gmra.mxu2 %vm268_vm0, %v256_v14  ;;  %v525_v30 = vld [vmem:[%s676_s5] ss:$0 sm:$0xff] }
  0x14   : > { %509 = vmatmul.msk.f32.vlgmr.msra.gmra.mxu3 %vm268_vm0, %v252_v15  ;;  %336 = vmatpush.msra.mxu1 %v261_v13 }
  0x15   : > { %296 = vmatpush.msra.mxu0 %v264_v16 }
  0x16   : > { %337 = vmatpush.msra.mxu1 %v260_v17  ;;  %497 = vmatmul.msk.f32.vlgmr.msra.gmra.mxu0 %vm268_vm0, %v256_v14 }
  0x17   : > { %501 = vmatmul.msk.f32.vlgmr.msra.gmra.mxu1 %vm268_vm0, %v252_v15 }
  0x1b   : > { %506 = vmatmul.msk.f32.gmra.mxu2 %vm268_vm0, %v257_v18 }
  0x1c   : > { %510 = vmatmul.msk.f32.gmra.mxu3 %vm268_vm0, %v253_v19 }
  0x1e   : > { %498 = vmatmul.msk.f32.gmra.mxu0 %vm268_vm0, %v257_v18 }
  0x1f   : > { %502 = vmatmul.msk.f32.gmra.mxu1 %vm268_vm0, %v253_v19 }
  0x23   : > { %507 = vmatmul.msk.f32.gmra.mxu2 %vm268_vm0, %v258_v20 }
  0x24   : > { %511 = vmatmul.msk.f32.gmra.mxu3 %vm268_vm0, %v254_v21 }
  0x26   : > { %499 = vmatmul.msk.f32.gmra.mxu0 %vm268_vm0, %v258_v20 }
  0x27   : > { %503 = vmatmul.msk.f32.gmra.mxu1 %vm268_vm0, %v254_v21 }
  0x2b   : > { %508 = vmatmul.msk.f32.gmra.mxu2 %vm268_vm0, %v259_v22 }
  0x2c   : > { %512 = vmatmul.msk.f32.gmra.mxu3 %vm268_vm0, %v255_v23 }
  0x2e   : > { %500 = vmatmul.msk.f32.gmra.mxu0 %vm268_vm0, %v259_v22 }
  0x2f   : > { %504 = vmatmul.msk.f32.gmra.mxu1 %vm268_vm0, %v255_v23 }
  0x93   : > { %v298_v24 = vpop.f32.mrf.mxu0 }
  0x94   : > { %v339_v25 = vpop.f32.mrf.mxu1 }
  0x95   : > { %v340_v26 = vadd.f32 %v339_v25, %v298_v24 }
  0x96   : > { %v376_v27 = vpop.f32.mrf.mxu2 }
  0x97   : > { %v405_v28 = vpop.f32.mrf.mxu3 }
  0x98   : > { %v406_v29 = vadd.f32 %v405_v28, %v376_v27 }
  0x9a   : > { %v417_v31 = vmax.f32 %v340_v26, %v406_v29 }
  0x9b   : > { %v301_v33 = vpop.f32.mrf.mxu0 }
  0x9c   : > { %v425_v32 = vadd.f32 %v525_v30, %v417_v31  ;;  %v342_v34 = vpop.f32.mrf.mxu1 }
  0x9d   : > { %v343_v35 = vadd.f32 %v342_v34, %v301_v33 }
  0x9e   : > { %430 = vst.msk [vmem:[%s251_s18] sm:$0xff] %vm429_vm1, %v425_v32  ;;  %v379_v36 = vpop.f32.mrf.mxu2 }
  0x9f   : > { %v408_v37 = vpop.f32.mrf.mxu3 }
  0xa0   : > { %v409_v38 = vadd.f32 %v408_v37, %v379_v36 }
  0xa2   : > { %v418_v39 = vmax.f32 %v343_v35, %v409_v38 }
  0xa3   : > { %v304_v41 = vpop.f32.mrf.mxu0 }
  0xa4   : > { %v426_v40 = vadd.f32 %v525_v30, %v418_v39  ;;  %v345_v42 = vpop.f32.mrf.mxu1 }
  0xa5   : > { %v346_v43 = vadd.f32 %v345_v42, %v304_v41 }
  0xa6   : > { %431 = vst.msk [vmem:[%s251_s18 + $0x8] sm:$0xff] %vm429_vm1, %v426_v40  ;;  %v382_v44 = vpop.f32.mrf.mxu2 }
  0xa7   : > { %v411_v45 = vpop.f32.mrf.mxu3 }
  0xa8   : > { %v412_v46 = vadd.f32 %v411_v45, %v382_v44 }
  0xaa   : > { %v419_v47 = vmax.f32 %v346_v43, %v412_v46 }
  0xab   : > { %v307_v49 = vpop.f32.mrf.mxu0 }
  0xac   : > { %v427_v48 = vadd.f32 %v525_v30, %v419_v47  ;;  %v348_v50 = vpop.f32.mrf.mxu1 }
  0xad   : > { %v349_v51 = vadd.f32 %v348_v50, %v307_v49 }
  0xae   : > { %432 = vst.msk [vmem:[%s251_s18 + $0x10] sm:$0xff] %vm429_vm1, %v427_v48  ;;  %v385_v52 = vpop.f32.mrf.mxu2 }
  0xaf   : > { %v414_v53 = vpop.f32.mrf.mxu3 }
  0xb0   : > { %v415_v54 = vadd.f32 %v414_v53, %v385_v52 }
  0xb2   : > { %v420_v55 = vmax.f32 %v349_v51, %v415_v54 }
  0xb4   : > { %v428_v56 = vadd.f32 %v525_v30, %v420_v55 }
  0xb6   : > { %433 = vst.msk [vmem:[%s251_s18 + $0x18] sm:$0xff] %vm429_vm1, %v428_v56 }
  0xb7 PF: > { %s16_s21 = sadd.s32 1, %s532_s21  }
  0xb8   : > { %p13_p4 = scmp.ge.s32.totalorder %s16_s21, 4  }
  0xba   :  { %15 = sbr.rel (!%p13_p4) target bundleno = 1 (0x1), region = 74 }

// kernel: bird_recognition_forward.7
= control target key start
LH: loop header
LB: loop body
LE: loop exit
PB: predicated region body
PF: predicated region fallthrough
CT: control target
= control target key end

     0   :  { %9 = vsyncpa [#allocation3], 0  ;;  %s5314_s0 = inlined_call_operand.vmem [shape: f32[2,512], index: 0, kind: input, shape index: {}]   ;;  %s5315_s1 = inlined_call_operand.vmem [shape: f32[512,1024], index: 1, kind: input, shape index: {}]   ;;  %s5316_s2 = inlined_call_operand.hbm [shape: f32[256,1024], index: 2, kind: input, shape index: {}]   ;;  %s5317_s3 = inlined_call_operand.vmem [shape: f32[256,10], index: 3, kind: input, shape index: {}]   ;;  %s5318_s4 = inlined_call_operand.hbm [shape: f32[1,10], index: 4, kind: output, shape index: {}]  }
   0x1   :  { %10 = vsyncpa [#allocation4], 0  ;;  %s19_s17 = sshll.u32 %s5316_s2, 4  ;;  %s2775_s18 = smov [#allocation2]   ;;  %s20_s17 = int_to_ptr.hbm [resolvable:$true] %s19_s17 }
   0x2   :  { %s21_s19 = sshll.u32 %s2775_s18, 4  ;;  %s2776_s20 = smov 1024   ;;  %s22_s19 = int_to_ptr.vmem [resolvable:$true] %s21_s19 }
   0x3   :  { %s2777_s21 = smov 64  }
   0x4   :  { %27 = dma.hbm_to_vmem [thread:$0]  %s20_s17, 32768, %s22_s19, [#allocation3], %s2776_s20, %s2776_s20, %s2777_s21  }
   0x5   :  { %2771 = dma.done.wait [#allocation3], 32768  }
   0x6   :  { %2772 = vsyncadd [#allocation3], 4294934528  ;;  %v155_v0 = vld [vmem:[%s5315_s1 + $0x3c0] sm:$0xff]  ;;  %s2499_s26 = sshll.u32 %s5318_s4, 4  ;;  %s2500_s26 = int_to_ptr.hbm [resolvable:$true] %s2499_s26 }
   0x7   :  { %v283_v1 = vld [vmem:[%s5315_s1 + $0x7c0] sm:$0xff]  ;;  %557 = vmatpush.msra.mxu0 %v155_v0  ;;  %v156_v0 = vld [vmem:[%s5315_s1 + $0x3c8] sm:$0xff] }
   0x8   :  { %v411_v2 = vld [vmem:[%s5315_s1 + $0xbc0] sm:$0xff]  ;;  %577 = vmatpush.msra.mxu1 %v283_v1  ;;  %v284_v1 = vld [vmem:[%s5315_s1 + $0x7c8] sm:$0xff] }
   0x9   :  { %v539_v3 = vld [vmem:[%s5315_s1 + $0xfc0] sm:$0xff]  ;;  %597 = vmatpush.msra.mxu2 %v411_v2  ;;  %v412_v2 = vld [vmem:[%s5315_s1 + $0xbc8] sm:$0xff] }
   0xa   :  { %v147_v4 = vld [vmem:[%s5315_s1 + $0x380] sm:$0xff]  ;;  %617 = vmatpush.msra.mxu3 %v539_v3  ;;  %v540_v3 = vld [vmem:[%s5315_s1 + $0xfc8] sm:$0xff] }
   0xb   :  { %v275_v5 = vld [vmem:[%s5315_s1 + $0x780] sm:$0xff]  ;;  %558 = vmatpush.msra.mxu0 %v147_v4  ;;  %v148_v4 = vld [vmem:[%s5315_s1 + $0x388] sm:$0xff] }
   0xc   :  { %v403_v6 = vld [vmem:[%s5315_s1 + $0xb80] sm:$0xff]  ;;  %578 = vmatpush.msra.mxu1 %v275_v5  ;;  %v276_v5 = vld [vmem:[%s5315_s1 + $0x788] sm:$0xff] }
   0xd   :  { %v531_v7 = vld [vmem:[%s5315_s1 + $0xf80] sm:$0xff]  ;;  %598 = vmatpush.msra.mxu2 %v403_v6  ;;  %v404_v6 = vld [vmem:[%s5315_s1 + $0xb88] sm:$0xff] }
   0xe   :  { %v139_v8 = vld [vmem:[%s5315_s1 + $0x340] sm:$0xff]  ;;  %618 = vmatpush.msra.mxu3 %v531_v7  ;;  %v532_v7 = vld [vmem:[%s5315_s1 + $0xf88] sm:$0xff] }
   0xf   :  { %v267_v9 = vld [vmem:[%s5315_s1 + $0x740] sm:$0xff]  ;;  %559 = vmatpush.msra.mxu0 %v139_v8  ;;  %v140_v8 = vld [vmem:[%s5315_s1 + $0x348] sm:$0xff] }
  0x10   :  { %v395_v10 = vld [vmem:[%s5315_s1 + $0xb40] sm:$0xff]  ;;  %579 = vmatpush.msra.mxu1 %v267_v9  ;;  %v268_v9 = vld [vmem:[%s5315_s1 + $0x748] sm:$0xff] }
  0x11   :  { %v523_v11 = vld [vmem:[%s5315_s1 + $0xf40] sm:$0xff]  ;;  %599 = vmatpush.msra.mxu2 %v395_v10  ;;  %v396_v10 = vld [vmem:[%s5315_s1 + $0xb48] sm:$0xff] }
  0x12   :  { %v131_v12 = vld [vmem:[%s5315_s1 + $0x300] sm:$0xff]  ;;  %619 = vmatpush.msra.mxu3 %v523_v11  ;;  %v524_v11 = vld [vmem:[%s5315_s1 + $0xf48] sm:$0xff] }
  0x13   :  { %v259_v13 = vld [vmem:[%s5315_s1 + $0x700] sm:$0xff]  ;;  %560 = vmatpush.msra.mxu0 %v131_v12  ;;  %v132_v12 = vld [vmem:[%s5315_s1 + $0x308] sm:$0xff] }
  0x14   :  { %v387_v14 = vld [vmem:[%s5315_s1 + $0xb00] sm:$0xff]  ;;  %580 = vmatpush.msra.mxu1 %v259_v13  ;;  %v260_v13 = vld [vmem:[%s5315_s1 + $0x708] sm:$0xff] }
  0x15   :  { %v515_v15 = vld [vmem:[%s5315_s1 + $0xf00] sm:$0xff]  ;;  %600 = vmatpush.msra.mxu2 %v387_v14  ;;  %v388_v14 = vld [vmem:[%s5315_s1 + $0xb08] sm:$0xff] }
  0x16   :  { %v123_v16 = vld [vmem:[%s5315_s1 + $0x2c0] sm:$0xff]  ;;  %620 = vmatpush.msra.mxu3 %v515_v15  ;;  %v516_v15 = vld [vmem:[%s5315_s1 + $0xf08] sm:$0xff] }
  0x17   :  { %v251_v17 = vld [vmem:[%s5315_s1 + $0x6c0] sm:$0xff]  ;;  %561 = vmatpush.msra.mxu0 %v123_v16  ;;  %v124_v16 = vld [vmem:[%s5315_s1 + $0x2c8] sm:$0xff] }
  0x18   :  { %v379_v18 = vld [vmem:[%s5315_s1 + $0xac0] sm:$0xff]  ;;  %581 = vmatpush.msra.mxu1 %v251_v17  ;;  %v252_v17 = vld [vmem:[%s5315_s1 + $0x6c8] sm:$0xff] }
  0x19   :  { %v507_v19 = vld [vmem:[%s5315_s1 + $0xec0] sm:$0xff]  ;;  %601 = vmatpush.msra.mxu2 %v379_v18  ;;  %v380_v18 = vld [vmem:[%s5315_s1 + $0xac8] sm:$0xff] }
  0x1a   :  { %v115_v20 = vld [vmem:[%s5315_s1 + $0x280] sm:$0xff]  ;;  %621 = vmatpush.msra.mxu3 %v507_v19  ;;  %v508_v19 = vld [vmem:[%s5315_s1 + $0xec8] sm:$0xff] }
  0x1b   :  { %v243_v21 = vld [vmem:[%s5315_s1 + $0x680] sm:$0xff]  ;;  %562 = vmatpush.msra.mxu0 %v115_v20  ;;  %v116_v20 = vld [vmem:[%s5315_s1 + $0x288] sm:$0xff] }
  0x1c   :  { %v371_v22 = vld [vmem:[%s5315_s1 + $0xa80] sm:$0xff]  ;;  %582 = vmatpush.msra.mxu1 %v243_v21  ;;  %v244_v21 = vld [vmem:[%s5315_s1 + $0x688] sm:$0xff] }
  0x1d   :  { %v499_v23 = vld [vmem:[%s5315_s1 + $0xe80] sm:$0xff]  ;;  %602 = vmatpush.msra.mxu2 %v371_v22  ;;  %v372_v22 = vld [vmem:[%s5315_s1 + $0xa88] sm:$0xff] }
  0x1e   :  { %v107_v24 = vld [vmem:[%s5315_s1 + $0x240] sm:$0xff]  ;;  %622 = vmatpush.msra.mxu3 %v499_v23  ;;  %v500_v23 = vld [vmem:[%s5315_s1 + $0xe88] sm:$0xff] }
  0x1f   :  { %v235_v25 = vld [vmem:[%s5315_s1 + $0x640] sm:$0xff]  ;;  %563 = vmatpush.msra.mxu0 %v107_v24 }
  0x20   :  { %v363_v26 = vld [vmem:[%s5315_s1 + $0xa40] sm:$0xff]  ;;  %583 = vmatpush.msra.mxu1 %v235_v25  ;;  %v108_v25 = vld [vmem:[%s5315_s1 + $0x248] sm:$0xff] }
  0x21   :  { %v491_v27 = vld [vmem:[%s5315_s1 + $0xe40] sm:$0xff]  ;;  %603 = vmatpush.msra.mxu2 %v363_v26  ;;  %v236_v26 = vld [vmem:[%s5315_s1 + $0x648] sm:$0xff] }
  0x22   :  { %v99_v28 = vld [vmem:[%s5315_s1 + $0x200] sm:$0xff]  ;;  %623 = vmatpush.msra.mxu3 %v491_v27  ;;  %v364_v27 = vld [vmem:[%s5315_s1 + $0xa48] sm:$0xff] }
  0x23   :  { %v227_v29 = vld [vmem:[%s5315_s1 + $0x600] sm:$0xff]  ;;  %564 = vmatpush.msra.mxu0 %v99_v28  ;;  %v492_v28 = vld [vmem:[%s5315_s1 + $0xe48] sm:$0xff] }
  0x24   :  { %v355_v30 = vld [vmem:[%s5315_s1 + $0xa00] sm:$0xff]  ;;  %584 = vmatpush.msra.mxu1 %v227_v29  ;;  %v100_v29 = vld [vmem:[%s5315_s1 + $0x208] sm:$0xff] }
  0x25   :  { %v483_v31 = vld [vmem:[%s5315_s1 + $0xe00] sm:$0xff]  ;;  %604 = vmatpush.msra.mxu2 %v355_v30  ;;  %v228_v30 = vld [vmem:[%s5315_s1 + $0x608] sm:$0xff] }
  0x26   :  { %v91_v32 = vld [vmem:[%s5315_s1 + $0x1c0] sm:$0xff]  ;;  %624 = vmatpush.msra.mxu3 %v483_v31  ;;  %v356_v31 = vld [vmem:[%s5315_s1 + $0xa08] sm:$0xff] }
  0x27   :  { %v219_v33 = vld [vmem:[%s5315_s1 + $0x5c0] sm:$0xff]  ;;  %565 = vmatpush.msra.mxu0 %v91_v32  ;;  %v484_v32 = vld [vmem:[%s5315_s1 + $0xe08] sm:$0xff] }
  0x28   :  { %v347_v34 = vld [vmem:[%s5315_s1 + $0x9c0] sm:$0xff]  ;;  %585 = vmatpush.msra.mxu1 %v219_v33  ;;  %v92_v33 = vld [vmem:[%s5315_s1 + $0x1c8] sm:$0xff] }
  0x29   :  { %v475_v35 = vld [vmem:[%s5315_s1 + $0xdc0] sm:$0xff]  ;;  %605 = vmatpush.msra.mxu2 %v347_v34  ;;  %v220_v34 = vld [vmem:[%s5315_s1 + $0x5c8] sm:$0xff] }
  0x2a   :  { %v83_v36 = vld [vmem:[%s5315_s1 + $0x180] sm:$0xff]  ;;  %625 = vmatpush.msra.mxu3 %v475_v35  ;;  %v348_v35 = vld [vmem:[%s5315_s1 + $0x9c8] sm:$0xff] }
  0x2b   :  { %v211_v37 = vld [vmem:[%s5315_s1 + $0x580] sm:$0xff]  ;;  %566 = vmatpush.msra.mxu0 %v83_v36  ;;  %v476_v36 = vld [vmem:[%s5315_s1 + $0xdc8] sm:$0xff] }
  0x2c   :  { %v339_v38 = vld [vmem:[%s5315_s1 + $0x980] sm:$0xff]  ;;  %586 = vmatpush.msra.mxu1 %v211_v37  ;;  %v84_v37 = vld [vmem:[%s5315_s1 + $0x188] sm:$0xff] }
  0x2d   :  { %v467_v39 = vld [vmem:[%s5315_s1 + $0xd80] sm:$0xff]  ;;  %606 = vmatpush.msra.mxu2 %v339_v38  ;;  %v212_v38 = vld [vmem:[%s5315_s1 + $0x588] sm:$0xff] }
  0x2e   :  { %v75_v40 = vld [vmem:[%s5315_s1 + $0x140] sm:$0xff]  ;;  %626 = vmatpush.msra.mxu3 %v467_v39  ;;  %v340_v39 = vld [vmem:[%s5315_s1 + $0x988] sm:$0xff] }
  0x2f   :  { %v203_v41 = vld [vmem:[%s5315_s1 + $0x540] sm:$0xff]  ;;  %567 = vmatpush.msra.mxu0 %v75_v40  ;;  %v468_v40 = vld [vmem:[%s5315_s1 + $0xd88] sm:$0xff] }
  0x30   :  { %v331_v42 = vld [vmem:[%s5315_s1 + $0x940] sm:$0xff]  ;;  %587 = vmatpush.msra.mxu1 %v203_v41  ;;  %v76_v41 = vld [vmem:[%s5315_s1 + $0x148] sm:$0xff] }
  0x31   :  { %v459_v43 = vld [vmem:[%s5315_s1 + $0xd40] sm:$0xff]  ;;  %607 = vmatpush.msra.mxu2 %v331_v42  ;;  %v204_v42 = vld [vmem:[%s5315_s1 + $0x548] sm:$0xff] }
  0x32   :  { %v67_v44 = vld [vmem:[%s5315_s1 + $0x100] sm:$0xff]  ;;  %627 = vmatpush.msra.mxu3 %v459_v43  ;;  %v332_v43 = vld [vmem:[%s5315_s1 + $0x948] sm:$0xff] }
  0x33   :  { %v195_v45 = vld [vmem:[%s5315_s1 + $0x500] sm:$0xff]  ;;  %568 = vmatpush.msra.mxu0 %v67_v44  ;;  %v460_v44 = vld [vmem:[%s5315_s1 + $0xd48] sm:$0xff] }
  0x34   :  { %v323_v46 = vld [vmem:[%s5315_s1 + $0x900] sm:$0xff]  ;;  %588 = vmatpush.msra.mxu1 %v195_v45  ;;  %v68_v45 = vld [vmem:[%s5315_s1 + $0x108] sm:$0xff] }
  0x35   :  { %v451_v47 = vld [vmem:[%s5315_s1 + $0xd00] sm:$0xff]  ;;  %608 = vmatpush.msra.mxu2 %v323_v46  ;;  %v196_v46 = vld [vmem:[%s5315_s1 + $0x508] sm:$0xff] }
  0x36   :  { %v59_v48 = vld [vmem:[%s5315_s1 + $0xc0] sm:$0xff]  ;;  %628 = vmatpush.msra.mxu3 %v451_v47  ;;  %v324_v47 = vld [vmem:[%s5315_s1 + $0x908] sm:$0xff] }
  0x37   :  { %v187_v49 = vld [vmem:[%s5315_s1 + $0x4c0] sm:$0xff]  ;;  %569 = vmatpush.msra.mxu0 %v59_v48  ;;  %v452_v48 = vld [vmem:[%s5315_s1 + $0xd08] sm:$0xff] }
  0x38   :  { %v315_v50 = vld [vmem:[%s5315_s1 + $0x8c0] sm:$0xff]  ;;  %589 = vmatpush.msra.mxu1 %v187_v49  ;;  %v60_v49 = vld [vmem:[%s5315_s1 + $0xc8] sm:$0xff] }
  0x39   :  { %v443_v51 = vld [vmem:[%s5315_s1 + $0xcc0] sm:$0xff]  ;;  %609 = vmatpush.msra.mxu2 %v315_v50  ;;  %v188_v50 = vld [vmem:[%s5315_s1 + $0x4c8] sm:$0xff] }
  0x3a   :  { %v51_v52 = vld [vmem:[%s5315_s1 + $0x80] sm:$0xff]  ;;  %629 = vmatpush.msra.mxu3 %v443_v51  ;;  %v316_v51 = vld [vmem:[%s5315_s1 + $0x8c8] sm:$0xff] }
  0x3b   :  { %v179_v53 = vld [vmem:[%s5315_s1 + $0x480] sm:$0xff]  ;;  %570 = vmatpush.msra.mxu0 %v51_v52  ;;  %v444_v52 = vld [vmem:[%s5315_s1 + $0xcc8] sm:$0xff] }
  0x3c   :  { %v307_v54 = vld [vmem:[%s5315_s1 + $0x880] sm:$0xff]  ;;  %590 = vmatpush.msra.mxu1 %v179_v53  ;;  %v52_v53 = vld [vmem:[%s5315_s1 + $0x88] sm:$0xff] }
  0x3d   :  { %v435_v55 = vld [vmem:[%s5315_s1 + $0xc80] sm:$0xff]  ;;  %610 = vmatpush.msra.mxu2 %v307_v54  ;;  %v180_v54 = vld [vmem:[%s5315_s1 + $0x488] sm:$0xff] }
  0x3e   :  { %v43_v56 = vld [vmem:[%s5315_s1 + $0x40] sm:$0xff]  ;;  %630 = vmatpush.msra.mxu3 %v435_v55  ;;  %v308_v55 = vld [vmem:[%s5315_s1 + $0x888] sm:$0xff] }
  0x3f   :  { %v171_v57 = vld [vmem:[%s5315_s1 + $0x440] sm:$0xff]  ;;  %571 = vmatpush.msra.mxu0 %v43_v56  ;;  %v436_v56 = vld [vmem:[%s5315_s1 + $0xc88] sm:$0xff] }
  0x40   :  { %v299_v58 = vld [vmem:[%s5315_s1 + $0x840] sm:$0xff]  ;;  %591 = vmatpush.msra.mxu1 %v171_v57  ;;  %v44_v57 = vld [vmem:[%s5315_s1 + $0x48] sm:$0xff] }
  0x41   :  { %v427_v59 = vld [vmem:[%s5315_s1 + $0xc40] sm:$0xff]  ;;  %611 = vmatpush.msra.mxu2 %v299_v58  ;;  %v172_v58 = vld [vmem:[%s5315_s1 + $0x448] sm:$0xff] }
  0x42   :  { %v35_v60 = vld [vmem:[%s5315_s1] sm:$0xff]  ;;  %631 = vmatpush.msra.mxu3 %v427_v59  ;;  %v300_v59 = vld [vmem:[%s5315_s1 + $0x848] sm:$0xff] }
  0x43   :  { %v163_v61 = vld [vmem:[%s5315_s1 + $0x400] sm:$0xff]  ;;  %572 = vmatpush.msra.mxu0 %v35_v60  ;;  %v428_v60 = vld [vmem:[%s5315_s1 + $0xc48] sm:$0xff] }
  0x44   :  { %v291_v62 = vld [vmem:[%s5315_s1 + $0x800] sm:$0xff]  ;;  %592 = vmatpush.msra.mxu1 %v163_v61 }
  0x45   :  { %v419_v63 = vld [vmem:[%s5315_s1 + $0xc00] sm:$0xff]  ;;  %612 = vmatpush.msra.mxu2 %v291_v62  ;;  %637 = vmatpush.msrb.mxu0 %v156_v0  ;;  %v36_v62 = vld [vmem:[%s5315_s1 + $0x8] sm:$0xff] }
  0x46   :  { %632 = vmatpush.msra.mxu3 %v419_v63  ;;  %657 = vmatpush.msrb.mxu1 %v284_v1  ;;  %v34_v24 = vld [vmem:[%s5314_s0] sm:$0xff]  ;;  %v164_v63 = vld [vmem:[%s5315_s1 + $0x408] sm:$0xff] }
  0x47   :  { %677 = vmatpush.msrb.mxu2 %v412_v2  ;;  %638 = vmatpush.msrb.mxu0 %v148_v4  ;;  %548 = vst [vmem:[#allocation1] ss:$4 sm:$0xff] %v34_v24  ;;  %v292_v0 = vld [vmem:[%s5315_s1 + $0x808] sm:$0xff]  ;;  %v509_v24 = vld [vmem:[%s5315_s1 + $0xed0] sm:$0xff] }
  0x48   :  { %697 = vmatpush.msrb.mxu3 %v540_v3  ;;  %658 = vmatpush.msrb.mxu1 %v276_v5  ;;  %v420_v1 = vld [vmem:[%s5315_s1 + $0xc08] sm:$0xff]  ;;  %v157_v5 = vld [vmem:[%s5315_s1 + $0x3d0] sm:$0xff] }
  0x49   :  { %678 = vmatpush.msrb.mxu2 %v404_v6  ;;  %639 = vmatpush.msrb.mxu0 %v140_v8  ;;  %v285_v6 = vld [vmem:[%s5315_s1 + $0x7d0] sm:$0xff] }
  0x4a   :  { %698 = vmatpush.msrb.mxu3 %v532_v7  ;;  %659 = vmatpush.msrb.mxu1 %v268_v9  ;;  %v413_v7 = vld [vmem:[%s5315_s1 + $0xbd0] sm:$0xff] }
  0x4b   :  { %679 = vmatpush.msrb.mxu2 %v396_v10  ;;  %640 = vmatpush.msrb.mxu0 %v132_v12  ;;  %v541_v8 = vld [vmem:[%s5315_s1 + $0xfd0] sm:$0xff] }
  0x4c   :  { %699 = vmatpush.msrb.mxu3 %v524_v11  ;;  %660 = vmatpush.msrb.mxu1 %v260_v13  ;;  %v149_v9 = vld [vmem:[%s5315_s1 + $0x390] sm:$0xff] }
  0x4d   :  { %680 = vmatpush.msrb.mxu2 %v388_v14  ;;  %641 = vmatpush.msrb.mxu0 %v124_v16  ;;  %v277_v10 = vld [vmem:[%s5315_s1 + $0x790] sm:$0xff] }
  0x4e   :  { %700 = vmatpush.msrb.mxu3 %v516_v15  ;;  %661 = vmatpush.msrb.mxu1 %v252_v17  ;;  %v3183_v61 = vld.sshfl [vmem:[#allocation1 + $0x10] sm:$0xff pattern:$0x73625140]  ;;  %v3197_v2 = vld.sshfl [vmem:[#allocation1] sm:$0xff pattern:$0x73625140] }
  0x4f   :  { %681 = vmatpush.msrb.mxu2 %v380_v18  ;;  %642 = vmatpush.msrb.mxu0 %v116_v20  ;;  %v3200_v3 = vld.sshfl [vmem:[#allocation1 + $0x8] sm:$0xff pattern:$0x73625140]  ;;  %v3202_v4 = vld.sshfl [vmem:[#allocation1 + $0x18] sm:$0xff pattern:$0x73625140] }
  0x50   :  { %701 = vmatpush.msrb.mxu3 %v508_v19  ;;  %662 = vmatpush.msrb.mxu1 %v244_v21  ;;  %v405_v11 = vld [vmem:[%s5315_s1 + $0xb90] sm:$0xff] }
  0x51   :  { %682 = vmatpush.msrb.mxu2 %v372_v22  ;;  %643 = vmatpush.msrb.mxu0 %v108_v25  ;;  %v533_v12 = vld [vmem:[%s5315_s1 + $0xf90] sm:$0xff] }
  0x52   :  { %702 = vmatpush.msrb.mxu3 %v500_v23  ;;  %663 = vmatpush.msrb.mxu1 %v236_v26  ;;  %v141_v13 = vld [vmem:[%s5315_s1 + $0x350] sm:$0xff] }
  0x53   :  { %683 = vmatpush.msrb.mxu2 %v364_v27  ;;  %644 = vmatpush.msrb.mxu0 %v100_v29  ;;  %v269_v14 = vld [vmem:[%s5315_s1 + $0x750] sm:$0xff] }
  0x54   :  { %703 = vmatpush.msrb.mxu3 %v492_v28  ;;  %664 = vmatpush.msrb.mxu1 %v228_v30  ;;  %v397_v15 = vld [vmem:[%s5315_s1 + $0xb50] sm:$0xff] }
  0x55   :  { %684 = vmatpush.msrb.mxu2 %v356_v31  ;;  %645 = vmatpush.msrb.mxu0 %v92_v33  ;;  %v525_v16 = vld [vmem:[%s5315_s1 + $0xf50] sm:$0xff] }
  0x56   :  { %704 = vmatpush.msrb.mxu3 %v484_v32  ;;  %665 = vmatpush.msrb.mxu1 %v220_v34  ;;  %v133_v17 = vld [vmem:[%s5315_s1 + $0x310] sm:$0xff] }
  0x57   :  { %685 = vmatpush.msrb.mxu2 %v348_v35  ;;  %646 = vmatpush.msrb.mxu0 %v84_v37  ;;  %v261_v18 = vld [vmem:[%s5315_s1 + $0x710] sm:$0xff] }
  0x58   :  { %705 = vmatpush.msrb.mxu3 %v476_v36  ;;  %666 = vmatpush.msrb.mxu1 %v212_v38  ;;  %v389_v19 = vld [vmem:[%s5315_s1 + $0xb10] sm:$0xff] }
  0x59   :  { %686 = vmatpush.msrb.mxu2 %v340_v39  ;;  %647 = vmatpush.msrb.mxu0 %v76_v41  ;;  %v517_v20 = vld [vmem:[%s5315_s1 + $0xf10] sm:$0xff] }
  0x5a   :  { %706 = vmatpush.msrb.mxu3 %v468_v40  ;;  %667 = vmatpush.msrb.mxu1 %v204_v42  ;;  %v125_v21 = vld [vmem:[%s5315_s1 + $0x2d0] sm:$0xff] }
  0x5b   :  { %687 = vmatpush.msrb.mxu2 %v332_v43  ;;  %648 = vmatpush.msrb.mxu0 %v68_v45  ;;  %v253_v22 = vld [vmem:[%s5315_s1 + $0x6d0] sm:$0xff] }
  0x5c   :  { %707 = vmatpush.msrb.mxu3 %v460_v44  ;;  %668 = vmatpush.msrb.mxu1 %v196_v46  ;;  %v381_v23 = vld [vmem:[%s5315_s1 + $0xad0] sm:$0xff] }
  0x5d   :  { %688 = vmatpush.msrb.mxu2 %v324_v47  ;;  %649 = vmatpush.msrb.mxu0 %v60_v49  ;;  %v117_v25 = vld [vmem:[%s5315_s1 + $0x290] sm:$0xff] }
  0x5e   :  { %708 = vmatpush.msrb.mxu3 %v452_v48  ;;  %669 = vmatpush.msrb.mxu1 %v188_v50  ;;  %v245_v26 = vld [vmem:[%s5315_s1 + $0x690] sm:$0xff] }
  0x5f   :  { %689 = vmatpush.msrb.mxu2 %v316_v51  ;;  %650 = vmatpush.msrb.mxu0 %v52_v53  ;;  %v373_v27 = vld [vmem:[%s5315_s1 + $0xa90] sm:$0xff] }
  0x60   :  { %709 = vmatpush.msrb.mxu3 %v444_v52  ;;  %670 = vmatpush.msrb.mxu1 %v180_v54  ;;  %v501_v28 = vld [vmem:[%s5315_s1 + $0xe90] sm:$0xff] }
  0x61   :  { %690 = vmatpush.msrb.mxu2 %v308_v55  ;;  %651 = vmatpush.msrb.mxu0 %v44_v57  ;;  %v109_v29 = vld [vmem:[%s5315_s1 + $0x250] sm:$0xff] }
  0x62   :  { %710 = vmatpush.msrb.mxu3 %v436_v56  ;;  %671 = vmatpush.msrb.mxu1 %v172_v58  ;;  %v237_v30 = vld [vmem:[%s5315_s1 + $0x650] sm:$0xff] }
  0x63   :  { %691 = vmatpush.msrb.mxu2 %v300_v59  ;;  %652 = vmatpush.msrb.mxu0 %v36_v62  ;;  %v365_v31 = vld [vmem:[%s5315_s1 + $0xa50] sm:$0xff] }
  0x64   :  { %711 = vmatpush.msrb.mxu3 %v428_v60  ;;  %613 = vmatmul.f32.vlgmr.msra.gmra.mxu2 %v3183_v61  ;;  %v493_v32 = vld [vmem:[%s5315_s1 + $0xe50] sm:$0xff] }
  0x65   :  { %672 = vmatpush.msrb.mxu1 %v164_v63  ;;  %692 = vmatpush.msrb.mxu2 %v292_v0  ;;  %v101_v33 = vld [vmem:[%s5315_s1 + $0x210] sm:$0xff] }
  0x66   :  { %712 = vmatpush.msrb.mxu3 %v420_v1  ;;  %573 = vmatmul.f32.vlgmr.msra.gmra.mxu0 %v3197_v2  ;;  %v229_v34 = vld [vmem:[%s5315_s1 + $0x610] sm:$0xff] }
  0x67   :  { %593 = vmatmul.f32.vlgmr.msra.gmra.mxu1 %v3200_v3  ;;  %633 = vmatmul.f32.vlgmr.msra.gmra.mxu3 %v3202_v4  ;;  %v357_v35 = vld [vmem:[%s5315_s1 + $0xa10] sm:$0xff] }
  0x68   :  { %717 = vmatpush.msra.mxu0 %v157_v5  ;;  %737 = vmatpush.msra.mxu1 %v285_v6  ;;  %v485_v36 = vld [vmem:[%s5315_s1 + $0xe10] sm:$0xff] }
  0x69   :  { %757 = vmatpush.msra.mxu2 %v413_v7  ;;  %777 = vmatpush.msra.mxu3 %v541_v8  ;;  %v93_v37 = vld [vmem:[%s5315_s1 + $0x1d0] sm:$0xff] }
  0x6a   :  { %718 = vmatpush.msra.mxu0 %v149_v9  ;;  %738 = vmatpush.msra.mxu1 %v277_v10  ;;  %v221_v38 = vld [vmem:[%s5315_s1 + $0x5d0] sm:$0xff]  ;;  %v158_v9 = vld [vmem:[%s5315_s1 + $0x3d8] sm:$0xff] }
  0x6b   :  { %758 = vmatpush.msra.mxu2 %v405_v11  ;;  %778 = vmatpush.msra.mxu3 %v533_v12  ;;  %v349_v39 = vld [vmem:[%s5315_s1 + $0x9d0] sm:$0xff]  ;;  %v286_v10 = vld [vmem:[%s5315_s1 + $0x7d8] sm:$0xff] }
  0x6c   :  { %719 = vmatpush.msra.mxu0 %v141_v13  ;;  %739 = vmatpush.msra.mxu1 %v269_v14  ;;  %v477_v40 = vld [vmem:[%s5315_s1 + $0xdd0] sm:$0xff]  ;;  %v414_v11 = vld [vmem:[%s5315_s1 + $0xbd8] sm:$0xff] }
  0x6d   :  { %759 = vmatpush.msra.mxu2 %v397_v15  ;;  %779 = vmatpush.msra.mxu3 %v525_v16  ;;  %v85_v41 = vld [vmem:[%s5315_s1 + $0x190] sm:$0xff]  ;;  %v542_v12 = vld [vmem:[%s5315_s1 + $0xfd8] sm:$0xff] }
  0x6e   :  { %720 = vmatpush.msra.mxu0 %v133_v17  ;;  %740 = vmatpush.msra.mxu1 %v261_v18  ;;  %v213_v42 = vld [vmem:[%s5315_s1 + $0x590] sm:$0xff]  ;;  %v150_v13 = vld [vmem:[%s5315_s1 + $0x398] sm:$0xff] }
  0x6f   :  { %760 = vmatpush.msra.mxu2 %v389_v19  ;;  %780 = vmatpush.msra.mxu3 %v517_v20  ;;  %v341_v43 = vld [vmem:[%s5315_s1 + $0x990] sm:$0xff]  ;;  %v278_v14 = vld [vmem:[%s5315_s1 + $0x798] sm:$0xff] }
  0x70   :  { %721 = vmatpush.msra.mxu0 %v125_v21  ;;  %741 = vmatpush.msra.mxu1 %v253_v22  ;;  %v469_v44 = vld [vmem:[%s5315_s1 + $0xd90] sm:$0xff]  ;;  %v406_v15 = vld [vmem:[%s5315_s1 + $0xb98] sm:$0xff] }
  0x71   :  { %761 = vmatpush.msra.mxu2 %v381_v23  ;;  %781 = vmatpush.msra.mxu3 %v509_v24  ;;  %v77_v45 = vld [vmem:[%s5315_s1 + $0x150] sm:$0xff]  ;;  %v534_v16 = vld [vmem:[%s5315_s1 + $0xf98] sm:$0xff] }
  0x72   :  { %722 = vmatpush.msra.mxu0 %v117_v25  ;;  %742 = vmatpush.msra.mxu1 %v245_v26  ;;  %v205_v46 = vld [vmem:[%s5315_s1 + $0x550] sm:$0xff]  ;;  %v142_v17 = vld [vmem:[%s5315_s1 + $0x358] sm:$0xff] }
  0x73   :  { %762 = vmatpush.msra.mxu2 %v373_v27  ;;  %782 = vmatpush.msra.mxu3 %v501_v28  ;;  %v333_v47 = vld [vmem:[%s5315_s1 + $0x950] sm:$0xff]  ;;  %v270_v18 = vld [vmem:[%s5315_s1 + $0x758] sm:$0xff] }
  0x74   :  { %723 = vmatpush.msra.mxu0 %v109_v29  ;;  %743 = vmatpush.msra.mxu1 %v237_v30  ;;  %v461_v48 = vld [vmem:[%s5315_s1 + $0xd50] sm:$0xff]  ;;  %v398_v19 = vld [vmem:[%s5315_s1 + $0xb58] sm:$0xff] }
  0x75   :  { %763 = vmatpush.msra.mxu2 %v365_v31  ;;  %783 = vmatpush.msra.mxu3 %v493_v32  ;;  %v69_v49 = vld [vmem:[%s5315_s1 + $0x110] sm:$0xff]  ;;  %v526_v20 = vld [vmem:[%s5315_s1 + $0xf58] sm:$0xff] }
  0x76   :  { %724 = vmatpush.msra.mxu0 %v101_v33  ;;  %744 = vmatpush.msra.mxu1 %v229_v34  ;;  %v197_v50 = vld [vmem:[%s5315_s1 + $0x510] sm:$0xff]  ;;  %v134_v21 = vld [vmem:[%s5315_s1 + $0x318] sm:$0xff] }
  0x77   :  { %764 = vmatpush.msra.mxu2 %v357_v35  ;;  %784 = vmatpush.msra.mxu3 %v485_v36  ;;  %v325_v51 = vld [vmem:[%s5315_s1 + $0x910] sm:$0xff]  ;;  %v262_v22 = vld [vmem:[%s5315_s1 + $0x718] sm:$0xff] }
  0x78   :  { %725 = vmatpush.msra.mxu0 %v93_v37  ;;  %745 = vmatpush.msra.mxu1 %v221_v38  ;;  %v453_v52 = vld [vmem:[%s5315_s1 + $0xd10] sm:$0xff]  ;;  %v390_v23 = vld [vmem:[%s5315_s1 + $0xb18] sm:$0xff] }
  0x79   :  { %765 = vmatpush.msra.mxu2 %v349_v39  ;;  %785 = vmatpush.msra.mxu3 %v477_v40  ;;  %v61_v53 = vld [vmem:[%s5315_s1 + $0xd0] sm:$0xff]  ;;  %v518_v24 = vld [vmem:[%s5315_s1 + $0xf18] sm:$0xff] }
  0x7a   :  { %726 = vmatpush.msra.mxu0 %v85_v41  ;;  %746 = vmatpush.msra.mxu1 %v213_v42  ;;  %v189_v54 = vld [vmem:[%s5315_s1 + $0x4d0] sm:$0xff]  ;;  %v126_v25 = vld [vmem:[%s5315_s1 + $0x2d8] sm:$0xff] }
  0x7b   :  { %766 = vmatpush.msra.mxu2 %v341_v43  ;;  %786 = vmatpush.msra.mxu3 %v469_v44  ;;  %v317_v55 = vld [vmem:[%s5315_s1 + $0x8d0] sm:$0xff]  ;;  %v254_v26 = vld [vmem:[%s5315_s1 + $0x6d8] sm:$0xff] }
  0x7c   :  { %727 = vmatpush.msra.mxu0 %v77_v45  ;;  %747 = vmatpush.msra.mxu1 %v205_v46  ;;  %v445_v56 = vld [vmem:[%s5315_s1 + $0xcd0] sm:$0xff]  ;;  %v382_v27 = vld [vmem:[%s5315_s1 + $0xad8] sm:$0xff] }
  0x7d   :  { %767 = vmatpush.msra.mxu2 %v333_v47  ;;  %787 = vmatpush.msra.mxu3 %v461_v48  ;;  %v53_v57 = vld [vmem:[%s5315_s1 + $0x90] sm:$0xff]  ;;  %v510_v28 = vld [vmem:[%s5315_s1 + $0xed8] sm:$0xff] }
  0x7e   :  { %728 = vmatpush.msra.mxu0 %v69_v49  ;;  %748 = vmatpush.msra.mxu1 %v197_v50  ;;  %v181_v58 = vld [vmem:[%s5315_s1 + $0x490] sm:$0xff]  ;;  %v118_v29 = vld [vmem:[%s5315_s1 + $0x298] sm:$0xff] }
  0x7f   :  { %768 = vmatpush.msra.mxu2 %v325_v51  ;;  %788 = vmatpush.msra.mxu3 %v453_v52  ;;  %v309_v59 = vld [vmem:[%s5315_s1 + $0x890] sm:$0xff]  ;;  %v246_v30 = vld [vmem:[%s5315_s1 + $0x698] sm:$0xff] }
  0x80   :  { %729 = vmatpush.msra.mxu0 %v61_v53  ;;  %749 = vmatpush.msra.mxu1 %v189_v54  ;;  %v437_v60 = vld [vmem:[%s5315_s1 + $0xc90] sm:$0xff]  ;;  %v374_v31 = vld [vmem:[%s5315_s1 + $0xa98] sm:$0xff] }
  0x81   :  { %769 = vmatpush.msra.mxu2 %v317_v55  ;;  %789 = vmatpush.msra.mxu3 %v445_v56  ;;  %v45_v62 = vld [vmem:[%s5315_s1 + $0x50] sm:$0xff]  ;;  %v502_v32 = vld [vmem:[%s5315_s1 + $0xe98] sm:$0xff] }
  0x82   :  { %v173_v63 = vld [vmem:[%s5315_s1 + $0x450] sm:$0xff]  ;;  %730 = vmatpush.msra.mxu0 %v53_v57  ;;  %750 = vmatpush.msra.mxu1 %v181_v58  ;;  %v110_v33 = vld [vmem:[%s5315_s1 + $0x258] sm:$0xff] }
  0x83   :  { %v301_v0 = vld [vmem:[%s5315_s1 + $0x850] sm:$0xff]  ;;  %770 = vmatpush.msra.mxu2 %v309_v59  ;;  %790 = vmatpush.msra.mxu3 %v437_v60  ;;  %v238_v34 = vld [vmem:[%s5315_s1 + $0x658] sm:$0xff] }
  0x84   :  { %v429_v1 = vld [vmem:[%s5315_s1 + $0xc50] sm:$0xff]  ;;  %731 = vmatpush.msra.mxu0 %v45_v62  ;;  %751 = vmatpush.msra.mxu1 %v173_v63  ;;  %v366_v35 = vld [vmem:[%s5315_s1 + $0xa58] sm:$0xff] }
  0x85   :  { %v37_v5 = vld [vmem:[%s5315_s1 + $0x10] sm:$0xff]  ;;  %771 = vmatpush.msra.mxu2 %v301_v0  ;;  %791 = vmatpush.msra.mxu3 %v429_v1  ;;  %v494_v36 = vld [vmem:[%s5315_s1 + $0xe58] sm:$0xff] }
  0x86   :  { %v165_v6 = vld [vmem:[%s5315_s1 + $0x410] sm:$0xff]  ;;  %693 = vmatmul.f32.vlgmr.msrb.gmra.mxu2 %v3183_v61  ;;  %732 = vmatpush.msra.mxu0 %v37_v5  ;;  %v102_v37 = vld [vmem:[%s5315_s1 + $0x218] sm:$0xff] }
  0x87   :  { %v293_v7 = vld [vmem:[%s5315_s1 + $0x810] sm:$0xff]  ;;  %752 = vmatpush.msra.mxu1 %v165_v6  ;;  %653 = vmatmul.f32.vlgmr.msrb.gmra.mxu0 %v3197_v2  ;;  %v230_v38 = vld [vmem:[%s5315_s1 + $0x618] sm:$0xff] }
  0x88   :  { %v421_v8 = vld [vmem:[%s5315_s1 + $0xc10] sm:$0xff]  ;;  %772 = vmatpush.msra.mxu2 %v293_v7  ;;  %673 = vmatmul.f32.vlgmr.msrb.gmra.mxu1 %v3200_v3  ;;  %v358_v39 = vld [vmem:[%s5315_s1 + $0xa18] sm:$0xff] }
  0x89   :  { %792 = vmatpush.msra.mxu3 %v421_v8  ;;  %797 = vmatpush.msrb.mxu0 %v158_v9  ;;  %v486_v40 = vld [vmem:[%s5315_s1 + $0xe18] sm:$0xff] }
  0x8a   :  { %713 = vmatmul.f32.vlgmr.msrb.gmra.mxu3 %v3202_v4  ;;  %817 = vmatpush.msrb.mxu1 %v286_v10  ;;  %v94_v41 = vld [vmem:[%s5315_s1 + $0x1d8] sm:$0xff] }
  0x8b   :  { %837 = vmatpush.msrb.mxu2 %v414_v11  ;;  %857 = vmatpush.msrb.mxu3 %v542_v12  ;;  %v222_v42 = vld [vmem:[%s5315_s1 + $0x5d8] sm:$0xff] }
  0x8c   :  { %798 = vmatpush.msrb.mxu0 %v150_v13  ;;  %818 = vmatpush.msrb.mxu1 %v278_v14  ;;  %v350_v43 = vld [vmem:[%s5315_s1 + $0x9d8] sm:$0xff]  ;;  %v159_v13 = vld [vmem:[%s5315_s1 + $0x3e0] sm:$0xff] }
  0x8d   :  { %838 = vmatpush.msrb.mxu2 %v406_v15  ;;  %858 = vmatpush.msrb.mxu3 %v534_v16  ;;  %v478_v44 = vld [vmem:[%s5315_s1 + $0xdd8] sm:$0xff]  ;;  %v287_v14 = vld [vmem:[%s5315_s1 + $0x7e0] sm:$0xff] }
  0x8e   :  { %799 = vmatpush.msrb.mxu0 %v142_v17  ;;  %819 = vmatpush.msrb.mxu1 %v270_v18  ;;  %v86_v45 = vld [vmem:[%s5315_s1 + $0x198] sm:$0xff]  ;;  %v415_v15 = vld [vmem:[%s5315_s1 + $0xbe0] sm:$0xff] }
  0x8f   :  { %839 = vmatpush.msrb.mxu2 %v398_v19  ;;  %859 = vmatpush.msrb.mxu3 %v526_v20  ;;  %v214_v46 = vld [vmem:[%s5315_s1 + $0x598] sm:$0xff]  ;;  %v543_v16 = vld [vmem:[%s5315_s1 + $0xfe0] sm:$0xff] }
  0x90   :  { %800 = vmatpush.msrb.mxu0 %v134_v21  ;;  %820 = vmatpush.msrb.mxu1 %v262_v22  ;;  %v342_v47 = vld [vmem:[%s5315_s1 + $0x998] sm:$0xff]  ;;  %v151_v17 = vld [vmem:[%s5315_s1 + $0x3a0] sm:$0xff] }
  0x91   :  { %840 = vmatpush.msrb.mxu2 %v390_v23  ;;  %860 = vmatpush.msrb.mxu3 %v518_v24  ;;  %v470_v48 = vld [vmem:[%s5315_s1 + $0xd98] sm:$0xff]  ;;  %v279_v18 = vld [vmem:[%s5315_s1 + $0x7a0] sm:$0xff] }
  0x92   :  { %801 = vmatpush.msrb.mxu0 %v126_v25  ;;  %821 = vmatpush.msrb.mxu1 %v254_v26  ;;  %v78_v49 = vld [vmem:[%s5315_s1 + $0x158] sm:$0xff]  ;;  %v407_v19 = vld [vmem:[%s5315_s1 + $0xba0] sm:$0xff] }
  0x93   :  { %841 = vmatpush.msrb.mxu2 %v382_v27  ;;  %861 = vmatpush.msrb.mxu3 %v510_v28  ;;  %v206_v50 = vld [vmem:[%s5315_s1 + $0x558] sm:$0xff]  ;;  %v535_v20 = vld [vmem:[%s5315_s1 + $0xfa0] sm:$0xff] }
  0x94   :  { %802 = vmatpush.msrb.mxu0 %v118_v29  ;;  %822 = vmatpush.msrb.mxu1 %v246_v30  ;;  %v334_v51 = vld [vmem:[%s5315_s1 + $0x958] sm:$0xff]  ;;  %v143_v21 = vld [vmem:[%s5315_s1 + $0x360] sm:$0xff] }
  0x95   :  { %842 = vmatpush.msrb.mxu2 %v374_v31  ;;  %862 = vmatpush.msrb.mxu3 %v502_v32  ;;  %v462_v52 = vld [vmem:[%s5315_s1 + $0xd58] sm:$0xff]  ;;  %v271_v22 = vld [vmem:[%s5315_s1 + $0x760] sm:$0xff] }
  0x96   :  { %803 = vmatpush.msrb.mxu0 %v110_v33  ;;  %823 = vmatpush.msrb.mxu1 %v238_v34  ;;  %v70_v53 = vld [vmem:[%s5315_s1 + $0x118] sm:$0xff]  ;;  %v399_v23 = vld [vmem:[%s5315_s1 + $0xb60] sm:$0xff] }
  0x97   :  { %843 = vmatpush.msrb.mxu2 %v366_v35  ;;  %863 = vmatpush.msrb.mxu3 %v494_v36  ;;  %v198_v54 = vld [vmem:[%s5315_s1 + $0x518] sm:$0xff]  ;;  %v527_v24 = vld [vmem:[%s5315_s1 + $0xf60] sm:$0xff] }
  0x98   :  { %804 = vmatpush.msrb.mxu0 %v102_v37  ;;  %824 = vmatpush.msrb.mxu1 %v230_v38  ;;  %v326_v55 = vld [vmem:[%s5315_s1 + $0x918] sm:$0xff]  ;;  %v135_v25 = vld [vmem:[%s5315_s1 + $0x320] sm:$0xff] }
  0x99   :  { %844 = vmatpush.msrb.mxu2 %v358_v39  ;;  %864 = vmatpush.msrb.mxu3 %v486_v40  ;;  %v454_v56 = vld [vmem:[%s5315_s1 + $0xd18] sm:$0xff]  ;;  %v263_v26 = vld [vmem:[%s5315_s1 + $0x720] sm:$0xff] }
  0x9a   :  { %805 = vmatpush.msrb.mxu0 %v94_v41  ;;  %825 = vmatpush.msrb.mxu1 %v222_v42  ;;  %v62_v57 = vld [vmem:[%s5315_s1 + $0xd8] sm:$0xff]  ;;  %v391_v27 = vld [vmem:[%s5315_s1 + $0xb20] sm:$0xff] }
  0x9b   :  { %845 = vmatpush.msrb.mxu2 %v350_v43  ;;  %865 = vmatpush.msrb.mxu3 %v478_v44  ;;  %v190_v58 = vld [vmem:[%s5315_s1 + $0x4d8] sm:$0xff]  ;;  %v519_v28 = vld [vmem:[%s5315_s1 + $0xf20] sm:$0xff] }
  0x9c   :  { %806 = vmatpush.msrb.mxu0 %v86_v45  ;;  %826 = vmatpush.msrb.mxu1 %v214_v46  ;;  %v318_v59 = vld [vmem:[%s5315_s1 + $0x8d8] sm:$0xff]  ;;  %v127_v29 = vld [vmem:[%s5315_s1 + $0x2e0] sm:$0xff] }
  0x9d   :  { %846 = vmatpush.msrb.mxu2 %v342_v47  ;;  %866 = vmatpush.msrb.mxu3 %v470_v48  ;;  %v446_v60 = vld [vmem:[%s5315_s1 + $0xcd8] sm:$0xff]  ;;  %v255_v30 = vld [vmem:[%s5315_s1 + $0x6e0] sm:$0xff] }
  0x9e   :  { %807 = vmatpush.msrb.mxu0 %v78_v49  ;;  %827 = vmatpush.msrb.mxu1 %v206_v50  ;;  %v54_v62 = vld [vmem:[%s5315_s1 + $0x98] sm:$0xff]  ;;  %v383_v31 = vld [vmem:[%s5315_s1 + $0xae0] sm:$0xff] }
  0x9f   :  { %847 = vmatpush.msrb.mxu2 %v334_v51  ;;  %867 = vmatpush.msrb.mxu3 %v462_v52  ;;  %v182_v63 = vld [vmem:[%s5315_s1 + $0x498] sm:$0xff]  ;;  %v511_v32 = vld [vmem:[%s5315_s1 + $0xee0] sm:$0xff] }
  0xa0   :  { %808 = vmatpush.msrb.mxu0 %v70_v53  ;;  %828 = vmatpush.msrb.mxu1 %v198_v54  ;;  %v310_v0 = vld [vmem:[%s5315_s1 + $0x898] sm:$0xff]  ;;  %v119_v33 = vld [vmem:[%s5315_s1 + $0x2a0] sm:$0xff] }
  0xa1   :  { %848 = vmatpush.msrb.mxu2 %v326_v55  ;;  %868 = vmatpush.msrb.mxu3 %v454_v56  ;;  %v438_v1 = vld [vmem:[%s5315_s1 + $0xc98] sm:$0xff]  ;;  %v247_v34 = vld [vmem:[%s5315_s1 + $0x6a0] sm:$0xff] }
  0xa2   :  { %809 = vmatpush.msrb.mxu0 %v62_v57  ;;  %829 = vmatpush.msrb.mxu1 %v190_v58  ;;  %v46_v5 = vld [vmem:[%s5315_s1 + $0x58] sm:$0xff]  ;;  %v375_v35 = vld [vmem:[%s5315_s1 + $0xaa0] sm:$0xff] }
  0xa3   :  { %849 = vmatpush.msrb.mxu2 %v318_v59  ;;  %869 = vmatpush.msrb.mxu3 %v446_v60  ;;  %v174_v6 = vld [vmem:[%s5315_s1 + $0x458] sm:$0xff]  ;;  %v503_v36 = vld [vmem:[%s5315_s1 + $0xea0] sm:$0xff] }
  0xa4   :  { %810 = vmatpush.msrb.mxu0 %v54_v62  ;;  %830 = vmatpush.msrb.mxu1 %v182_v63  ;;  %v302_v7 = vld [vmem:[%s5315_s1 + $0x858] sm:$0xff]  ;;  %v111_v37 = vld [vmem:[%s5315_s1 + $0x260] sm:$0xff] }
  0xa5   :  { %v430_v8 = vld [vmem:[%s5315_s1 + $0xc58] sm:$0xff]  ;;  %850 = vmatpush.msrb.mxu2 %v310_v0  ;;  %870 = vmatpush.msrb.mxu3 %v438_v1  ;;  %v239_v38 = vld [vmem:[%s5315_s1 + $0x660] sm:$0xff] }
  0xa6   :  { %v38_v9 = vld [vmem:[%s5315_s1 + $0x18] sm:$0xff]  ;;  %811 = vmatpush.msrb.mxu0 %v46_v5  ;;  %831 = vmatpush.msrb.mxu1 %v174_v6  ;;  %v367_v39 = vld [vmem:[%s5315_s1 + $0xa60] sm:$0xff] }
  0xa7   :  { %v166_v10 = vld [vmem:[%s5315_s1 + $0x418] sm:$0xff]  ;;  %851 = vmatpush.msrb.mxu2 %v302_v7  ;;  %871 = vmatpush.msrb.mxu3 %v430_v8  ;;  %v495_v40 = vld [vmem:[%s5315_s1 + $0xe60] sm:$0xff] }
  0xa8   :  { %v294_v11 = vld [vmem:[%s5315_s1 + $0x818] sm:$0xff]  ;;  %773 = vmatmul.f32.vlgmr.msra.gmra.mxu2 %v3183_v61  ;;  %812 = vmatpush.msrb.mxu0 %v38_v9  ;;  %v103_v41 = vld [vmem:[%s5315_s1 + $0x220] sm:$0xff] }
  0xa9   :  { %v422_v12 = vld [vmem:[%s5315_s1 + $0xc18] sm:$0xff]  ;;  %832 = vmatpush.msrb.mxu1 %v166_v10  ;;  %852 = vmatpush.msrb.mxu2 %v294_v11  ;;  %v231_v42 = vld [vmem:[%s5315_s1 + $0x620] sm:$0xff] }
  0xaa   :  { %872 = vmatpush.msrb.mxu3 %v422_v12  ;;  %733 = vmatmul.f32.vlgmr.msra.gmra.mxu0 %v3197_v2  ;;  %v359_v43 = vld [vmem:[%s5315_s1 + $0xa20] sm:$0xff] }
  0xab   :  { %753 = vmatmul.f32.vlgmr.msra.gmra.mxu1 %v3200_v3  ;;  %793 = vmatmul.f32.vlgmr.msra.gmra.mxu3 %v3202_v4  ;;  %v487_v44 = vld [vmem:[%s5315_s1 + $0xe20] sm:$0xff] }
  0xac   :  { %877 = vmatpush.msra.mxu0 %v159_v13  ;;  %897 = vmatpush.msra.mxu1 %v287_v14  ;;  %v95_v45 = vld [vmem:[%s5315_s1 + $0x1e0] sm:$0xff] }
  0xad   :  { %917 = vmatpush.msra.mxu2 %v415_v15  ;;  %937 = vmatpush.msra.mxu3 %v543_v16  ;;  %v223_v46 = vld [vmem:[%s5315_s1 + $0x5e0] sm:$0xff] }
  0xae   :  { %878 = vmatpush.msra.mxu0 %v151_v17  ;;  %898 = vmatpush.msra.mxu1 %v279_v18  ;;  %v351_v47 = vld [vmem:[%s5315_s1 + $0x9e0] sm:$0xff]  ;;  %v160_v17 = vld [vmem:[%s5315_s1 + $0x3e8] sm:$0xff] }
  0xaf   :  { %918 = vmatpush.msra.mxu2 %v407_v19  ;;  %938 = vmatpush.msra.mxu3 %v535_v20  ;;  %v479_v48 = vld [vmem:[%s5315_s1 + $0xde0] sm:$0xff]  ;;  %v288_v18 = vld [vmem:[%s5315_s1 + $0x7e8] sm:$0xff] }
  0xb0   :  { %879 = vmatpush.msra.mxu0 %v143_v21  ;;  %899 = vmatpush.msra.mxu1 %v271_v22  ;;  %v87_v49 = vld [vmem:[%s5315_s1 + $0x1a0] sm:$0xff]  ;;  %v416_v19 = vld [vmem:[%s5315_s1 + $0xbe8] sm:$0xff] }
  0xb1   :  { %919 = vmatpush.msra.mxu2 %v399_v23  ;;  %939 = vmatpush.msra.mxu3 %v527_v24  ;;  %v215_v50 = vld [vmem:[%s5315_s1 + $0x5a0] sm:$0xff]  ;;  %v152_v20 = vld [vmem:[%s5315_s1 + $0x3a8] sm:$0xff] }
  0xb2   :  { %880 = vmatpush.msra.mxu0 %v135_v25  ;;  %900 = vmatpush.msra.mxu1 %v263_v26  ;;  %v343_v51 = vld [vmem:[%s5315_s1 + $0x9a0] sm:$0xff]  ;;  %v408_v21 = vld [vmem:[%s5315_s1 + $0xba8] sm:$0xff] }
  0xb3   :  { %920 = vmatpush.msra.mxu2 %v391_v27  ;;  %940 = vmatpush.msra.mxu3 %v519_v28  ;;  %v471_v52 = vld [vmem:[%s5315_s1 + $0xda0] sm:$0xff]  ;;  %v272_v22 = vld [vmem:[%s5315_s1 + $0x768] sm:$0xff] }
  0xb4   :  { %881 = vmatpush.msra.mxu0 %v127_v29  ;;  %901 = vmatpush.msra.mxu1 %v255_v30  ;;  %v79_v53 = vld [vmem:[%s5315_s1 + $0x160] sm:$0xff]  ;;  %v400_v23 = vld [vmem:[%s5315_s1 + $0xb68] sm:$0xff] }
  0xb5   :  { %921 = vmatpush.msra.mxu2 %v383_v31  ;;  %941 = vmatpush.msra.mxu3 %v511_v32  ;;  %v207_v54 = vld [vmem:[%s5315_s1 + $0x560] sm:$0xff]  ;;  %v528_v24 = vld [vmem:[%s5315_s1 + $0xf68] sm:$0xff] }
  0xb6   :  { %882 = vmatpush.msra.mxu0 %v119_v33  ;;  %902 = vmatpush.msra.mxu1 %v247_v34  ;;  %v335_v55 = vld [vmem:[%s5315_s1 + $0x960] sm:$0xff]  ;;  %v136_v25 = vld [vmem:[%s5315_s1 + $0x328] sm:$0xff] }
  0xb7   :  { %922 = vmatpush.msra.mxu2 %v375_v35  ;;  %942 = vmatpush.msra.mxu3 %v503_v36  ;;  %v463_v56 = vld [vmem:[%s5315_s1 + $0xd60] sm:$0xff]  ;;  %v264_v26 = vld [vmem:[%s5315_s1 + $0x728] sm:$0xff] }
  0xb8   :  { %883 = vmatpush.msra.mxu0 %v111_v37  ;;  %903 = vmatpush.msra.mxu1 %v239_v38  ;;  %v71_v57 = vld [vmem:[%s5315_s1 + $0x120] sm:$0xff]  ;;  %v392_v27 = vld [vmem:[%s5315_s1 + $0xb28] sm:$0xff] }
  0xb9   :  { %923 = vmatpush.msra.mxu2 %v367_v39  ;;  %943 = vmatpush.msra.mxu3 %v495_v40  ;;  %v199_v58 = vld [vmem:[%s5315_s1 + $0x520] sm:$0xff]  ;;  %v520_v28 = vld [vmem:[%s5315_s1 + $0xf28] sm:$0xff] }
  0xba   :  { %884 = vmatpush.msra.mxu0 %v103_v41  ;;  %904 = vmatpush.msra.mxu1 %v231_v42  ;;  %v327_v59 = vld [vmem:[%s5315_s1 + $0x920] sm:$0xff]  ;;  %v128_v29 = vld [vmem:[%s5315_s1 + $0x2e8] sm:$0xff] }
  0xbb   :  { %924 = vmatpush.msra.mxu2 %v359_v43  ;;  %944 = vmatpush.msra.mxu3 %v487_v44  ;;  %v455_v60 = vld [vmem:[%s5315_s1 + $0xd20] sm:$0xff]  ;;  %v256_v30 = vld [vmem:[%s5315_s1 + $0x6e8] sm:$0xff] }
  0xbc   :  { %885 = vmatpush.msra.mxu0 %v95_v45  ;;  %905 = vmatpush.msra.mxu1 %v223_v46  ;;  %v63_v62 = vld [vmem:[%s5315_s1 + $0xe0] sm:$0xff]  ;;  %v384_v31 = vld [vmem:[%s5315_s1 + $0xae8] sm:$0xff] }
  0xbd   :  { %925 = vmatpush.msra.mxu2 %v351_v47  ;;  %945 = vmatpush.msra.mxu3 %v479_v48  ;;  %v191_v63 = vld [vmem:[%s5315_s1 + $0x4e0] sm:$0xff]  ;;  %v512_v32 = vld [vmem:[%s5315_s1 + $0xee8] sm:$0xff] }
  0xbe   :  { %886 = vmatpush.msra.mxu0 %v87_v49  ;;  %906 = vmatpush.msra.mxu1 %v215_v50  ;;  %v319_v0 = vld [vmem:[%s5315_s1 + $0x8e0] sm:$0xff]  ;;  %v120_v33 = vld [vmem:[%s5315_s1 + $0x2a8] sm:$0xff] }
  0xbf   :  { %926 = vmatpush.msra.mxu2 %v343_v51  ;;  %946 = vmatpush.msra.mxu3 %v471_v52  ;;  %v447_v1 = vld [vmem:[%s5315_s1 + $0xce0] sm:$0xff]  ;;  %v248_v34 = vld [vmem:[%s5315_s1 + $0x6a8] sm:$0xff] }
  0xc0   :  { %887 = vmatpush.msra.mxu0 %v79_v53  ;;  %907 = vmatpush.msra.mxu1 %v207_v54  ;;  %v55_v5 = vld [vmem:[%s5315_s1 + $0xa0] sm:$0xff]  ;;  %v376_v35 = vld [vmem:[%s5315_s1 + $0xaa8] sm:$0xff] }
  0xc1   :  { %927 = vmatpush.msra.mxu2 %v335_v55  ;;  %947 = vmatpush.msra.mxu3 %v463_v56  ;;  %v183_v6 = vld [vmem:[%s5315_s1 + $0x4a0] sm:$0xff]  ;;  %v504_v36 = vld [vmem:[%s5315_s1 + $0xea8] sm:$0xff] }
  0xc2   :  { %888 = vmatpush.msra.mxu0 %v71_v57  ;;  %908 = vmatpush.msra.mxu1 %v199_v58  ;;  %v311_v7 = vld [vmem:[%s5315_s1 + $0x8a0] sm:$0xff]  ;;  %v112_v37 = vld [vmem:[%s5315_s1 + $0x268] sm:$0xff] }
  0xc3   :  { %928 = vmatpush.msra.mxu2 %v327_v59  ;;  %948 = vmatpush.msra.mxu3 %v455_v60  ;;  %v439_v8 = vld [vmem:[%s5315_s1 + $0xca0] sm:$0xff]  ;;  %v240_v38 = vld [vmem:[%s5315_s1 + $0x668] sm:$0xff] }
  0xc4   :  { %889 = vmatpush.msra.mxu0 %v63_v62  ;;  %909 = vmatpush.msra.mxu1 %v191_v63  ;;  %v47_v9 = vld [vmem:[%s5315_s1 + $0x60] sm:$0xff]  ;;  %v368_v39 = vld [vmem:[%s5315_s1 + $0xa68] sm:$0xff] }
  0xc5   :  { %929 = vmatpush.msra.mxu2 %v319_v0  ;;  %949 = vmatpush.msra.mxu3 %v447_v1  ;;  %v175_v10 = vld [vmem:[%s5315_s1 + $0x460] sm:$0xff]  ;;  %v496_v40 = vld [vmem:[%s5315_s1 + $0xe68] sm:$0xff] }
  0xc6   :  { %890 = vmatpush.msra.mxu0 %v55_v5  ;;  %910 = vmatpush.msra.mxu1 %v183_v6  ;;  %v303_v11 = vld [vmem:[%s5315_s1 + $0x860] sm:$0xff]  ;;  %v104_v41 = vld [vmem:[%s5315_s1 + $0x228] sm:$0xff] }
  0xc7   :  { %v431_v12 = vld [vmem:[%s5315_s1 + $0xc60] sm:$0xff]  ;;  %930 = vmatpush.msra.mxu2 %v311_v7  ;;  %950 = vmatpush.msra.mxu3 %v439_v8  ;;  %v232_v42 = vld [vmem:[%s5315_s1 + $0x628] sm:$0xff] }
  0xc8   :  { %v39_v13 = vld [vmem:[%s5315_s1 + $0x20] sm:$0xff]  ;;  %891 = vmatpush.msra.mxu0 %v47_v9  ;;  %911 = vmatpush.msra.mxu1 %v175_v10  ;;  %v360_v43 = vld [vmem:[%s5315_s1 + $0xa28] sm:$0xff] }
  0xc9   :  { %v167_v14 = vld [vmem:[%s5315_s1 + $0x420] sm:$0xff]  ;;  %931 = vmatpush.msra.mxu2 %v303_v11  ;;  %951 = vmatpush.msra.mxu3 %v431_v12  ;;  %v488_v44 = vld [vmem:[%s5315_s1 + $0xe28] sm:$0xff] }
  0xca   :  { %v295_v15 = vld [vmem:[%s5315_s1 + $0x820] sm:$0xff]  ;;  %853 = vmatmul.f32.vlgmr.msrb.gmra.mxu2 %v3183_v61  ;;  %892 = vmatpush.msra.mxu0 %v39_v13  ;;  %v544_v61 = vld [vmem:[%s5315_s1 + $0xfe8] sm:$0xff] }
  0xcb   :  { %v423_v16 = vld [vmem:[%s5315_s1 + $0xc20] sm:$0xff]  ;;  %912 = vmatpush.msra.mxu1 %v167_v14  ;;  %932 = vmatpush.msra.mxu2 %v295_v15  ;;  %v96_v45 = vld [vmem:[%s5315_s1 + $0x1e8] sm:$0xff] }
  0xcc   :  { %952 = vmatpush.msra.mxu3 %v423_v16  ;;  %813 = vmatmul.f32.vlgmr.msrb.gmra.mxu0 %v3197_v2  ;;  %v280_v2 = vld [vmem:[%s5315_s1 + $0x7a8] sm:$0xff] }
  0xcd   :  { %833 = vmatmul.f32.vlgmr.msrb.gmra.mxu1 %v3200_v3  ;;  %873 = vmatmul.f32.vlgmr.msrb.gmra.mxu3 %v3202_v4  ;;  %v536_v3 = vld [vmem:[%s5315_s1 + $0xfa8] sm:$0xff] }
  0xce   :  { %957 = vmatpush.msrb.mxu0 %v160_v17  ;;  %977 = vmatpush.msrb.mxu1 %v288_v18  ;;  %v144_v4 = vld [vmem:[%s5315_s1 + $0x368] sm:$0xff] }
  0xcf   :  { %997 = vmatpush.msrb.mxu2 %v416_v19  ;;  %1017 = vmatpush.msrb.mxu3 %v544_v61  ;;  %v224_v46 = vld [vmem:[%s5315_s1 + $0x5e8] sm:$0xff] }
  0xd0   :  { %958 = vmatpush.msrb.mxu0 %v152_v20  ;;  %978 = vmatpush.msrb.mxu1 %v280_v2  ;;  %v352_v47 = vld [vmem:[%s5315_s1 + $0x9e8] sm:$0xff] }
  0xd1   :  { %998 = vmatpush.msrb.mxu2 %v408_v21  ;;  %1018 = vmatpush.msrb.mxu3 %v536_v3  ;;  %v480_v48 = vld [vmem:[%s5315_s1 + $0xde8] sm:$0xff]  ;;  %v3989_v3 = vld.sshfl [vmem:[#allocation1 + $0x10] sm:$0xff pattern:$0x73625140] }
  0xd2   :  { %959 = vmatpush.msrb.mxu0 %v144_v4  ;;  %979 = vmatpush.msrb.mxu1 %v272_v22  ;;  %v88_v49 = vld [vmem:[%s5315_s1 + $0x1a8] sm:$0xff]  ;;  %v161_v4 = vld [vmem:[%s5315_s1 + $0x3f0] sm:$0xff] }
  0xd3   :  { %999 = vmatpush.msrb.mxu2 %v400_v23  ;;  %1019 = vmatpush.msrb.mxu3 %v528_v24  ;;  %v216_v50 = vld [vmem:[%s5315_s1 + $0x5a8] sm:$0xff]  ;;  %v289_v22 = vld [vmem:[%s5315_s1 + $0x7f0] sm:$0xff]  ;;  %v3998_v23 = vld.sshfl [vmem:[#allocation1] sm:$0xff pattern:$0x73625140] }
  0xd4   :  { %960 = vmatpush.msrb.mxu0 %v136_v25  ;;  %980 = vmatpush.msrb.mxu1 %v264_v26  ;;  %v344_v51 = vld [vmem:[%s5315_s1 + $0x9a8] sm:$0xff]  ;;  %v417_v24 = vld [vmem:[%s5315_s1 + $0xbf0] sm:$0xff] }
  0xd5   :  { %1000 = vmatpush.msrb.mxu2 %v392_v27  ;;  %1020 = vmatpush.msrb.mxu3 %v520_v28  ;;  %v472_v52 = vld [vmem:[%s5315_s1 + $0xda8] sm:$0xff]  ;;  %v545_v25 = vld [vmem:[%s5315_s1 + $0xff0] sm:$0xff]  ;;  %v4010_v27 = vld.sshfl [vmem:[#allocation1 + $0x18] sm:$0xff pattern:$0x73625140] }
  0xd6   :  { %961 = vmatpush.msrb.mxu0 %v128_v29  ;;  %981 = vmatpush.msrb.mxu1 %v256_v30  ;;  %v80_v53 = vld [vmem:[%s5315_s1 + $0x168] sm:$0xff]  ;;  %v153_v28 = vld [vmem:[%s5315_s1 + $0x3b0] sm:$0xff] }
  0xd7   :  { %1001 = vmatpush.msrb.mxu2 %v384_v31  ;;  %1021 = vmatpush.msrb.mxu3 %v512_v32  ;;  %v208_v54 = vld [vmem:[%s5315_s1 + $0x568] sm:$0xff]  ;;  %v281_v29 = vld [vmem:[%s5315_s1 + $0x7b0] sm:$0xff] }
  0xd8   :  { %962 = vmatpush.msrb.mxu0 %v120_v33  ;;  %982 = vmatpush.msrb.mxu1 %v248_v34  ;;  %v336_v55 = vld [vmem:[%s5315_s1 + $0x968] sm:$0xff]  ;;  %v409_v30 = vld [vmem:[%s5315_s1 + $0xbb0] sm:$0xff] }
  0xd9   :  { %1002 = vmatpush.msrb.mxu2 %v376_v35  ;;  %1022 = vmatpush.msrb.mxu3 %v504_v36  ;;  %v464_v56 = vld [vmem:[%s5315_s1 + $0xd68] sm:$0xff]  ;;  %v537_v31 = vld [vmem:[%s5315_s1 + $0xfb0] sm:$0xff] }
  0xda   :  { %963 = vmatpush.msrb.mxu0 %v112_v37  ;;  %983 = vmatpush.msrb.mxu1 %v240_v38  ;;  %v72_v57 = vld [vmem:[%s5315_s1 + $0x128] sm:$0xff]  ;;  %v145_v32 = vld [vmem:[%s5315_s1 + $0x370] sm:$0xff] }
  0xdb   :  { %1003 = vmatpush.msrb.mxu2 %v368_v39  ;;  %1023 = vmatpush.msrb.mxu3 %v496_v40  ;;  %v200_v58 = vld [vmem:[%s5315_s1 + $0x528] sm:$0xff]  ;;  %v273_v33 = vld [vmem:[%s5315_s1 + $0x770] sm:$0xff] }
  0xdc   :  { %964 = vmatpush.msrb.mxu0 %v104_v41  ;;  %984 = vmatpush.msrb.mxu1 %v232_v42  ;;  %v328_v59 = vld [vmem:[%s5315_s1 + $0x928] sm:$0xff]  ;;  %v401_v34 = vld [vmem:[%s5315_s1 + $0xb70] sm:$0xff] }
  0xdd   :  { %1004 = vmatpush.msrb.mxu2 %v360_v43  ;;  %1024 = vmatpush.msrb.mxu3 %v488_v44  ;;  %v456_v60 = vld [vmem:[%s5315_s1 + $0xd28] sm:$0xff]  ;;  %v529_v35 = vld [vmem:[%s5315_s1 + $0xf70] sm:$0xff] }
  0xde   :  { %965 = vmatpush.msrb.mxu0 %v96_v45  ;;  %985 = vmatpush.msrb.mxu1 %v224_v46  ;;  %v64_v62 = vld [vmem:[%s5315_s1 + $0xe8] sm:$0xff]  ;;  %v137_v36 = vld [vmem:[%s5315_s1 + $0x330] sm:$0xff] }
  0xdf   :  { %1005 = vmatpush.msrb.mxu2 %v352_v47  ;;  %1025 = vmatpush.msrb.mxu3 %v480_v48  ;;  %v192_v63 = vld [vmem:[%s5315_s1 + $0x4e8] sm:$0xff]  ;;  %v265_v37 = vld [vmem:[%s5315_s1 + $0x730] sm:$0xff] }
  0xe0   :  { %966 = vmatpush.msrb.mxu0 %v88_v49  ;;  %986 = vmatpush.msrb.mxu1 %v216_v50  ;;  %v320_v1 = vld [vmem:[%s5315_s1 + $0x8e8] sm:$0xff]  ;;  %v393_v38 = vld [vmem:[%s5315_s1 + $0xb30] sm:$0xff] }
  0xe1   :  { %1006 = vmatpush.msrb.mxu2 %v344_v51  ;;  %1026 = vmatpush.msrb.mxu3 %v472_v52  ;;  %v448_v5 = vld [vmem:[%s5315_s1 + $0xce8] sm:$0xff]  ;;  %v521_v39 = vld [vmem:[%s5315_s1 + $0xf30] sm:$0xff] }
  0xe2   :  { %967 = vmatpush.msrb.mxu0 %v80_v53  ;;  %987 = vmatpush.msrb.mxu1 %v208_v54  ;;  %v56_v7 = vld [vmem:[%s5315_s1 + $0xa8] sm:$0xff]  ;;  %v129_v40 = vld [vmem:[%s5315_s1 + $0x2f0] sm:$0xff] }
  0xe3   :  { %1007 = vmatpush.msrb.mxu2 %v336_v55  ;;  %1027 = vmatpush.msrb.mxu3 %v464_v56  ;;  %v574_v0 = vpop.f32.mrf.mxu0  ;;  %v184_v8 = vld [vmem:[%s5315_s1 + $0x4a8] sm:$0xff]  ;;  %v257_v41 = vld [vmem:[%s5315_s1 + $0x6f0] sm:$0xff] }
  0xe4   :  { %968 = vmatpush.msrb.mxu0 %v72_v57  ;;  %988 = vmatpush.msrb.mxu1 %v200_v58  ;;  %v594_v6 = vpop.f32.mrf.mxu1  ;;  %v312_v10 = vld [vmem:[%s5315_s1 + $0x8a8] sm:$0xff]  ;;  %v385_v42 = vld [vmem:[%s5315_s1 + $0xaf0] sm:$0xff] }
  0xe5   :  { %1008 = vmatpush.msrb.mxu2 %v328_v59  ;;  %1028 = vmatpush.msrb.mxu3 %v456_v60  ;;  %v595_v9 = vadd.f32 %v594_v6, %v574_v0  ;;  %v440_v11 = vld [vmem:[%s5315_s1 + $0xca8] sm:$0xff]  ;;  %v513_v43 = vld [vmem:[%s5315_s1 + $0xef0] sm:$0xff] }
  0xe6   :  { %969 = vmatpush.msrb.mxu0 %v64_v62  ;;  %989 = vmatpush.msrb.mxu1 %v192_v63  ;;  %v48_v12 = vld [vmem:[%s5315_s1 + $0x68] sm:$0xff]  ;;  %v121_v44 = vld [vmem:[%s5315_s1 + $0x2b0] sm:$0xff] }
  0xe7   :  { %1009 = vmatpush.msrb.mxu2 %v320_v1  ;;  %1029 = vmatpush.msrb.mxu3 %v448_v5  ;;  %v176_v13 = vld [vmem:[%s5315_s1 + $0x468] sm:$0xff]  ;;  %v614_v14 = vpop.f32.mrf.mxu2  ;;  %v249_v45 = vld [vmem:[%s5315_s1 + $0x6b0] sm:$0xff] }
  0xe8   :  { %970 = vmatpush.msrb.mxu0 %v56_v7  ;;  %990 = vmatpush.msrb.mxu1 %v184_v8  ;;  %v304_v15 = vld [vmem:[%s5315_s1 + $0x868] sm:$0xff]  ;;  %v615_v17 = vadd.f32 %v614_v14, %v595_v9  ;;  %v377_v46 = vld [vmem:[%s5315_s1 + $0xab0] sm:$0xff] }
  0xe9   :  { %v432_v16 = vld [vmem:[%s5315_s1 + $0xc68] sm:$0xff]  ;;  %1010 = vmatpush.msrb.mxu2 %v312_v10  ;;  %1030 = vmatpush.msrb.mxu3 %v440_v11  ;;  %v505_v47 = vld [vmem:[%s5315_s1 + $0xeb0] sm:$0xff] }
  0xea   :  { %v40_v18 = vld [vmem:[%s5315_s1 + $0x28] sm:$0xff]  ;;  %971 = vmatpush.msrb.mxu0 %v48_v12  ;;  %991 = vmatpush.msrb.mxu1 %v176_v13  ;;  %v634_v20 = vpop.f32.mrf.mxu3  ;;  %v113_v48 = vld [vmem:[%s5315_s1 + $0x270] sm:$0xff] }
  0xeb   :  { %v168_v19 = vld [vmem:[%s5315_s1 + $0x428] sm:$0xff]  ;;  %1011 = vmatpush.msrb.mxu2 %v304_v15  ;;  %1031 = vmatpush.msrb.mxu3 %v432_v16  ;;  %v3987_v21 = vadd.f32 %v634_v20, %v615_v17  ;;  %v241_v49 = vld [vmem:[%s5315_s1 + $0x670] sm:$0xff] }
  0xec   :  { %v296_v61 = vld [vmem:[%s5315_s1 + $0x828] sm:$0xff]  ;;  %933 = vmatmul.f32.vlgmr.msra.gmra.mxu2 %v3989_v3  ;;  %972 = vmatpush.msrb.mxu0 %v40_v18  ;;  %v369_v50 = vld [vmem:[%s5315_s1 + $0xa70] sm:$0xff] }
  0xed   :  { %v424_v2 = vld [vmem:[%s5315_s1 + $0xc28] sm:$0xff]  ;;  %5402 = vst [vmem:[#allocation8_spill] sm:$0xff] %v3987_v21  ;;  %992 = vmatpush.msrb.mxu1 %v168_v19  ;;  %1012 = vmatpush.msrb.mxu2 %v296_v61  ;;  %v497_v51 = vld [vmem:[%s5315_s1 + $0xe70] sm:$0xff]  ;;  %v4587_v21 = vld [vmem:[#allocation2 + $0x650] sm:$0xff] }
  0xee   :  { %1032 = vmatpush.msrb.mxu3 %v424_v2  ;;  %893 = vmatmul.f32.vlgmr.msra.gmra.mxu0 %v3998_v23  ;;  %v4007_v26 = vld.sshfl [vmem:[#allocation1 + $0x8] sm:$0xff pattern:$0x73625140]  ;;  %v105_v52 = vld [vmem:[%s5315_s1 + $0x230] sm:$0xff]  ;;  %5420 = vst [vmem:[#allocation26_spill] sm:$0xff] %v4587_v21 }
  0xef   :  { %913 = vmatmul.f32.vlgmr.msra.gmra.mxu1 %v4007_v26  ;;  %953 = vmatmul.f32.vlgmr.msra.gmra.mxu3 %v4010_v27  ;;  %v233_v53 = vld [vmem:[%s5315_s1 + $0x630] sm:$0xff] }
  0xf0   :  { %1037 = vmatpush.msra.mxu0 %v161_v4  ;;  %1057 = vmatpush.msra.mxu1 %v289_v22  ;;  %v361_v54 = vld [vmem:[%s5315_s1 + $0xa30] sm:$0xff] }
  0xf1   :  { %1077 = vmatpush.msra.mxu2 %v417_v24  ;;  %1097 = vmatpush.msra.mxu3 %v545_v25  ;;  %v489_v55 = vld [vmem:[%s5315_s1 + $0xe30] sm:$0xff] }
  0xf2   :  { %1038 = vmatpush.msra.mxu0 %v153_v28  ;;  %1058 = vmatpush.msra.mxu1 %v281_v29  ;;  %v97_v56 = vld [vmem:[%s5315_s1 + $0x1f0] sm:$0xff] }
  0xf3   :  { %1078 = vmatpush.msra.mxu2 %v409_v30  ;;  %1098 = vmatpush.msra.mxu3 %v537_v31  ;;  %v225_v57 = vld [vmem:[%s5315_s1 + $0x5f0] sm:$0xff] }
  0xf4   :  { %1039 = vmatpush.msra.mxu0 %v145_v32  ;;  %1059 = vmatpush.msra.mxu1 %v273_v33  ;;  %v353_v58 = vld [vmem:[%s5315_s1 + $0x9f0] sm:$0xff] }
  0xf5   :  { %1079 = vmatpush.msra.mxu2 %v401_v34  ;;  %1099 = vmatpush.msra.mxu3 %v529_v35  ;;  %v481_v59 = vld [vmem:[%s5315_s1 + $0xdf0] sm:$0xff] }
  0xf6   :  { %1040 = vmatpush.msra.mxu0 %v137_v36  ;;  %1060 = vmatpush.msra.mxu1 %v265_v37  ;;  %v89_v60 = vld [vmem:[%s5315_s1 + $0x1b0] sm:$0xff]  ;;  %v162_v36 = vld [vmem:[%s5315_s1 + $0x3f8] sm:$0xff] }
  0xf7   :  { %1080 = vmatpush.msra.mxu2 %v393_v38  ;;  %1100 = vmatpush.msra.mxu3 %v521_v39  ;;  %v217_v62 = vld [vmem:[%s5315_s1 + $0x5b0] sm:$0xff]  ;;  %v290_v37 = vld [vmem:[%s5315_s1 + $0x7f8] sm:$0xff] }
  0xf8   :  { %1041 = vmatpush.msra.mxu0 %v129_v40  ;;  %1061 = vmatpush.msra.mxu1 %v257_v41  ;;  %v345_v63 = vld [vmem:[%s5315_s1 + $0x9b0] sm:$0xff]  ;;  %v418_v38 = vld [vmem:[%s5315_s1 + $0xbf8] sm:$0xff] }
  0xf9   :  { %1081 = vmatpush.msra.mxu2 %v385_v42  ;;  %1101 = vmatpush.msra.mxu3 %v513_v43  ;;  %v473_v0 = vld [vmem:[%s5315_s1 + $0xdb0] sm:$0xff]  ;;  %v546_v39 = vld [vmem:[%s5315_s1 + $0xff8] sm:$0xff] }
  0xfa   :  { %1042 = vmatpush.msra.mxu0 %v121_v44  ;;  %1062 = vmatpush.msra.mxu1 %v249_v45  ;;  %v81_v1 = vld [vmem:[%s5315_s1 + $0x170] sm:$0xff]  ;;  %v154_v40 = vld [vmem:[%s5315_s1 + $0x3b8] sm:$0xff] }
  0xfb   :  { %1082 = vmatpush.msra.mxu2 %v377_v46  ;;  %1102 = vmatpush.msra.mxu3 %v505_v47  ;;  %v209_v5 = vld [vmem:[%s5315_s1 + $0x570] sm:$0xff]  ;;  %v282_v41 = vld [vmem:[%s5315_s1 + $0x7b8] sm:$0xff] }
  0xfc   :  { %1043 = vmatpush.msra.mxu0 %v113_v48  ;;  %1063 = vmatpush.msra.mxu1 %v241_v49  ;;  %v337_v6 = vld [vmem:[%s5315_s1 + $0x970] sm:$0xff]  ;;  %v410_v42 = vld [vmem:[%s5315_s1 + $0xbb8] sm:$0xff] }
  0xfd   :  { %1083 = vmatpush.msra.mxu2 %v369_v50  ;;  %1103 = vmatpush.msra.mxu3 %v497_v51  ;;  %v465_v7 = vld [vmem:[%s5315_s1 + $0xd70] sm:$0xff]  ;;  %v538_v43 = vld [vmem:[%s5315_s1 + $0xfb8] sm:$0xff] }
  0xfe   :  { %1044 = vmatpush.msra.mxu0 %v105_v52  ;;  %1064 = vmatpush.msra.mxu1 %v233_v53  ;;  %v73_v8 = vld [vmem:[%s5315_s1 + $0x130] sm:$0xff]  ;;  %v146_v44 = vld [vmem:[%s5315_s1 + $0x378] sm:$0xff] }
  0xff   :  { %1084 = vmatpush.msra.mxu2 %v361_v54  ;;  %1104 = vmatpush.msra.mxu3 %v489_v55  ;;  %v201_v9 = vld [vmem:[%s5315_s1 + $0x530] sm:$0xff]  ;;  %v274_v45 = vld [vmem:[%s5315_s1 + $0x778] sm:$0xff] }
 0x100   :  { %1045 = vmatpush.msra.mxu0 %v97_v56  ;;  %1065 = vmatpush.msra.mxu1 %v225_v57  ;;  %v329_v10 = vld [vmem:[%s5315_s1 + $0x930] sm:$0xff]  ;;  %v402_v46 = vld [vmem:[%s5315_s1 + $0xb78] sm:$0xff] }
 0x101   :  { %1085 = vmatpush.msra.mxu2 %v353_v58  ;;  %1105 = vmatpush.msra.mxu3 %v481_v59  ;;  %v457_v11 = vld [vmem:[%s5315_s1 + $0xd30] sm:$0xff]  ;;  %v530_v47 = vld [vmem:[%s5315_s1 + $0xf78] sm:$0xff] }
 0x102   :  { %1046 = vmatpush.msra.mxu0 %v89_v60  ;;  %1066 = vmatpush.msra.mxu1 %v217_v62  ;;  %v65_v12 = vld [vmem:[%s5315_s1 + $0xf0] sm:$0xff]  ;;  %v138_v48 = vld [vmem:[%s5315_s1 + $0x338] sm:$0xff] }
 0x103   :  { %1086 = vmatpush.msra.mxu2 %v345_v63  ;;  %1106 = vmatpush.msra.mxu3 %v473_v0  ;;  %v193_v13 = vld [vmem:[%s5315_s1 + $0x4f0] sm:$0xff]  ;;  %v266_v49 = vld [vmem:[%s5315_s1 + $0x738] sm:$0xff] }
 0x104   :  { %1047 = vmatpush.msra.mxu0 %v81_v1  ;;  %1067 = vmatpush.msra.mxu1 %v209_v5  ;;  %v654_v14 = vpop.f32.mrf.mxu0  ;;  %v321_v15 = vld [vmem:[%s5315_s1 + $0x8f0] sm:$0xff]  ;;  %v394_v50 = vld [vmem:[%s5315_s1 + $0xb38] sm:$0xff] }
 0x105   :  { %1087 = vmatpush.msra.mxu2 %v337_v6  ;;  %1107 = vmatpush.msra.mxu3 %v465_v7  ;;  %v449_v16 = vld [vmem:[%s5315_s1 + $0xcf0] sm:$0xff]  ;;  %v674_v17 = vpop.f32.mrf.mxu1  ;;  %v522_v51 = vld [vmem:[%s5315_s1 + $0xf38] sm:$0xff] }
 0x106   :  { %1048 = vmatpush.msra.mxu0 %v73_v8  ;;  %1068 = vmatpush.msra.mxu1 %v201_v9  ;;  %v57_v18 = vld [vmem:[%s5315_s1 + $0xb0] sm:$0xff]  ;;  %v675_v61 = vadd.f32 %v674_v17, %v654_v14  ;;  %v130_v52 = vld [vmem:[%s5315_s1 + $0x2f8] sm:$0xff] }
 0x107   :  { %1088 = vmatpush.msra.mxu2 %v329_v10  ;;  %1108 = vmatpush.msra.mxu3 %v457_v11  ;;  %v185_v19 = vld [vmem:[%s5315_s1 + $0x4b0] sm:$0xff]  ;;  %v258_v53 = vld [vmem:[%s5315_s1 + $0x6f8] sm:$0xff] }
 0x108   :  { %1049 = vmatpush.msra.mxu0 %v65_v12  ;;  %1069 = vmatpush.msra.mxu1 %v193_v13  ;;  %v313_v20 = vld [vmem:[%s5315_s1 + $0x8b0] sm:$0xff]  ;;  %v386_v54 = vld [vmem:[%s5315_s1 + $0xaf8] sm:$0xff] }
 0x109   :  { %v441_v2 = vld [vmem:[%s5315_s1 + $0xcb0] sm:$0xff]  ;;  %1089 = vmatpush.msra.mxu2 %v321_v15  ;;  %1109 = vmatpush.msra.mxu3 %v449_v16  ;;  %v694_v24 = vpop.f32.mrf.mxu2  ;;  %v514_v55 = vld [vmem:[%s5315_s1 + $0xef8] sm:$0xff] }
 0x10a   :  { %v49_v4 = vld [vmem:[%s5315_s1 + $0x70] sm:$0xff]  ;;  %1050 = vmatpush.msra.mxu0 %v57_v18  ;;  %1070 = vmatpush.msra.mxu1 %v185_v19  ;;  %v695_v29 = vadd.f32 %v694_v24, %v675_v61  ;;  %v122_v56 = vld [vmem:[%s5315_s1 + $0x2b8] sm:$0xff] }
 0x10b   :  { %v177_v22 = vld [vmem:[%s5315_s1 + $0x470] sm:$0xff]  ;;  %1090 = vmatpush.msra.mxu2 %v313_v20  ;;  %1110 = vmatpush.msra.mxu3 %v441_v2  ;;  %v250_v57 = vld [vmem:[%s5315_s1 + $0x6b8] sm:$0xff] }
 0x10c   :  { %v305_v25 = vld [vmem:[%s5315_s1 + $0x870] sm:$0xff]  ;;  %1051 = vmatpush.msra.mxu0 %v49_v4  ;;  %1071 = vmatpush.msra.mxu1 %v177_v22  ;;  %v378_v58 = vld [vmem:[%s5315_s1 + $0xab8] sm:$0xff] }
 0x10d   :  { %v433_v28 = vld [vmem:[%s5315_s1 + $0xc70] sm:$0xff]  ;;  %v714_v33 = vpop.f32.mrf.mxu3  ;;  %1091 = vmatpush.msra.mxu2 %v305_v25  ;;  %973 = vmatmul.f32.vlgmr.msrb.gmra.mxu0 %v3998_v23  ;;  %v506_v59 = vld [vmem:[%s5315_s1 + $0xeb8] sm:$0xff] }
 0x10e   :  { %v41_v30 = vld [vmem:[%s5315_s1 + $0x30] sm:$0xff]  ;;  %1111 = vmatpush.msra.mxu3 %v433_v28  ;;  %v4193_v35 = vadd.f32 %v714_v33, %v695_v29  ;;  %1013 = vmatmul.f32.vlgmr.msrb.gmra.mxu2 %v3989_v3  ;;  %v114_v60 = vld [vmem:[%s5315_s1 + $0x278] sm:$0xff] }
 0x10f   :  { %v169_v31 = vld [vmem:[%s5315_s1 + $0x430] sm:$0xff]  ;;  %1052 = vmatpush.msra.mxu0 %v41_v30  ;;  %993 = vmatmul.f32.vlgmr.msrb.gmra.mxu1 %v4007_v26  ;;  %v242_v62 = vld [vmem:[%s5315_s1 + $0x678] sm:$0xff] }
 0x110   :  { %v297_v32 = vld [vmem:[%s5315_s1 + $0x830] sm:$0xff]  ;;  %5403 = vst [vmem:[#allocation9_spill] sm:$0xff] %v4193_v35  ;;  %1072 = vmatpush.msra.mxu1 %v169_v31  ;;  %1033 = vmatmul.f32.vlgmr.msrb.gmra.mxu3 %v4010_v27  ;;  %v370_v63 = vld [vmem:[%s5315_s1 + $0xa78] sm:$0xff] }
 0x111   :  { %v425_v34 = vld [vmem:[%s5315_s1 + $0xc30] sm:$0xff]  ;;  %1092 = vmatpush.msra.mxu2 %v297_v32  ;;  %1117 = vmatpush.msrb.mxu0 %v162_v36  ;;  %v498_v0 = vld [vmem:[%s5315_s1 + $0xe78] sm:$0xff] }
 0x112   :  { %1112 = vmatpush.msra.mxu3 %v425_v34  ;;  %1137 = vmatpush.msrb.mxu1 %v290_v37  ;;  %v106_v1 = vld [vmem:[%s5315_s1 + $0x238] sm:$0xff] }
 0x113   :  { %1157 = vmatpush.msrb.mxu2 %v418_v38  ;;  %1118 = vmatpush.msrb.mxu0 %v154_v40  ;;  %v234_v5 = vld [vmem:[%s5315_s1 + $0x638] sm:$0xff] }
 0x114   :  { %1177 = vmatpush.msrb.mxu3 %v546_v39  ;;  %1138 = vmatpush.msrb.mxu1 %v282_v41  ;;  %v362_v6 = vld [vmem:[%s5315_s1 + $0xa38] sm:$0xff] }
 0x115   :  { %1158 = vmatpush.msrb.mxu2 %v410_v42  ;;  %1119 = vmatpush.msrb.mxu0 %v146_v44  ;;  %v490_v7 = vld [vmem:[%s5315_s1 + $0xe38] sm:$0xff]  ;;  %v1317_v42 = vld [vmem:[#allocation2 + $0x3c0] sm:$0xff]  ;;  %v1318_v44 = vld [vmem:[#allocation2 + $0x3c8] sm:$0xff] }
 0x116   :  { %1178 = vmatpush.msrb.mxu3 %v538_v43  ;;  %1139 = vmatpush.msrb.mxu1 %v274_v45  ;;  %v98_v8 = vld [vmem:[%s5315_s1 + $0x1f8] sm:$0xff]  ;;  %v1445_v43 = vld [vmem:[#allocation2 + $0x7c0] sm:$0xff]  ;;  %v1446_v45 = vld [vmem:[#allocation2 + $0x7c8] sm:$0xff] }
 0x117   :  { %1159 = vmatpush.msrb.mxu2 %v402_v46  ;;  %1120 = vmatpush.msrb.mxu0 %v138_v48  ;;  %v226_v9 = vld [vmem:[%s5315_s1 + $0x5f8] sm:$0xff]  ;;  %v1309_v46 = vld [vmem:[#allocation2 + $0x380] sm:$0xff]  ;;  %v1310_v48 = vld [vmem:[#allocation2 + $0x388] sm:$0xff] }
 0x118   :  { %1179 = vmatpush.msrb.mxu3 %v530_v47  ;;  %1140 = vmatpush.msrb.mxu1 %v266_v49  ;;  %v354_v10 = vld [vmem:[%s5315_s1 + $0x9f8] sm:$0xff]  ;;  %v1437_v47 = vld [vmem:[#allocation2 + $0x780] sm:$0xff]  ;;  %v1438_v49 = vld [vmem:[#allocation2 + $0x788] sm:$0xff] }
 0x119   :  { %1160 = vmatpush.msrb.mxu2 %v394_v50  ;;  %1121 = vmatpush.msrb.mxu0 %v130_v52  ;;  %v482_v11 = vld [vmem:[%s5315_s1 + $0xdf8] sm:$0xff]  ;;  %v1301_v50 = vld [vmem:[#allocation2 + $0x340] sm:$0xff]  ;;  %v1302_v52 = vld [vmem:[#allocation2 + $0x348] sm:$0xff] }
 0x11a   :  { %1180 = vmatpush.msrb.mxu3 %v522_v51  ;;  %1141 = vmatpush.msrb.mxu1 %v258_v53  ;;  %v90_v12 = vld [vmem:[%s5315_s1 + $0x1b8] sm:$0xff]  ;;  %v1429_v51 = vld [vmem:[#allocation2 + $0x740] sm:$0xff]  ;;  %v1430_v53 = vld [vmem:[#allocation2 + $0x748] sm:$0xff] }
 0x11b   :  { %1161 = vmatpush.msrb.mxu2 %v386_v54  ;;  %1122 = vmatpush.msrb.mxu0 %v122_v56  ;;  %v218_v13 = vld [vmem:[%s5315_s1 + $0x5b8] sm:$0xff]  ;;  %v1293_v54 = vld [vmem:[#allocation2 + $0x300] sm:$0xff]  ;;  %v1294_v56 = vld [vmem:[#allocation2 + $0x308] sm:$0xff] }
 0x11c   :  { %1181 = vmatpush.msrb.mxu3 %v514_v55  ;;  %1142 = vmatpush.msrb.mxu1 %v250_v57  ;;  %v346_v14 = vld [vmem:[%s5315_s1 + $0x9b8] sm:$0xff]  ;;  %v1421_v55 = vld [vmem:[#allocation2 + $0x700] sm:$0xff]  ;;  %v1422_v57 = vld [vmem:[#allocation2 + $0x708] sm:$0xff] }
 0x11d   :  { %1162 = vmatpush.msrb.mxu2 %v378_v58  ;;  %1123 = vmatpush.msrb.mxu0 %v114_v60  ;;  %v474_v15 = vld [vmem:[%s5315_s1 + $0xdb8] sm:$0xff]  ;;  %v1285_v58 = vld [vmem:[#allocation2 + $0x2c0] sm:$0xff]  ;;  %v1286_v60 = vld [vmem:[#allocation2 + $0x2c8] sm:$0xff] }
 0x11e   :  { %1182 = vmatpush.msrb.mxu3 %v506_v59  ;;  %1143 = vmatpush.msrb.mxu1 %v242_v62  ;;  %v82_v16 = vld [vmem:[%s5315_s1 + $0x178] sm:$0xff]  ;;  %v1413_v59 = vld [vmem:[#allocation2 + $0x6c0] sm:$0xff]  ;;  %v1414_v62 = vld [vmem:[#allocation2 + $0x6c8] sm:$0xff] }
 0x11f   :  { %1163 = vmatpush.msrb.mxu2 %v370_v63  ;;  %1124 = vmatpush.msrb.mxu0 %v106_v1  ;;  %v210_v17 = vld [vmem:[%s5315_s1 + $0x578] sm:$0xff]  ;;  %v1277_v63 = vld [vmem:[#allocation2 + $0x280] sm:$0xff]  ;;  %v1278_v1 = vld [vmem:[#allocation2 + $0x288] sm:$0xff] }
 0x120   :  { %1183 = vmatpush.msrb.mxu3 %v498_v0  ;;  %1144 = vmatpush.msrb.mxu1 %v234_v5  ;;  %v338_v18 = vld [vmem:[%s5315_s1 + $0x978] sm:$0xff]  ;;  %v1405_v0 = vld [vmem:[#allocation2 + $0x680] sm:$0xff]  ;;  %v1406_v5 = vld [vmem:[#allocation2 + $0x688] sm:$0xff] }
 0x121   :  { %1164 = vmatpush.msrb.mxu2 %v362_v6  ;;  %1125 = vmatpush.msrb.mxu0 %v98_v8  ;;  %v466_v19 = vld [vmem:[%s5315_s1 + $0xd78] sm:$0xff]  ;;  %v1269_v6 = vld [vmem:[#allocation2 + $0x240] sm:$0xff]  ;;  %v4395_v8 = vld [vmem:[#allocation2 + $0x248] sm:$0xff] }
 0x122   :  { %1184 = vmatpush.msrb.mxu3 %v490_v7  ;;  %1145 = vmatpush.msrb.mxu1 %v226_v9  ;;  %v74_v61 = vld [vmem:[%s5315_s1 + $0x138] sm:$0xff]  ;;  %v1397_v7 = vld [vmem:[#allocation2 + $0x640] sm:$0xff]  ;;  %v4397_v9 = vld [vmem:[#allocation2 + $0x648] sm:$0xff] }
 0x123   :  { %1165 = vmatpush.msrb.mxu2 %v354_v10  ;;  %1126 = vmatpush.msrb.mxu0 %v90_v12  ;;  %v202_v20 = vld [vmem:[%s5315_s1 + $0x538] sm:$0xff]  ;;  %v4399_v10 = vld [vmem:[#allocation2 + $0x200] sm:$0xff]  ;;  %v4403_v12 = vld [vmem:[#allocation2 + $0x208] sm:$0xff] }
 0x124   :  { %1185 = vmatpush.msrb.mxu3 %v482_v11  ;;  %1146 = vmatpush.msrb.mxu1 %v218_v13  ;;  %v330_v2 = vld [vmem:[%s5315_s1 + $0x938] sm:$0xff]  ;;  %v4401_v11 = vld [vmem:[#allocation2 + $0x600] sm:$0xff]  ;;  %v4405_v13 = vld [vmem:[#allocation2 + $0x608] sm:$0xff] }
 0x125   :  { %1166 = vmatpush.msrb.mxu2 %v346_v14  ;;  %1127 = vmatpush.msrb.mxu0 %v82_v16  ;;  %v458_v4 = vld [vmem:[%s5315_s1 + $0xd38] sm:$0xff]  ;;  %v4409_v14 = vld [vmem:[#allocation2 + $0x1c0] sm:$0xff]  ;;  %v4415_v16 = vld [vmem:[#allocation2 + $0x1c8] sm:$0xff] }
 0x126   :  { %1186 = vmatpush.msrb.mxu3 %v474_v15  ;;  %1147 = vmatpush.msrb.mxu1 %v210_v17  ;;  %v66_v22 = vld [vmem:[%s5315_s1 + $0xf8] sm:$0xff]  ;;  %v4411_v15 = vld [vmem:[#allocation2 + $0x5c0] sm:$0xff]  ;;  %v4417_v17 = vld [vmem:[#allocation2 + $0x5c8] sm:$0xff] }
 0x127   :  { %1167 = vmatpush.msrb.mxu2 %v338_v18  ;;  %v194_v24 = vld [vmem:[%s5315_s1 + $0x4f8] sm:$0xff]  ;;  %1128 = vmatpush.msrb.mxu0 %v74_v61  ;;  %v4421_v18 = vld [vmem:[#allocation2 + $0x180] sm:$0xff]  ;;  %v4427_v61 = vld [vmem:[#allocation2 + $0x188] sm:$0xff] }
 0x128   :  { %1187 = vmatpush.msrb.mxu3 %v466_v19  ;;  %1148 = vmatpush.msrb.mxu1 %v202_v20  ;;  %v322_v25 = vld [vmem:[%s5315_s1 + $0x8f8] sm:$0xff]  ;;  %v4423_v19 = vld [vmem:[#allocation2 + $0x580] sm:$0xff]  ;;  %v4429_v20 = vld [vmem:[#allocation2 + $0x588] sm:$0xff] }
 0x129   :  { %v450_v28 = vld [vmem:[%s5315_s1 + $0xcf8] sm:$0xff]  ;;  %1168 = vmatpush.msrb.mxu2 %v330_v2  ;;  %1129 = vmatpush.msrb.mxu0 %v66_v22  ;;  %v4433_v2 = vld [vmem:[#allocation2 + $0x140] sm:$0xff]  ;;  %v4439_v22 = vld [vmem:[#allocation2 + $0x148] sm:$0xff] }
 0x12a   :  { %1188 = vmatpush.msrb.mxu3 %v458_v4  ;;  %v58_v29 = vld [vmem:[%s5315_s1 + $0xb8] sm:$0xff]  ;;  %1149 = vmatpush.msrb.mxu1 %v194_v24  ;;  %v4435_v4 = vld [vmem:[#allocation2 + $0x540] sm:$0xff]  ;;  %v4441_v24 = vld [vmem:[#allocation2 + $0x548] sm:$0xff] }
 0x12b   :  { %v186_v30 = vld [vmem:[%s5315_s1 + $0x4b8] sm:$0xff]  ;;  %1169 = vmatpush.msrb.mxu2 %v322_v25  ;;  %1130 = vmatpush.msrb.mxu0 %v58_v29  ;;  %v4445_v25 = vld [vmem:[#allocation2 + $0x100] sm:$0xff]  ;;  %v4451_v29 = vld [vmem:[#allocation2 + $0x108] sm:$0xff] }
 0x12c   :  { %v314_v31 = vld [vmem:[%s5315_s1 + $0x8b8] sm:$0xff]  ;;  %1189 = vmatpush.msrb.mxu3 %v450_v28  ;;  %1150 = vmatpush.msrb.mxu1 %v186_v30  ;;  %v4447_v28 = vld [vmem:[#allocation2 + $0x500] sm:$0xff]  ;;  %v4453_v30 = vld [vmem:[#allocation2 + $0x508] sm:$0xff] }
 0x12d   :  { %v442_v32 = vld [vmem:[%s5315_s1 + $0xcb8] sm:$0xff]  ;;  %1170 = vmatpush.msrb.mxu2 %v314_v31  ;;  %1053 = vmatmul.f32.vlgmr.msra.gmra.mxu0 %v3998_v23  ;;  %v4461_v31 = vld [vmem:[#allocation2 + $0xc0] sm:$0xff] }
 0x12e   :  { %v50_v33 = vld [vmem:[%s5315_s1 + $0x78] sm:$0xff]  ;;  %1190 = vmatpush.msrb.mxu3 %v442_v32  ;;  %1093 = vmatmul.f32.vlgmr.msra.gmra.mxu2 %v3989_v3  ;;  %v4463_v32 = vld [vmem:[#allocation2 + $0x4c0] sm:$0xff] }
 0x12f   :  { %v178_v34 = vld [vmem:[%s5315_s1 + $0x478] sm:$0xff]  ;;  %1131 = vmatpush.msrb.mxu0 %v50_v33  ;;  %1073 = vmatmul.f32.vlgmr.msra.gmra.mxu1 %v4007_v26  ;;  %v4467_v33 = vld [vmem:[#allocation2 + $0xc8] sm:$0xff] }
 0x130   :  { %v306_v36 = vld [vmem:[%s5315_s1 + $0x878] sm:$0xff]  ;;  %1151 = vmatpush.msrb.mxu1 %v178_v34  ;;  %1113 = vmatmul.f32.vlgmr.msra.gmra.mxu3 %v4010_v27  ;;  %v4469_v34 = vld [vmem:[#allocation2 + $0x4c8] sm:$0xff] }
 0x131   :  { %v434_v37 = vld [vmem:[%s5315_s1 + $0xc78] sm:$0xff]  ;;  %1171 = vmatpush.msrb.mxu2 %v306_v36  ;;  %v4473_v36 = vld [vmem:[#allocation2 + $0x80] sm:$0xff] }
 0x132   :  { %v42_v38 = vld [vmem:[%s5315_s1 + $0x38] sm:$0xff]  ;;  %1191 = vmatpush.msrb.mxu3 %v434_v37  ;;  %v4475_v37 = vld [vmem:[#allocation2 + $0x480] sm:$0xff] }
 0x133   :  { %v170_v39 = vld [vmem:[%s5315_s1 + $0x438] sm:$0xff]  ;;  %1132 = vmatpush.msrb.mxu0 %v42_v38  ;;  %v4479_v38 = vld [vmem:[#allocation2 + $0x88] sm:$0xff] }
 0x134   :  { %v298_v40 = vld [vmem:[%s5315_s1 + $0x838] sm:$0xff]  ;;  %1152 = vmatpush.msrb.mxu1 %v170_v39  ;;  %v4493_v39 = vld [vmem:[#allocation2 + $0x448] sm:$0xff] }
 0x135   :  { %v426_v41 = vld [vmem:[%s5315_s1 + $0xc38] sm:$0xff]  ;;  %1172 = vmatpush.msrb.mxu2 %v298_v40  ;;  %1453 = vmatpush.msra.mxu0 %v1317_v42  ;;  %v4497_v40 = vld [vmem:[#allocation2] sm:$0xff]  ;;  %v4503_v42 = vld [vmem:[#allocation2 + $0x8] sm:$0xff] }
 0x136   :  { %1192 = vmatpush.msrb.mxu3 %v426_v41  ;;  %1473 = vmatpush.msra.mxu1 %v1445_v43  ;;  %v4499_v41 = vld [vmem:[#allocation2 + $0x400] sm:$0xff]  ;;  %v4505_v43 = vld [vmem:[#allocation2 + $0x408] sm:$0xff]  ;;  %v4585_v35 = vld [vmem:[#allocation2 + $0x250] sm:$0xff] }
 0x137   :  { %1493 = vmatpush.msra.mxu2 %v1318_v44  ;;  %1454 = vmatpush.msra.mxu0 %v1309_v46  ;;  %v4513_v44 = vld [vmem:[#allocation2 + $0x3d0] sm:$0xff]  ;;  %v5319_v46 = vmov 0.0   ;;  %5419 = vst [vmem:[#allocation25_spill] sm:$0xff] %v4585_v35 }
 0x138   :  { %1513 = vmatpush.msra.mxu3 %v1446_v45  ;;  %1474 = vmatpush.msra.mxu1 %v1437_v47  ;;  %v4515_v45 = vld [vmem:[#allocation2 + $0x7d0] sm:$0xff]  ;;  %v4519_v47 = vld [vmem:[#allocation2 + $0x3d8] sm:$0xff] }
 0x139   :  { %1494 = vmatpush.msra.mxu2 %v1310_v48  ;;  %1455 = vmatpush.msra.mxu0 %v1301_v50  ;;  %v4521_v48 = vld [vmem:[#allocation2 + $0x7d8] sm:$0xff]  ;;  %v4527_v50 = vld [vmem:[#allocation2 + $0x790] sm:$0xff] }
 0x13a   :  { %1514 = vmatpush.msra.mxu3 %v1438_v49  ;;  %1475 = vmatpush.msra.mxu1 %v1429_v51  ;;  %v4525_v49 = vld [vmem:[#allocation2 + $0x390] sm:$0xff]  ;;  %v4531_v51 = vld [vmem:[#allocation2 + $0x398] sm:$0xff] }
 0x13b   :  { %1495 = vmatpush.msra.mxu2 %v1302_v52  ;;  %1456 = vmatpush.msra.mxu0 %v1293_v54  ;;  %v4533_v52 = vld [vmem:[#allocation2 + $0x798] sm:$0xff]  ;;  %v4539_v54 = vld [vmem:[#allocation2 + $0x750] sm:$0xff] }
 0x13c   :  { %1515 = vmatpush.msra.mxu3 %v1430_v53  ;;  %1476 = vmatpush.msra.mxu1 %v1421_v55  ;;  %5404 = vst [vmem:[#allocation10_spill] sm:$0xff] %v4533_v52  ;;  %v4537_v53 = vld [vmem:[#allocation2 + $0x350] sm:$0xff]  ;;  %v4543_v55 = vld [vmem:[#allocation2 + $0x358] sm:$0xff] }
 0x13d   :  { %1496 = vmatpush.msra.mxu2 %v1294_v56  ;;  %1457 = vmatpush.msra.mxu0 %v1285_v58  ;;  %5405 = vst [vmem:[#allocation11_spill] sm:$0xff] %v4539_v54  ;;  %v4545_v56 = vld [vmem:[#allocation2 + $0x758] sm:$0xff]  ;;  %v4551_v58 = vld [vmem:[#allocation2 + $0x710] sm:$0xff] }
 0x13e   :  { %1516 = vmatpush.msra.mxu3 %v1422_v57  ;;  %1477 = vmatpush.msra.mxu1 %v1413_v59  ;;  %5406 = vst [vmem:[#allocation12_spill] sm:$0xff] %v4545_v56  ;;  %v4549_v57 = vld [vmem:[#allocation2 + $0x310] sm:$0xff]  ;;  %v4555_v59 = vld [vmem:[#allocation2 + $0x318] sm:$0xff] }
 0x13f   :  { %1497 = vmatpush.msra.mxu2 %v1286_v60  ;;  %1458 = vmatpush.msra.mxu0 %v1277_v63  ;;  %5407 = vst [vmem:[#allocation13_spill] sm:$0xff] %v4549_v57  ;;  %v4557_v60 = vld [vmem:[#allocation2 + $0x718] sm:$0xff]  ;;  %v4563_v63 = vld [vmem:[#allocation2 + $0x6d0] sm:$0xff] }
 0x140   :  { %1517 = vmatpush.msra.mxu3 %v1414_v62  ;;  %1478 = vmatpush.msra.mxu1 %v1405_v0  ;;  %5408 = vst [vmem:[#allocation14_spill] sm:$0xff] %v4551_v58  ;;  %v4561_v62 = vld [vmem:[#allocation2 + $0x2d0] sm:$0xff]  ;;  %v4567_v0 = vld [vmem:[#allocation2 + $0x2d8] sm:$0xff] }
 0x141   :  { %1498 = vmatpush.msra.mxu2 %v1278_v1  ;;  %1459 = vmatpush.msra.mxu0 %v1269_v6  ;;  %5409 = vst [vmem:[#allocation15_spill] sm:$0xff] %v4555_v59  ;;  %v4569_v1 = vld [vmem:[#allocation2 + $0x6d8] sm:$0xff]  ;;  %v4575_v6 = vld [vmem:[#allocation2 + $0x690] sm:$0xff] }
 0x142   :  { %1518 = vmatpush.msra.mxu3 %v1406_v5  ;;  %1479 = vmatpush.msra.mxu1 %v1397_v7  ;;  %5410 = vst [vmem:[#allocation16_spill] sm:$0xff] %v4557_v60  ;;  %v4573_v5 = vld [vmem:[#allocation2 + $0x290] sm:$0xff]  ;;  %v4579_v7 = vld [vmem:[#allocation2 + $0x298] sm:$0xff] }
 0x143   :  { %1499 = vmatpush.msra.mxu2 %v4395_v8  ;;  %1460 = vmatpush.msra.mxu0 %v4399_v10  ;;  %5411 = vst [vmem:[#allocation17_spill] sm:$0xff] %v4561_v62 }
 0x144   :  { %1519 = vmatpush.msra.mxu3 %v4397_v9  ;;  %1480 = vmatpush.msra.mxu1 %v4401_v11  ;;  %5412 = vst [vmem:[#allocation18_spill] sm:$0xff] %v4563_v63 }
 0x145   :  { %1500 = vmatpush.msra.mxu2 %v4403_v12  ;;  %1461 = vmatpush.msra.mxu0 %v4409_v14  ;;  %5413 = vst [vmem:[#allocation19_spill] sm:$0xff] %v4567_v0 }
 0x146   :  { %1520 = vmatpush.msra.mxu3 %v4405_v13  ;;  %1481 = vmatpush.msra.mxu1 %v4411_v15  ;;  %5414 = vst [vmem:[#allocation20_spill] sm:$0xff] %v4569_v1 }
 0x147   :  { %1501 = vmatpush.msra.mxu2 %v4415_v16  ;;  %1462 = vmatpush.msra.mxu0 %v4421_v18  ;;  %5415 = vst [vmem:[#allocation21_spill] sm:$0xff] %v4573_v5 }
 0x148   :  { %1521 = vmatpush.msra.mxu3 %v4417_v17  ;;  %1482 = vmatpush.msra.mxu1 %v4423_v19  ;;  %5416 = vst [vmem:[#allocation22_spill] sm:$0xff] %v4575_v6 }
 0x149   :  { %1502 = vmatpush.msra.mxu2 %v4427_v61  ;;  %1463 = vmatpush.msra.mxu0 %v4433_v2  ;;  %5417 = vst [vmem:[#allocation23_spill] sm:$0xff] %v4579_v7 }
 0x14a   :  { %1522 = vmatpush.msra.mxu3 %v4429_v20  ;;  %1483 = vmatpush.msra.mxu1 %v4435_v4 }
 0x14b   :  { %1503 = vmatpush.msra.mxu2 %v4439_v22  ;;  %1464 = vmatpush.msra.mxu0 %v4445_v25 }
 0x14c   :  { %1523 = vmatpush.msra.mxu3 %v4441_v24  ;;  %1484 = vmatpush.msra.mxu1 %v4447_v28 }
 0x14d   :  { %1504 = vmatpush.msra.mxu2 %v4451_v29  ;;  %1133 = vmatmul.f32.vlgmr.msrb.gmra.mxu0 %v3998_v23  ;;  %v4481_v23 = vld [vmem:[#allocation2 + $0x488] sm:$0xff] }
 0x14e   :  { %1524 = vmatpush.msra.mxu3 %v4453_v30  ;;  %1153 = vmatmul.f32.vlgmr.msrb.gmra.mxu1 %v4007_v26  ;;  %v4485_v26 = vld [vmem:[#allocation2 + $0x40] sm:$0xff] }
 0x14f   :  { %1173 = vmatmul.f32.vlgmr.msrb.gmra.mxu2 %v3989_v3  ;;  %1193 = vmatmul.f32.vlgmr.msrb.gmra.mxu3 %v4010_v27  ;;  %v4487_v3 = vld [vmem:[#allocation2 + $0x440] sm:$0xff]  ;;  %v4491_v27 = vld [vmem:[#allocation2 + $0x48] sm:$0xff] }
 0x150   :  { %1465 = vmatpush.msra.mxu0 %v4461_v31  ;;  %1485 = vmatpush.msra.mxu1 %v4463_v32 }
 0x151   :  { %1505 = vmatpush.msra.mxu2 %v4467_v33  ;;  %1525 = vmatpush.msra.mxu3 %v4469_v34 }
 0x152   :  { %1466 = vmatpush.msra.mxu0 %v4473_v36  ;;  %1486 = vmatpush.msra.mxu1 %v4475_v37 }
 0x153   :  { %1506 = vmatpush.msra.mxu2 %v4479_v38  ;;  %1526 = vmatpush.msra.mxu3 %v4481_v23 }
 0x154   :  { %1467 = vmatpush.msra.mxu0 %v4485_v26  ;;  %1487 = vmatpush.msra.mxu1 %v4487_v3 }
 0x155   :  { %1507 = vmatpush.msra.mxu2 %v4491_v27  ;;  %1527 = vmatpush.msra.mxu3 %v4493_v39 }
 0x156   :  { %1468 = vmatpush.msra.mxu0 %v4497_v40  ;;  %1488 = vmatpush.msra.mxu1 %v4499_v41 }
 0x157   :  { %1508 = vmatpush.msra.mxu2 %v4503_v42  ;;  %1528 = vmatpush.msra.mxu3 %v4505_v43 }
 0x158   :  { %1469 = vmatmul.f32.vlgmr.msra.gmra.mxu0 %v5319_v46  ;;  %1489 = vmatmul.f32.vlgmr.msra.gmra.mxu1 %v5319_v46 }
 0x159   :  { %1509 = vmatmul.f32.vlgmr.msra.gmra.mxu2 %v5319_v46  ;;  %1529 = vmatmul.f32.vlgmr.msra.gmra.mxu3 %v5319_v46  ;;  %v4581_v46 = vld [vmem:[#allocation2 + $0x698] sm:$0xff] }
 0x15a   :  { %1533 = vmatpush.msrb.mxu0 %v4513_v44  ;;  %1553 = vmatpush.msrb.mxu1 %v4515_v45  ;;  %5418 = vst [vmem:[#allocation24_spill] sm:$0xff] %v4581_v46 }
 0x15b   :  { %1573 = vmatpush.msrb.mxu2 %v4519_v47  ;;  %1593 = vmatpush.msrb.mxu3 %v4521_v48 }
 0x15c   :  { %1534 = vmatpush.msrb.mxu0 %v4525_v49  ;;  %1554 = vmatpush.msrb.mxu1 %v4527_v50 }
 0x15d   :  { %1574 = vmatpush.msrb.mxu2 %v4531_v51  ;;  %1594 = vmatpush.msrb.mxu3 %v4533_v52  ;;  %v1426_v52 = vld [vmem:[#allocation2 + $0x728] sm:$0xff] }
 0x15e   :  { %1535 = vmatpush.msrb.mxu0 %v4537_v53  ;;  %1555 = vmatpush.msrb.mxu1 %v4539_v54  ;;  %v1297_v54 = vld [vmem:[#allocation2 + $0x320] sm:$0xff] }
 0x15f   :  { %1575 = vmatpush.msrb.mxu2 %v4543_v55  ;;  %1595 = vmatpush.msrb.mxu3 %v4545_v56  ;;  %v1434_v56 = vld [vmem:[#allocation2 + $0x768] sm:$0xff] }
 0x160   :  { %1536 = vmatpush.msrb.mxu0 %v4549_v57  ;;  %1556 = vmatpush.msrb.mxu1 %v4551_v58  ;;  %v4593_v58 = vld [vmem:[#allocation2 + $0x658] sm:$0xff]  ;;  %v1298_v57 = vld [vmem:[#allocation2 + $0x328] sm:$0xff] }
 0x161   :  { %1576 = vmatpush.msrb.mxu2 %v4555_v59  ;;  %1596 = vmatpush.msrb.mxu3 %v4557_v60  ;;  %v4591_v60 = vld [vmem:[#allocation2 + $0x258] sm:$0xff]  ;;  %5422 = vst [vmem:[#allocation28_spill] sm:$0xff] %v4593_v58  ;;  %v1425_v59 = vld [vmem:[#allocation2 + $0x720] sm:$0xff] }
 0x162   :  { %1537 = vmatpush.msrb.mxu0 %v4561_v62  ;;  %1557 = vmatpush.msrb.mxu1 %v4563_v63  ;;  %5421 = vst [vmem:[#allocation27_spill] sm:$0xff] %v4591_v60  ;;  %v4597_v63 = vld [vmem:[#allocation2 + $0x210] sm:$0xff]  ;;  %v1306_v62 = vld [vmem:[#allocation2 + $0x368] sm:$0xff] }
 0x163   :  { %1577 = vmatpush.msrb.mxu2 %v4567_v0  ;;  %1597 = vmatpush.msrb.mxu3 %v4569_v1  ;;  %5423 = vst [vmem:[#allocation29_spill] sm:$0xff] %v4597_v63  ;;  %v4599_v0 = vld [vmem:[#allocation2 + $0x610] sm:$0xff]  ;;  %v4603_v1 = vld [vmem:[#allocation2 + $0x218] sm:$0xff] }
 0x164   :  { %1538 = vmatpush.msrb.mxu0 %v4573_v5  ;;  %1558 = vmatpush.msrb.mxu1 %v4575_v6  ;;  %5424 = vst [vmem:[#allocation30_spill] sm:$0xff] %v4599_v0  ;;  %v4605_v5 = vld [vmem:[#allocation2 + $0x618] sm:$0xff]  ;;  %v4609_v6 = vld [vmem:[#allocation2 + $0x1d0] sm:$0xff] }
 0x165   :  { %1578 = vmatpush.msrb.mxu2 %v4579_v7  ;;  %1598 = vmatpush.msrb.mxu3 %v4581_v46  ;;  %5425 = vst [vmem:[#allocation31_spill] sm:$0xff] %v4603_v1  ;;  %v4611_v7 = vld [vmem:[#allocation2 + $0x5d0] sm:$0xff]  ;;  %v4615_v46 = vld [vmem:[#allocation2 + $0x1d8] sm:$0xff] }
 0x166   :  { %1539 = vmatpush.msrb.mxu0 %v4585_v35  ;;  %1559 = vmatpush.msrb.mxu1 %v4587_v21  ;;  %5426 = vst [vmem:[#allocation32_spill] sm:$0xff] %v4605_v5  ;;  %v4617_v35 = vld [vmem:[#allocation2 + $0x5d8] sm:$0xff]  ;;  %v4621_v21 = vld [vmem:[#allocation2 + $0x190] sm:$0xff] }
 0x167   :  { %1579 = vmatpush.msrb.mxu2 %v4591_v60  ;;  %1599 = vmatpush.msrb.mxu3 %v4593_v58  ;;  %5427 = vst [vmem:[#allocation33_spill] sm:$0xff] %v4609_v6  ;;  %v4623_v60 = vld [vmem:[#allocation2 + $0x590] sm:$0xff]  ;;  %v4627_v58 = vld [vmem:[#allocation2 + $0x198] sm:$0xff] }
 0x168   :  { %5428 = vst [vmem:[#allocation34_spill] sm:$0xff] %v4611_v7  ;;  %1540 = vmatpush.msrb.mxu0 %v4597_v63  ;;  %1560 = vmatpush.msrb.mxu1 %v4599_v0  ;;  %v4629_v63 = vld [vmem:[#allocation2 + $0x598] sm:$0xff]  ;;  %v4633_v0 = vld [vmem:[#allocation2 + $0x150] sm:$0xff] }
 0x169   :  { %5429 = vst [vmem:[#allocation35_spill] sm:$0xff] %v4615_v46  ;;  %1580 = vmatpush.msrb.mxu2 %v4603_v1  ;;  %1600 = vmatpush.msrb.mxu3 %v4605_v5  ;;  %v4635_v1 = vld [vmem:[#allocation2 + $0x550] sm:$0xff]  ;;  %v4639_v5 = vld [vmem:[#allocation2 + $0x158] sm:$0xff] }
 0x16a   :  { %5430 = vst [vmem:[#allocation36_spill] sm:$0xff] %v4617_v35  ;;  %1541 = vmatpush.msrb.mxu0 %v4609_v6  ;;  %1561 = vmatpush.msrb.mxu1 %v4611_v7  ;;  %v4641_v6 = vld [vmem:[#allocation2 + $0x558] sm:$0xff]  ;;  %v4645_v7 = vld [vmem:[#allocation2 + $0x110] sm:$0xff] }
 0x16b   :  { %5431 = vst [vmem:[#allocation37_spill] sm:$0xff] %v4621_v21  ;;  %1581 = vmatpush.msrb.mxu2 %v4615_v46  ;;  %1601 = vmatpush.msrb.mxu3 %v4617_v35  ;;  %v4647_v46 = vld [vmem:[#allocation2 + $0x510] sm:$0xff]  ;;  %v4651_v35 = vld [vmem:[#allocation2 + $0x118] sm:$0xff] }
 0x16c   :  { %5432 = vst [vmem:[#allocation38_spill] sm:$0xff] %v4623_v60  ;;  %1542 = vmatpush.msrb.mxu0 %v4621_v21  ;;  %1562 = vmatpush.msrb.mxu1 %v4623_v60  ;;  %v4653_v21 = vld [vmem:[#allocation2 + $0x518] sm:$0xff]  ;;  %v4657_v60 = vld [vmem:[#allocation2 + $0xd0] sm:$0xff] }
 0x16d   :  { %5433 = vst [vmem:[#allocation39_spill] sm:$0xff] %v4627_v58  ;;  %1582 = vmatpush.msrb.mxu2 %v4627_v58  ;;  %1602 = vmatpush.msrb.mxu3 %v4629_v63  ;;  %v4659_v58 = vld [vmem:[#allocation2 + $0x4d0] sm:$0xff] }
 0x16e   :  { %5434 = vst [vmem:[#allocation40_spill] sm:$0xff] %v4629_v63  ;;  %1543 = vmatpush.msrb.mxu0 %v4633_v0  ;;  %1563 = vmatpush.msrb.mxu1 %v4635_v1  ;;  %v4663_v63 = vld [vmem:[#allocation2 + $0xd8] sm:$0xff] }
 0x16f   :  { %5435 = vst [vmem:[#allocation41_spill] sm:$0xff] %v4633_v0  ;;  %1583 = vmatpush.msrb.mxu2 %v4639_v5  ;;  %1603 = vmatpush.msrb.mxu3 %v4641_v6  ;;  %v4665_v0 = vld [vmem:[#allocation2 + $0x4d8] sm:$0xff] }
 0x170   :  { %5436 = vst [vmem:[#allocation42_spill] sm:$0xff] %v4635_v1  ;;  %1544 = vmatpush.msrb.mxu0 %v4645_v7  ;;  %1564 = vmatpush.msrb.mxu1 %v4647_v46  ;;  %v4669_v1 = vld [vmem:[#allocation2 + $0x90] sm:$0xff] }
 0x171   :  { %5437 = vst [vmem:[#allocation43_spill] sm:$0xff] %v4639_v5  ;;  %1584 = vmatpush.msrb.mxu2 %v4651_v35  ;;  %1604 = vmatpush.msrb.mxu3 %v4653_v21  ;;  %v4671_v5 = vld [vmem:[#allocation2 + $0x490] sm:$0xff] }
 0x172   :  { %5438 = vst [vmem:[#allocation44_spill] sm:$0xff] %v4641_v6  ;;  %1545 = vmatpush.msrb.mxu0 %v4657_v60  ;;  %1565 = vmatpush.msrb.mxu1 %v4659_v58  ;;  %v4675_v6 = vld [vmem:[#allocation2 + $0x98] sm:$0xff] }
 0x173   :  { %5439 = vst [vmem:[#allocation45_spill] sm:$0xff] %v4645_v7  ;;  %v4677_v7 = vld [vmem:[#allocation2 + $0x498] sm:$0xff]  ;;  %1585 = vmatpush.msrb.mxu2 %v4663_v63  ;;  %1605 = vmatpush.msrb.mxu3 %v4665_v0 }
 0x174   :  { %5440 = vst [vmem:[#allocation46_spill] sm:$0xff] %v4647_v46  ;;  %v4681_v46 = vld [vmem:[#allocation2 + $0x50] sm:$0xff]  ;;  %1546 = vmatpush.msrb.mxu0 %v4669_v1  ;;  %1566 = vmatpush.msrb.mxu1 %v4671_v5 }
 0x175   :  { %5441 = vst [vmem:[#allocation47_spill] sm:$0xff] %v4651_v35  ;;  %v4683_v35 = vld [vmem:[#allocation2 + $0x450] sm:$0xff]  ;;  %1586 = vmatpush.msrb.mxu2 %v4675_v6  ;;  %1606 = vmatpush.msrb.mxu3 %v4677_v7 }
 0x176   :  { %5442 = vst [vmem:[#allocation48_spill] sm:$0xff] %v4653_v21  ;;  %v4687_v21 = vld [vmem:[#allocation2 + $0x58] sm:$0xff]  ;;  %1547 = vmatpush.msrb.mxu0 %v4681_v46  ;;  %1567 = vmatpush.msrb.mxu1 %v4683_v35 }
 0x177   :  { %5443 = vst [vmem:[#allocation49_spill] sm:$0xff] %v4657_v60  ;;  %v4689_v60 = vld [vmem:[#allocation2 + $0x458] sm:$0xff]  ;;  %1587 = vmatpush.msrb.mxu2 %v4687_v21 }
 0x178   :  { %5444 = vst [vmem:[#allocation50_spill] sm:$0xff] %v4659_v58  ;;  %v4693_v58 = vld [vmem:[#allocation2 + $0x10] sm:$0xff]  ;;  %1607 = vmatpush.msrb.mxu3 %v4689_v60 }
 0x179   :  { %5445 = vst [vmem:[#allocation51_spill] sm:$0xff] %v4663_v63  ;;  %v4695_v63 = vld [vmem:[#allocation2 + $0x410] sm:$0xff]  ;;  %1548 = vmatpush.msrb.mxu0 %v4693_v58 }
 0x17a   :  { %5446 = vst [vmem:[#allocation52_spill] sm:$0xff] %v4665_v0  ;;  %v4699_v0 = vld [vmem:[#allocation2 + $0x18] sm:$0xff]  ;;  %1568 = vmatpush.msrb.mxu1 %v4695_v63 }
 0x17b   :  { %5447 = vst [vmem:[#allocation53_spill] sm:$0xff] %v4669_v1  ;;  %v4701_v1 = vld [vmem:[#allocation2 + $0x418] sm:$0xff]  ;;  %1588 = vmatpush.msrb.mxu2 %v4699_v0 }
 0x17c   :  { %5448 = vst [vmem:[#allocation54_spill] sm:$0xff] %v4671_v5  ;;  %1608 = vmatpush.msrb.mxu3 %v4701_v1  ;;  %v1449_v5 = vld [vmem:[#allocation2 + $0x7e0] sm:$0xff] }
 0x17d   :  { %5449 = vst [vmem:[#allocation55_spill] sm:$0xff] %v4675_v6  ;;  %v1450_v6 = vld [vmem:[#allocation2 + $0x7e8] sm:$0xff]  ;;  %1633 = vmatpush.msra.mxu1 %v1449_v5  ;;  %v1289_v5 = vld [vmem:[#allocation2 + $0x2e0] sm:$0xff] }
 0x17e   :  { %5450 = vst [vmem:[#allocation56_spill] sm:$0xff] %v4677_v7  ;;  %v1321_v7 = vld [vmem:[#allocation2 + $0x3e0] sm:$0xff]  ;;  %1673 = vmatpush.msra.mxu3 %v1450_v6  ;;  %v1418_v6 = vld [vmem:[#allocation2 + $0x6e8] sm:$0xff] }
 0x17f   :  { %5451 = vst [vmem:[#allocation57_spill] sm:$0xff] %v4681_v46  ;;  %v5459_v46 = vmov 0.0   ;;  %1613 = vmatpush.msra.mxu0 %v1321_v7  ;;  %v1417_v7 = vld [vmem:[#allocation2 + $0x6e0] sm:$0xff] }
 0x180   :  { %5452 = vst [vmem:[#allocation58_spill] sm:$0xff] %v4683_v35  ;;  %1549 = vmatmul.f32.vlgmr.msrb.gmra.mxu0 %v5459_v46  ;;  %1569 = vmatmul.f32.vlgmr.msrb.gmra.mxu1 %v5459_v46  ;;  %v1322_v35 = vld [vmem:[#allocation2 + $0x3e8] sm:$0xff] }
 0x181   :  { %5453 = vst [vmem:[#allocation59_spill] sm:$0xff] %v4687_v21  ;;  %1589 = vmatmul.f32.vlgmr.msrb.gmra.mxu2 %v5459_v46  ;;  %1609 = vmatmul.f32.vlgmr.msrb.gmra.mxu3 %v5459_v46  ;;  %v1433_v21 = vld [vmem:[#allocation2 + $0x760] sm:$0xff] }
 0x182   :  { %5454 = vst [vmem:[#allocation60_spill] sm:$0xff] %v4689_v60  ;;  %v1313_v60 = vld [vmem:[#allocation2 + $0x3a0] sm:$0xff]  ;;  %1653 = vmatpush.msra.mxu2 %v1322_v35  ;;  %v1290_v35 = vld [vmem:[#allocation2 + $0x2e8] sm:$0xff] }
 0x183   :  { %5455 = vst [vmem:[#allocation61_spill] sm:$0xff] %v4693_v58  ;;  %v1441_v58 = vld [vmem:[#allocation2 + $0x7a0] sm:$0xff]  ;;  %1614 = vmatpush.msra.mxu0 %v1313_v60 }
 0x184   :  { %5456 = vst [vmem:[#allocation62_spill] sm:$0xff] %v4695_v63  ;;  %v1314_v63 = vld [vmem:[#allocation2 + $0x3a8] sm:$0xff]  ;;  %1634 = vmatpush.msra.mxu1 %v1441_v58  ;;  %v1281_v58 = vld [vmem:[#allocation2 + $0x2a0] sm:$0xff] }
 0x185   :  { %5457 = vst [vmem:[#allocation63_spill] sm:$0xff] %v4699_v0  ;;  %v1442_v0 = vld [vmem:[#allocation2 + $0x7a8] sm:$0xff]  ;;  %1654 = vmatpush.msra.mxu2 %v1314_v63  ;;  %v1409_v60 = vld [vmem:[#allocation2 + $0x6a0] sm:$0xff] }
 0x186   :  { %5458 = vst [vmem:[#allocation64_spill] sm:$0xff] %v4701_v1  ;;  %v1305_v1 = vld [vmem:[#allocation2 + $0x360] sm:$0xff]  ;;  %1674 = vmatpush.msra.mxu3 %v1442_v0  ;;  %1635 = vmatpush.msra.mxu1 %v1433_v21  ;;  %v1282_v63 = vld [vmem:[#allocation2 + $0x2a8] sm:$0xff] }
 0x187   :  { %1615 = vmatpush.msra.mxu0 %v1305_v1  ;;  %1655 = vmatpush.msra.mxu2 %v1306_v62  ;;  %v1410_v0 = vld [vmem:[#allocation2 + $0x6a8] sm:$0xff]  ;;  %v1273_v21 = vld [vmem:[#allocation2 + $0x260] sm:$0xff] }
 0x188   :  { %1675 = vmatpush.msra.mxu3 %v1434_v56  ;;  %1636 = vmatpush.msra.mxu1 %v1425_v59  ;;  %v1401_v1 = vld [vmem:[#allocation2 + $0x660] sm:$0xff]  ;;  %v1274_v56 = vld [vmem:[#allocation2 + $0x268] sm:$0xff] }
 0x189   :  { %1616 = vmatpush.msra.mxu0 %v1297_v54  ;;  %1656 = vmatpush.msra.mxu2 %v1298_v57  ;;  %v1402_v62 = vld [vmem:[#allocation2 + $0x668] sm:$0xff]  ;;  %v1265_v54 = vld [vmem:[#allocation2 + $0x220] sm:$0xff] }
 0x18a   :  { %1676 = vmatpush.msra.mxu3 %v1426_v52  ;;  %1637 = vmatpush.msra.mxu1 %v1417_v7  ;;  %v1393_v59 = vld [vmem:[#allocation2 + $0x620] sm:$0xff]  ;;  %v1266_v52 = vld [vmem:[#allocation2 + $0x228] sm:$0xff] }
 0x18b   :  { %1617 = vmatpush.msra.mxu0 %v1289_v5  ;;  %1657 = vmatpush.msra.mxu2 %v1290_v35  ;;  %v1394_v57 = vld [vmem:[#allocation2 + $0x628] sm:$0xff]  ;;  %v1257_v5 = vld [vmem:[#allocation2 + $0x1e0] sm:$0xff] }
 0x18c   :  { %1677 = vmatpush.msra.mxu3 %v1418_v6  ;;  %1638 = vmatpush.msra.mxu1 %v1409_v60  ;;  %v1385_v7 = vld [vmem:[#allocation2 + $0x5e0] sm:$0xff]  ;;  %v1258_v35 = vld [vmem:[#allocation2 + $0x1e8] sm:$0xff] }
 0x18d   :  { %1618 = vmatpush.msra.mxu0 %v1281_v58  ;;  %1658 = vmatpush.msra.mxu2 %v1282_v63  ;;  %v1386_v6 = vld [vmem:[#allocation2 + $0x5e8] sm:$0xff]  ;;  %v1249_v58 = vld [vmem:[#allocation2 + $0x1a0] sm:$0xff] }
 0x18e   :  { %1678 = vmatpush.msra.mxu3 %v1410_v0  ;;  %1639 = vmatpush.msra.mxu1 %v1401_v1  ;;  %v1377_v60 = vld [vmem:[#allocation2 + $0x5a0] sm:$0xff]  ;;  %v1250_v63 = vld [vmem:[#allocation2 + $0x1a8] sm:$0xff] }
 0x18f   :  { %1619 = vmatpush.msra.mxu0 %v1273_v21  ;;  %1659 = vmatpush.msra.mxu2 %v1274_v56  ;;  %v1378_v0 = vld [vmem:[#allocation2 + $0x5a8] sm:$0xff]  ;;  %v1241_v21 = vld [vmem:[#allocation2 + $0x160] sm:$0xff] }
 0x190   :  { %1679 = vmatpush.msra.mxu3 %v1402_v62  ;;  %1640 = vmatpush.msra.mxu1 %v1393_v59  ;;  %v1369_v1 = vld [vmem:[#allocation2 + $0x560] sm:$0xff]  ;;  %v1242_v56 = vld [vmem:[#allocation2 + $0x168] sm:$0xff] }
 0x191   :  { %1620 = vmatpush.msra.mxu0 %v1265_v54  ;;  %1660 = vmatpush.msra.mxu2 %v1266_v52  ;;  %v1370_v62 = vld [vmem:[#allocation2 + $0x568] sm:$0xff]  ;;  %v1233_v54 = vld [vmem:[#allocation2 + $0x120] sm:$0xff] }
 0x192   :  { %1680 = vmatpush.msra.mxu3 %v1394_v57  ;;  %1641 = vmatpush.msra.mxu1 %v1385_v7  ;;  %v1361_v59 = vld [vmem:[#allocation2 + $0x520] sm:$0xff]  ;;  %v1234_v52 = vld [vmem:[#allocation2 + $0x128] sm:$0xff] }
 0x193   :  { %1621 = vmatpush.msra.mxu0 %v1257_v5  ;;  %1661 = vmatpush.msra.mxu2 %v1258_v35  ;;  %v1362_v57 = vld [vmem:[#allocation2 + $0x528] sm:$0xff]  ;;  %v1225_v5 = vld [vmem:[#allocation2 + $0xe0] sm:$0xff] }
 0x194   :  { %1681 = vmatpush.msra.mxu3 %v1386_v6  ;;  %1642 = vmatpush.msra.mxu1 %v1377_v60  ;;  %v1353_v7 = vld [vmem:[#allocation2 + $0x4e0] sm:$0xff]  ;;  %v1226_v35 = vld [vmem:[#allocation2 + $0xe8] sm:$0xff] }
 0x195   :  { %1622 = vmatpush.msra.mxu0 %v1249_v58  ;;  %1662 = vmatpush.msra.mxu2 %v1250_v63  ;;  %v1354_v6 = vld [vmem:[#allocation2 + $0x4e8] sm:$0xff]  ;;  %v1217_v58 = vld [vmem:[#allocation2 + $0xa0] sm:$0xff] }
 0x196   :  { %1682 = vmatpush.msra.mxu3 %v1378_v0  ;;  %1643 = vmatpush.msra.mxu1 %v1369_v1  ;;  %v1345_v60 = vld [vmem:[#allocation2 + $0x4a0] sm:$0xff]  ;;  %v1218_v63 = vld [vmem:[#allocation2 + $0xa8] sm:$0xff] }
 0x197   :  { %1623 = vmatpush.msra.mxu0 %v1241_v21  ;;  %1663 = vmatpush.msra.mxu2 %v1242_v56  ;;  %v1346_v0 = vld [vmem:[#allocation2 + $0x4a8] sm:$0xff]  ;;  %v1209_v21 = vld [vmem:[#allocation2 + $0x60] sm:$0xff] }
 0x198   :  { %1683 = vmatpush.msra.mxu3 %v1370_v62  ;;  %1644 = vmatpush.msra.mxu1 %v1361_v59  ;;  %v1337_v1 = vld [vmem:[#allocation2 + $0x460] sm:$0xff]  ;;  %v1210_v56 = vld [vmem:[#allocation2 + $0x68] sm:$0xff] }
 0x199   :  { %1624 = vmatpush.msra.mxu0 %v1233_v54  ;;  %1664 = vmatpush.msra.mxu2 %v1234_v52  ;;  %v1338_v62 = vld [vmem:[#allocation2 + $0x468] sm:$0xff]  ;;  %v1201_v54 = vld [vmem:[#allocation2 + $0x20] sm:$0xff] }
 0x19a   :  { %1684 = vmatpush.msra.mxu3 %v1362_v57  ;;  %1645 = vmatpush.msra.mxu1 %v1353_v7  ;;  %v1329_v59 = vld [vmem:[#allocation2 + $0x420] sm:$0xff]  ;;  %v1202_v52 = vld [vmem:[#allocation2 + $0x28] sm:$0xff]  ;;  %v1451_v7 = vld [vmem:[#allocation2 + $0x7f0] sm:$0xff] }
 0x19b   :  { %1625 = vmatpush.msra.mxu0 %v1225_v5  ;;  %1665 = vmatpush.msra.mxu2 %v1226_v35  ;;  %v1330_v57 = vld [vmem:[#allocation2 + $0x428] sm:$0xff]  ;;  %v1323_v5 = vld [vmem:[#allocation2 + $0x3f0] sm:$0xff]  ;;  %v1324_v35 = vld [vmem:[#allocation2 + $0x3f8] sm:$0xff] }
 0x19c   :  { %1685 = vmatpush.msra.mxu3 %v1354_v6  ;;  %1646 = vmatpush.msra.mxu1 %v1345_v60  ;;  %v1452_v6 = vld [vmem:[#allocation2 + $0x7f8] sm:$0xff]  ;;  %v1443_v60 = vld [vmem:[#allocation2 + $0x7b0] sm:$0xff] }
 0x19d   :  { %1626 = vmatpush.msra.mxu0 %v1217_v58  ;;  %1666 = vmatpush.msra.mxu2 %v1218_v63  ;;  %v1315_v58 = vld [vmem:[#allocation2 + $0x3b0] sm:$0xff]  ;;  %v1316_v63 = vld [vmem:[#allocation2 + $0x3b8] sm:$0xff] }
 0x19e   :  { %1686 = vmatpush.msra.mxu3 %v1346_v0  ;;  %1647 = vmatpush.msra.mxu1 %v1337_v1  ;;  %v1444_v0 = vld [vmem:[#allocation2 + $0x7b8] sm:$0xff]  ;;  %v1435_v1 = vld [vmem:[#allocation2 + $0x770] sm:$0xff] }
 0x19f   :  { %1627 = vmatpush.msra.mxu0 %v1209_v21  ;;  %1667 = vmatpush.msra.mxu2 %v1210_v56  ;;  %v1307_v21 = vld [vmem:[#allocation2 + $0x370] sm:$0xff]  ;;  %v1308_v56 = vld [vmem:[#allocation2 + $0x378] sm:$0xff] }
 0x1a0   :  { %1687 = vmatpush.msra.mxu3 %v1338_v62  ;;  %1648 = vmatpush.msra.mxu1 %v1329_v59  ;;  %v1436_v62 = vld [vmem:[#allocation2 + $0x778] sm:$0xff]  ;;  %v1427_v59 = vld [vmem:[#allocation2 + $0x730] sm:$0xff] }
 0x1a1   :  { %1628 = vmatpush.msra.mxu0 %v1201_v54  ;;  %1668 = vmatpush.msra.mxu2 %v1202_v52  ;;  %v1299_v54 = vld [vmem:[#allocation2 + $0x330] sm:$0xff]  ;;  %v1300_v52 = vld [vmem:[#allocation2 + $0x338] sm:$0xff] }
 0x1a2   :  { %1688 = vmatpush.msra.mxu3 %v1330_v57  ;;  %1629 = vmatmul.f32.vlgmr.msra.gmra.mxu0 %v5459_v46  ;;  %v1428_v57 = vld [vmem:[#allocation2 + $0x738] sm:$0xff] }
 0x1a3   :  { %1649 = vmatmul.f32.vlgmr.msra.gmra.mxu1 %v5459_v46  ;;  %1669 = vmatmul.f32.vlgmr.msra.gmra.mxu2 %v5459_v46 }
 0x1a4   :  { %1689 = vmatmul.f32.vlgmr.msra.gmra.mxu3 %v5459_v46  ;;  %1693 = vmatpush.msrb.mxu0 %v1323_v5  ;;  %v1291_v5 = vld [vmem:[#allocation2 + $0x2f0] sm:$0xff] }
 0x1a5   :  { %1713 = vmatpush.msrb.mxu1 %v1451_v7  ;;  %1733 = vmatpush.msrb.mxu2 %v1324_v35  ;;  %v1419_v7 = vld [vmem:[#allocation2 + $0x6f0] sm:$0xff]  ;;  %v1292_v35 = vld [vmem:[#allocation2 + $0x2f8] sm:$0xff] }
 0x1a6   :  { %1753 = vmatpush.msrb.mxu3 %v1452_v6  ;;  %1694 = vmatpush.msrb.mxu0 %v1315_v58  ;;  %v1420_v6 = vld [vmem:[#allocation2 + $0x6f8] sm:$0xff]  ;;  %v1283_v58 = vld [vmem:[#allocation2 + $0x2b0] sm:$0xff] }
 0x1a7   :  { %1714 = vmatpush.msrb.mxu1 %v1443_v60  ;;  %1734 = vmatpush.msrb.mxu2 %v1316_v63  ;;  %v1411_v60 = vld [vmem:[#allocation2 + $0x6b0] sm:$0xff]  ;;  %v1284_v63 = vld [vmem:[#allocation2 + $0x2b8] sm:$0xff] }
 0x1a8   :  { %1754 = vmatpush.msrb.mxu3 %v1444_v0  ;;  %1695 = vmatpush.msrb.mxu0 %v1307_v21  ;;  %v1412_v0 = vld [vmem:[#allocation2 + $0x6b8] sm:$0xff]  ;;  %v1275_v21 = vld [vmem:[#allocation2 + $0x270] sm:$0xff] }
 0x1a9   :  { %1715 = vmatpush.msrb.mxu1 %v1435_v1  ;;  %1735 = vmatpush.msrb.mxu2 %v1308_v56  ;;  %v1403_v1 = vld [vmem:[#allocation2 + $0x670] sm:$0xff]  ;;  %v1276_v56 = vld [vmem:[#allocation2 + $0x278] sm:$0xff] }
 0x1aa   :  { %1755 = vmatpush.msrb.mxu3 %v1436_v62  ;;  %1696 = vmatpush.msrb.mxu0 %v1299_v54  ;;  %v1404_v62 = vld [vmem:[#allocation2 + $0x678] sm:$0xff]  ;;  %v4717_v54 = vld [vmem:[#allocation2 + $0x230] sm:$0xff] }
 0x1ab   :  { %1716 = vmatpush.msrb.mxu1 %v1427_v59  ;;  %1736 = vmatpush.msrb.mxu2 %v1300_v52  ;;  %v1395_v59 = vld [vmem:[#allocation2 + $0x630] sm:$0xff]  ;;  %v4719_v52 = vld [vmem:[#allocation2 + $0x238] sm:$0xff] }
 0x1ac   :  { %1756 = vmatpush.msrb.mxu3 %v1428_v57  ;;  %1697 = vmatpush.msrb.mxu0 %v1291_v5  ;;  %v1396_v57 = vld [vmem:[#allocation2 + $0x638] sm:$0xff]  ;;  %v4721_v5 = vld [vmem:[#allocation2 + $0x1f0] sm:$0xff] }
 0x1ad   :  { %1717 = vmatpush.msrb.mxu1 %v1419_v7  ;;  %1737 = vmatpush.msrb.mxu2 %v1292_v35  ;;  %v1387_v7 = vld [vmem:[#allocation2 + $0x5f0] sm:$0xff]  ;;  %v4724_v35 = vld [vmem:[#allocation2 + $0x1f8] sm:$0xff] }
 0x1ae   :  { %1757 = vmatpush.msrb.mxu3 %v1420_v6  ;;  %1698 = vmatpush.msrb.mxu0 %v1283_v58  ;;  %v1388_v6 = vld [vmem:[#allocation2 + $0x5f8] sm:$0xff]  ;;  %v4727_v58 = vld [vmem:[#allocation2 + $0x1b0] sm:$0xff] }
 0x1af   :  { %1718 = vmatpush.msrb.mxu1 %v1411_v60  ;;  %1738 = vmatpush.msrb.mxu2 %v1284_v63  ;;  %v1379_v60 = vld [vmem:[#allocation2 + $0x5b0] sm:$0xff]  ;;  %v4730_v63 = vld [vmem:[#allocation2 + $0x1b8] sm:$0xff] }
 0x1b0   :  { %1758 = vmatpush.msrb.mxu3 %v1412_v0  ;;  %1699 = vmatpush.msrb.mxu0 %v1275_v21  ;;  %5460 = vst [vmem:[#allocation65_spill] sm:$0xff] %v4730_v63  ;;  %v1380_v0 = vld [vmem:[#allocation2 + $0x5b8] sm:$0xff]  ;;  %v4733_v21 = vld [vmem:[#allocation2 + $0x170] sm:$0xff] }
 0x1b1   :  { %1719 = vmatpush.msrb.mxu1 %v1403_v1  ;;  %1739 = vmatpush.msrb.mxu2 %v1276_v56  ;;  %5461 = vst [vmem:[#allocation66_spill] sm:$0xff] %v4733_v21  ;;  %v4735_v1 = vld [vmem:[#allocation2 + $0x570] sm:$0xff]  ;;  %v4738_v56 = vld [vmem:[#allocation2 + $0x178] sm:$0xff] }
 0x1b2   :  { %1759 = vmatpush.msrb.mxu3 %v1404_v62  ;;  %1700 = vmatpush.msrb.mxu0 %v4717_v54  ;;  %5462 = vst [vmem:[#allocation67_spill] sm:$0xff] %v4735_v1  ;;  %v4740_v62 = vld [vmem:[#allocation2 + $0x578] sm:$0xff] }
 0x1b3   :  { %1720 = vmatpush.msrb.mxu1 %v1395_v59  ;;  %1740 = vmatpush.msrb.mxu2 %v4719_v52  ;;  %5463 = vst [vmem:[#allocation68_spill] sm:$0xff] %v4738_v56  ;;  %v4743_v59 = vld [vmem:[#allocation2 + $0x130] sm:$0xff] }
 0x1b4   :  { %1760 = vmatpush.msrb.mxu3 %v1396_v57  ;;  %1701 = vmatpush.msrb.mxu0 %v4721_v5  ;;  %5464 = vst [vmem:[#allocation69_spill] sm:$0xff] %v4740_v62  ;;  %v4745_v57 = vld [vmem:[#allocation2 + $0x530] sm:$0xff] }
 0x1b5   :  { %1721 = vmatpush.msrb.mxu1 %v1387_v7  ;;  %1741 = vmatpush.msrb.mxu2 %v4724_v35  ;;  %5465 = vst [vmem:[#allocation70_spill] sm:$0xff] %v4743_v59  ;;  %v4749_v7 = vld [vmem:[#allocation2 + $0x138] sm:$0xff] }
 0x1b6   :  { %1761 = vmatpush.msrb.mxu3 %v1388_v6  ;;  %1702 = vmatpush.msrb.mxu0 %v4727_v58  ;;  %5466 = vst [vmem:[#allocation71_spill] sm:$0xff] %v4745_v57  ;;  %v4751_v6 = vld [vmem:[#allocation2 + $0x538] sm:$0xff] }
 0x1b7   :  { %1722 = vmatpush.msrb.mxu1 %v1379_v60  ;;  %1742 = vmatpush.msrb.mxu2 %v4730_v63  ;;  %5467 = vst [vmem:[#allocation72_spill] sm:$0xff] %v4749_v7  ;;  %v4755_v60 = vld [vmem:[#allocation2 + $0xf0] sm:$0xff] }
 0x1b8   :  { %1762 = vmatpush.msrb.mxu3 %v1380_v0  ;;  %1703 = vmatpush.msrb.mxu0 %v4733_v21  ;;  %5468 = vst [vmem:[#allocation73_spill] sm:$0xff] %v4751_v6  ;;  %v4757_v63 = vld [vmem:[#allocation2 + $0x4f0] sm:$0xff]  ;;  %v4761_v0 = vld [vmem:[#allocation2 + $0xf8] sm:$0xff] }
 0x1b9   :  { %1723 = vmatpush.msrb.mxu1 %v4735_v1  ;;  %1743 = vmatpush.msrb.mxu2 %v4738_v56  ;;  %5469 = vst [vmem:[#allocation74_spill] sm:$0xff] %v4755_v60  ;;  %v4763_v21 = vld [vmem:[#allocation2 + $0x4f8] sm:$0xff]  ;;  %v4767_v1 = vld [vmem:[#allocation2 + $0xb0] sm:$0xff] }
 0x1ba   :  { %1763 = vmatpush.msrb.mxu3 %v4740_v62  ;;  %5470 = vst [vmem:[#allocation75_spill] sm:$0xff] %v4757_v63  ;;  %1704 = vmatpush.msrb.mxu0 %v4743_v59  ;;  %v4769_v56 = vld [vmem:[#allocation2 + $0x4b0] sm:$0xff]  ;;  %v4773_v62 = vld [vmem:[#allocation2 + $0xb8] sm:$0xff] }
 0x1bb   :  { %1724 = vmatpush.msrb.mxu1 %v4745_v57  ;;  %5471 = vst [vmem:[#allocation76_spill] sm:$0xff] %v4761_v0  ;;  %1744 = vmatpush.msrb.mxu2 %v4749_v7  ;;  %v4775_v59 = vld [vmem:[#allocation2 + $0x4b8] sm:$0xff]  ;;  %v4779_v57 = vld [vmem:[#allocation2 + $0x70] sm:$0xff] }
 0x1bc   :  { %5472 = vst [vmem:[#allocation77_spill] sm:$0xff] %v4763_v21  ;;  %1764 = vmatpush.msrb.mxu3 %v4751_v6  ;;  %1705 = vmatpush.msrb.mxu0 %v4755_v60  ;;  %v4781_v7 = vld [vmem:[#allocation2 + $0x470] sm:$0xff]  ;;  %v4785_v6 = vld [vmem:[#allocation2 + $0x78] sm:$0xff] }
 0x1bd   :  { %5473 = vst [vmem:[#allocation78_spill] sm:$0xff] %v4767_v1  ;;  %1725 = vmatpush.msrb.mxu1 %v4757_v63  ;;  %1745 = vmatpush.msrb.mxu2 %v4761_v0  ;;  %v4787_v60 = vld [vmem:[#allocation2 + $0x478] sm:$0xff]  ;;  %v4791_v63 = vld [vmem:[#allocation2 + $0x30] sm:$0xff] }
 0x1be   :  { %5474 = vst [vmem:[#allocation79_spill] sm:$0xff] %v4769_v56  ;;  %1765 = vmatpush.msrb.mxu3 %v4763_v21  ;;  %1706 = vmatpush.msrb.mxu0 %v4767_v1  ;;  %v4793_v0 = vld [vmem:[#allocation2 + $0x430] sm:$0xff]  ;;  %v4797_v21 = vld [vmem:[#allocation2 + $0x38] sm:$0xff] }
 0x1bf   :  { %5475 = vst [vmem:[#allocation80_spill] sm:$0xff] %v4775_v59  ;;  %1726 = vmatpush.msrb.mxu1 %v4769_v56  ;;  %1746 = vmatpush.msrb.mxu2 %v4773_v62  ;;  %v4799_v1 = vld [vmem:[#allocation2 + $0x438] sm:$0xff]  ;;  %v2602_v56 = vld [vmem:[#allocation2 + $0x7c8] sm:$0xff] }
 0x1c0   :  { %5476 = vst [vmem:[#allocation81_spill] sm:$0xff] %v4779_v57  ;;  %1766 = vmatpush.msrb.mxu3 %v4775_v59  ;;  %1707 = vmatpush.msrb.mxu0 %v4779_v57  ;;  %v2600_v59 = vld [vmem:[#allocation2 + $0x3c8] sm:$0xff] }
 0x1c1   :  { %5477 = vst [vmem:[#allocation82_spill] sm:$0xff] %v4781_v7  ;;  %1727 = vmatpush.msrb.mxu1 %v4781_v7  ;;  %1747 = vmatpush.msrb.mxu2 %v4785_v6  ;;  %v2599_v7 = vld [vmem:[#allocation2 + $0x3c0] sm:$0xff]  ;;  %v2608_v57 = vld [vmem:[#allocation2 + $0x348] sm:$0xff] }
 0x1c2   :  { %5478 = vst [vmem:[#allocation83_spill] sm:$0xff] %v4785_v6  ;;  %1767 = vmatpush.msrb.mxu3 %v4787_v60  ;;  %1708 = vmatpush.msrb.mxu0 %v4791_v63  ;;  %v2607_v6 = vld [vmem:[#allocation2 + $0x340] sm:$0xff] }
 0x1c3   :  { %5479 = vst [vmem:[#allocation84_spill] sm:$0xff] %v4787_v60  ;;  %1728 = vmatpush.msrb.mxu1 %v4793_v0  ;;  %1748 = vmatpush.msrb.mxu2 %v4797_v21  ;;  %v2601_v60 = vld [vmem:[#allocation2 + $0x7c0] sm:$0xff] }
 0x1c4   :  { %5480 = vst [vmem:[#allocation85_spill] sm:$0xff] %v4791_v63  ;;  %1768 = vmatpush.msrb.mxu3 %v4799_v1  ;;  %1709 = vmatmul.f32.vlgmr.msrb.gmra.mxu0 %v5459_v46  ;;  %v2606_v63 = vld [vmem:[#allocation2 + $0x788] sm:$0xff] }
 0x1c5   :  { %5481 = vst [vmem:[#allocation86_spill] sm:$0xff] %v4793_v0  ;;  %1729 = vmatmul.f32.vlgmr.msrb.gmra.mxu1 %v5459_v46  ;;  %1749 = vmatmul.f32.vlgmr.msrb.gmra.mxu2 %v5459_v46  ;;  %v2603_v0 = vld [vmem:[#allocation2 + $0x380] sm:$0xff] }
 0x1c6   :  { %5482 = vst [vmem:[#allocation87_spill] sm:$0xff] %v4797_v21  ;;  %1769 = vmatmul.f32.vlgmr.msrb.gmra.mxu3 %v5459_v46  ;;  %1907 = vmatpush.msra.mxu0 %v2599_v7  ;;  %v2604_v21 = vld [vmem:[#allocation2 + $0x388] sm:$0xff]  ;;  %v2609_v46 = vld [vmem:[#allocation2 + $0x740] sm:$0xff] }
 0x1c7   :  { %5483 = vst [vmem:[#allocation88_spill] sm:$0xff] %v4799_v1  ;;  %1947 = vmatpush.msra.mxu2 %v2600_v59  ;;  %1927 = vmatpush.msra.mxu1 %v2601_v60  ;;  %v2605_v1 = vld [vmem:[#allocation2 + $0x780] sm:$0xff]  ;;  %v2610_v7 = vld [vmem:[#allocation2 + $0x748] sm:$0xff] }
 0x1c8   :  { %1967 = vmatpush.msra.mxu3 %v2602_v56  ;;  %1908 = vmatpush.msra.mxu0 %v2603_v0  ;;  %v2611_v59 = vld [vmem:[#allocation2 + $0x300] sm:$0xff]  ;;  %v2612_v60 = vld [vmem:[#allocation2 + $0x308] sm:$0xff] }
 0x1c9   :  { %1948 = vmatpush.msra.mxu2 %v2604_v21  ;;  %1928 = vmatpush.msra.mxu1 %v2605_v1  ;;  %v2613_v56 = vld [vmem:[#allocation2 + $0x700] sm:$0xff]  ;;  %v2614_v0 = vld [vmem:[#allocation2 + $0x708] sm:$0xff] }
 0x1ca   :  { %1968 = vmatpush.msra.mxu3 %v2606_v63  ;;  %1909 = vmatpush.msra.mxu0 %v2607_v6  ;;  %v2615_v21 = vld [vmem:[#allocation2 + $0x2c0] sm:$0xff]  ;;  %v2616_v1 = vld [vmem:[#allocation2 + $0x2c8] sm:$0xff] }
 0x1cb   :  { %1949 = vmatpush.msra.mxu2 %v2608_v57  ;;  %1929 = vmatpush.msra.mxu1 %v2609_v46  ;;  %v2617_v63 = vld [vmem:[#allocation2 + $0x6c0] sm:$0xff]  ;;  %v2618_v6 = vld [vmem:[#allocation2 + $0x6c8] sm:$0xff] }
 0x1cc   :  { %1969 = vmatpush.msra.mxu3 %v2610_v7  ;;  %1910 = vmatpush.msra.mxu0 %v2611_v59  ;;  %v2619_v57 = vld [vmem:[#allocation2 + $0x280] sm:$0xff]  ;;  %v2620_v46 = vld [vmem:[#allocation2 + $0x288] sm:$0xff] }
 0x1cd   :  { %1950 = vmatpush.msra.mxu2 %v2612_v60  ;;  %1930 = vmatpush.msra.mxu1 %v2613_v56  ;;  %v2621_v7 = vld [vmem:[#allocation2 + $0x680] sm:$0xff]  ;;  %v2622_v59 = vld [vmem:[#allocation2 + $0x688] sm:$0xff] }
 0x1ce   :  { %1970 = vmatpush.msra.mxu3 %v2614_v0  ;;  %1911 = vmatpush.msra.mxu0 %v2615_v21  ;;  %v2623_v60 = vld [vmem:[#allocation2 + $0x240] sm:$0xff]  ;;  %v5517_v0 = vld [vmem:[#allocation45_spill] sm:$0xff] }
 0x1cf   :  { %1951 = vmatpush.msra.mxu2 %v2616_v1  ;;  %1931 = vmatpush.msra.mxu1 %v2617_v63  ;;  %v2624_v56 = vld [vmem:[#allocation2 + $0x640] sm:$0xff]  ;;  %v5519_v1 = vld [vmem:[#allocation42_spill] sm:$0xff] }
 0x1d0   :  { %1971 = vmatpush.msra.mxu3 %v2618_v6  ;;  %1912 = vmatpush.msra.mxu0 %v2619_v57  ;;  %v5518_v21 = vld [vmem:[#allocation47_spill] sm:$0xff]  ;;  %v5520_v63 = vld [vmem:[#allocation44_spill] sm:$0xff]  ;;  %v5521_v6 = vld [vmem:[#allocation49_spill] sm:$0xff] }
 0x1d1   :  { %1952 = vmatpush.msra.mxu2 %v2620_v46  ;;  %1932 = vmatpush.msra.mxu1 %v2621_v7  ;;  %v5522_v57 = vld [vmem:[#allocation51_spill] sm:$0xff]  ;;  %v5523_v46 = vld [vmem:[#allocation46_spill] sm:$0xff]  ;;  %v5524_v7 = vld [vmem:[#allocation48_spill] sm:$0xff] }
 0x1d2   :  { %1972 = vmatpush.msra.mxu3 %v2622_v59  ;;  %1913 = vmatpush.msra.mxu0 %v2623_v60 }
 0x1d3   :  { %1953 = vmatpush.msra.mxu2 %v4395_v8  ;;  %1933 = vmatpush.msra.mxu1 %v2624_v56  ;;  %v4837_v8 = vpop.f32.mrf.mxu0  ;;  %v5525_v56 = vld [vmem:[#allocation53_spill] sm:$0xff] }
 0x1d4   :  { %1973 = vmatpush.msra.mxu3 %v4397_v9  ;;  %1914 = vmatpush.msra.mxu0 %v4399_v10  ;;  %v4839_v9 = vpop.f32.mrf.mxu1  ;;  %v4855_v10 = vpop.f32.mrf.mxu2 }
 0x1d5   :  { %1954 = vmatpush.msra.mxu2 %v4403_v12  ;;  %1934 = vmatpush.msra.mxu1 %v4401_v11  ;;  %v4857_v11 = vpop.f32.mrf.mxu3 }
 0x1d6   :  { %1974 = vmatpush.msra.mxu3 %v4405_v13  ;;  %1915 = vmatpush.msra.mxu0 %v4409_v14  ;;  %v5484_v14 = vld [vmem:[#allocation10_spill] sm:$0xff] }
 0x1d7   :  { %1955 = vmatpush.msra.mxu2 %v4415_v16  ;;  %1935 = vmatpush.msra.mxu1 %v4411_v15  ;;  %v5485_v15 = vld [vmem:[#allocation13_spill] sm:$0xff]  ;;  %v5486_v16 = vld [vmem:[#allocation15_spill] sm:$0xff] }
 0x1d8   :  { %1975 = vmatpush.msra.mxu3 %v4417_v17  ;;  %1916 = vmatpush.msra.mxu0 %v4421_v18  ;;  %v5487_v17 = vld [vmem:[#allocation11_spill] sm:$0xff]  ;;  %v5488_v18 = vld [vmem:[#allocation12_spill] sm:$0xff] }
 0x1d9   :  { %1956 = vmatpush.msra.mxu2 %v4427_v61  ;;  %1936 = vmatpush.msra.mxu1 %v4423_v19  ;;  %v5489_v19 = vld [vmem:[#allocation17_spill] sm:$0xff]  ;;  %v5490_v61 = vld [vmem:[#allocation19_spill] sm:$0xff] }
 0x1da   :  { %1976 = vmatpush.msra.mxu3 %v4429_v20  ;;  %1917 = vmatpush.msra.mxu0 %v4433_v2  ;;  %v5491_v20 = vld [vmem:[#allocation14_spill] sm:$0xff]  ;;  %v5492_v2 = vld [vmem:[#allocation16_spill] sm:$0xff] }
 0x1db   :  { %1957 = vmatpush.msra.mxu2 %v4439_v22  ;;  %1937 = vmatpush.msra.mxu1 %v4435_v4  ;;  %v4861_v12 = vpop.f32.mrf.mxu0 }
 0x1dc   :  { %1977 = vmatpush.msra.mxu3 %v4441_v24  ;;  %1918 = vmatpush.msra.mxu0 %v4445_v25  ;;  %v4863_v13 = vpop.f32.mrf.mxu1  ;;  %v4879_v4 = vpop.f32.mrf.mxu2  ;;  %v5493_v24 = vld [vmem:[#allocation21_spill] sm:$0xff]  ;;  %v5494_v25 = vld [vmem:[#allocation23_spill] sm:$0xff] }
 0x1dd   :  { %1958 = vmatpush.msra.mxu2 %v4451_v29  ;;  %1938 = vmatpush.msra.mxu1 %v4447_v28  ;;  %v4881_v22 = vpop.f32.mrf.mxu3 }
 0x1de   :  { %1978 = vmatpush.msra.mxu3 %v4453_v30  ;;  %1919 = vmatpush.msra.mxu0 %v4461_v31  ;;  %v5495_v30 = vld [vmem:[#allocation18_spill] sm:$0xff]  ;;  %v5496_v31 = vld [vmem:[#allocation20_spill] sm:$0xff] }
 0x1df   :  { %1959 = vmatpush.msra.mxu2 %v4467_v33  ;;  %1939 = vmatpush.msra.mxu1 %v4463_v32  ;;  %v5497_v32 = vld [vmem:[#allocation25_spill] sm:$0xff]  ;;  %v5498_v33 = vld [vmem:[#allocation27_spill] sm:$0xff] }
 0x1e0   :  { %1979 = vmatpush.msra.mxu3 %v4469_v34  ;;  %1920 = vmatpush.msra.mxu0 %v4473_v36  ;;  %v5499_v34 = vld [vmem:[#allocation22_spill] sm:$0xff]  ;;  %v5500_v36 = vld [vmem:[#allocation24_spill] sm:$0xff] }
 0x1e1   :  { %1960 = vmatpush.msra.mxu2 %v4479_v38  ;;  %1940 = vmatpush.msra.mxu1 %v4475_v37  ;;  %v5501_v37 = vld [vmem:[#allocation29_spill] sm:$0xff]  ;;  %v5502_v38 = vld [vmem:[#allocation31_spill] sm:$0xff] }
 0x1e2   :  { %1980 = vmatpush.msra.mxu3 %v4481_v23  ;;  %1921 = vmatpush.msra.mxu0 %v4485_v26  ;;  %v5503_v23 = vld [vmem:[#allocation26_spill] sm:$0xff]  ;;  %v5504_v26 = vld [vmem:[#allocation28_spill] sm:$0xff] }
 0x1e3   :  { %1961 = vmatpush.msra.mxu2 %v4491_v27  ;;  %1941 = vmatpush.msra.mxu1 %v4487_v3  ;;  %v4885_v28 = vpop.f32.mrf.mxu0  ;;  %v5505_v3 = vld [vmem:[#allocation33_spill] sm:$0xff]  ;;  %v5506_v27 = vld [vmem:[#allocation35_spill] sm:$0xff] }
 0x1e4   :  { %1981 = vmatpush.msra.mxu3 %v4493_v39  ;;  %1922 = vmatpush.msra.mxu0 %v4497_v40  ;;  %v4887_v29 = vpop.f32.mrf.mxu1  ;;  %v5507_v39 = vld [vmem:[#allocation30_spill] sm:$0xff]  ;;  %v5508_v40 = vld [vmem:[#allocation32_spill] sm:$0xff] }
 0x1e5   :  { %1962 = vmatpush.msra.mxu2 %v4503_v42  ;;  %1942 = vmatpush.msra.mxu1 %v4499_v41  ;;  %v4903_v41 = vpop.f32.mrf.mxu2  ;;  %v4905_v42 = vpop.f32.mrf.mxu3 }
 0x1e6   :  { %1987 = vmatpush.msrb.mxu0 %v4513_v44  ;;  %1982 = vmatpush.msra.mxu3 %v4505_v43  ;;  %v5509_v43 = vld [vmem:[#allocation37_spill] sm:$0xff]  ;;  %v5510_v44 = vld [vmem:[#allocation39_spill] sm:$0xff] }
 0x1e7   :  { %2027 = vmatpush.msrb.mxu2 %v4519_v47  ;;  %2007 = vmatpush.msrb.mxu1 %v4515_v45 }
 0x1e8   :  { %1988 = vmatpush.msrb.mxu0 %v4525_v49  ;;  %2047 = vmatpush.msrb.mxu3 %v4521_v48  ;;  %v5511_v48 = vld [vmem:[#allocation34_spill] sm:$0xff]  ;;  %v5512_v49 = vld [vmem:[#allocation36_spill] sm:$0xff] }
 0x1e9   :  { %2028 = vmatpush.msrb.mxu2 %v4531_v51  ;;  %2008 = vmatpush.msrb.mxu1 %v4527_v50  ;;  %v5513_v50 = vld [vmem:[#allocation41_spill] sm:$0xff]  ;;  %v5514_v51 = vld [vmem:[#allocation43_spill] sm:$0xff] }
 0x1ea   :  { %1989 = vmatpush.msrb.mxu0 %v4537_v53  ;;  %2048 = vmatpush.msrb.mxu3 %v5484_v14  ;;  %v5515_v53 = vld [vmem:[#allocation38_spill] sm:$0xff]  ;;  %v5526_v14 = vld [vmem:[#allocation55_spill] sm:$0xff] }
 0x1eb   :  { %2029 = vmatpush.msrb.mxu2 %v4543_v55  ;;  %2009 = vmatpush.msrb.mxu1 %v5487_v17  ;;  %v4909_v45 = vpop.f32.mrf.mxu0  ;;  %v5516_v55 = vld [vmem:[#allocation40_spill] sm:$0xff]  ;;  %v5527_v17 = vld [vmem:[#allocation50_spill] sm:$0xff] }
 0x1ec   :  { %1990 = vmatpush.msrb.mxu0 %v5485_v15  ;;  %2049 = vmatpush.msrb.mxu3 %v5488_v18  ;;  %v4911_v47 = vpop.f32.mrf.mxu1  ;;  %v5528_v18 = vld [vmem:[#allocation52_spill] sm:$0xff] }
 0x1ed   :  { %2030 = vmatpush.msrb.mxu2 %v5486_v16  ;;  %2010 = vmatpush.msrb.mxu1 %v5491_v20  ;;  %v4927_v59 = vpop.f32.mrf.mxu2  ;;  %v4929_v60 = vpop.f32.mrf.mxu3  ;;  %v5531_v20 = vld [vmem:[#allocation54_spill] sm:$0xff] }
 0x1ee   :  { %1991 = vmatpush.msrb.mxu0 %v5489_v19  ;;  %2050 = vmatpush.msrb.mxu3 %v5492_v2  ;;  %v5529_v19 = vld [vmem:[#allocation57_spill] sm:$0xff]  ;;  %v5532_v2 = vld [vmem:[#allocation56_spill] sm:$0xff] }
 0x1ef   :  { %2031 = vmatpush.msrb.mxu2 %v5490_v61  ;;  %2011 = vmatpush.msrb.mxu1 %v5495_v30  ;;  %v5530_v61 = vld [vmem:[#allocation59_spill] sm:$0xff]  ;;  %v5535_v30 = vld [vmem:[#allocation58_spill] sm:$0xff] }
 0x1f0   :  { %1992 = vmatpush.msrb.mxu0 %v5493_v24  ;;  %2051 = vmatpush.msrb.mxu3 %v5496_v31  ;;  %v5533_v24 = vld [vmem:[#allocation61_spill] sm:$0xff]  ;;  %v5536_v31 = vld [vmem:[#allocation60_spill] sm:$0xff] }
 0x1f1   :  { %2032 = vmatpush.msrb.mxu2 %v5494_v25  ;;  %2012 = vmatpush.msrb.mxu1 %v5499_v34  ;;  %v5534_v25 = vld [vmem:[#allocation63_spill] sm:$0xff] }
 0x1f2   :  { %1993 = vmatpush.msrb.mxu0 %v5497_v32  ;;  %2052 = vmatpush.msrb.mxu3 %v5500_v36  ;;  %v5537_v32 = vld [vmem:[#allocation62_spill] sm:$0xff] }
 0x1f3   :  { %2033 = vmatpush.msrb.mxu2 %v5498_v33  ;;  %2013 = vmatpush.msrb.mxu1 %v5503_v23  ;;  %v4933_v15 = vpop.f32.mrf.mxu0  ;;  %v5538_v33 = vld [vmem:[#allocation64_spill] sm:$0xff] }
 0x1f4   :  { %1994 = vmatpush.msrb.mxu0 %v5501_v37  ;;  %2053 = vmatpush.msrb.mxu3 %v5504_v26  ;;  %v1074_v16 = vpop.f32.mrf.mxu1 }
 0x1f5   :  { %2034 = vmatpush.msrb.mxu2 %v5502_v38  ;;  %2014 = vmatpush.msrb.mxu1 %v5507_v39  ;;  %v1094_v34 = vpop.f32.mrf.mxu2  ;;  %v4947_v36 = vpop.f32.mrf.mxu3  ;;  %v755_v39 = vadd.f32 %v4839_v9, %v4837_v8 }
 0x1f6   :  { %1995 = vmatpush.msrb.mxu0 %v5505_v3  ;;  %2054 = vmatpush.msrb.mxu3 %v5508_v40 }
 0x1f7   :  { %2035 = vmatpush.msrb.mxu2 %v5506_v27  ;;  %2015 = vmatpush.msrb.mxu1 %v5511_v48 }
 0x1f8   :  { %1996 = vmatpush.msrb.mxu0 %v5509_v43  ;;  %2055 = vmatpush.msrb.mxu3 %v5512_v49  ;;  %v775_v49 = vadd.f32 %v4855_v10, %v755_v39 }
 0x1f9   :  { %2036 = vmatpush.msrb.mxu2 %v5510_v44  ;;  %2016 = vmatpush.msrb.mxu1 %v5515_v53  ;;  %v835_v53 = vadd.f32 %v4863_v13, %v4861_v12  ;;  %v5540_v12 = vld [vmem:[#allocation9_spill] sm:$0xff] }
 0x1fa   :  { %1997 = vmatpush.msrb.mxu0 %v5513_v50  ;;  %2056 = vmatpush.msrb.mxu3 %v5516_v55  ;;  %v4959_v55 = vadd.f32 %v4857_v11, %v775_v49 }
 0x1fb   :  { %2037 = vmatpush.msrb.mxu2 %v5514_v51  ;;  %2017 = vmatpush.msrb.mxu1 %v5519_v1  ;;  %v1134_v37 = vpop.f32.mrf.mxu0  ;;  %v855_v9 = vadd.f32 %v4879_v4, %v835_v53 }
 0x1fc   :  { %1998 = vmatpush.msrb.mxu0 %v5517_v0  ;;  %2057 = vmatpush.msrb.mxu3 %v5520_v63  ;;  %v1154_v38 = vpop.f32.mrf.mxu1  ;;  %v5539_v0 = vld [vmem:[#allocation8_spill] sm:$0xff] }
 0x1fd   :  { %2038 = vmatpush.msrb.mxu2 %v5518_v21  ;;  %2018 = vmatpush.msrb.mxu1 %v5523_v46  ;;  %v4949_v23 = vpop.f32.mrf.mxu2  ;;  %v4951_v26 = vpop.f32.mrf.mxu3 }
 0x1fe   :  { %1999 = vmatpush.msrb.mxu0 %v5521_v6  ;;  %2058 = vmatpush.msrb.mxu3 %v5524_v7  ;;  %v4965_v7 = vadd.f32 %v4881_v22, %v855_v9 }
 0x1ff   :  { %2039 = vmatpush.msrb.mxu2 %v5522_v57  ;;  %2019 = vmatpush.msrb.mxu1 %v5527_v17 }
 0x200   :  { %2000 = vmatpush.msrb.mxu0 %v5525_v56  ;;  %2059 = vmatpush.msrb.mxu3 %v5528_v18 }
 0x201   :  { %2040 = vmatpush.msrb.mxu2 %v5526_v14  ;;  %2020 = vmatpush.msrb.mxu1 %v5531_v20 }
 0x202   :  { %2001 = vmatpush.msrb.mxu0 %v5529_v19  ;;  %2060 = vmatpush.msrb.mxu3 %v5532_v2 }
 0x203   :  { %2041 = vmatpush.msrb.mxu2 %v5530_v61  ;;  %2021 = vmatpush.msrb.mxu1 %v5535_v30  ;;  %v1470_v3 = vpop.f32.mrf.mxu0 }
 0x204   :  { %2002 = vmatpush.msrb.mxu0 %v5533_v24  ;;  %2061 = vmatpush.msrb.mxu3 %v5536_v31  ;;  %v1490_v27 = vpop.f32.mrf.mxu1  ;;  %v1075_v31 = vadd.f32 %v1074_v16, %v4933_v15  ;;  %v995_v16 = vadd.f32 %v4911_v47, %v4909_v45 }
 0x205   :  { %2042 = vmatpush.msrb.mxu2 %v5534_v25  ;;  %2022 = vmatpush.msrb.mxu1 %v5537_v32  ;;  %v1510_v40 = vpop.f32.mrf.mxu2  ;;  %v1530_v43 = vpop.f32.mrf.mxu3  ;;  %v1491_v50 = vadd.f32 %v1490_v27, %v1470_v3 }
 0x206   :  { %2062 = vmatpush.msrb.mxu3 %v5538_v33  ;;  %v1531_v57 = vadd.f32 %v1530_v43, %v1510_v40  ;;  %v915_v33 = vadd.f32 %v4887_v29, %v4885_v28  ;;  %v1095_v27 = vadd.f32 %v1094_v34, %v1075_v31  ;;  %v1015_v45 = vadd.f32 %v4927_v59, %v995_v16 }
 0x207   :  { %v1773_v21 = vadd.f32 %v1491_v50, %v5539_v0 }
 0x208   :  { %v1774_v13 = vadd.f32 %v1531_v57, %v5540_v12  ;;  %v935_v40 = vadd.f32 %v4903_v41, %v915_v33  ;;  %v4998_v50 = vadd.f32 %v4947_v36, %v1095_v27  ;;  %v5016_v59 = vadd.f32 %v4929_v60, %v1015_v45 }
 0x209   :  { %v2509_v6 = vmul.f32 -1.442695, %v1773_v21 }
 0x20a   :  { %v2510_v56 = vmul.f32 -1.442695, %v1774_v13  ;;  %v5003_v41 = vadd.f32 %v4905_v42, %v935_v40 }
 0x20b   :  { %v1550_v44 = vpop.f32.mrf.mxu0  ;;  %2527 = vpow2.f32 %v2509_v6 }
 0x20c   :  { %v1570_v48 = vpop.f32.mrf.mxu1 }
 0x20d   :  { %v1571_v51 = vadd.f32 %v1570_v48, %v1550_v44  ;;  %v1590_v63 = vpop.f32.mrf.mxu2  ;;  %v1610_v8 = vpop.f32.mrf.mxu3  ;;  %v1155_v44 = vadd.f32 %v1154_v38, %v1134_v37 }
 0x20e   :  { %v1611_v46 = vadd.f32 %v1610_v8, %v1590_v63 }
 0x20f   :  { %v1775_v1 = vadd.f32 %v1571_v51, %v4959_v55  ;;  %v1175_v47 = vadd.f32 %v4949_v23, %v1155_v44 }
 0x210   :  { %v1776_v11 = vadd.f32 %v1611_v46, %v4965_v7 }
 0x211   :  { %v2511_v10 = vmul.f32 -1.442695, %v1775_v1  ;;  %v2528_v17 = vpop.eup %2527  ;;  %v5019_v23 = vadd.f32 %v4951_v26, %v1175_v47 }
 0x212   :  { %v2512_v14 = vmul.f32 -1.442695, %v1776_v11  ;;  %v4969_v19 = vadd.f32 1.0, %v2528_v17 }
 0x213   :  { %2529 = vpow2.f32 %v2511_v10 }
 0x214   :  { %2531 = vpow2.f32 %v2510_v56  ;;  %v1800_v56 = vand.u32 2147483648, %v4969_v19  ;;  %vm1794_vm2 = vweird.f32 %v4969_v19  ;;  %v1798_v26 = vand.u32 2147483647, %v4969_v19 }
 0x215   :  { %2533 = vpow2.f32 %v2512_v14 }
 0x216   :  { %2535 = vrcp.f32 %v4969_v19  ;;  %vm1799_vm6 = vcmp.eq.f32.partialorder %v1798_v26, 8.507059e+37 }
 0x219   :  { %v2530_v18 = vpop.eup %2529 }
 0x21a   :  { %v4971_v4 = vadd.f32 1.0, %v2530_v18  ;;  %v2532_v22 = vpop.eup %2531 }
 0x21b   :  { %v2534_v61 = vpop.eup %2533  ;;  %v4975_v20 = vadd.f32 1.0, %v2532_v22 }
 0x21c   :  { %2537 = vrcp.f32 %v4971_v4  ;;  %v4977_v2 = vadd.f32 1.0, %v2534_v61  ;;  %v4979_v30 = vpop.eup %2535  ;;  %v1838_v17 = vand.u32 2147483648, %v4971_v4  ;;  %vm1832_vm3 = vweird.f32 %v4971_v4 }
 0x21d   :  { %2539 = vrcp.f32 %v4975_v20  ;;  %v1790_v3 = vmul.f32 %v4979_v30, %v4969_v19  ;;  %vm1795_vm0 = vweird.f32 %v4979_v30  ;;  %v1836_v61 = vand.u32 2147483647, %v4971_v4 }
 0x21e   :  { %2541 = vrcp.f32 %v4977_v2  ;;  %vm5034_vm4 = vmor %vm1794_vm2, %vm1795_vm0  ;;  %vm1809_vm10 = vweird.f32 %v4975_v20  ;;  %vm1847_vm11 = vweird.f32 %v4977_v2 }
 0x21f   :  { %v1630_v24 = vpop.f32.mrf.mxu0  ;;  %v1791_v28 = vsub.f32 1.0, %v1790_v3  ;;  %v1801_v3 = vor.u32 1.1754944e-38, %v1800_v56  ;;  %vm1837_vm7 = vcmp.eq.f32.partialorder %v1836_v61, 8.507059e+37 }
 0x220   :  { %v1650_v25 = vpop.f32.mrf.mxu1 }
 0x221   :  { %v1651_v34 = vadd.f32 %v1650_v25, %v1630_v24  ;;  %v1792_v37 = vmul.f32 %v4979_v30, %v1791_v28  ;;  %v1815_v28 = vand.u32 2147483648, %v4975_v20 }
 0x222   :  { %v4982_v32 = vpop.eup %2537 }
 0x223   :  { %v1828_v39 = vmul.f32 %v4982_v32, %v4971_v4  ;;  %v4995_v49 = vpop.eup %2539  ;;  %v1777_v63 = vadd.f32 %v1651_v34, %v5003_v41  ;;  %v1793_v11 = vadd.f32 %v4979_v30, %v1792_v37  ;;  %vm1833_vm1 = vweird.f32 %v4982_v32 }
 0x224   :  { %v5000_v53 = vpop.eup %2541  ;;  %v1805_v36 = vmul.f32 %v4995_v49, %v4975_v20  ;;  %vm1834_vm5 = vmor %vm1832_vm3, %vm1833_vm1  ;;  %vm1810_vm8 = vweird.f32 %v4995_v49  ;;  %v1851_v34 = vand.u32 2147483647, %v4977_v2 }
 0x225   :  { %v1829_v21 = vsub.f32 1.0, %v1828_v39  ;;  %v1843_v38 = vmul.f32 %v5000_v53, %v4977_v2  ;;  %v1797_v19 = vsel %vm5034_vm4, %v4979_v30, %v1793_v11  ;;  %vm1848_vm9 = vweird.f32 %v5000_v53  ;;  %vm5053_vm12 = vmor %vm1809_vm10, %vm1810_vm8 }
 0x226   :  { %v1670_v43 = vpop.f32.mrf.mxu2  ;;  %v1806_v10 = vsub.f32 1.0, %v1805_v36  ;;  %v1802_v4 = vsel %vm1799_vm6, %v1801_v3, %v1797_v19  ;;  %vm1849_vm13 = vmor %vm1847_vm11, %vm1848_vm9  ;;  %vm1852_vm15 = vcmp.eq.f32.partialorder %v1851_v34, 8.507059e+37  ;;  %v2625_v19 = vld [vmem:[#allocation2 + $0x3e0] sm:$0xff] }
 0x227   :  { %v1690_v15 = vpop.f32.mrf.mxu3  ;;  %v1830_v42 = vmul.f32 %v4982_v32, %v1829_v21  ;;  %v1844_v13 = vsub.f32 1.0, %v1843_v38  ;;  %v2636_v34 = vld [vmem:[#allocation2 + $0x7a0] sm:$0xff] }
 0x228   :  { %v1691_v9 = vadd.f32 %v1690_v15, %v1670_v43  ;;  %v1807_v33 = vmul.f32 %v4995_v49, %v1806_v10  ;;  %v1839_v43 = vor.u32 1.1754944e-38, %v1838_v17 }
 0x229   :  { %v1831_v14 = vadd.f32 %v4982_v32, %v1830_v42  ;;  %v1845_v31 = vmul.f32 %v5000_v53, %v1844_v13 }
 0x22a   :  { %v1778_v18 = vadd.f32 %v1691_v9, %v5016_v59  ;;  %v1808_v30 = vadd.f32 %v4995_v49, %v1807_v33  ;;  %v2626_v33 = vld [vmem:[#allocation2 + $0x3e8] sm:$0xff] }
 0x22b   :  { %v1835_v27 = vsel %vm1834_vm5, %v4982_v32, %v1831_v14  ;;  %v1846_v16 = vadd.f32 %v5000_v53, %v1845_v31  ;;  %v1853_v32 = vand.u32 2147483648, %v4977_v2 }
 0x22c   :  { %v1840_v15 = vsel %vm1837_vm7, %v1839_v43, %v1835_v27  ;;  %v1812_v45 = vsel %vm5053_vm12, %v4995_v49, %v1808_v30  ;;  %v2629_v30 = vld [vmem:[#allocation2 + $0x360] sm:$0xff] }
 0x22d   :  { %v1897_v21 = vmul.f32 0.0, %v1840_v15  ;;  %v1850_v47 = vsel %vm1849_vm13, %v5000_v53, %v1846_v16  ;;  %v1854_v38 = vor.u32 1.1754944e-38, %v1853_v32  ;;  %v2630_v16 = vld [vmem:[#allocation2 + $0x368] sm:$0xff]  ;;  %v2631_v32 = vld [vmem:[#allocation2 + $0x320] sm:$0xff] }
 0x22f   :  { %v1855_v42 = vsel %vm1852_vm15, %v1854_v38, %v1850_v47  ;;  %v2641_v47 = vld [vmem:[#allocation2 + $0x2a8] sm:$0xff]  ;;  %v2644_v38 = vld [vmem:[#allocation2 + $0x720] sm:$0xff] }
 0x230   :  { %v1898_v49 = vmul.f32 0.0, %v1855_v42  ;;  %v2648_v42 = vld [vmem:[#allocation2 + $0x6e0] sm:$0xff] }
 0x241   :  { %v1710_v29 = vpop.f32.mrf.mxu0 }
 0x242   :  { %v1730_v48 = vpop.f32.mrf.mxu1 }
 0x243   :  { %v1731_v51 = vadd.f32 %v1730_v48, %v1710_v29  ;;  %v1813_v48 = vand.u32 2147483647, %v4975_v20  ;;  %v2634_v29 = vld [vmem:[#allocation2 + $0x7e8] sm:$0xff] }
 0x245   :  { %v1779_v1 = vadd.f32 %v1731_v51, %v4998_v50  ;;  %vm1814_vm14 = vcmp.eq.f32.partialorder %v1813_v48, 8.507059e+37  ;;  %v2635_v48 = vld [vmem:[#allocation2 + $0x2e0] sm:$0xff] }
 0x247   :  { %v2513_v8 = vmul.f32 -1.442695, %v1779_v1 }
 0x248   :  { %v1750_v6 = vpop.f32.mrf.mxu2 }
 0x249   :  { %2543 = vpow2.f32 %v2513_v8  ;;  %v1770_v57 = vpop.f32.mrf.mxu3  ;;  %v1816_v8 = vor.u32 1.1754944e-38, %v1815_v28  ;;  %v2633_v28 = vld [vmem:[#allocation2 + $0x328] sm:$0xff] }
 0x24a   :  { %v1771_v46 = vadd.f32 %v1770_v57, %v1750_v6  ;;  %2545 = vtanh.f32 %v1777_v63 }
 0x24b   :  { %v1817_v2 = vsel %vm1814_vm14, %v1816_v8, %v1812_v45  ;;  %v2640_v45 = vld [vmem:[#allocation2 + $0x760] sm:$0xff]  ;;  %v2645_v8 = vld [vmem:[#allocation2 + $0x268] sm:$0xff] }
 0x24c   :  { %v1780_v60 = vadd.f32 %v1771_v46, %v5019_v23 }
 0x24e   :  { %v2514_v24 = vmul.f32 -1.442695, %v1780_v60 }
 0x24f   :  { %v2544_v25 = vpop.eup %2543 }
 0x250   :  { %v1865_v39 = vadd.f32 1.0, %v2544_v25  ;;  %2547 = vpow2.f32 %v2514_v24  ;;  %v2546_v40 = vpop.eup %2545 }
 0x251   :  { %2549 = vtanh.f32 %v1778_v18  ;;  %v1899_v44 = vmul.f32 %v2546_v40, %v1802_v4  ;;  %v2628_v40 = vld [vmem:[#allocation2 + $0x3a8] sm:$0xff] }
 0x252   :  { %2551 = vrcp.f32 %v1865_v39  ;;  %v1878_v57 = vand.u32 2147483648, %v1865_v39  ;;  %v1876_v53 = vand.u32 2147483647, %v1865_v39  ;;  %vm1872_vm1 = vweird.f32 %v1865_v39 }
 0x253   :  { %v5063_v63 = vadd.f32 %v1899_v44, %v1897_v21  ;;  %v2632_v44 = vld [vmem:[#allocation2 + $0x7e0] sm:$0xff]  ;;  %v2638_v21 = vld [vmem:[#allocation2 + $0x7a8] sm:$0xff] }
 0x254   :  { %v1879_v56 = vor.u32 1.1754944e-38, %v1878_v57  ;;  %vm1877_vm3 = vcmp.eq.f32.partialorder %v1876_v53, 8.507059e+37  ;;  %v2651_v57 = vld [vmem:[#allocation2 + $0x1e0] sm:$0xff]  ;;  %v2654_v53 = vld [vmem:[#allocation2 + $0x6a8] sm:$0xff] }
 0x256   :  { %v2548_v51 = vpop.eup %2547 }
 0x257   :  { %v2550_v1 = vpop.eup %2549  ;;  %v1866_v37 = vadd.f32 1.0, %v2548_v51  ;;  %v2637_v51 = vld [vmem:[#allocation2 + $0x2e8] sm:$0xff] }
 0x258   :  { %v2552_v36 = vpop.eup %2551  ;;  %v1900_v9 = vmul.f32 %v2550_v1, %v1817_v2  ;;  %v2639_v1 = vld [vmem:[#allocation2 + $0x2a0] sm:$0xff] }
 0x259   :  { %v1868_v20 = vmul.f32 %v2552_v36, %v1865_v39  ;;  %2553 = vrcp.f32 %v1866_v37  ;;  %vm1873_vm0 = vweird.f32 %v2552_v36  ;;  %v1893_v61 = vand.u32 2147483648, %v1866_v37  ;;  %v2627_v39 = vld [vmem:[#allocation2 + $0x3a0] sm:$0xff] }
 0x25a   :  { %2555 = vtanh.f32 %v5063_v63  ;;  %v5066_v13 = vadd.f32 %v1900_v9, %v1898_v49  ;;  %vm1874_vm2 = vmor %vm1872_vm1, %vm1873_vm0  ;;  %v1891_v25 = vand.u32 2147483647, %v1866_v37  ;;  %vm1887_vm5 = vweird.f32 %v1866_v37  ;;  %v2647_v2 = vld [vmem:[#allocation2 + $0x220] sm:$0xff]  ;;  %v2649_v9 = vld [vmem:[#allocation2 + $0x228] sm:$0xff] }
 0x25b   :  { %v1869_v6 = vsub.f32 1.0, %v1868_v20  ;;  %v1894_v3 = vor.u32 1.1754944e-38, %v1893_v61  ;;  %v2646_v20 = vld [vmem:[#allocation2 + $0x728] sm:$0xff]  ;;  %v2652_v49 = vld [vmem:[#allocation2 + $0x6a0] sm:$0xff] }
 0x25c   :  { %2557 = vtanh.f32 %v5066_v13  ;;  %vm1892_vm7 = vcmp.eq.f32.partialorder %v1891_v25, 8.507059e+37  ;;  %v2663_v61 = vld [vmem:[#allocation2 + $0x120] sm:$0xff]  ;;  %v2665_v25 = vld [vmem:[#allocation2 + $0x128] sm:$0xff] }
 0x25d   :  { %v1870_v46 = vmul.f32 %v2552_v36, %v1869_v6  ;;  %v2650_v6 = vld [vmem:[#allocation2 + $0x6e8] sm:$0xff] }
 0x25f   :  { %v2554_v10 = vpop.eup %2553  ;;  %v1871_v11 = vadd.f32 %v2552_v36, %v1870_v46  ;;  %v2653_v46 = vld [vmem:[#allocation2 + $0x1e8] sm:$0xff] }
 0x260   :  { %v1883_v14 = vmul.f32 %v2554_v10, %v1866_v37  ;;  %v2556_v17 = vpop.eup %2555  ;;  %vm1888_vm4 = vweird.f32 %v2554_v10  ;;  %v2642_v37 = vld [vmem:[#allocation2 + $0x768] sm:$0xff] }
 0x261   :  { %v1875_v60 = vsel %vm1874_vm2, %v2552_v36, %v1871_v11  ;;  %vm1889_vm6 = vmor %vm1887_vm5, %vm1888_vm4  ;;  %v2643_v36 = vld [vmem:[#allocation2 + $0x260] sm:$0xff] }
 0x262   :  { %v1880_v26 = vsel %vm1877_vm3, %v1879_v56, %v1875_v60  ;;  %v1884_v18 = vsub.f32 1.0, %v1883_v14  ;;  %v2558_v43 = vpop.eup %2557  ;;  %v2656_v11 = vld [vmem:[#allocation2 + $0x660] sm:$0xff]  ;;  %v2657_v56 = vld [vmem:[#allocation2 + $0x1a8] sm:$0xff] }
 0x263   :  { %v5069_v22 = vmul.f32 %v2556_v17, %v1880_v26  ;;  %v2658_v14 = vld [vmem:[#allocation2 + $0x668] sm:$0xff]  ;;  %v2659_v60 = vld [vmem:[#allocation2 + $0x160] sm:$0xff] }
 0x264   :  { %v1885_v24 = vmul.f32 %v2554_v10, %v1884_v18  ;;  %v2660_v17 = vld [vmem:[#allocation2 + $0x620] sm:$0xff]  ;;  %v2661_v26 = vld [vmem:[#allocation2 + $0x168] sm:$0xff] }
 0x265   :  { %1923 = vmatmul.f32.vlgmr.msra.gmra.mxu0 %v5069_v22  ;;  %1963 = vmatmul.f32.vlgmr.msra.gmra.mxu2 %v5069_v22  ;;  %v2662_v18 = vld [vmem:[#allocation2 + $0x628] sm:$0xff] }
 0x266   :  { %v1886_v31 = vadd.f32 %v2554_v10, %v1885_v24  ;;  %2067 = vmatpush.msra.mxu0 %v2625_v19  ;;  %2107 = vmatpush.msra.mxu2 %v2626_v33  ;;  %v2664_v24 = vld [vmem:[#allocation2 + $0x5e0] sm:$0xff] }
 0x267   :  { %v2667_v19 = vld [vmem:[#allocation2 + $0xe0] sm:$0xff] }
 0x268   :  { %v1890_v27 = vsel %vm1889_vm6, %v2554_v10, %v1886_v31  ;;  %2068 = vmatpush.msra.mxu0 %v2627_v39  ;;  %2108 = vmatpush.msra.mxu2 %v2628_v40  ;;  %v2655_v10 = vld [vmem:[#allocation2 + $0x1a0] sm:$0xff]  ;;  %v2666_v31 = vld [vmem:[#allocation2 + $0x5e8] sm:$0xff] }
 0x269   :  { %v1895_v4 = vsel %vm1892_vm7, %v1894_v3, %v1890_v27  ;;  %v2668_v33 = vld [vmem:[#allocation2 + $0x5a0] sm:$0xff]  ;;  %v2669_v3 = vld [vmem:[#allocation2 + $0xe8] sm:$0xff] }
 0x26a   :  { %v5073_v15 = vmul.f32 %v2558_v43, %v1895_v4  ;;  %2069 = vmatpush.msra.mxu0 %v2629_v30  ;;  %2109 = vmatpush.msra.mxu2 %v2630_v16  ;;  %v2670_v27 = vld [vmem:[#allocation2 + $0x5a8] sm:$0xff]  ;;  %v2671_v39 = vld [vmem:[#allocation2 + $0xa0] sm:$0xff] }
 0x26b   :  { %v2672_v40 = vld [vmem:[#allocation2 + $0x560] sm:$0xff]  ;;  %v2673_v43 = vld [vmem:[#allocation2 + $0xa8] sm:$0xff] }
 0x26c   :  { %1943 = vmatmul.f32.vlgmr.msra.gmra.mxu1 %v5073_v15  ;;  %1983 = vmatmul.f32.vlgmr.msra.gmra.mxu3 %v5073_v15  ;;  %v2674_v4 = vld [vmem:[#allocation2 + $0x568] sm:$0xff]  ;;  %v2675_v30 = vld [vmem:[#allocation2 + $0x60] sm:$0xff] }
 0x26d   :  { %2070 = vmatpush.msra.mxu0 %v2631_v32  ;;  %2087 = vmatpush.msra.mxu1 %v2632_v44  ;;  %v2676_v16 = vld [vmem:[#allocation2 + $0x520] sm:$0xff]  ;;  %v2677_v32 = vld [vmem:[#allocation2 + $0x68] sm:$0xff] }
 0x26e   :  { %2110 = vmatpush.msra.mxu2 %v2633_v28  ;;  %2127 = vmatpush.msra.mxu3 %v2634_v29  ;;  %v2678_v44 = vld [vmem:[#allocation2 + $0x528] sm:$0xff]  ;;  %v2679_v28 = vld [vmem:[#allocation2 + $0x20] sm:$0xff] }
 0x26f   :  { %2003 = vmatmul.f32.vlgmr.msrb.gmra.mxu0 %v5069_v22  ;;  %2043 = vmatmul.f32.vlgmr.msrb.gmra.mxu2 %v5069_v22  ;;  %v2680_v29 = vld [vmem:[#allocation2 + $0x4e0] sm:$0xff] }
 0x270   :  { %2071 = vmatpush.msra.mxu0 %v2635_v48  ;;  %2088 = vmatpush.msra.mxu1 %v2636_v34  ;;  %v2681_v48 = vld [vmem:[#allocation2 + $0x28] sm:$0xff] }
 0x271   :  { %2111 = vmatpush.msra.mxu2 %v2637_v51  ;;  %2128 = vmatpush.msra.mxu3 %v2638_v21  ;;  %v2682_v34 = vld [vmem:[#allocation2 + $0x4e8] sm:$0xff]  ;;  %v2683_v51 = vld [vmem:[#allocation2 + $0x3f0] sm:$0xff]  ;;  %v2684_v21 = vld [vmem:[#allocation2 + $0x3f8] sm:$0xff] }
 0x272   :  { %2072 = vmatpush.msra.mxu0 %v2639_v1  ;;  %2089 = vmatpush.msra.mxu1 %v2640_v45  ;;  %v2685_v1 = vld [vmem:[#allocation2 + $0x4a0] sm:$0xff]  ;;  %v2686_v45 = vld [vmem:[#allocation2 + $0x4a8] sm:$0xff] }
 0x273   :  { %2112 = vmatpush.msra.mxu2 %v2641_v47  ;;  %2129 = vmatpush.msra.mxu3 %v2642_v37  ;;  %v2687_v47 = vld [vmem:[#allocation2 + $0x3b0] sm:$0xff]  ;;  %v2688_v37 = vld [vmem:[#allocation2 + $0x3b8] sm:$0xff] }
 0x274   :  { %2073 = vmatpush.msra.mxu0 %v2643_v36  ;;  %2090 = vmatpush.msra.mxu1 %v2644_v38  ;;  %v2689_v36 = vld [vmem:[#allocation2 + $0x460] sm:$0xff]  ;;  %v2690_v38 = vld [vmem:[#allocation2 + $0x468] sm:$0xff] }
 0x275   :  { %2113 = vmatpush.msra.mxu2 %v2645_v8  ;;  %2130 = vmatpush.msra.mxu3 %v2646_v20  ;;  %v2691_v8 = vld [vmem:[#allocation2 + $0x370] sm:$0xff]  ;;  %v2692_v20 = vld [vmem:[#allocation2 + $0x378] sm:$0xff] }
 0x276   :  { %2023 = vmatmul.f32.vlgmr.msrb.gmra.mxu1 %v5073_v15  ;;  %2063 = vmatmul.f32.vlgmr.msrb.gmra.mxu3 %v5073_v15 }
 0x277   :  { %2074 = vmatpush.msra.mxu0 %v2647_v2  ;;  %2091 = vmatpush.msra.mxu1 %v2648_v42  ;;  %v2693_v2 = vld [vmem:[#allocation2 + $0x420] sm:$0xff]  ;;  %v2694_v42 = vld [vmem:[#allocation2 + $0x428] sm:$0xff] }
 0x278   :  { %2114 = vmatpush.msra.mxu2 %v2649_v9  ;;  %2131 = vmatpush.msra.mxu3 %v2650_v6  ;;  %v2695_v9 = vld [vmem:[#allocation2 + $0x330] sm:$0xff] }
 0x279   :  { %2075 = vmatpush.msra.mxu0 %v2651_v57  ;;  %2092 = vmatpush.msra.mxu1 %v2652_v49  ;;  %v2696_v6 = vld [vmem:[#allocation2 + $0x7f0] sm:$0xff]  ;;  %v2697_v57 = vld [vmem:[#allocation2 + $0x338] sm:$0xff] }
 0x27a   :  { %2115 = vmatpush.msra.mxu2 %v2653_v46  ;;  %2132 = vmatpush.msra.mxu3 %v2654_v53  ;;  %v2698_v49 = vld [vmem:[#allocation2 + $0x7f8] sm:$0xff]  ;;  %v2699_v46 = vld [vmem:[#allocation2 + $0x2f0] sm:$0xff] }
 0x27b   :  { %2076 = vmatpush.msra.mxu0 %v2655_v10  ;;  %2093 = vmatpush.msra.mxu1 %v2656_v11  ;;  %v2700_v53 = vld [vmem:[#allocation2 + $0x7b0] sm:$0xff]  ;;  %v2701_v10 = vld [vmem:[#allocation2 + $0x2f8] sm:$0xff] }
 0x27c   :  { %2116 = vmatpush.msra.mxu2 %v2657_v56  ;;  %2133 = vmatpush.msra.mxu3 %v2658_v14  ;;  %v2702_v11 = vld [vmem:[#allocation2 + $0x7b8] sm:$0xff]  ;;  %v2703_v56 = vld [vmem:[#allocation2 + $0x2b0] sm:$0xff] }
 0x27d   :  { %2077 = vmatpush.msra.mxu0 %v2659_v60  ;;  %2094 = vmatpush.msra.mxu1 %v2660_v17  ;;  %v2704_v14 = vld [vmem:[#allocation2 + $0x770] sm:$0xff]  ;;  %v2705_v60 = vld [vmem:[#allocation2 + $0x2b8] sm:$0xff] }
 0x27e   :  { %2117 = vmatpush.msra.mxu2 %v2661_v26  ;;  %2134 = vmatpush.msra.mxu3 %v2662_v18  ;;  %v2706_v17 = vld [vmem:[#allocation2 + $0x778] sm:$0xff]  ;;  %v2707_v26 = vld [vmem:[#allocation2 + $0x270] sm:$0xff] }
 0x27f   :  { %2078 = vmatpush.msra.mxu0 %v2663_v61  ;;  %2095 = vmatpush.msra.mxu1 %v2664_v24  ;;  %v2708_v18 = vld [vmem:[#allocation2 + $0x730] sm:$0xff]  ;;  %v2709_v61 = vld [vmem:[#allocation2 + $0x278] sm:$0xff] }
 0x280   :  { %2118 = vmatpush.msra.mxu2 %v2665_v25  ;;  %2135 = vmatpush.msra.mxu3 %v2666_v31  ;;  %v2710_v24 = vld [vmem:[#allocation2 + $0x738] sm:$0xff]  ;;  %v2711_v25 = vld [vmem:[#allocation2 + $0x6f0] sm:$0xff] }
 0x281   :  { %2079 = vmatpush.msra.mxu0 %v2667_v19  ;;  %2096 = vmatpush.msra.mxu1 %v2668_v33  ;;  %v2712_v31 = vld [vmem:[#allocation2 + $0x6f8] sm:$0xff]  ;;  %v2713_v19 = vld [vmem:[#allocation2 + $0x6b0] sm:$0xff] }
 0x282   :  { %2119 = vmatpush.msra.mxu2 %v2669_v3  ;;  %2136 = vmatpush.msra.mxu3 %v2670_v27  ;;  %v2714_v33 = vld [vmem:[#allocation2 + $0x6b8] sm:$0xff]  ;;  %v2715_v3 = vld [vmem:[#allocation2 + $0x670] sm:$0xff] }
 0x283   :  { %2080 = vmatpush.msra.mxu0 %v2671_v39  ;;  %2097 = vmatpush.msra.mxu1 %v2672_v40  ;;  %v5545_v27 = vld [vmem:[#allocation65_spill] sm:$0xff]  ;;  %v5546_v39 = vld [vmem:[#allocation66_spill] sm:$0xff]  ;;  %v5547_v40 = vld [vmem:[#allocation68_spill] sm:$0xff] }
 0x284   :  { %2120 = vmatpush.msra.mxu2 %v2673_v43  ;;  %2137 = vmatpush.msra.mxu3 %v2674_v4  ;;  %v5548_v43 = vld [vmem:[#allocation70_spill] sm:$0xff]  ;;  %v5549_v4 = vld [vmem:[#allocation72_spill] sm:$0xff] }
 0x285   :  { %2081 = vmatpush.msra.mxu0 %v2675_v30  ;;  %2098 = vmatpush.msra.mxu1 %v2676_v16  ;;  %v5550_v30 = vld [vmem:[#allocation74_spill] sm:$0xff] }
 0x286   :  { %2121 = vmatpush.msra.mxu2 %v2677_v32  ;;  %2138 = vmatpush.msra.mxu3 %v2678_v44  ;;  %v2721_v16 = vld [vmem:[#allocation2 + $0x5b0] sm:$0xff]  ;;  %v5551_v32 = vld [vmem:[#allocation76_spill] sm:$0xff]  ;;  %v2722_v44 = vld [vmem:[#allocation2 + $0x5b8] sm:$0xff] }
 0x287   :  { %2082 = vmatpush.msra.mxu0 %v2679_v28  ;;  %2099 = vmatpush.msra.mxu1 %v2680_v29  ;;  %v5552_v28 = vld [vmem:[#allocation78_spill] sm:$0xff]  ;;  %v5553_v29 = vld [vmem:[#allocation67_spill] sm:$0xff] }
 0x288   :  { %2122 = vmatpush.msra.mxu2 %v2681_v48  ;;  %2139 = vmatpush.msra.mxu3 %v2682_v34  ;;  %v5554_v48 = vld [vmem:[#allocation69_spill] sm:$0xff] }
 0x289   :  { %2083 = vmatmul.f32.vlgmr.msra.gmra.mxu0 %v5069_v22  ;;  %2123 = vmatmul.f32.vlgmr.msra.gmra.mxu2 %v5069_v22  ;;  %v5555_v34 = vld [vmem:[#allocation81_spill] sm:$0xff] }
 0x28a   :  { %2147 = vmatpush.msrb.mxu0 %v2683_v51  ;;  %2187 = vmatpush.msrb.mxu2 %v2684_v21  ;;  %v5556_v51 = vld [vmem:[#allocation71_spill] sm:$0xff] }
 0x28b   :  { %2100 = vmatpush.msra.mxu1 %v2685_v1  ;;  %2140 = vmatpush.msra.mxu3 %v2686_v45  ;;  %v5557_v21 = vld [vmem:[#allocation83_spill] sm:$0xff]  ;;  %v5558_v1 = vld [vmem:[#allocation73_spill] sm:$0xff] }
 0x28c   :  { %2148 = vmatpush.msrb.mxu0 %v2687_v47  ;;  %2188 = vmatpush.msrb.mxu2 %v2688_v37  ;;  %v5559_v45 = vld [vmem:[#allocation85_spill] sm:$0xff]  ;;  %v5560_v47 = vld [vmem:[#allocation75_spill] sm:$0xff] }
 0x28d   :  { %2101 = vmatpush.msra.mxu1 %v2689_v36  ;;  %2141 = vmatpush.msra.mxu3 %v2690_v38  ;;  %v5561_v37 = vld [vmem:[#allocation87_spill] sm:$0xff]  ;;  %v5562_v36 = vld [vmem:[#allocation77_spill] sm:$0xff]  ;;  %v5564_v38 = vld [vmem:[#allocation80_spill] sm:$0xff] }
 0x28e   :  { %2149 = vmatpush.msrb.mxu0 %v2691_v8  ;;  %2189 = vmatpush.msrb.mxu2 %v2692_v20  ;;  %v5565_v8 = vld [vmem:[#allocation82_spill] sm:$0xff]  ;;  %v5566_v20 = vld [vmem:[#allocation84_spill] sm:$0xff] }
 0x28f   :  { %2102 = vmatpush.msra.mxu1 %v2693_v2  ;;  %2142 = vmatpush.msra.mxu3 %v2694_v42  ;;  %v5567_v2 = vld [vmem:[#allocation86_spill] sm:$0xff]  ;;  %v5568_v42 = vld [vmem:[#allocation88_spill] sm:$0xff] }
 0x290   :  { %2103 = vmatmul.f32.vlgmr.msra.gmra.mxu1 %v5073_v15  ;;  %2143 = vmatmul.f32.vlgmr.msra.gmra.mxu3 %v5073_v15 }
 0x291   :  { %2150 = vmatpush.msrb.mxu0 %v2695_v9  ;;  %2167 = vmatpush.msrb.mxu1 %v2696_v6 }
 0x292   :  { %2190 = vmatpush.msrb.mxu2 %v2697_v57  ;;  %2207 = vmatpush.msrb.mxu3 %v2698_v49 }
 0x293   :  { %2151 = vmatpush.msrb.mxu0 %v2699_v46  ;;  %2168 = vmatpush.msrb.mxu1 %v2700_v53 }
 0x294   :  { %2191 = vmatpush.msrb.mxu2 %v2701_v10  ;;  %2208 = vmatpush.msrb.mxu3 %v2702_v11 }
 0x295   :  { %2152 = vmatpush.msrb.mxu0 %v2703_v56  ;;  %2169 = vmatpush.msrb.mxu1 %v2704_v14 }
 0x296   :  { %2192 = vmatpush.msrb.mxu2 %v2705_v60  ;;  %2209 = vmatpush.msrb.mxu3 %v2706_v17 }
 0x297   :  { %2153 = vmatpush.msrb.mxu0 %v2707_v26  ;;  %2170 = vmatpush.msrb.mxu1 %v2708_v18 }
 0x298   :  { %2193 = vmatpush.msrb.mxu2 %v2709_v61  ;;  %2210 = vmatpush.msrb.mxu3 %v2710_v24 }
 0x299   :  { %2154 = vmatpush.msrb.mxu0 %v4717_v54  ;;  %2171 = vmatpush.msrb.mxu1 %v2711_v25  ;;  %v2716_v54 = vld [vmem:[#allocation2 + $0x678] sm:$0xff] }
 0x29a   :  { %2194 = vmatpush.msrb.mxu2 %v4719_v52  ;;  %2211 = vmatpush.msrb.mxu3 %v2712_v31  ;;  %v2717_v52 = vld [vmem:[#allocation2 + $0x630] sm:$0xff] }
 0x29b   :  { %2155 = vmatpush.msrb.mxu0 %v4721_v5  ;;  %2172 = vmatpush.msrb.mxu1 %v2713_v19  ;;  %v2718_v5 = vld [vmem:[#allocation2 + $0x638] sm:$0xff] }
 0x29c   :  { %2195 = vmatpush.msrb.mxu2 %v4724_v35  ;;  %2212 = vmatpush.msrb.mxu3 %v2714_v33  ;;  %v2719_v35 = vld [vmem:[#allocation2 + $0x5f0] sm:$0xff] }
 0x29d   :  { %2156 = vmatpush.msrb.mxu0 %v4727_v58  ;;  %2173 = vmatpush.msrb.mxu1 %v2715_v3  ;;  %v2720_v58 = vld [vmem:[#allocation2 + $0x5f8] sm:$0xff]  ;;  %v2408_v3 = vld [vmem:[%s5317_s3 + $0x78] sm:$0xff] }
 0x29e   :  { %2196 = vmatpush.msrb.mxu2 %v5545_v27  ;;  %2213 = vmatpush.msrb.mxu3 %v2716_v54  ;;  %v2405_v54 = vld [vmem:[%s5317_s3 + $0x60] sm:$0xff] }
 0x29f   :  { %2157 = vmatpush.msrb.mxu0 %v5546_v39  ;;  %2174 = vmatpush.msrb.mxu1 %v2717_v52  ;;  %v2424_v39 = vld [vmem:[%s5317_s3 + $0xf8] sm:$0xff] }
 0x2a0   :  { %2197 = vmatpush.msrb.mxu2 %v5547_v40  ;;  %2214 = vmatpush.msrb.mxu3 %v2718_v5  ;;  %v2404_v40 = vld [vmem:[%s5317_s3 + $0x58] sm:$0xff]  ;;  %v2423_v5 = vld [vmem:[%s5317_s3 + $0xf0] sm:$0xff] }
 0x2a1   :  { %2158 = vmatpush.msrb.mxu0 %v5548_v43  ;;  %2175 = vmatpush.msrb.mxu1 %v2719_v35 }
 0x2a2   :  { %2198 = vmatpush.msrb.mxu2 %v5549_v4  ;;  %2215 = vmatpush.msrb.mxu3 %v2720_v58  ;;  %v2403_v4 = vld [vmem:[%s5317_s3 + $0x50] sm:$0xff]  ;;  %v2422_v58 = vld [vmem:[%s5317_s3 + $0xe8] sm:$0xff] }
 0x2a3   :  { %2159 = vmatpush.msrb.mxu0 %v5550_v30  ;;  %2176 = vmatpush.msrb.mxu1 %v2721_v16  ;;  %v2402_v16 = vld [vmem:[%s5317_s3 + $0x48] sm:$0xff] }
 0x2a4   :  { %2199 = vmatpush.msrb.mxu2 %v5551_v32  ;;  %2216 = vmatpush.msrb.mxu3 %v2722_v44  ;;  %v2421_v32 = vld [vmem:[%s5317_s3 + $0xe0] sm:$0xff] }
 0x2a5   :  { %2160 = vmatpush.msrb.mxu0 %v5552_v28  ;;  %2177 = vmatpush.msrb.mxu1 %v5553_v29  ;;  %v2401_v28 = vld [vmem:[%s5317_s3 + $0x40] sm:$0xff]  ;;  %v2420_v29 = vld [vmem:[%s5317_s3 + $0xd8] sm:$0xff] }
 0x2a6   :  { %2200 = vmatpush.msrb.mxu2 %v4773_v62  ;;  %2217 = vmatpush.msrb.mxu3 %v5554_v48  ;;  %v5563_v62 = vld [vmem:[#allocation79_spill] sm:$0xff] }
 0x2a7   :  { %2161 = vmatpush.msrb.mxu0 %v5555_v34  ;;  %2178 = vmatpush.msrb.mxu1 %v5556_v51 }
 0x2a8   :  { %2201 = vmatpush.msrb.mxu2 %v5557_v21  ;;  %2218 = vmatpush.msrb.mxu3 %v5558_v1  ;;  %v2400_v1 = vld [vmem:[%s5317_s3 + $0x38] sm:$0xff] }
 0x2a9   :  { %2162 = vmatpush.msrb.mxu0 %v5559_v45  ;;  %2179 = vmatpush.msrb.mxu1 %v5560_v47  ;;  %v2419_v45 = vld [vmem:[%s5317_s3 + $0xd0] sm:$0xff] }
 0x2aa   :  { %2202 = vmatpush.msrb.mxu2 %v5561_v37  ;;  %2219 = vmatpush.msrb.mxu3 %v5562_v36  ;;  %v2399_v47 = vld [vmem:[%s5317_s3 + $0x30] sm:$0xff]  ;;  %v2418_v37 = vld [vmem:[%s5317_s3 + $0xc8] sm:$0xff] }
 0x2ab   :  { %2163 = vmatmul.f32.vlgmr.msrb.gmra.mxu0 %v5069_v22  ;;  %2203 = vmatmul.f32.vlgmr.msrb.gmra.mxu2 %v5069_v22 }
 0x2ac   :  { %2180 = vmatpush.msrb.mxu1 %v5563_v62  ;;  %2220 = vmatpush.msrb.mxu3 %v5564_v38  ;;  %v2398_v38 = vld [vmem:[%s5317_s3 + $0x28] sm:$0xff] }
 0x2ad   :  { %2431 = vmatpush.msra.mxu0 %v2408_v3  ;;  %v2412_v3 = vld [vmem:[%s5317_s3 + $0x98] sm:$0xff] }
 0x2ae   :  { %2181 = vmatpush.msrb.mxu1 %v5565_v8  ;;  %2221 = vmatpush.msrb.mxu3 %v5566_v20  ;;  %v2417_v8 = vld [vmem:[%s5317_s3 + $0xc0] sm:$0xff] }
 0x2b0   :  { %2182 = vmatpush.msrb.mxu1 %v5567_v2  ;;  %2222 = vmatpush.msrb.mxu3 %v5568_v42 }
 0x2b1   :  { %2183 = vmatmul.f32.vlgmr.msrb.gmra.mxu1 %v5073_v15  ;;  %2223 = vmatmul.f32.vlgmr.msrb.gmra.mxu3 %v5073_v15 }
 0x2b2   :  { %2451 = vmatpush.msra.mxu1 %v2424_v39 }
 0x2b4   :  { %2452 = vmatpush.msra.mxu1 %v2423_v5 }
 0x2b6   :  { %2453 = vmatpush.msra.mxu1 %v2422_v58  ;;  %v2410_v58 = vld [vmem:[%s5317_s3 + $0x88] sm:$0xff] }
 0x2b8   :  { %2454 = vmatpush.msra.mxu1 %v2421_v32 }
 0x2ba   :  { %2455 = vmatpush.msra.mxu1 %v2420_v29 }
 0x2bc   :  { %2456 = vmatpush.msra.mxu1 %v2419_v45 }
 0x2be   :  { %2457 = vmatpush.msra.mxu1 %v2418_v37 }
 0x2c0   :  { %2458 = vmatpush.msra.mxu1 %v2417_v8  ;;  %v2377_v8 = vrot.slane %v5063_v63, 7 }
 0x2e2   :  { %v1924_v6 = vpop.f32.mrf.mxu0 }
 0x2e8   :  { %v1964_v22 = vpop.f32.mrf.mxu2 }
 0x2e9   :  { %v1944_v9 = vpop.f32.mrf.mxu1 }
 0x2ea   :  { %v1945_v46 = vadd.f32 %v1944_v9, %v1924_v6  ;;  %v2397_v9 = vld [vmem:[%s5317_s3 + $0x20] sm:$0xff]  ;;  %v2416_v6 = vld [vmem:[%s5317_s3 + $0xb8] sm:$0xff] }
 0x2eb   :  { %2459 = vmatpush.msra.mxu1 %v2416_v6 }
 0x2ec   :  { %v2004_v53 = vpop.f32.mrf.mxu0  ;;  %v2235_v11 = vrot.slane %v1945_v46, 7 }
 0x2ee   :  { %v2251_v18 = vadd.f32 %v2235_v11, %v5539_v0  ;;  %v2415_v11 = vld [vmem:[%s5317_s3 + $0xb0] sm:$0xff] }
 0x2ef   :  { %v1984_v57 = vpop.f32.mrf.mxu3  ;;  %2460 = vmatpush.msra.mxu1 %v2415_v11 }
 0x2f0   :  { %v1985_v60 = vadd.f32 %v1984_v57, %v1964_v22  ;;  %v2515_v25 = vmul.f32 -1.442695, %v2251_v18 }
 0x2f2   :  { %v2044_v17 = vpop.f32.mrf.mxu2  ;;  %v2236_v24 = vrot.slane %v1985_v60, 7  ;;  %2559 = vpow2.f32 %v2515_v25  ;;  %v2414_v60 = vld [vmem:[%s5317_s3 + $0xa8] sm:$0xff] }
 0x2f3   :  { %v2024_v49 = vpop.f32.mrf.mxu1  ;;  %2461 = vmatpush.msra.mxu1 %v2414_v60 }
 0x2f4   :  { %v2025_v10 = vadd.f32 %v2024_v49, %v2004_v53  ;;  %v2252_v19 = vadd.f32 %v2236_v24, %v5540_v12  ;;  %v2406_v12 = vld [vmem:[%s5317_s3 + $0x68] sm:$0xff]  ;;  %v2413_v24 = vld [vmem:[%s5317_s3 + $0xa0] sm:$0xff] }
 0x2f5   :  { %2462 = vmatpush.msra.mxu1 %v2413_v24 }
 0x2f6   :  { %v2237_v14 = vrot.slane %v2025_v10, 7  ;;  %v2516_v27 = vmul.f32 -1.442695, %v2252_v19  ;;  %v2396_v10 = vld [vmem:[%s5317_s3 + $0x18] sm:$0xff] }
 0x2f7   :  { %2463 = vmatpush.msra.mxu1 %v2412_v3 }
 0x2f8   :  { %v2253_v61 = vadd.f32 %v2237_v14, %v4959_v55  ;;  %v2407_v55 = vld [vmem:[%s5317_s3 + $0x70] sm:$0xff] }
 0x2f9   :  { %v2064_v56 = vpop.f32.mrf.mxu3  ;;  %2432 = vmatpush.msra.mxu0 %v2407_v55 }
 0x2fa   :  { %v2065_v26 = vadd.f32 %v2064_v56, %v2044_v17  ;;  %v2517_v31 = vmul.f32 -1.442695, %v2253_v61  ;;  %v2395_v56 = vld [vmem:[%s5317_s3 + $0x10] sm:$0xff]  ;;  %v2394_v61 = vld [vmem:[%s5317_s3 + $0x8] sm:$0xff] }
 0x2fb   :  { %2433 = vmatpush.msra.mxu0 %v2406_v12 }
 0x2fc   :  { %v2238_v15 = vrot.slane %v2065_v26, 7  ;;  %2561 = vpow2.f32 %v2517_v31 }
 0x2fd   :  { %2563 = vpow2.f32 %v2516_v27  ;;  %2434 = vmatpush.msra.mxu0 %v2405_v54 }
 0x2fe   :  { %v2254_v33 = vadd.f32 %v2238_v15, %v4965_v7  ;;  %v2560_v7 = vpop.eup %2559 }
 0x2ff   :  { %v5144_v43 = vadd.f32 1.0, %v2560_v7  ;;  %2435 = vmatpush.msra.mxu0 %v2404_v40 }
 0x300   :  { %v2518_v0 = vmul.f32 -1.442695, %v2254_v33  ;;  %v2393_v33 = vld [vmem:[%s5317_s3] sm:$0xff] }
 0x301   :  { %2436 = vmatpush.msra.mxu0 %v2403_v4  ;;  %v2411_v4 = vld [vmem:[%s5317_s3 + $0x90] sm:$0xff]  ;;  %v2278_v32 = vand.u32 2147483648, %v5144_v43  ;;  %vm2272_vm10 = vweird.f32 %v5144_v43 }
 0x302   :  { %v2562_v52 = vpop.eup %2561  ;;  %2565 = vpow2.f32 %v2518_v0  ;;  %2464 = vmatpush.msra.mxu1 %v2411_v4 }
 0x303   :  { %v5146_v35 = vadd.f32 1.0, %v2562_v52  ;;  %v2564_v30 = vpop.eup %2563  ;;  %2567 = vrcp.f32 %v5144_v43  ;;  %2437 = vmatpush.msra.mxu0 %v2402_v16  ;;  %v2276_v16 = vand.u32 2147483647, %v5144_v43 }
 0x304   :  { %v5168_v48 = vadd.f32 1.0, %v2564_v30  ;;  %2465 = vmatpush.msra.mxu1 %v2410_v58 }
 0x305   :  { %2569 = vrcp.f32 %v5146_v35  ;;  %2438 = vmatpush.msra.mxu0 %v2401_v28  ;;  %v2409_v28 = vld [vmem:[%s5317_s3 + $0x80] sm:$0xff]  ;;  %vm2310_vm11 = vweird.f32 %v5146_v35  ;;  %vm5278_vm14 = vcmp.eq.f32.partialorder %v2276_v16, 8.507059e+37  ;;  %s2779_s3 = smov [#allocation5]  }
 0x306   :  { %v2084_v34 = vpop.f32.mrf.mxu0  ;;  %2571 = vrcp.f32 %v5168_v48  ;;  %2466 = vmatpush.msra.mxu1 %v2409_v28  ;;  %vm2287_vm15 = vweird.f32 %v5168_v48  ;;  %v2291_v11 = vand.u32 2147483647, %v5168_v48  ;;  %s2497_s23 = sshll.u32 %s2779_s3, 4  ;;  %s2498_s23 = int_to_ptr.vmem [resolvable:$true] %s2497_s23 }
 0x307   :  { %2439 = vmatpush.msra.mxu0 %v2400_v1  ;;  %v2314_v1 = vand.u32 2147483647, %v5146_v35 }
 0x308   :  { %v2566_v44 = vpop.eup %2565  ;;  %vm2292_vm6 = vcmp.eq.f32.partialorder %v2291_v11, 8.507059e+37 }
 0x309   :  { %v5170_v21 = vadd.f32 1.0, %v2566_v44  ;;  %v5184_v36 = vpop.eup %2567  ;;  %2440 = vmatpush.msra.mxu0 %v2399_v47  ;;  %vm2315_vm0 = vcmp.eq.f32.partialorder %v2314_v1, 8.507059e+37 }
 0x30a   :  { %v2268_v57 = vmul.f32 %v5184_v36, %v5144_v43  ;;  %vm2273_vm8 = vweird.f32 %v5184_v36 }
 0x30b   :  { %v5187_v62 = vpop.eup %2569  ;;  %2573 = vrcp.f32 %v5170_v21  ;;  %2441 = vmatpush.msra.mxu0 %v2398_v38  ;;  %vm5266_vm12 = vmor %vm2272_vm10, %vm2273_vm8  ;;  %vm2325_vm3 = vweird.f32 %v5170_v21 }
 0x30c   :  { %v2124_v20 = vpop.f32.mrf.mxu2  ;;  %v2306_v22 = vmul.f32 %v5187_v62, %v5146_v35  ;;  %v5215_v14 = vpop.eup %2571  ;;  %v2269_v15 = vsub.f32 1.0, %v2268_v57  ;;  %vm2311_vm9 = vweird.f32 %v5187_v62 }
 0x30d   :  { %v2104_v51 = vpop.f32.mrf.mxu1  ;;  %2442 = vmatpush.msra.mxu0 %v2397_v9  ;;  %v2283_v27 = vmul.f32 %v5215_v14, %v5168_v48  ;;  %vm5274_vm13 = vmor %vm2310_vm11, %vm2311_vm9  ;;  %vm2288_vm1 = vweird.f32 %v5215_v14 }
 0x30e   :  { %v2105_v42 = vadd.f32 %v2104_v51, %v2084_v34  ;;  %v2307_v25 = vsub.f32 1.0, %v2306_v22  ;;  %v2270_v52 = vmul.f32 %v5184_v36, %v2269_v15  ;;  %v2316_v51 = vand.u32 2147483648, %v5146_v35  ;;  %vm5300_vm4 = vmor %vm2287_vm15, %vm2288_vm1 }
 0x30f   :  { %2443 = vmatpush.msra.mxu0 %v2396_v10 }
 0x310   :  { %v2239_v26 = vrot.slane %v2105_v42, 7  ;;  %v2308_v39 = vmul.f32 %v5187_v62, %v2307_v25  ;;  %v2271_v29 = vadd.f32 %v5184_v36, %v2270_v52  ;;  %v2317_v6 = vor.u32 1.1754944e-38, %v2316_v51 }
 0x311   :  { %v5220_v17 = vpop.eup %2573  ;;  %2444 = vmatpush.msra.mxu0 %v2395_v56  ;;  %v2329_v56 = vand.u32 2147483647, %v5170_v21 }
 0x312   :  { %v2321_v55 = vmul.f32 %v5220_v17, %v5170_v21  ;;  %v2309_v34 = vadd.f32 %v5187_v62, %v2308_v39  ;;  %vm2326_vm2 = vweird.f32 %v5220_v17 }
 0x313   :  { %v2144_v2 = vpop.f32.mrf.mxu3  ;;  %2445 = vmatpush.msra.mxu0 %v2394_v61  ;;  %vm2327_vm5 = vmor %vm2325_vm3, %vm2326_vm2  ;;  %vm2330_vm7 = vcmp.eq.f32.partialorder %v2329_v56, 8.507059e+37  ;;  %vm2490_vm3 = vcmask 73728  }
 0x314   :  { %v2145_v31 = vadd.f32 %v2144_v2, %v2124_v20  ;;  %v2322_v30 = vsub.f32 1.0, %v2321_v55  ;;  %v2279_v20 = vor.u32 1.1754944e-38, %v2278_v32  ;;  %v2275_v2 = vsel %vm5266_vm12, %v5184_v36, %v2271_v29 }
 0x315   :  { %2446 = vmatpush.msra.mxu0 %v2393_v33  ;;  %v2313_v63 = vsel %vm5274_vm13, %v5187_v62, %v2309_v34  ;;  %v2331_v36 = vand.u32 2147483648, %v5170_v21 }
 0x316   :  { %v2240_v40 = vrot.slane %v2145_v31, 7  ;;  %v2323_v47 = vmul.f32 %v5220_v17, %v2322_v30  ;;  %v2280_v62 = vsel %vm5278_vm14, %v2279_v20, %v2275_v2 }
 0x317   :  { %v2332_v25 = vor.u32 1.1754944e-38, %v2331_v36 }
 0x318   :  { %v2256_v45 = vadd.f32 %v2240_v40, %v5016_v59  ;;  %v2324_v22 = vadd.f32 %v5220_v17, %v2323_v47 }
 0x31a   :  { %v2328_v61 = vsel %vm2327_vm5, %v5220_v17, %v2324_v22 }
 0x31b   :  { %v2333_v21 = vsel %vm2330_vm7, %v2332_v25, %v2328_v61 }
 0x328   :  { %v2164_v49 = vpop.f32.mrf.mxu0 }
 0x32e   :  { %v2184_v46 = vpop.f32.mrf.mxu1  ;;  %v2204_v0 = vpop.f32.mrf.mxu2 }
 0x32f   :  { %v2185_v53 = vadd.f32 %v2184_v46, %v2164_v49  ;;  %v2318_v49 = vsel %vm2315_vm0, %v2317_v6, %v2313_v63  ;;  %v2293_v46 = vand.u32 2147483648, %v5168_v48 }
 0x331   :  { %v2241_v18 = vrot.slane %v2185_v53, 7  ;;  %v2294_v31 = vor.u32 1.1754944e-38, %v2293_v46 }
 0x333   :  { %v2257_v19 = vadd.f32 %v2241_v18, %v4998_v50  ;;  %v2255_v50 = vadd.f32 %v2239_v26, %v5003_v41  ;;  %v2284_v41 = vsub.f32 1.0, %v2283_v27  ;;  %v2381_v26 = vmul.f32 %v2377_v8, %v2318_v49 }
 0x334   :  { %v2224_v12 = vpop.f32.mrf.mxu3  ;;  %v2378_v27 = vrot.slane %v5066_v13, 7 }
 0x335   :  { %v2519_v7 = vmul.f32 -1.442695, %v2257_v19  ;;  %v2225_v54 = vadd.f32 %v2224_v12, %v2204_v0  ;;  %v2285_v43 = vmul.f32 %v5215_v14, %v2284_v41 }
 0x337   :  { %2575 = vpow2.f32 %v2519_v7  ;;  %v2242_v5 = vrot.slane %v2225_v54, 7  ;;  %v2286_v57 = vadd.f32 %v5215_v14, %v2285_v43 }
 0x338   :  { %2577 = vtanh.f32 %v2255_v50 }
 0x339   :  { %v2258_v44 = vadd.f32 %v2242_v5, %v5019_v23  ;;  %v2290_v18 = vsel %vm5300_vm4, %v5215_v14, %v2286_v57  ;;  %v2382_v14 = vmul.f32 %v2378_v27, %v2333_v21 }
 0x33a   :  { %v2295_v48 = vsel %vm2292_vm6, %v2294_v31, %v2290_v18 }
 0x33b   :  { %v2520_v23 = vmul.f32 -1.442695, %v2258_v44 }
 0x33d   :  { %v2576_v38 = vpop.eup %2575  ;;  %2579 = vpow2.f32 %v2520_v23 }
 0x33e   :  { %v2343_v42 = vadd.f32 1.0, %v2576_v38  ;;  %v2578_v9 = vpop.eup %2577  ;;  %2581 = vtanh.f32 %v2256_v45 }
 0x33f   :  { %v2383_v53 = vmul.f32 %v2578_v9, %v2280_v62 }
 0x340   :  { %2583 = vrcp.f32 %v2343_v42  ;;  %v2356_v12 = vand.u32 2147483648, %v2343_v42  ;;  %v2354_v50 = vand.u32 2147483647, %v2343_v42  ;;  %vm2350_vm9 = vweird.f32 %v2343_v42 }
 0x341   :  { %v2385_v33 = vadd.f32 %v2383_v53, %v2381_v26 }
 0x342   :  { %v2357_v40 = vor.u32 1.1754944e-38, %v2356_v12  ;;  %vm2355_vm11 = vcmp.eq.f32.partialorder %v2354_v50, 8.507059e+37 }
 0x343   :  { %v2580_v60 = vpop.eup %2579 }
 0x344   :  { %v2344_v24 = vadd.f32 1.0, %v2580_v60  ;;  %v2582_v15 = vpop.eup %2581 }
 0x345   :  { %v2384_v55 = vmul.f32 %v2582_v15, %v2295_v48 }
 0x346   :  { %v2584_v19 = vpop.eup %2583  ;;  %2585 = vrcp.f32 %v2344_v24  ;;  %v2371_v41 = vand.u32 2147483648, %v2344_v24  ;;  %v2369_v32 = vand.u32 2147483647, %v2344_v24  ;;  %vm2365_vm13 = vweird.f32 %v2344_v24 }
 0x347   :  { %v2346_v3 = vmul.f32 %v2584_v19, %v2343_v42  ;;  %2587 = vtanh.f32 %v2385_v33  ;;  %vm2351_vm8 = vweird.f32 %v2584_v19  ;;  %v2386_v54 = vadd.f32 %v2384_v55, %v2382_v14 }
 0x348   :  { %vm2352_vm10 = vmor %vm2350_vm9, %vm2351_vm8  ;;  %v2372_v29 = vor.u32 1.1754944e-38, %v2371_v41  ;;  %vm2370_vm15 = vcmp.eq.f32.partialorder %v2369_v32, 8.507059e+37 }
 0x349   :  { %v2347_v0 = vsub.f32 1.0, %v2346_v3  ;;  %2589 = vtanh.f32 %v2386_v54 }
 0x34b   :  { %v2348_v17 = vmul.f32 %v2584_v19, %v2347_v0 }
 0x34c   :  { %v2586_v7 = vpop.eup %2585 }
 0x34d   :  { %v2361_v39 = vmul.f32 %v2586_v7, %v2344_v24  ;;  %v2349_v52 = vadd.f32 %v2584_v19, %v2348_v17  ;;  %v2588_v58 = vpop.eup %2587  ;;  %vm2366_vm12 = vweird.f32 %v2586_v7 }
 0x34e   :  { %vm2367_vm14 = vmor %vm2365_vm13, %vm2366_vm12 }
 0x34f   :  { %v2362_v5 = vsub.f32 1.0, %v2361_v39  ;;  %v2353_v4 = vsel %vm2352_vm10, %v2584_v19, %v2349_v52  ;;  %v2590_v1 = vpop.eup %2589 }
 0x350   :  { %v2358_v13 = vsel %vm2355_vm11, %v2357_v40, %v2353_v4 }
 0x351   :  { %v2389_v30 = vmul.f32 %v2588_v58, %v2358_v13  ;;  %v2363_v16 = vmul.f32 %v2586_v7, %v2362_v5 }
 0x353   :  { %v2391_v44 = vmax.f32 %v2389_v30, 0.0  ;;  %v2364_v28 = vadd.f32 %v2586_v7, %v2363_v16 }
 0x355   :  { %v2427_v34 = vrot.slane %v2391_v44, 1  ;;  %v2368_v51 = vsel %vm2367_vm14, %v2586_v7, %v2364_v28 }
 0x356   :  { %v2373_v45 = vsel %vm2370_vm15, %v2372_v29, %v2368_v51 }
 0x357   :  { %2447 = vmatmul.f32.vlgmr.msra.gmra.mxu0 %v2427_v34  ;;  %v2390_v23 = vmul.f32 %v2590_v1, %v2373_v45 }
 0x359   :  { %v2392_v47 = vmax.f32 %v2390_v23, 0.0 }
 0x35b   :  { %v2428_v37 = vrot.slane %v2392_v47, 1 }
 0x35d   :  { %2467 = vmatmul.f32.vlgmr.msra.gmra.mxu1 %v2428_v37 }
 0x3d4   :  { %v2448_v43 = vpop.f32.mrf.mxu0 }
 0x3da   :  { %v2468_v38 = vpop.f32.mrf.mxu1 }
 0x3db   :  { %v2469_v8 = vadd.f32 %v2468_v38, %v2448_v43 }
 0x3dd   :  { %v2521_v59 = vmul.f32 -1.442695, %v2469_v8 }
 0x3df   :  { %2591 = vpow2.f32 %v2521_v59 }
 0x3e5   :  { %v2592_v35 = vpop.eup %2591 }
 0x3e6   :  { %v2474_v20 = vadd.f32 1.0, %v2592_v35 }
 0x3e8   :  { %2593 = vrcp.f32 %v2474_v20  ;;  %v2486_v9 = vand.u32 2147483648, %v2474_v20  ;;  %v2484_v57 = vand.u32 2147483647, %v2474_v20  ;;  %vm2480_vm1 = vweird.f32 %v2474_v20 }
 0x3ea   :  { %v2487_v36 = vor.u32 1.1754944e-38, %v2486_v9  ;;  %vm2485_vm4 = vcmp.eq.f32.partialorder %v2484_v57, 8.507059e+37 }
 0x3ee   :  { %v2594_v2 = vpop.eup %2593 }
 0x3ef   :  { %v2476_v63 = vmul.f32 %v2594_v2, %v2474_v20  ;;  %vm2481_vm0 = vweird.f32 %v2594_v2 }
 0x3f0   :  { %vm2482_vm2 = vmor %vm2480_vm1, %vm2481_vm0 }
 0x3f1   :  { %v2477_v42 = vsub.f32 1.0, %v2476_v63 }
 0x3f3   :  { %v2478_v6 = vmul.f32 %v2594_v2, %v2477_v42 }
 0x3f5   :  { %v2479_v22 = vadd.f32 %v2594_v2, %v2478_v6 }
 0x3f7   :  { %v2483_v62 = vsel %vm2482_vm2, %v2594_v2, %v2479_v22 }
 0x3f8   :  { %v2488_v49 = vsel %vm2485_vm4, %v2487_v36, %v2483_v62 }
 0x3f9   :  { %2491 = vst.msk [vmem:[#allocation5] sm:$0x1] %vm2490_vm3, %v2488_v49 }
 0x3fa   :  { %2502 = dma.vmem_to_hbm [thread:$0]  %s2498_s23, 16, %s2500_s26, [#allocation4]  }
 0x3fb   :  { %2773 = dma.done.wait [#allocation4], 16  }
 0x3fc   :  { %2774 = vsyncadd [#allocation4], 4294967280 }
 0x3fd   :  { %2507 = vsyncpa [#allocation3], 1 }
 0x3fe   :  { %2508 = vsyncpa [#allocation4], 1 }

</bundles_post_ra>
